<compile_context>
chip_gen: v6e
topology: v6e:2x2x1
jax: 0.10.0
libtpu: 0.0.40
codegen_flags: <defaults>
</compile_context>

<pallas_src>
import functools
import math

import jax
import jax.numpy as jnp
from jax.experimental import pallas as pl
from jax.experimental.pallas import tpu as pltpu

LEAKY_SLOPE = 0.2


def _round_up(x, m):
    return (x + m - 1) // m * m


# ----------------------------- Pallas kernel --------------------------------

def _matmul_bias_act_kernel(x_ref, w_ref, b_ref, o_ref, *, apply_act):
    # bf16 x bf16 on the MXU, f32 accumulation; bias + LeakyReLU epilogue in f32.
    y = jnp.dot(x_ref[...], w_ref[...], preferred_element_type=jnp.float32)
    y = y + b_ref[...]
    if apply_act:
        y = jnp.where(y >= 0, y, LEAKY_SLOPE * y)
    o_ref[...] = y.astype(o_ref.dtype)


def _choose_tile_m(Mp, K):
    # ~4 MiB VMEM budget for the (tile_m, K) bf16 patch block; prefer fat
    # tiles but keep >=2 grid steps so both v7x TensorCores get work.
    budget_rows = max(128, ((4 << 20) // (2 * K)) // 128 * 128)
    for t in (1024, 512, 256):
        if t <= budget_rows and Mp % t == 0 and Mp // t >= 2:
            return t
    return 128


def fused_matmul_bias_act(x, w, b, *, lrelu, out_dtype):
    """(M, K) @ (K, N) + b, optional LeakyReLU, tiled over M.

    K and N are lane-multiples by construction (weights pre-padded at init),
    so the only padding ever done here is a small row pad when M % 128 != 0.
    """
    M, K = x.shape
    K2, N = w.shape
    assert K == K2 and K % 128 == 0 and N % 128 == 0, (K, K2, N)
    Mp = _round_up(M, 128)
    if Mp != M:
        x = jnp.pad(x, ((0, Mp - M), (0, 0)))
    tile_m = _choose_tile_m(Mp, K)
    out = pl.pallas_call(
        functools.partial(_matmul_bias_act_kernel, apply_act=lrelu),
        out_shape=jax.ShapeDtypeStruct((Mp, N), out_dtype),
        grid=(Mp // tile_m,),
        in_specs=[
            pl.BlockSpec((tile_m, K), lambda i: (i, 0)),
            pl.BlockSpec((K, N), lambda i: (0, 0)),
            pl.BlockSpec((1, N), lambda i: (0, 0)),
        ],
        out_specs=pl.BlockSpec((tile_m, N), lambda i: (i, 0)),
        compiler_params=pltpu.CompilerParams(
            dimension_semantics=("parallel",)),
    )(x, w, b)
    return out if Mp == M else out[:M]


# ----------------------------- conv via im2col ------------------------------

def conv2d(x, w, b, *, k, stride, pad, lrelu, out_dtype):
    """k x k conv on NHWC (channels pre-padded) via im2col + fused Pallas matmul.

    Weight layout: (k*k*cin_pad, cout_pad), kernel-tap major / channel minor.
    """
    B, H, W, C = x.shape
    xp = jnp.pad(x, ((0, 0), (pad, pad), (pad, pad), (0, 0))) if pad else x
    Ho = (H + 2 * pad - k) // stride + 1
    Wo = (W + 2 * pad - k) // stride + 1
    # TODO(synk): move patch extraction into the kernel (grid axis over the
    # k*k taps + VMEM accumulator) to avoid materializing the k*k im2col
    # expansion in HBM; kept as XLA glue (in bf16) for robustness here.
    cols = []
    for i in range(k):
        for j in range(k):
            cols.append(xp[:, i:i + stride * Ho:stride,
                           j:j + stride * Wo:stride, :])
    patches = jnp.stack(cols, axis=3).reshape(B * Ho * Wo, k * k * C)
    out = fused_matmul_bias_act(patches, w, b, lrelu=lrelu, out_dtype=out_dtype)
    return out.reshape(B, Ho, Wo, -1)


# ----------------------------- parameters -----------------------------------

def _conv_params(key, k, cin, cin_pad, cout, cout_pad):
    wkey, bkey = jax.random.split(key)
    bound = 1.0 / math.sqrt(k * k * cin)
    w = jax.random.uniform(wkey, (k, k, cin, cout), jnp.float32, -bound, bound)
    b = jax.random.uniform(bkey, (cout,), jnp.float32, -bound, bound)
    # Pad channels to lane-friendly sizes once, here at init.  Padded input
    # rows / output cols are zero, so they never change the math and padded
    # output channels of the activation stay exactly zero downstream.
    w = jnp.pad(w, ((0, 0), (0, 0), (0, cin_pad - cin), (0, cout_pad - cout)))
    w = w.reshape(k * k * cin_pad, cout_pad).astype(jnp.bfloat16)
    b = jnp.pad(b, (0, cout_pad - cout)).reshape(1, cout_pad).astype(jnp.float32)
    return w, b


def init_d_nlayers(key, input_nc=3, ndf=64, n_layers=3):
    # Layer plan exactly as in the PyTorch module (norm_layer=None).
    layer_defs = [dict(cin=input_nc, cout=ndf, k=4, s=2, p=1, act=True)]
    nf = 1
    for n in range(1, n_layers):
        nf_prev, nf = nf, min(2 ** n, 8)
        layer_defs.append(dict(cin=ndf * nf_prev, cout=ndf * nf,
                               k=4, s=2, p=1, act=True))
    nf_prev, nf = nf, min(2 ** n_layers, 8)
    layer_defs.append(dict(cin=ndf * nf_prev, cout=ndf * nf,
                           k=4, s=1, p=1, act=True))
    layer_defs.append(dict(cin=ndf * nf, cout=1, k=4, s=1, p=0, act=False))

    keys = jax.random.split(key, len(layer_defs))
    cfg, weights = [], []
    prev_pad = _round_up(input_nc, 8)          # 16 * cin_pad == 128 for conv0
    for d, kk in zip(layer_defs, keys):
        cin_pad = prev_pad
        cout_pad = _round_up(d["cout"], 128)   # lane-dense outputs
        w, b = _conv_params(kk, d["k"], d["cin"], cin_pad, d["cout"], cout_pad)
        cfg.append(dict(d, cin_pad=cin_pad, cout_pad=cout_pad))
        weights.append((w, b))
        prev_pad = cout_pad
    return cfg, weights


# ----------------------------- forward pass ---------------------------------

def d_nlayers_forward(cfg, weights, x_nchw):
    # Accepts NCHW (PyTorch convention); compute is NHWC, channel-padded, bf16.
    x = jnp.transpose(x_nchw, (0, 2, 3, 1)).astype(jnp.float32)
    cpad0 = cfg[0]["cin_pad"]
    if cpad0 != x.shape[-1]:
        x = jnp.pad(x, ((0, 0), (0, 0), (0, 0), (0, cpad0 - x.shape[-1])))
    h = x.astype(jnp.bfloat16)
    n = len(cfg)
    for i, (lp, (w, b)) in enumerate(zip(cfg, weights)):
        last = i == n - 1
        h = conv2d(h, w, b, k=lp["k"], stride=lp["s"], pad=lp["p"],
                   lrelu=lp["act"],
                   out_dtype=jnp.float32 if last else jnp.bfloat16)
    out = h[..., :cfg[-1]["cout"]]             # drop padded output channels
    return jnp.transpose(out, (0, 3, 1, 2))    # back to NCHW


# ----------------------------- reference (sanity) ----------------------------

def _reference_forward(cfg, weights, x_nchw):
    """Plain-XLA f32 reference using the same (bf16-stored) weights."""
    x = jnp.transpose(x_nchw, (0, 2, 3, 1)).astype(jnp.float32)
    for lp, (w, b) in zip(cfg, weights):
        k = lp["k"]
        w4 = w.astype(jnp.float32).reshape(k, k, lp["cin_pad"], lp["cout_pad"])
        w4 = w4[:, :, :lp["cin"], :lp["cout"]]
        y = jax.lax.conv_general_dilated(
            x, w4, window_strides=(lp["s"], lp["s"]),
            padding=[(lp["p"], lp["p"])] * 2,
            dimension_numbers=("NHWC", "HWIO", "NHWC"))
        y = y + b.astype(jnp.float32)[0, :lp["cout"]]
        if lp["act"]:
            y = jnp.where(y >= 0, y, LEAKY_SLOPE * y)
        x = y
    return jnp.transpose(x, (0, 3, 1, 2))


# --------------------------------- main --------------------------------------

if __name__ == "__main__":
    INPUT_NC, NDF, N_LAYERS = 3, 8, 3
    B, H = 2, 64   # final valid 4x4 conv needs H/8 - 4 >= 1  ->  H >= 40

    key = jax.random.PRNGKey(0)
    pkey, xkey = jax.random.split(key)
    cfg, weights = init_d_nlayers(pkey, INPUT_NC, NDF, N_LAYERS)
    x = jax.random.normal(xkey, (B, INPUT_NC, H, H), jnp.float32)

    fwd = jax.jit(functools.partial(d_nlayers_forward, cfg))
    out = jax.block_until_ready(fwd(weights, x))

    assert out.shape == (B, 1, H // 8 - 4, H // 8 - 4), out.shape
    assert bool(jnp.all(jnp.isfinite(out)))

    # Loose check against an f32 XLA conv reference (bf16 activation storage
    # in the Pallas path introduces tiny rounding differences only).
    ref = _reference_forward(cfg, weights, x)
    assert float(jnp.max(jnp.abs(out - ref))) < 5e-2

    print("KERNEL_OK")
</pallas_src>

<mosaic_0001>
module attributes {stable_mosaic.version = 11 : i64} {
  func.func @_matmul_bias_act_kernel(%arg0: i32, %arg1: memref<1024x128xbf16, #tpu.memory_space<vmem>>, %arg2: memref<128x128xbf16, #tpu.memory_space<vmem>>, %arg3: memref<1x128xf32, #tpu.memory_space<vmem>>, %arg4: memref<1024x128xbf16, #tpu.memory_space<vmem>>) attributes {dimension_semantics = [#tpu.dimension_semantics<parallel>], iteration_bounds = array<i64: 2>, scalar_prefetch = 0 : i64, scratch_operands = 0 : i64, tpu.core_type = #tpu.core_type<tc>, window_params = [{transform_indices = @transform_0, window_bounds = array<i64: 1024, 128>}, {pipeline_mode = #tpu.pipeline_mode<synchronous>, transform_indices = @transform_1, window_bounds = array<i64: 128, 128>}, {pipeline_mode = #tpu.pipeline_mode<synchronous>, transform_indices = @transform_2, window_bounds = array<i64: 1, 128>}, {transform_indices = @transform_3, window_bounds = array<i64: 1024, 128>}]} {
    %c0 = arith.constant 0 : index
    %c0_0 = arith.constant 0 : index
    %0 = vector.load %arg1[%c0, %c0_0] : memref<1024x128xbf16, #tpu.memory_space<vmem>>, vector<1024x128xbf16>
    %c0_1 = arith.constant 0 : index
    %c0_2 = arith.constant 0 : index
    %1 = vector.load %arg2[%c0_1, %c0_2] : memref<128x128xbf16, #tpu.memory_space<vmem>>, vector<128x128xbf16>
    %cst = arith.constant dense<0.000000e+00> : vector<1024x128xf32>
    %2 = tpu.matmul %0, %1, %cst {dimension_numbers = #tpu.dot_dimension_numbers<[1], [0], [0], [1], [0, 0, 1, 1], [], []>} : vector<1024x128xbf16>, vector<128x128xbf16>, vector<1024x128xf32> -> vector<1024x128xf32>
    %c0_3 = arith.constant 0 : index
    %c0_4 = arith.constant 0 : index
    %3 = vector.load %arg3[%c0_3, %c0_4] : memref<1x128xf32, #tpu.memory_space<vmem>>, vector<1x128xf32>
    %4 = vector.broadcast %3 : vector<1x128xf32> to vector<1024x128xf32>
    %5 = arith.addf %2, %4 : vector<1024x128xf32>
    %cst_5 = arith.constant 0.000000e+00 : f32
    %6 = vector.broadcast %cst_5 : f32 to vector<1024x128xf32>
    %7 = arith.cmpf oge, %5, %6 : vector<1024x128xf32>
    %cst_6 = arith.constant 2.000000e-01 : f32
    %8 = vector.broadcast %cst_6 : f32 to vector<1024x128xf32>
    %9 = arith.mulf %8, %5 : vector<1024x128xf32>
    %10 = arith.select %7, %5, %9 : vector<1024x128xi1>, vector<1024x128xf32>
    %11 = arith.truncf %10 : vector<1024x128xf32> to vector<1024x128xbf16>
    %c0_7 = arith.constant 0 : index
    %c0_8 = arith.constant 0 : index
    %12 = vector.load %arg4[%c0_7, %c0_8] : memref<1024x128xbf16, #tpu.memory_space<vmem>>, vector<1024x128xbf16>
    tpu.vector_store %arg4[%c0_7, %c0_8], %11 {strides = array<i32>} : memref<1024x128xbf16, #tpu.memory_space<vmem>>, vector<1024x128xbf16>,
    return
  }
  func.func @transform_0(%arg0: i32) -> (i32, i32) {
    %c0_i32 = arith.constant 0 : i32
    %c0_i32_0 = arith.constant 0 : i32
    return %arg0, %c0_i32 : i32, i32
  }
  func.func @transform_1(%arg0: i32) -> (i32, i32) {
    %c0_i32 = arith.constant 0 : i32
    %c0_i32_0 = arith.constant 0 : i32
    %c0_i32_1 = arith.constant 0 : i32
    return %c0_i32, %c0_i32_0 : i32, i32
  }
  func.func @transform_2(%arg0: i32) -> (i32, i32) {
    %c0_i32 = arith.constant 0 : i32
    %c0_i32_0 = arith.constant 0 : i32
    %c0_i32_1 = arith.constant 0 : i32
    return %c0_i32, %c0_i32_0 : i32, i32
  }
  func.func @transform_3(%arg0: i32) -> (i32, i32) {
    %c0_i32 = arith.constant 0 : i32
    %c0_i32_0 = arith.constant 0 : i32
    return %arg0, %c0_i32 : i32, i32
  }
}

module attributes {stable_mosaic.version = 11 : i64} {
  func.func @_matmul_bias_act_kernel(%arg0: i32, %arg1: memref<256x2048xbf16, #tpu.memory_space<vmem>>, %arg2: memref<2048x128xbf16, #tpu.memory_space<vmem>>, %arg3: memref<1x128xf32, #tpu.memory_space<vmem>>, %arg4: memref<256x128xbf16, #tpu.memory_space<vmem>>) attributes {dimension_semantics = [#tpu.dimension_semantics<parallel>], iteration_bounds = array<i64: 2>, scalar_prefetch = 0 : i64, scratch_operands = 0 : i64, tpu.core_type = #tpu.core_type<tc>, window_params = [{transform_indices = @transform_0, window_bounds = array<i64: 256, 2048>}, {pipeline_mode = #tpu.pipeline_mode<synchronous>, transform_indices = @transform_1, window_bounds = array<i64: 2048, 128>}, {pipeline_mode = #tpu.pipeline_mode<synchronous>, transform_indices = @transform_2, window_bounds = array<i64: 1, 128>}, {transform_indices = @transform_3, window_bounds = array<i64: 256, 128>}]} {
    %c0 = arith.constant 0 : index
    %c0_0 = arith.constant 0 : index
    %0 = vector.load %arg1[%c0, %c0_0] : memref<256x2048xbf16, #tpu.memory_space<vmem>>, vector<256x2048xbf16>
    %c0_1 = arith.constant 0 : index
    %c0_2 = arith.constant 0 : index
    %1 = vector.load %arg2[%c0_1, %c0_2] : memref<2048x128xbf16, #tpu.memory_space<vmem>>, vector<2048x128xbf16>
    %cst = arith.constant dense<0.000000e+00> : vector<256x128xf32>
    %2 = tpu.matmul %0, %1, %cst {dimension_numbers = #tpu.dot_dimension_numbers<[1], [0], [0], [1], [0, 0, 1, 1], [], []>} : vector<256x2048xbf16>, vector<2048x128xbf16>, vector<256x128xf32> -> vector<256x128xf32>
    %c0_3 = arith.constant 0 : index
    %c0_4 = arith.constant 0 : index
    %3 = vector.load %arg3[%c0_3, %c0_4] : memref<1x128xf32, #tpu.memory_space<vmem>>, vector<1x128xf32>
    %4 = vector.broadcast %3 : vector<1x128xf32> to vector<256x128xf32>
    %5 = arith.addf %2, %4 : vector<256x128xf32>
    %cst_5 = arith.constant 0.000000e+00 : f32
    %6 = vector.broadcast %cst_5 : f32 to vector<256x128xf32>
    %7 = arith.cmpf oge, %5, %6 : vector<256x128xf32>
    %cst_6 = arith.constant 2.000000e-01 : f32
    %8 = vector.broadcast %cst_6 : f32 to vector<256x128xf32>
    %9 = arith.mulf %8, %5 : vector<256x128xf32>
    %10 = arith.select %7, %5, %9 : vector<256x128xi1>, vector<256x128xf32>
    %11 = arith.truncf %10 : vector<256x128xf32> to vector<256x128xbf16>
    %c0_7 = arith.constant 0 : index
    %c0_8 = arith.constant 0 : index
    %12 = vector.load %arg4[%c0_7, %c0_8] : memref<256x128xbf16, #tpu.memory_space<vmem>>, vector<256x128xbf16>
    tpu.vector_store %arg4[%c0_7, %c0_8], %11 {strides = array<i32>} : memref<256x128xbf16, #tpu.memory_space<vmem>>, vector<256x128xbf16>,
    return
  }
  func.func @transform_0(%arg0: i32) -> (i32, i32) {
    %c0_i32 = arith.constant 0 : i32
    %c0_i32_0 = arith.constant 0 : i32
    return %arg0, %c0_i32 : i32, i32
  }
  func.func @transform_1(%arg0: i32) -> (i32, i32) {
    %c0_i32 = arith.constant 0 : i32
    %c0_i32_0 = arith.constant 0 : i32
    %c0_i32_1 = arith.constant 0 : i32
    return %c0_i32, %c0_i32_0 : i32, i32
  }
  func.func @transform_2(%arg0: i32) -> (i32, i32) {
    %c0_i32 = arith.constant 0 : i32
    %c0_i32_0 = arith.constant 0 : i32
    %c0_i32_1 = arith.constant 0 : i32
    return %c0_i32, %c0_i32_0 : i32, i32
  }
  func.func @transform_3(%arg0: i32) -> (i32, i32) {
    %c0_i32 = arith.constant 0 : i32
    %c0_i32_0 = arith.constant 0 : i32
    return %arg0, %c0_i32 : i32, i32
  }
}

module attributes {stable_mosaic.version = 11 : i64} {
  func.func @_matmul_bias_act_kernel(%arg0: i32, %arg1: memref<128x2048xbf16, #tpu.memory_space<vmem>>, %arg2: memref<2048x128xbf16, #tpu.memory_space<vmem>>, %arg3: memref<1x128xf32, #tpu.memory_space<vmem>>, %arg4: memref<128x128xbf16, #tpu.memory_space<vmem>>) attributes {dimension_semantics = [#tpu.dimension_semantics<parallel>], iteration_bounds = array<i64: 1>, scalar_prefetch = 0 : i64, scratch_operands = 0 : i64, tpu.core_type = #tpu.core_type<tc>, window_params = [{transform_indices = @transform_0, window_bounds = array<i64: 128, 2048>}, {pipeline_mode = #tpu.pipeline_mode<synchronous>, transform_indices = @transform_1, window_bounds = array<i64: 2048, 128>}, {pipeline_mode = #tpu.pipeline_mode<synchronous>, transform_indices = @transform_2, window_bounds = array<i64: 1, 128>}, {transform_indices = @transform_3, window_bounds = array<i64: 128, 128>}]} {
    %c0 = arith.constant 0 : index
    %c0_0 = arith.constant 0 : index
    %0 = vector.load %arg1[%c0, %c0_0] : memref<128x2048xbf16, #tpu.memory_space<vmem>>, vector<128x2048xbf16>
    %c0_1 = arith.constant 0 : index
    %c0_2 = arith.constant 0 : index
    %1 = vector.load %arg2[%c0_1, %c0_2] : memref<2048x128xbf16, #tpu.memory_space<vmem>>, vector<2048x128xbf16>
    %cst = arith.constant dense<0.000000e+00> : vector<128x128xf32>
    %2 = tpu.matmul %0, %1, %cst {dimension_numbers = #tpu.dot_dimension_numbers<[1], [0], [0], [1], [0, 0, 1, 1], [], []>} : vector<128x2048xbf16>, vector<2048x128xbf16>, vector<128x128xf32> -> vector<128x128xf32>
    %c0_3 = arith.constant 0 : index
    %c0_4 = arith.constant 0 : index
    %3 = vector.load %arg3[%c0_3, %c0_4] : memref<1x128xf32, #tpu.memory_space<vmem>>, vector<1x128xf32>
    %4 = vector.broadcast %3 : vector<1x128xf32> to vector<128x128xf32>
    %5 = arith.addf %2, %4 : vector<128x128xf32>
    %cst_5 = arith.constant 0.000000e+00 : f32
    %6 = vector.broadcast %cst_5 : f32 to vector<128x128xf32>
    %7 = arith.cmpf oge, %5, %6 : vector<128x128xf32>
    %cst_6 = arith.constant 2.000000e-01 : f32
    %8 = vector.broadcast %cst_6 : f32 to vector<128x128xf32>
    %9 = arith.mulf %8, %5 : vector<128x128xf32>
    %10 = arith.select %7, %5, %9 : vector<128x128xi1>, vector<128x128xf32>
    %11 = arith.truncf %10 : vector<128x128xf32> to vector<128x128xbf16>
    %c0_7 = arith.constant 0 : index
    %c0_8 = arith.constant 0 : index
    %12 = vector.load %arg4[%c0_7, %c0_8] : memref<128x128xbf16, #tpu.memory_space<vmem>>, vector<128x128xbf16>
    tpu.vector_store %arg4[%c0_7, %c0_8], %11 {strides = array<i32>} : memref<128x128xbf16, #tpu.memory_space<vmem>>, vector<128x128xbf16>,
    return
  }
  func.func @transform_0(%arg0: i32) -> (i32, i32) {
    %c0_i32 = arith.constant 0 : i32
    %c0_i32_0 = arith.constant 0 : i32
    return %arg0, %c0_i32 : i32, i32
  }
  func.func @transform_1(%arg0: i32) -> (i32, i32) {
    %c0_i32 = arith.constant 0 : i32
    %c0_i32_0 = arith.constant 0 : i32
    %c0_i32_1 = arith.constant 0 : i32
    return %c0_i32, %c0_i32_0 : i32, i32
  }
  func.func @transform_2(%arg0: i32) -> (i32, i32) {
    %c0_i32 = arith.constant 0 : i32
    %c0_i32_0 = arith.constant 0 : i32
    %c0_i32_1 = arith.constant 0 : i32
    return %c0_i32, %c0_i32_0 : i32, i32
  }
  func.func @transform_3(%arg0: i32) -> (i32, i32) {
    %c0_i32 = arith.constant 0 : i32
    %c0_i32_0 = arith.constant 0 : i32
    return %arg0, %c0_i32 : i32, i32
  }
}

module attributes {stable_mosaic.version = 11 : i64} {
  func.func @_matmul_bias_act_kernel(%arg0: i32, %arg1: memref<128x2048xbf16, #tpu.memory_space<vmem>>, %arg2: memref<2048x128xbf16, #tpu.memory_space<vmem>>, %arg3: memref<1x128xf32, #tpu.memory_space<vmem>>, %arg4: memref<128x128xf32, #tpu.memory_space<vmem>>) attributes {dimension_semantics = [#tpu.dimension_semantics<parallel>], iteration_bounds = array<i64: 1>, scalar_prefetch = 0 : i64, scratch_operands = 0 : i64, tpu.core_type = #tpu.core_type<tc>, window_params = [{transform_indices = @transform_0, window_bounds = array<i64: 128, 2048>}, {pipeline_mode = #tpu.pipeline_mode<synchronous>, transform_indices = @transform_1, window_bounds = array<i64: 2048, 128>}, {pipeline_mode = #tpu.pipeline_mode<synchronous>, transform_indices = @transform_2, window_bounds = array<i64: 1, 128>}, {transform_indices = @transform_3, window_bounds = array<i64: 128, 128>}]} {
    %c0 = arith.constant 0 : index
    %c0_0 = arith.constant 0 : index
    %0 = vector.load %arg1[%c0, %c0_0] : memref<128x2048xbf16, #tpu.memory_space<vmem>>, vector<128x2048xbf16>
    %c0_1 = arith.constant 0 : index
    %c0_2 = arith.constant 0 : index
    %1 = vector.load %arg2[%c0_1, %c0_2] : memref<2048x128xbf16, #tpu.memory_space<vmem>>, vector<2048x128xbf16>
    %cst = arith.constant dense<0.000000e+00> : vector<128x128xf32>
    %2 = tpu.matmul %0, %1, %cst {dimension_numbers = #tpu.dot_dimension_numbers<[1], [0], [0], [1], [0, 0, 1, 1], [], []>} : vector<128x2048xbf16>, vector<2048x128xbf16>, vector<128x128xf32> -> vector<128x128xf32>
    %c0_3 = arith.constant 0 : index
    %c0_4 = arith.constant 0 : index
    %3 = vector.load %arg3[%c0_3, %c0_4] : memref<1x128xf32, #tpu.memory_space<vmem>>, vector<1x128xf32>
    %4 = vector.broadcast %3 : vector<1x128xf32> to vector<128x128xf32>
    %5 = arith.addf %2, %4 : vector<128x128xf32>
    %c0_5 = arith.constant 0 : index
    %c0_6 = arith.constant 0 : index
    %6 = vector.load %arg4[%c0_5, %c0_6] : memref<128x128xf32, #tpu.memory_space<vmem>>, vector<128x128xf32>
    tpu.vector_store %arg4[%c0_5, %c0_6], %5 {strides = array<i32>} : memref<128x128xf32, #tpu.memory_space<vmem>>, vector<128x128xf32>,
    return
  }
  func.func @transform_0(%arg0: i32) -> (i32, i32) {
    %c0_i32 = arith.constant 0 : i32
    %c0_i32_0 = arith.constant 0 : i32
    return %arg0, %c0_i32 : i32, i32
  }
  func.func @transform_1(%arg0: i32) -> (i32, i32) {
    %c0_i32 = arith.constant 0 : i32
    %c0_i32_0 = arith.constant 0 : i32
    %c0_i32_1 = arith.constant 0 : i32
    return %c0_i32, %c0_i32_0 : i32, i32
  }
  func.func @transform_2(%arg0: i32) -> (i32, i32) {
    %c0_i32 = arith.constant 0 : i32
    %c0_i32_0 = arith.constant 0 : i32
    %c0_i32_1 = arith.constant 0 : i32
    return %c0_i32, %c0_i32_0 : i32, i32
  }
  func.func @transform_3(%arg0: i32) -> (i32, i32) {
    %c0_i32 = arith.constant 0 : i32
    %c0_i32_0 = arith.constant 0 : i32
    return %arg0, %c0_i32 : i32, i32
  }
}

</mosaic_0001>

<bundles_post_ra>
// kernel: d_nlayers_forward.5
= control target key start
LH: loop header
LB: loop body
LE: loop exit
PB: predicated region body
PF: predicated region fallthrough
CT: control target
= control target key end

     0   :  { %s3447_s12 = smov 0   ;;  %s3863_s0 = inlined_call_operand.vmem [shape: bf16[2048,128], index: 0, kind: input, shape index: {}]   ;;  %s3864_s1 = inlined_call_operand.vmem [shape: bf16[128,128], index: 1, kind: input, shape index: {}]   ;;  %s3865_s2 = inlined_call_operand.vmem [shape: f32[1,128], index: 2, kind: input, shape index: {}]   ;;  %s3866_s3 = inlined_call_operand.vmem [shape: bf16[2048,128], index: 3, kind: output, shape index: {}]  }
   0x1 LB: > { %s2383_s13 = sadd.s32 4294967295, %s3425_s12   ;;  %p2387_p0 = scmp.ge.s32.totalorder %s3425_s12, 1  ;;  %s3425_s12 = sphi %s3447_s12, %s13_s12  }
   0x2   : > { %p138_p1 = scmp.lt.s32.totalorder %s3425_s12, 3 }
   0x4   : > { %p139_p2 = pnand %p2387_p0, %p138_p1 }
   0x5   : > { %s2388_s16 = sshll.u32 (!%p139_p2), %s2383_s13, 7 }
   0x6   : > { %142 = sbr.rel (%p139_p2) target bundleno = 388 (0x184), region = 32  ;;  %p163_p3 = scmp.lt.s32.totalorder (!%p139_p2), %s2388_s16, 255 }
   0xb   : > { %v3346_v0 = vld [vmem:[%s3864_s1 + $0x38] sm:$0xff]   ;;  %v3347_v1 = vld [vmem:[%s3864_s1 + $0x30] sm:$0xff]   ;;  %s3868_s16 = smov (!%p163_p3, %s2388_s16), 255  ;;  %v3348_v2 = vld [vmem:[%s3864_s1 + $0x28] sm:$0xff]  }
   0xc   : > { %3178 = vmatprep.subr.bf16.mxu0 %v3346_v0  ;;  %3322 = vmatprep.subr.bf16.mxu1 %v3346_v0  ;;  %s2389_s21 = sshll.u32 %s3868_s16, 2  ;;  %v3349_v3 = vld [vmem:[%s3864_s1 + $0x20] sm:$0xff]   ;;  %v3350_v6 = vld [vmem:[%s3864_s1 + $0x18] sm:$0xff]   ;;  %v3351_v7 = vld [vmem:[%s3864_s1 + $0x10] sm:$0xff]  }
   0xd   : > { %3179 = vmatpush3.bf16.msra.mxu0 %v3346_v0  ;;  %3330 = vmatpush3.bf16.msra.mxu1 %v3346_v0  ;;  %s3472_s24 = scalar_lea.vmem %s3863_s0, %s2389_s21  ;;  %v3352_v8 = vld [vmem:[%s3864_s1 + $0x8] sm:$0xff]   ;;  %v3353_v9 = vld [vmem:[%s3864_s1] sm:$0xff]   ;;  %s3571_s13 = scalar_lea.vmem %s3866_s3, %s2389_s21 }
   0xe   : > { %3180 = vmatprep.subr.bf16.mxu0 %v3347_v1  ;;  %3323 = vmatprep.subr.bf16.mxu1 %v3347_v1  ;;  %v3354_v4 = vld [vmem:[%s3472_s24] sm:$0xff]   ;;  %v3356_v10 = vld [vmem:[%s3472_s24 + $0x8] sm:$0xff]   ;;  %v3358_v12 = vld [vmem:[%s3472_s24 + $0x10] sm:$0xff]  }
   0xf   : > { %v3355_v5 = vld [vmem:[%s3472_s24 + $0x100] sm:$0xff]   ;;  %3194 = vmatprep.mubr.bf16.mxu0 %v3354_v4  ;;  %v3357_v11 = vld [vmem:[%s3472_s24 + $0x108] sm:$0xff]   ;;  %v3359_v13 = vld [vmem:[%s3472_s24 + $0x110] sm:$0xff]  }
  0x10   : > { %3258 = vmatprep.mubr.bf16.mxu1 %v3355_v5  ;;  %v3360_v14 = vld [vmem:[%s3472_s24 + $0x18] sm:$0xff]   ;;  %v3362_v16 = vld [vmem:[%s3472_s24 + $0x20] sm:$0xff]   ;;  %v3364_v18 = vld [vmem:[%s3472_s24 + $0x28] sm:$0xff]  }
  0x11   : > { %3181 = vmatpush3.bf16.msra.mxu0 %v3347_v1  ;;  %3331 = vmatpush3.bf16.msra.mxu1 %v3347_v1  ;;  %v3361_v15 = vld [vmem:[%s3472_s24 + $0x118] sm:$0xff]   ;;  %v3363_v17 = vld [vmem:[%s3472_s24 + $0x120] sm:$0xff]   ;;  %v3365_v19 = vld [vmem:[%s3472_s24 + $0x128] sm:$0xff]  }
  0x12   : > { %3182 = vmatprep.subr.bf16.mxu0 %v3348_v2  ;;  %3324 = vmatprep.subr.bf16.mxu1 %v3348_v2  ;;  %v3366_v20 = vld [vmem:[%s3472_s24 + $0x30] sm:$0xff]   ;;  %v3368_v22 = vld [vmem:[%s3472_s24 + $0x38] sm:$0xff]   ;;  %v3370_v24 = vld [vmem:[%s3472_s24 + $0x40] sm:$0xff]  }
  0x13   : > { %v3367_v21 = vld [vmem:[%s3472_s24 + $0x130] sm:$0xff]   ;;  %v3369_v23 = vld [vmem:[%s3472_s24 + $0x138] sm:$0xff]   ;;  %v3371_v25 = vld [vmem:[%s3472_s24 + $0x140] sm:$0xff]  }
  0x14   : > { %v3372_v26 = vld [vmem:[%s3472_s24 + $0x48] sm:$0xff]   ;;  %v3374_v28 = vld [vmem:[%s3472_s24 + $0x50] sm:$0xff]   ;;  %v3376_v30 = vld [vmem:[%s3472_s24 + $0x58] sm:$0xff]  }
  0x15   : > { %3183 = vmatpush3.bf16.msra.mxu0 %v3348_v2  ;;  %3332 = vmatpush3.bf16.msra.mxu1 %v3348_v2  ;;  %v3373_v27 = vld [vmem:[%s3472_s24 + $0x148] sm:$0xff]   ;;  %v3375_v29 = vld [vmem:[%s3472_s24 + $0x150] sm:$0xff]   ;;  %v3377_v31 = vld [vmem:[%s3472_s24 + $0x158] sm:$0xff]  }
  0x16   : > { %3184 = vmatprep.subr.bf16.mxu0 %v3349_v3  ;;  %3325 = vmatprep.subr.bf16.mxu1 %v3349_v3  ;;  %v3378_v32 = vld [vmem:[%s3472_s24 + $0x60] sm:$0xff]   ;;  %v3380_v34 = vld [vmem:[%s3472_s24 + $0x68] sm:$0xff]   ;;  %v3382_v36 = vld [vmem:[%s3472_s24 + $0x70] sm:$0xff]  }
  0x17   : > { %v3379_v33 = vld [vmem:[%s3472_s24 + $0x160] sm:$0xff]   ;;  %v3381_v35 = vld [vmem:[%s3472_s24 + $0x168] sm:$0xff]   ;;  %v3383_v37 = vld [vmem:[%s3472_s24 + $0x170] sm:$0xff]  }
  0x18   : > { %v3384_v38 = vld [vmem:[%s3472_s24 + $0x78] sm:$0xff]   ;;  %v3386_v40 = vld [vmem:[%s3472_s24 + $0x80] sm:$0xff]   ;;  %v3388_v42 = vld [vmem:[%s3472_s24 + $0x88] sm:$0xff]  }
  0x19   : > { %3185 = vmatpush3.bf16.msra.mxu0 %v3349_v3  ;;  %3333 = vmatpush3.bf16.msra.mxu1 %v3349_v3  ;;  %v3385_v39 = vld [vmem:[%s3472_s24 + $0x178] sm:$0xff]   ;;  %v3387_v41 = vld [vmem:[%s3472_s24 + $0x180] sm:$0xff]   ;;  %v3389_v43 = vld [vmem:[%s3472_s24 + $0x188] sm:$0xff]  }
  0x1a   : > { %3186 = vmatprep.subr.bf16.mxu0 %v3350_v6  ;;  %3326 = vmatprep.subr.bf16.mxu1 %v3350_v6  ;;  %v3390_v44 = vld [vmem:[%s3472_s24 + $0x90] sm:$0xff]   ;;  %v3392_v46 = vld [vmem:[%s3472_s24 + $0x98] sm:$0xff]   ;;  %v3394_v48 = vld [vmem:[%s3472_s24 + $0xa0] sm:$0xff]  }
  0x1b   : > { %v3391_v45 = vld [vmem:[%s3472_s24 + $0x190] sm:$0xff]   ;;  %v3393_v47 = vld [vmem:[%s3472_s24 + $0x198] sm:$0xff]   ;;  %v3395_v49 = vld [vmem:[%s3472_s24 + $0x1a0] sm:$0xff]  }
  0x1c   : > { %v3396_v50 = vld [vmem:[%s3472_s24 + $0xa8] sm:$0xff]   ;;  %v3398_v52 = vld [vmem:[%s3472_s24 + $0xb0] sm:$0xff]   ;;  %v3400_v54 = vld [vmem:[%s3472_s24 + $0xb8] sm:$0xff]  }
  0x1d   : > { %3187 = vmatpush3.bf16.msra.mxu0 %v3350_v6  ;;  %3334 = vmatpush3.bf16.msra.mxu1 %v3350_v6  ;;  %v3397_v51 = vld [vmem:[%s3472_s24 + $0x1a8] sm:$0xff]   ;;  %v3399_v53 = vld [vmem:[%s3472_s24 + $0x1b0] sm:$0xff]   ;;  %v3401_v55 = vld [vmem:[%s3472_s24 + $0x1b8] sm:$0xff]  }
  0x1e   : > { %3188 = vmatprep.subr.bf16.mxu0 %v3351_v7  ;;  %3327 = vmatprep.subr.bf16.mxu1 %v3351_v7  ;;  %v3402_v56 = vld [vmem:[%s3472_s24 + $0xc0] sm:$0xff]   ;;  %v3404_v58 = vld [vmem:[%s3472_s24 + $0xc8] sm:$0xff]   ;;  %v3406_v60 = vld [vmem:[%s3472_s24 + $0xd0] sm:$0xff]  }
  0x1f   : > { %v3403_v57 = vld [vmem:[%s3472_s24 + $0x1c0] sm:$0xff]   ;;  %v3405_v59 = vld [vmem:[%s3472_s24 + $0x1c8] sm:$0xff]   ;;  %v3407_v61 = vld [vmem:[%s3472_s24 + $0x1d0] sm:$0xff]  }
  0x20   : > { %v3408_v62 = vld [vmem:[%s3472_s24 + $0xd8] sm:$0xff]   ;;  %v3410_v0 = vld [vmem:[%s3472_s24 + $0xe0] sm:$0xff]   ;;  %v3412_v2 = vld [vmem:[%s3472_s24 + $0xe8] sm:$0xff]  }
  0x21   : > { %3189 = vmatpush3.bf16.msra.mxu0 %v3351_v7  ;;  %3335 = vmatpush3.bf16.msra.mxu1 %v3351_v7  ;;  %v3409_v63 = vld [vmem:[%s3472_s24 + $0x1d8] sm:$0xff]   ;;  %v3411_v1 = vld [vmem:[%s3472_s24 + $0x1e0] sm:$0xff]   ;;  %v3413_v3 = vld [vmem:[%s3472_s24 + $0x1e8] sm:$0xff]  }
  0x22   : > { %3190 = vmatprep.subr.bf16.mxu0 %v3352_v8  ;;  %3328 = vmatprep.subr.bf16.mxu1 %v3352_v8  ;;  %v3414_v4 = vld [vmem:[%s3472_s24 + $0xf0] sm:$0xff]   ;;  %v3416_v6 = vld [vmem:[%s3472_s24 + $0xf8] sm:$0xff]  }
  0x23   : > { %v3415_v5 = vld [vmem:[%s3472_s24 + $0x1f0] sm:$0xff]   ;;  %v3417_v7 = vld [vmem:[%s3472_s24 + $0x1f8] sm:$0xff]  }
  0x25   : > { %3191 = vmatpush3.bf16.msra.mxu0 %v3352_v8  ;;  %3336 = vmatpush3.bf16.msra.mxu1 %v3352_v8  ;;  %v3556_v8 = vld [vmem:[%s3865_s2] ss:$0 sm:$0xff] }
  0x26   : > { %3192 = vmatprep.subr.bf16.mxu0 %v3353_v9  ;;  %3329 = vmatprep.subr.bf16.mxu1 %v3353_v9 }
  0x29   : > { %3193 = vmatpush3.bf16.msra.mxu0 %v3353_v9  ;;  %3337 = vmatpush3.bf16.msra.mxu1 %v3353_v9 }
  0x2c   : > { %3195 = vmatmul.mubr.bf16.vlgmr.msra.gmra.mxu0 %v3356_v10  ;;  %3259 = vmatmul.mubr.bf16.vlgmr.msra.gmra.mxu1 %v3357_v11 }
  0x2d   : > { %3198 = vmatprep.mubr.bf16.mxu0 %v3358_v12  ;;  %3262 = vmatprep.mubr.bf16.mxu1 %v3359_v13 }
  0x34   : > { %3199 = vmatmul.mubr.bf16.gmra.mxu0 %v3360_v14  ;;  %3263 = vmatmul.mubr.bf16.gmra.mxu1 %v3361_v15 }
  0x35   : > { %3202 = vmatprep.mubr.bf16.mxu0 %v3362_v16  ;;  %3266 = vmatprep.mubr.bf16.mxu1 %v3363_v17 }
  0x3c   : > { %3203 = vmatmul.mubr.bf16.gmra.mxu0 %v3364_v18  ;;  %3267 = vmatmul.mubr.bf16.gmra.mxu1 %v3365_v19 }
  0x3d   : > { %3206 = vmatprep.mubr.bf16.mxu0 %v3366_v20  ;;  %3270 = vmatprep.mubr.bf16.mxu1 %v3367_v21 }
  0x44   : > { %3207 = vmatmul.mubr.bf16.gmra.mxu0 %v3368_v22  ;;  %3271 = vmatmul.mubr.bf16.gmra.mxu1 %v3369_v23 }
  0x45   : > { %3210 = vmatprep.mubr.bf16.mxu0 %v3370_v24  ;;  %3274 = vmatprep.mubr.bf16.mxu1 %v3371_v25 }
  0x4c   : > { %3211 = vmatmul.mubr.bf16.gmra.mxu0 %v3372_v26  ;;  %3275 = vmatmul.mubr.bf16.gmra.mxu1 %v3373_v27 }
  0x4d   : > { %3214 = vmatprep.mubr.bf16.mxu0 %v3374_v28  ;;  %3278 = vmatprep.mubr.bf16.mxu1 %v3375_v29 }
  0x54   : > { %3215 = vmatmul.mubr.bf16.gmra.mxu0 %v3376_v30  ;;  %3279 = vmatmul.mubr.bf16.gmra.mxu1 %v3377_v31 }
  0x55   : > { %3218 = vmatprep.mubr.bf16.mxu0 %v3378_v32  ;;  %3282 = vmatprep.mubr.bf16.mxu1 %v3379_v33 }
  0x5c   : > { %3219 = vmatmul.mubr.bf16.gmra.mxu0 %v3380_v34  ;;  %3283 = vmatmul.mubr.bf16.gmra.mxu1 %v3381_v35 }
  0x5d   : > { %3222 = vmatprep.mubr.bf16.mxu0 %v3382_v36  ;;  %3286 = vmatprep.mubr.bf16.mxu1 %v3383_v37 }
  0x64   : > { %3223 = vmatmul.mubr.bf16.gmra.mxu0 %v3384_v38  ;;  %3287 = vmatmul.mubr.bf16.gmra.mxu1 %v3385_v39 }
  0x65   : > { %3226 = vmatprep.mubr.bf16.mxu0 %v3386_v40  ;;  %3290 = vmatprep.mubr.bf16.mxu1 %v3387_v41 }
  0x6c   : > { %3227 = vmatmul.mubr.bf16.gmra.mxu0 %v3388_v42  ;;  %3291 = vmatmul.mubr.bf16.gmra.mxu1 %v3389_v43 }
  0x6d   : > { %3230 = vmatprep.mubr.bf16.mxu0 %v3390_v44  ;;  %3294 = vmatprep.mubr.bf16.mxu1 %v3391_v45 }
  0x74   : > { %3231 = vmatmul.mubr.bf16.gmra.mxu0 %v3392_v46  ;;  %3295 = vmatmul.mubr.bf16.gmra.mxu1 %v3393_v47 }
  0x75   : > { %3234 = vmatprep.mubr.bf16.mxu0 %v3394_v48  ;;  %3298 = vmatprep.mubr.bf16.mxu1 %v3395_v49 }
  0x7c   : > { %3235 = vmatmul.mubr.bf16.gmra.mxu0 %v3396_v50  ;;  %3299 = vmatmul.mubr.bf16.gmra.mxu1 %v3397_v51 }
  0x7d   : > { %3238 = vmatprep.mubr.bf16.mxu0 %v3398_v52  ;;  %3302 = vmatprep.mubr.bf16.mxu1 %v3399_v53 }
  0x84   : > { %3239 = vmatmul.mubr.bf16.gmra.mxu0 %v3400_v54  ;;  %3303 = vmatmul.mubr.bf16.gmra.mxu1 %v3401_v55 }
  0x85   : > { %3242 = vmatprep.mubr.bf16.mxu0 %v3402_v56  ;;  %3306 = vmatprep.mubr.bf16.mxu1 %v3403_v57 }
  0x8c   : > { %3243 = vmatmul.mubr.bf16.gmra.mxu0 %v3404_v58  ;;  %3307 = vmatmul.mubr.bf16.gmra.mxu1 %v3405_v59 }
  0x8d   : > { %3246 = vmatprep.mubr.bf16.mxu0 %v3406_v60  ;;  %3310 = vmatprep.mubr.bf16.mxu1 %v3407_v61 }
  0x94   : > { %3247 = vmatmul.mubr.bf16.gmra.mxu0 %v3408_v62  ;;  %3311 = vmatmul.mubr.bf16.gmra.mxu1 %v3409_v63 }
  0x95   : > { %3250 = vmatprep.mubr.bf16.mxu0 %v3410_v0  ;;  %3314 = vmatprep.mubr.bf16.mxu1 %v3411_v1 }
  0x9c   : > { %3251 = vmatmul.mubr.bf16.gmra.mxu0 %v3412_v2  ;;  %3315 = vmatmul.mubr.bf16.gmra.mxu1 %v3413_v3 }
  0x9d   : > { %3254 = vmatprep.mubr.bf16.mxu0 %v3414_v4  ;;  %3318 = vmatprep.mubr.bf16.mxu1 %v3415_v5 }
  0xa4   : > { %3255 = vmatmul.mubr.bf16.gmra.mxu0 %v3416_v6  ;;  %3319 = vmatmul.mubr.bf16.gmra.mxu1 %v3417_v7 }
  0xec   : > { %v3196_v9 = vpop.f32.mrf.mxu0  ;;  %v3260_v10 = vpop.f32.mrf.mxu1 }
  0xed   : > { %v801_v11 = vadd.f32 %v3196_v9, %v3556_v8  ;;  %v1057_v12 = vadd.f32 %v3260_v10, %v3556_v8 }
  0xee   : > { %v792_v13 = vpop.f32.mrf.mxu0  ;;  %v1048_v14 = vpop.f32.mrf.mxu1 }
  0xef   : > { %vm1305_vm0 = vcmp.ge.f32.partialorder %v801_v11, 0.0  ;;  %v1433_v15 = vmul.f32 0.2, %v801_v11  ;;  %vm1369_vm1 = vcmp.ge.f32.partialorder %v1057_v12, 0.0  ;;  %v1497_v16 = vmul.f32 0.2, %v1057_v12 }
  0xf0   : > { %v793_v17 = vadd.f32 %v3556_v8, %v792_v13  ;;  %v1049_v18 = vadd.f32 %v3556_v8, %v1048_v14  ;;  %v3197_v19 = vpop.f32.mrf.mxu0  ;;  %v3261_v20 = vpop.f32.mrf.mxu1 }
  0xf1   : > { %v1561_v21 = vsel %vm1305_vm0, %v801_v11, %v1433_v15  ;;  %v804_v22 = vadd.f32 %v3197_v19, %v3556_v8  ;;  %v1060_v23 = vadd.f32 %v3261_v20, %v3556_v8  ;;  %v1625_v24 = vsel %vm1369_vm1, %v1057_v12, %v1497_v16 }
  0xf2   : > { %vm1303_vm2 = vcmp.ge.f32.partialorder %v793_v17, 0.0  ;;  %v1431_v25 = vmul.f32 0.2, %v793_v17  ;;  %vm1367_vm3 = vcmp.ge.f32.partialorder %v1049_v18, 0.0  ;;  %v795_v26 = vpop.f32.mrf.mxu0  ;;  %v1051_v27 = vpop.f32.mrf.mxu1  ;;  %v1495_v31 = vmul.f32 0.2, %v1049_v18 }
  0xf3   : > { %vm1306_vm4 = vcmp.ge.f32.partialorder %v804_v22, 0.0  ;;  %v1434_v28 = vmul.f32 0.2, %v804_v22  ;;  %vm1370_vm5 = vcmp.ge.f32.partialorder %v1060_v23, 0.0  ;;  %v1498_v29 = vmul.f32 0.2, %v1060_v23 }
  0xf4   : > { %v1559_v30 = vsel %vm1303_vm2, %v793_v17, %v1431_v25  ;;  %v796_v32 = vadd.f32 %v3556_v8, %v795_v26  ;;  %v1052_v33 = vadd.f32 %v3556_v8, %v1051_v27  ;;  %v3200_v34 = vpop.f32.mrf.mxu0  ;;  %v3264_v35 = vpop.f32.mrf.mxu1  ;;  %v1623_v47 = vsel %vm1367_vm3, %v1049_v18, %v1495_v31 }
  0xf5   : > { %v1562_v36 = vsel %vm1306_vm4, %v804_v22, %v1434_v28  ;;  %v1626_v37 = vsel %vm1370_vm5, %v1060_v23, %v1498_v29  ;;  %v817_v38 = vadd.f32 %v3200_v34, %v3556_v8  ;;  %v1073_v39 = vadd.f32 %v3264_v35, %v3556_v8 }
  0xf6   : > { %v2731_v40 = vpack.c.bf16 %v1562_v36, %v1561_v21  ;;  %v2891_v41 = vpack.c.bf16 %v1626_v37, %v1625_v24  ;;  %vm1304_vm6 = vcmp.ge.f32.partialorder %v796_v32, 0.0  ;;  %v1432_v42 = vmul.f32 0.2, %v796_v32  ;;  %v808_v43 = vpop.f32.mrf.mxu0  ;;  %v1064_v44 = vpop.f32.mrf.mxu1 }
  0xf7   : > { %vm1368_vm7 = vcmp.ge.f32.partialorder %v1052_v33, 0.0  ;;  %v1496_v45 = vmul.f32 0.2, %v1052_v33  ;;  %vm1309_vm8 = vcmp.ge.f32.partialorder %v817_v38, 0.0  ;;  %v1437_v46 = vmul.f32 0.2, %v817_v38 }
  0xf8   : > { %3043 = vst [vmem:[%s3571_s13 + $0x8] sm:$0xff] %v2731_v40   ;;  %3075 = vst [vmem:[%s3571_s13 + $0x108] sm:$0xff] %v2891_v41   ;;  %v1560_v48 = vsel %vm1304_vm6, %v796_v32, %v1432_v42  ;;  %v1501_v49 = vmul.f32 0.2, %v1073_v39  ;;  %v809_v50 = vadd.f32 %v3556_v8, %v808_v43  ;;  %v3201_v51 = vpop.f32.mrf.mxu0  ;;  %v3265_v52 = vpop.f32.mrf.mxu1  ;;  %vm1373_vm9 = vcmp.ge.f32.partialorder %v1073_v39, 0.0 }
  0xf9   : > { %v2726_v53 = vpack.c.bf16 %v1560_v48, %v1559_v30  ;;  %v1624_v54 = vsel %vm1368_vm7, %v1052_v33, %v1496_v45  ;;  %v1065_v55 = vadd.f32 %v3556_v8, %v1064_v44  ;;  %v1565_v57 = vsel %vm1309_vm8, %v817_v38, %v1437_v46 }
  0xfa   : > { %v2886_v56 = vpack.c.bf16 %v1624_v54, %v1623_v47  ;;  %vm1307_vm10 = vcmp.ge.f32.partialorder %v809_v50, 0.0  ;;  %v1435_v58 = vmul.f32 0.2, %v809_v50  ;;  %v811_v59 = vpop.f32.mrf.mxu0  ;;  %v1067_v60 = vpop.f32.mrf.mxu1  ;;  %v820_v62 = vadd.f32 %v3201_v51, %v3556_v8 }
  0xfb   : > { %2727 = vst [vmem:[%s3571_s13] sm:$0xff] %v2726_v53   ;;  %vm1371_vm11 = vcmp.ge.f32.partialorder %v1065_v55, 0.0  ;;  %v1499_v61 = vmul.f32 0.2, %v1065_v55  ;;  %v1076_v63 = vadd.f32 %v3265_v52, %v3556_v8  ;;  %v1629_v0 = vsel %vm1373_vm9, %v1073_v39, %v1501_v49 }
  0xfc   : > { %3074 = vst [vmem:[%s3571_s13 + $0x100] sm:$0xff] %v2886_v56   ;;  %v1563_v1 = vsel %vm1307_vm10, %v809_v50, %v1435_v58  ;;  %v812_v2 = vadd.f32 %v3556_v8, %v811_v59  ;;  %v1068_v3 = vadd.f32 %v3556_v8, %v1067_v60  ;;  %v3204_v4 = vpop.f32.mrf.mxu0  ;;  %v3268_v5 = vpop.f32.mrf.mxu1  ;;  %vm1310_vm12 = vcmp.ge.f32.partialorder %v820_v62, 0.0 }
  0xfd   : > { %v1627_v6 = vsel %vm1371_vm11, %v1065_v55, %v1499_v61  ;;  %v1438_v7 = vmul.f32 0.2, %v820_v62  ;;  %vm1374_vm13 = vcmp.ge.f32.partialorder %v1076_v63, 0.0  ;;  %v1502_v9 = vmul.f32 0.2, %v1076_v63 }
  0xfe   : > { %vm1308_vm14 = vcmp.ge.f32.partialorder %v812_v2, 0.0  ;;  %v1436_v10 = vmul.f32 0.2, %v812_v2  ;;  %vm1372_vm15 = vcmp.ge.f32.partialorder %v1068_v3, 0.0  ;;  %v824_v11 = vpop.f32.mrf.mxu0  ;;  %v1080_v12 = vpop.f32.mrf.mxu1  ;;  %v1500_v14 = vmul.f32 0.2, %v1068_v3 }
  0xff   : > { %v1566_v13 = vsel %vm1310_vm12, %v820_v62, %v1438_v7  ;;  %v833_v15 = vadd.f32 %v3204_v4, %v3556_v8  ;;  %v1089_v16 = vadd.f32 %v3268_v5, %v3556_v8  ;;  %v1630_v18 = vsel %vm1374_vm13, %v1076_v63, %v1502_v9 }
 0x100   : > { %v2741_v17 = vpack.c.bf16 %v1566_v13, %v1565_v57  ;;  %v1564_v19 = vsel %vm1308_vm14, %v812_v2, %v1436_v10  ;;  %v825_v20 = vadd.f32 %v3556_v8, %v824_v11  ;;  %v3205_v21 = vpop.f32.mrf.mxu0  ;;  %v3269_v22 = vpop.f32.mrf.mxu1  ;;  %v2901_v23 = vpack.c.bf16 %v1630_v18, %v1629_v0 }
 0x101   : > { %v2736_v24 = vpack.c.bf16 %v1564_v19, %v1563_v1  ;;  %v1628_v25 = vsel %vm1372_vm15, %v1068_v3, %v1500_v14  ;;  %vm1313_vm0 = vcmp.ge.f32.partialorder %v833_v15, 0.0  ;;  %v1441_v27 = vmul.f32 0.2, %v833_v15 }
 0x102   : > { %3045 = vst [vmem:[%s3571_s13 + $0x18] sm:$0xff] %v2741_v17   ;;  %v2896_v26 = vpack.c.bf16 %v1628_v25, %v1627_v6  ;;  %vm1377_vm1 = vcmp.ge.f32.partialorder %v1089_v16, 0.0  ;;  %v1505_v28 = vmul.f32 0.2, %v1089_v16  ;;  %v827_v29 = vpop.f32.mrf.mxu0  ;;  %v1083_v30 = vpop.f32.mrf.mxu1  ;;  %3077 = vst [vmem:[%s3571_s13 + $0x118] sm:$0xff] %v2901_v23   ;;  %vm1311_vm2 = vcmp.ge.f32.partialorder %v825_v20, 0.0 }
 0x103   : > { %3044 = vst [vmem:[%s3571_s13 + $0x10] sm:$0xff] %v2736_v24   ;;  %v1439_v31 = vmul.f32 0.2, %v825_v20  ;;  %v1081_v32 = vadd.f32 %v3556_v8, %v1080_v12  ;;  %v836_v33 = vadd.f32 %v3205_v21, %v3556_v8  ;;  %v1569_v34 = vsel %vm1313_vm0, %v833_v15, %v1441_v27 }
 0x104   : > { %3076 = vst [vmem:[%s3571_s13 + $0x110] sm:$0xff] %v2896_v26   ;;  %v1633_v35 = vsel %vm1377_vm1, %v1089_v16, %v1505_v28  ;;  %v1092_v36 = vadd.f32 %v3269_v22, %v3556_v8  ;;  %v828_v37 = vadd.f32 %v3556_v8, %v827_v29  ;;  %v3208_v38 = vpop.f32.mrf.mxu0  ;;  %v3272_v39 = vpop.f32.mrf.mxu1  ;;  %v1084_v48 = vadd.f32 %v3556_v8, %v1083_v30 }
 0x105   : > { %v1567_v40 = vsel %vm1311_vm2, %v825_v20, %v1439_v31  ;;  %vm1375_vm3 = vcmp.ge.f32.partialorder %v1081_v32, 0.0  ;;  %v1503_v41 = vmul.f32 0.2, %v1081_v32  ;;  %vm1314_vm4 = vcmp.ge.f32.partialorder %v836_v33, 0.0 }
 0x106   : > { %v1442_v42 = vmul.f32 0.2, %v836_v33  ;;  %vm1378_vm5 = vcmp.ge.f32.partialorder %v1092_v36, 0.0  ;;  %v1506_v43 = vmul.f32 0.2, %v1092_v36  ;;  %vm1312_vm6 = vcmp.ge.f32.partialorder %v828_v37, 0.0  ;;  %v840_v44 = vpop.f32.mrf.mxu0  ;;  %v1096_v45 = vpop.f32.mrf.mxu1 }
 0x107   : > { %v1631_v46 = vsel %vm1375_vm3, %v1081_v32, %v1503_v41  ;;  %v1440_v47 = vmul.f32 0.2, %v828_v37  ;;  %v849_v49 = vadd.f32 %v3208_v38, %v3556_v8  ;;  %v1105_v52 = vadd.f32 %v3272_v39, %v3556_v8 }
 0x108   : > { %v1570_v50 = vsel %vm1314_vm4, %v836_v33, %v1442_v42  ;;  %v1634_v51 = vsel %vm1378_vm5, %v1092_v36, %v1506_v43  ;;  %v841_v53 = vadd.f32 %v3556_v8, %v840_v44  ;;  %v3209_v54 = vpop.f32.mrf.mxu0  ;;  %v3273_v55 = vpop.f32.mrf.mxu1  ;;  %vm1376_vm7 = vcmp.ge.f32.partialorder %v1084_v48, 0.0 }
 0x109   : > { %v2751_v56 = vpack.c.bf16 %v1570_v50, %v1569_v34  ;;  %v2911_v57 = vpack.c.bf16 %v1634_v51, %v1633_v35  ;;  %v1568_v58 = vsel %vm1312_vm6, %v828_v37, %v1440_v47  ;;  %v1504_v60 = vmul.f32 0.2, %v1084_v48 }
 0x10a   : > { %v2746_v59 = vpack.c.bf16 %v1568_v58, %v1567_v40  ;;  %vm1317_vm8 = vcmp.ge.f32.partialorder %v849_v49, 0.0  ;;  %v1445_v61 = vmul.f32 0.2, %v849_v49  ;;  %v843_v62 = vpop.f32.mrf.mxu0  ;;  %v1099_v63 = vpop.f32.mrf.mxu1  ;;  %vm1381_vm9 = vcmp.ge.f32.partialorder %v1105_v52, 0.0 }
 0x10b   : > { %3047 = vst [vmem:[%s3571_s13 + $0x28] sm:$0xff] %v2751_v56   ;;  %3079 = vst [vmem:[%s3571_s13 + $0x128] sm:$0xff] %v2911_v57   ;;  %v1509_v0 = vmul.f32 0.2, %v1105_v52  ;;  %vm1315_vm10 = vcmp.ge.f32.partialorder %v841_v53, 0.0  ;;  %v1632_v2 = vsel %vm1376_vm7, %v1084_v48, %v1504_v60  ;;  %v1097_v4 = vadd.f32 %v3556_v8, %v1096_v45 }
 0x10c   : > { %v1443_v1 = vmul.f32 0.2, %v841_v53  ;;  %3046 = vst [vmem:[%s3571_s13 + $0x20] sm:$0xff] %v2746_v59   ;;  %v1573_v3 = vsel %vm1317_vm8, %v849_v49, %v1445_v61  ;;  %v852_v5 = vadd.f32 %v3209_v54, %v3556_v8  ;;  %v3212_v6 = vpop.f32.mrf.mxu0  ;;  %v3276_v7 = vpop.f32.mrf.mxu1  ;;  %v2906_v9 = vpack.c.bf16 %v1632_v2, %v1631_v46 }
 0x10d   : > { %v1637_v10 = vsel %vm1381_vm9, %v1105_v52, %v1509_v0  ;;  %v1108_v12 = vadd.f32 %v3273_v55, %v3556_v8  ;;  %vm1379_vm11 = vcmp.ge.f32.partialorder %v1097_v4, 0.0  ;;  %v1507_v13 = vmul.f32 0.2, %v1097_v4 }
 0x10e   : > { %v1571_v11 = vsel %vm1315_vm10, %v841_v53, %v1443_v1  ;;  %vm1318_vm12 = vcmp.ge.f32.partialorder %v852_v5, 0.0  ;;  %v1446_v14 = vmul.f32 0.2, %v852_v5  ;;  %v856_v15 = vpop.f32.mrf.mxu0  ;;  %v1112_v16 = vpop.f32.mrf.mxu1  ;;  %3078 = vst [vmem:[%s3571_s13 + $0x120] sm:$0xff] %v2906_v9   ;;  %v844_v18 = vadd.f32 %v3556_v8, %v843_v62 }
 0x10f   : > { %vm1382_vm13 = vcmp.ge.f32.partialorder %v1108_v12, 0.0  ;;  %v1510_v17 = vmul.f32 0.2, %v1108_v12  ;;  %v1100_v19 = vadd.f32 %v3556_v8, %v1099_v63  ;;  %v1635_v20 = vsel %vm1379_vm11, %v1097_v4, %v1507_v13 }
 0x110   : > { %v1574_v21 = vsel %vm1318_vm12, %v852_v5, %v1446_v14  ;;  %v865_v22 = vadd.f32 %v3212_v6, %v3556_v8  ;;  %v1121_v23 = vadd.f32 %v3276_v7, %v3556_v8  ;;  %v3213_v24 = vpop.f32.mrf.mxu0  ;;  %v3277_v25 = vpop.f32.mrf.mxu1  ;;  %vm1316_vm14 = vcmp.ge.f32.partialorder %v844_v18, 0.0 }
 0x111   : > { %v2761_v26 = vpack.c.bf16 %v1574_v21, %v1573_v3  ;;  %v1638_v27 = vsel %vm1382_vm13, %v1108_v12, %v1510_v17  ;;  %v1444_v28 = vmul.f32 0.2, %v844_v18  ;;  %vm1380_vm15 = vcmp.ge.f32.partialorder %v1100_v19, 0.0 }
 0x112   : > { %v2921_v29 = vpack.c.bf16 %v1638_v27, %v1637_v10  ;;  %v1508_v30 = vmul.f32 0.2, %v1100_v19  ;;  %vm1321_vm0 = vcmp.ge.f32.partialorder %v865_v22, 0.0  ;;  %v859_v31 = vpop.f32.mrf.mxu0  ;;  %v1115_v32 = vpop.f32.mrf.mxu1  ;;  %v1449_v34 = vmul.f32 0.2, %v865_v22 }
 0x113   : > { %3049 = vst [vmem:[%s3571_s13 + $0x38] sm:$0xff] %v2761_v26   ;;  %v1572_v33 = vsel %vm1316_vm14, %v844_v18, %v1444_v28  ;;  %vm1385_vm1 = vcmp.ge.f32.partialorder %v1121_v23, 0.0  ;;  %v1513_v35 = vmul.f32 0.2, %v1121_v23  ;;  %v857_v38 = vadd.f32 %v3556_v8, %v856_v15 }
 0x114   : > { %3081 = vst [vmem:[%s3571_s13 + $0x138] sm:$0xff] %v2921_v29   ;;  %v2756_v36 = vpack.c.bf16 %v1572_v33, %v1571_v11  ;;  %v1636_v37 = vsel %vm1380_vm15, %v1100_v19, %v1508_v30  ;;  %v1113_v39 = vadd.f32 %v3556_v8, %v1112_v16  ;;  %v3216_v40 = vpop.f32.mrf.mxu0  ;;  %v3280_v41 = vpop.f32.mrf.mxu1  ;;  %v1577_v43 = vsel %vm1321_vm0, %v865_v22, %v1449_v34 }
 0x115   : > { %v2916_v42 = vpack.c.bf16 %v1636_v37, %v1635_v20  ;;  %v1641_v44 = vsel %vm1385_vm1, %v1121_v23, %v1513_v35  ;;  %v868_v45 = vadd.f32 %v3213_v24, %v3556_v8  ;;  %vm1319_vm2 = vcmp.ge.f32.partialorder %v857_v38, 0.0 }
 0x116   : > { %3048 = vst [vmem:[%s3571_s13 + $0x30] sm:$0xff] %v2756_v36   ;;  %v1447_v46 = vmul.f32 0.2, %v857_v38  ;;  %vm1383_vm3 = vcmp.ge.f32.partialorder %v1113_v39, 0.0  ;;  %v1511_v47 = vmul.f32 0.2, %v1113_v39  ;;  %v872_v48 = vpop.f32.mrf.mxu0  ;;  %v1128_v49 = vpop.f32.mrf.mxu1  ;;  %v1124_v51 = vadd.f32 %v3277_v25, %v3556_v8 }
 0x117   : > { %3080 = vst [vmem:[%s3571_s13 + $0x130] sm:$0xff] %v2916_v42   ;;  %vm1322_vm4 = vcmp.ge.f32.partialorder %v868_v45, 0.0  ;;  %v1450_v50 = vmul.f32 0.2, %v868_v45  ;;  %v860_v52 = vadd.f32 %v3556_v8, %v859_v31  ;;  %v1116_v55 = vadd.f32 %v3556_v8, %v1115_v32 }
 0x118   : > { %v1575_v53 = vsel %vm1319_vm2, %v857_v38, %v1447_v46  ;;  %v1639_v54 = vsel %vm1383_vm3, %v1113_v39, %v1511_v47  ;;  %v881_v56 = vadd.f32 %v3216_v40, %v3556_v8  ;;  %v3217_v57 = vpop.f32.mrf.mxu0  ;;  %v3281_v58 = vpop.f32.mrf.mxu1  ;;  %vm1386_vm5 = vcmp.ge.f32.partialorder %v1124_v51, 0.0 }
 0x119   : > { %v1578_v59 = vsel %vm1322_vm4, %v868_v45, %v1450_v50  ;;  %v1514_v60 = vmul.f32 0.2, %v1124_v51  ;;  %vm1320_vm6 = vcmp.ge.f32.partialorder %v860_v52, 0.0  ;;  %v1448_v62 = vmul.f32 0.2, %v860_v52 }
 0x11a   : > { %v2771_v61 = vpack.c.bf16 %v1578_v59, %v1577_v43  ;;  %vm1384_vm7 = vcmp.ge.f32.partialorder %v1116_v55, 0.0  ;;  %v1512_v63 = vmul.f32 0.2, %v1116_v55  ;;  %v875_v0 = vpop.f32.mrf.mxu0  ;;  %v1131_v1 = vpop.f32.mrf.mxu1  ;;  %vm1325_vm8 = vcmp.ge.f32.partialorder %v881_v56, 0.0 }
 0x11b   : > { %v1642_v2 = vsel %vm1386_vm5, %v1124_v51, %v1514_v60  ;;  %v1453_v3 = vmul.f32 0.2, %v881_v56  ;;  %v1137_v4 = vadd.f32 %v3280_v41, %v3556_v8  ;;  %v1576_v6 = vsel %vm1320_vm6, %v860_v52, %v1448_v62 }
 0x11c   : > { %3051 = vst [vmem:[%s3571_s13 + $0x48] sm:$0xff] %v2771_v61   ;;  %v2931_v5 = vpack.c.bf16 %v1642_v2, %v1641_v44  ;;  %v1640_v7 = vsel %vm1384_vm7, %v1116_v55, %v1512_v63  ;;  %v873_v9 = vadd.f32 %v3556_v8, %v872_v48  ;;  %v3220_v10 = vpop.f32.mrf.mxu0  ;;  %v3284_v11 = vpop.f32.mrf.mxu1  ;;  %v2766_v12 = vpack.c.bf16 %v1576_v6, %v1575_v53 }
 0x11d   : > { %v2926_v13 = vpack.c.bf16 %v1640_v7, %v1639_v54  ;;  %v1581_v14 = vsel %vm1325_vm8, %v881_v56, %v1453_v3  ;;  %vm1389_vm9 = vcmp.ge.f32.partialorder %v1137_v4, 0.0  ;;  %v1517_v15 = vmul.f32 0.2, %v1137_v4 }
 0x11e   : > { %3083 = vst [vmem:[%s3571_s13 + $0x148] sm:$0xff] %v2931_v5   ;;  %vm1323_vm10 = vcmp.ge.f32.partialorder %v873_v9, 0.0  ;;  %v1451_v16 = vmul.f32 0.2, %v873_v9  ;;  %v1129_v17 = vadd.f32 %v3556_v8, %v1128_v49  ;;  %v888_v18 = vpop.f32.mrf.mxu0  ;;  %v1144_v19 = vpop.f32.mrf.mxu1  ;;  %3050 = vst [vmem:[%s3571_s13 + $0x40] sm:$0xff] %v2766_v12   ;;  %v884_v20 = vadd.f32 %v3217_v57, %v3556_v8 }
 0x11f   : > { %3082 = vst [vmem:[%s3571_s13 + $0x140] sm:$0xff] %v2926_v13   ;;  %v1140_v21 = vadd.f32 %v3281_v58, %v3556_v8  ;;  %v876_v22 = vadd.f32 %v3556_v8, %v875_v0  ;;  %v1132_v23 = vadd.f32 %v3556_v8, %v1131_v1  ;;  %v1645_v24 = vsel %vm1389_vm9, %v1137_v4, %v1517_v15 }
 0x120   : > { %v1579_v25 = vsel %vm1323_vm10, %v873_v9, %v1451_v16  ;;  %vm1387_vm11 = vcmp.ge.f32.partialorder %v1129_v17, 0.0  ;;  %v1515_v26 = vmul.f32 0.2, %v1129_v17  ;;  %v3221_v27 = vpop.f32.mrf.mxu0  ;;  %v3285_v28 = vpop.f32.mrf.mxu1  ;;  %vm1326_vm12 = vcmp.ge.f32.partialorder %v884_v20, 0.0 }
 0x121   : > { %v1454_v29 = vmul.f32 0.2, %v884_v20  ;;  %vm1390_vm13 = vcmp.ge.f32.partialorder %v1140_v21, 0.0  ;;  %v1518_v30 = vmul.f32 0.2, %v1140_v21  ;;  %vm1324_vm14 = vcmp.ge.f32.partialorder %v876_v22, 0.0 }
 0x122   : > { %v1643_v31 = vsel %vm1387_vm11, %v1129_v17, %v1515_v26  ;;  %v1452_v32 = vmul.f32 0.2, %v876_v22  ;;  %vm1388_vm15 = vcmp.ge.f32.partialorder %v1132_v23, 0.0  ;;  %v891_v33 = vpop.f32.mrf.mxu0  ;;  %v1147_v34 = vpop.f32.mrf.mxu1  ;;  %v1516_v37 = vmul.f32 0.2, %v1132_v23 }
 0x123   : > { %v1582_v35 = vsel %vm1326_vm12, %v884_v20, %v1454_v29  ;;  %v1646_v36 = vsel %vm1390_vm13, %v1140_v21, %v1518_v30  ;;  %v897_v38 = vadd.f32 %v3220_v10, %v3556_v8  ;;  %v1153_v42 = vadd.f32 %v3284_v11, %v3556_v8 }
 0x124   : > { %v2781_v39 = vpack.c.bf16 %v1582_v35, %v1581_v14  ;;  %v2941_v40 = vpack.c.bf16 %v1646_v36, %v1645_v24  ;;  %v1580_v41 = vsel %vm1324_vm14, %v876_v22, %v1452_v32  ;;  %v3224_v43 = vpop.f32.mrf.mxu0  ;;  %v3288_v44 = vpop.f32.mrf.mxu1  ;;  %v1644_v46 = vsel %vm1388_vm15, %v1132_v23, %v1516_v37 }
 0x125   : > { %v2776_v45 = vpack.c.bf16 %v1580_v41, %v1579_v25  ;;  %vm1329_vm0 = vcmp.ge.f32.partialorder %v897_v38, 0.0  ;;  %v1457_v47 = vmul.f32 0.2, %v897_v38  ;;  %v2936_v48 = vpack.c.bf16 %v1644_v46, %v1643_v31 }
 0x126   : > { %3053 = vst [vmem:[%s3571_s13 + $0x58] sm:$0xff] %v2781_v39   ;;  %3085 = vst [vmem:[%s3571_s13 + $0x158] sm:$0xff] %v2941_v40   ;;  %vm1393_vm1 = vcmp.ge.f32.partialorder %v1153_v42, 0.0  ;;  %v1521_v49 = vmul.f32 0.2, %v1153_v42  ;;  %v889_v50 = vadd.f32 %v3556_v8, %v888_v18  ;;  %v904_v51 = vpop.f32.mrf.mxu0  ;;  %v1160_v52 = vpop.f32.mrf.mxu1  ;;  %v1145_v54 = vadd.f32 %v3556_v8, %v1144_v19 }
 0x127   : > { %3052 = vst [vmem:[%s3571_s13 + $0x50] sm:$0xff] %v2776_v45   ;;  %v1585_v53 = vsel %vm1329_vm0, %v897_v38, %v1457_v47  ;;  %v900_v55 = vadd.f32 %v3221_v27, %v3556_v8  ;;  %v1156_v56 = vadd.f32 %v3285_v28, %v3556_v8  ;;  %3084 = vst [vmem:[%s3571_s13 + $0x150] sm:$0xff] %v2936_v48  }
 0x128   : > { %v1649_v57 = vsel %vm1393_vm1, %v1153_v42, %v1521_v49  ;;  %vm1327_vm2 = vcmp.ge.f32.partialorder %v889_v50, 0.0  ;;  %v1455_v58 = vmul.f32 0.2, %v889_v50  ;;  %v892_v59 = vadd.f32 %v3556_v8, %v891_v33  ;;  %v3225_v60 = vpop.f32.mrf.mxu0  ;;  %v3289_v61 = vpop.f32.mrf.mxu1 }
 0x129   : > { %vm1391_vm3 = vcmp.ge.f32.partialorder %v1145_v54, 0.0  ;;  %v1519_v62 = vmul.f32 0.2, %v1145_v54  ;;  %vm1330_vm4 = vcmp.ge.f32.partialorder %v900_v55, 0.0  ;;  %v1458_v63 = vmul.f32 0.2, %v900_v55 }
 0x12a   : > { %v1583_v0 = vsel %vm1327_vm2, %v889_v50, %v1455_v58  ;;  %vm1394_vm5 = vcmp.ge.f32.partialorder %v1156_v56, 0.0  ;;  %v1522_v1 = vmul.f32 0.2, %v1156_v56  ;;  %vm1328_vm6 = vcmp.ge.f32.partialorder %v892_v59, 0.0  ;;  %v907_v2 = vpop.f32.mrf.mxu0  ;;  %v1163_v3 = vpop.f32.mrf.mxu1 }
 0x12b   : > { %v1647_v4 = vsel %vm1391_vm3, %v1145_v54, %v1519_v62  ;;  %v1586_v5 = vsel %vm1330_vm4, %v900_v55, %v1458_v63  ;;  %v1456_v6 = vmul.f32 0.2, %v892_v59  ;;  %v1148_v7 = vadd.f32 %v3556_v8, %v1147_v34 }
 0x12c   : > { %v2791_v9 = vpack.c.bf16 %v1586_v5, %v1585_v53  ;;  %v1650_v10 = vsel %vm1394_vm5, %v1156_v56, %v1522_v1  ;;  %v913_v11 = vadd.f32 %v3224_v43, %v3556_v8  ;;  %v1169_v12 = vadd.f32 %v3288_v44, %v3556_v8  ;;  %v3228_v13 = vpop.f32.mrf.mxu0  ;;  %v3292_v14 = vpop.f32.mrf.mxu1 }
 0x12d   : > { %v2951_v15 = vpack.c.bf16 %v1650_v10, %v1649_v57  ;;  %v1584_v16 = vsel %vm1328_vm6, %v892_v59, %v1456_v6  ;;  %vm1392_vm7 = vcmp.ge.f32.partialorder %v1148_v7, 0.0  ;;  %v1520_v17 = vmul.f32 0.2, %v1148_v7 }
 0x12e   : > { %3055 = vst [vmem:[%s3571_s13 + $0x68] sm:$0xff] %v2791_v9   ;;  %v2786_v18 = vpack.c.bf16 %v1584_v16, %v1583_v0  ;;  %vm1333_vm8 = vcmp.ge.f32.partialorder %v913_v11, 0.0  ;;  %v1461_v19 = vmul.f32 0.2, %v913_v11  ;;  %vm1397_vm9 = vcmp.ge.f32.partialorder %v1169_v12, 0.0  ;;  %v920_v20 = vpop.f32.mrf.mxu0  ;;  %v1176_v21 = vpop.f32.mrf.mxu1 }
 0x12f   : > { %3087 = vst [vmem:[%s3571_s13 + $0x168] sm:$0xff] %v2951_v15   ;;  %v1648_v22 = vsel %vm1392_vm7, %v1148_v7, %v1520_v17  ;;  %v1525_v23 = vmul.f32 0.2, %v1169_v12  ;;  %v905_v24 = vadd.f32 %v3556_v8, %v904_v51  ;;  %v1161_v25 = vadd.f32 %v3556_v8, %v1160_v52 }
 0x130   : > { %3054 = vst [vmem:[%s3571_s13 + $0x60] sm:$0xff] %v2786_v18   ;;  %v2946_v26 = vpack.c.bf16 %v1648_v22, %v1647_v4  ;;  %v1589_v27 = vsel %vm1333_vm8, %v913_v11, %v1461_v19  ;;  %v916_v28 = vadd.f32 %v3225_v60, %v3556_v8  ;;  %v1172_v29 = vadd.f32 %v3289_v61, %v3556_v8  ;;  %v3229_v30 = vpop.f32.mrf.mxu0  ;;  %v3293_v31 = vpop.f32.mrf.mxu1 }
 0x131   : > { %v1653_v32 = vsel %vm1397_vm9, %v1169_v12, %v1525_v23  ;;  %vm1331_vm10 = vcmp.ge.f32.partialorder %v905_v24, 0.0  ;;  %v1459_v33 = vmul.f32 0.2, %v905_v24  ;;  %vm1395_vm11 = vcmp.ge.f32.partialorder %v1161_v25, 0.0 }
 0x132   : > { %3086 = vst [vmem:[%s3571_s13 + $0x160] sm:$0xff] %v2946_v26   ;;  %v1523_v34 = vmul.f32 0.2, %v1161_v25  ;;  %vm1334_vm12 = vcmp.ge.f32.partialorder %v916_v28, 0.0  ;;  %v1462_v35 = vmul.f32 0.2, %v916_v28  ;;  %v923_v36 = vpop.f32.mrf.mxu0  ;;  %v1179_v37 = vpop.f32.mrf.mxu1  ;;  %v908_v40 = vadd.f32 %v3556_v8, %v907_v2 }
 0x133   : > { %vm1398_vm13 = vcmp.ge.f32.partialorder %v1172_v29, 0.0  ;;  %v1587_v38 = vsel %vm1331_vm10, %v905_v24, %v1459_v33  ;;  %v1526_v39 = vmul.f32 0.2, %v1172_v29  ;;  %v1164_v41 = vadd.f32 %v3556_v8, %v1163_v3 }
 0x134   : > { %v1651_v42 = vsel %vm1395_vm11, %v1161_v25, %v1523_v34  ;;  %v1590_v43 = vsel %vm1334_vm12, %v916_v28, %v1462_v35  ;;  %v929_v44 = vadd.f32 %v3228_v13, %v3556_v8  ;;  %v1185_v45 = vadd.f32 %v3292_v14, %v3556_v8  ;;  %v3232_v46 = vpop.f32.mrf.mxu0  ;;  %v3296_v47 = vpop.f32.mrf.mxu1 }
 0x135   : > { %v2801_v48 = vpack.c.bf16 %v1590_v43, %v1589_v27  ;;  %v1654_v49 = vsel %vm1398_vm13, %v1172_v29, %v1526_v39  ;;  %vm1332_vm14 = vcmp.ge.f32.partialorder %v908_v40, 0.0  ;;  %v1460_v50 = vmul.f32 0.2, %v908_v40 }
 0x136   : > { %v2961_v51 = vpack.c.bf16 %v1654_v49, %v1653_v32  ;;  %vm1396_vm15 = vcmp.ge.f32.partialorder %v1164_v41, 0.0  ;;  %v1524_v52 = vmul.f32 0.2, %v1164_v41  ;;  %vm1337_vm0 = vcmp.ge.f32.partialorder %v929_v44, 0.0  ;;  %v936_v53 = vpop.f32.mrf.mxu0  ;;  %v3661_v54 = vpop.f32.mrf.mxu1 }
 0x137   : > { %3057 = vst [vmem:[%s3571_s13 + $0x78] sm:$0xff] %v2801_v48   ;;  %v1588_v55 = vsel %vm1332_vm14, %v908_v40, %v1460_v50  ;;  %v1465_v56 = vmul.f32 0.2, %v929_v44  ;;  %vm1401_vm1 = vcmp.ge.f32.partialorder %v1185_v45, 0.0  ;;  %v1529_v57 = vmul.f32 0.2, %v1185_v45 }
 0x138   : > { %3089 = vst [vmem:[%s3571_s13 + $0x178] sm:$0xff] %v2961_v51   ;;  %v2796_v58 = vpack.c.bf16 %v1588_v55, %v1587_v38  ;;  %v1652_v59 = vsel %vm1396_vm15, %v1164_v41, %v1524_v52  ;;  %v921_v60 = vadd.f32 %v3556_v8, %v920_v20  ;;  %v1177_v61 = vadd.f32 %v3556_v8, %v1176_v21  ;;  %v3233_v62 = vpop.f32.mrf.mxu0  ;;  %v3297_v63 = vpop.f32.mrf.mxu1 }
 0x139   : > { %v2956_v0 = vpack.c.bf16 %v1652_v59, %v1651_v42  ;;  %v1593_v1 = vsel %vm1337_vm0, %v929_v44, %v1465_v56  ;;  %v1657_v2 = vsel %vm1401_vm1, %v1185_v45, %v1529_v57  ;;  %v932_v3 = vadd.f32 %v3229_v30, %v3556_v8 }
 0x13a   : > { %3056 = vst [vmem:[%s3571_s13 + $0x70] sm:$0xff] %v2796_v58   ;;  %vm1335_vm2 = vcmp.ge.f32.partialorder %v921_v60, 0.0  ;;  %v1463_v4 = vmul.f32 0.2, %v921_v60  ;;  %vm1399_vm3 = vcmp.ge.f32.partialorder %v1177_v61, 0.0  ;;  %v939_v6 = vpop.f32.mrf.mxu0  ;;  %v1195_v7 = vpop.f32.mrf.mxu1  ;;  %v1188_v10 = vadd.f32 %v3293_v31, %v3556_v8 }
 0x13b   : > { %v1527_v5 = vmul.f32 0.2, %v1177_v61  ;;  %3088 = vst [vmem:[%s3571_s13 + $0x170] sm:$0xff] %v2956_v0   ;;  %vm1338_vm4 = vcmp.ge.f32.partialorder %v932_v3, 0.0  ;;  %v1466_v9 = vmul.f32 0.2, %v932_v3  ;;  %v924_v11 = vadd.f32 %v3556_v8, %v923_v36 }
 0x13c   : > { %v1591_v12 = vsel %vm1335_vm2, %v921_v60, %v1463_v4  ;;  %v1180_v14 = vadd.f32 %v3556_v8, %v1179_v37  ;;  %v945_v15 = vadd.f32 %v3232_v46, %v3556_v8  ;;  %v3236_v16 = vpop.f32.mrf.mxu0  ;;  %v3675_v17 = vpop.f32.mrf.mxu1  ;;  %vm1402_vm5 = vcmp.ge.f32.partialorder %v1188_v10, 0.0 }
 0x13d   : > { %v1655_v13 = vsel %vm1399_vm3, %v1177_v61, %v1527_v5  ;;  %v1594_v18 = vsel %vm1338_vm4, %v932_v3, %v1466_v9  ;;  %v1530_v19 = vmul.f32 0.2, %v1188_v10  ;;  %vm1336_vm6 = vcmp.ge.f32.partialorder %v924_v11, 0.0 }
 0x13e   : > { %v2811_v20 = vpack.c.bf16 %v1594_v18, %v1593_v1  ;;  %v1464_v21 = vmul.f32 0.2, %v924_v11  ;;  %vm1400_vm7 = vcmp.ge.f32.partialorder %v1180_v14, 0.0  ;;  %v1528_v22 = vmul.f32 0.2, %v1180_v14  ;;  %v3677_v23 = vpop.f32.mrf.mxu0  ;;  %v3679_v24 = vpop.f32.mrf.mxu1 }
 0x13f   : > { %v1658_v25 = vsel %vm1402_vm5, %v1188_v10, %v1530_v19  ;;  %vm1341_vm8 = vcmp.ge.f32.partialorder %v945_v15, 0.0  ;;  %v1469_v26 = vmul.f32 0.2, %v945_v15  ;;  %v1201_v27 = vadd.f32 %v3296_v47, %v3556_v8  ;;  %v3727_v18 = vld [vmem:[%s3865_s2] ss:$0 sm:$0xff] }
 0x140   : > { %3059 = vst [vmem:[%s3571_s13 + $0x88] sm:$0xff] %v2811_v20   ;;  %v2971_v28 = vpack.c.bf16 %v1658_v25, %v1657_v2  ;;  %v1592_v29 = vsel %vm1336_vm6, %v924_v11, %v1464_v21  ;;  %v1656_v30 = vsel %vm1400_vm7, %v1180_v14, %v1528_v22  ;;  %v937_v31 = vadd.f32 %v3556_v8, %v936_v53  ;;  %v3237_v32 = vpop.f32.mrf.mxu0  ;;  %v3301_v33 = vpop.f32.mrf.mxu1 }
 0x141   : > { %v2806_v34 = vpack.c.bf16 %v1592_v29, %v1591_v12  ;;  %v2966_v35 = vpack.c.bf16 %v1656_v30, %v1655_v13  ;;  %v1597_v36 = vsel %vm1341_vm8, %v945_v15, %v1469_v26  ;;  %vm1405_vm9 = vcmp.ge.f32.partialorder %v1201_v27, 0.0 }
 0x142   : > { %3091 = vst [vmem:[%s3571_s13 + $0x188] sm:$0xff] %v2971_v28   ;;  %v1533_v37 = vmul.f32 0.2, %v1201_v27  ;;  %vm1339_vm10 = vcmp.ge.f32.partialorder %v937_v31, 0.0  ;;  %v1467_v38 = vmul.f32 0.2, %v937_v31  ;;  %v1193_v39 = vadd.f32 %v3556_v8, %v3661_v54  ;;  %v955_v40 = vpop.f32.mrf.mxu0  ;;  %v3687_v41 = vpop.f32.mrf.mxu1 }
 0x143   : > { %3058 = vst [vmem:[%s3571_s13 + $0x80] sm:$0xff] %v2806_v34   ;;  %3090 = vst [vmem:[%s3571_s13 + $0x180] sm:$0xff] %v2966_v35   ;;  %v948_v42 = vadd.f32 %v3233_v62, %v3556_v8  ;;  %v1204_v43 = vadd.f32 %v3297_v63, %v3556_v8  ;;  %v940_v44 = vadd.f32 %v3556_v8, %v939_v6 }
 0x144   : > { %v1196_v45 = vadd.f32 %v3556_v8, %v1195_v7  ;;  %v1661_v46 = vsel %vm1405_vm9, %v1201_v27, %v1533_v37  ;;  %v1595_v47 = vsel %vm1339_vm10, %v937_v31, %v1467_v38  ;;  %vm1403_vm11 = vcmp.ge.f32.partialorder %v1193_v39, 0.0  ;;  %v3695_v49 = vpop.f32.mrf.mxu0  ;;  %v3697_v50 = vpop.f32.mrf.mxu1 }
 0x145   : > { %v1531_v48 = vmul.f32 0.2, %v1193_v39  ;;  %vm1342_vm12 = vcmp.ge.f32.partialorder %v948_v42, 0.0  ;;  %v1470_v51 = vmul.f32 0.2, %v948_v42  ;;  %vm1406_vm13 = vcmp.ge.f32.partialorder %v1204_v43, 0.0 }
 0x146   : > { %v1534_v52 = vmul.f32 0.2, %v1204_v43  ;;  %vm1340_vm14 = vcmp.ge.f32.partialorder %v940_v44, 0.0  ;;  %v1468_v54 = vmul.f32 0.2, %v940_v44  ;;  %vm1404_vm15 = vcmp.ge.f32.partialorder %v1196_v45, 0.0  ;;  %v3699_v55 = vpop.f32.mrf.mxu0  ;;  %v3701_v56 = vpop.f32.mrf.mxu1 }
 0x147   : > { %v1659_v53 = vsel %vm1403_vm11, %v1193_v39, %v1531_v48  ;;  %v1598_v57 = vsel %vm1342_vm12, %v948_v42, %v1470_v51  ;;  %v1532_v59 = vmul.f32 0.2, %v1196_v45  ;;  %v961_v60 = vadd.f32 %v3236_v16, %v3556_v8 }
 0x148   : > { %v1662_v58 = vsel %vm1406_vm13, %v1204_v43, %v1534_v52  ;;  %v2821_v61 = vpack.c.bf16 %v1598_v57, %v1597_v36  ;;  %v1596_v63 = vsel %vm1340_vm14, %v940_v44, %v1468_v54  ;;  %v1217_v0 = vadd.f32 %v3675_v17, %v3556_v8  ;;  %v3706_v1 = vpop.f32.mrf.mxu0  ;;  %v3708_v2 = vpop.f32.mrf.mxu1 }
 0x149   : > { %v2981_v62 = vpack.c.bf16 %v1662_v58, %v1661_v46  ;;  %v2816_v3 = vpack.c.bf16 %v1596_v63, %v1595_v47  ;;  %v1660_v4 = vsel %vm1404_vm15, %v1196_v45, %v1532_v59  ;;  %vm1345_vm0 = vcmp.ge.f32.partialorder %v961_v60, 0.0 }
 0x14a   : > { %v1473_v5 = vmul.f32 0.2, %v961_v60  ;;  %3061 = vst [vmem:[%s3571_s13 + $0x98] sm:$0xff] %v2821_v61   ;;  %v2976_v6 = vpack.c.bf16 %v1660_v4, %v1659_v53  ;;  %vm1409_vm1 = vcmp.ge.f32.partialorder %v1217_v0, 0.0  ;;  %v1537_v7 = vmul.f32 0.2, %v1217_v0  ;;  %v3714_v10 = vpop.f32.mrf.mxu0  ;;  %v3716_v11 = vpop.f32.mrf.mxu1 }
 0x14b   : > { %3093 = vst [vmem:[%s3571_s13 + $0x198] sm:$0xff] %v2981_v62   ;;  %v953_v9 = vadd.f32 %v3556_v8, %v3677_v23  ;;  %3060 = vst [vmem:[%s3571_s13 + $0x90] sm:$0xff] %v2816_v3   ;;  %v1209_v13 = vadd.f32 %v3556_v8, %v3679_v24  ;;  %v964_v14 = vadd.f32 %v3237_v32, %v3556_v8 }
 0x14c   : > { %v1601_v12 = vsel %vm1345_vm0, %v961_v60, %v1473_v5  ;;  %v1220_v15 = vadd.f32 %v3301_v33, %v3556_v8  ;;  %3092 = vst [vmem:[%s3571_s13 + $0x190] sm:$0xff] %v2976_v6   ;;  %v1665_v16 = vsel %vm1409_vm1, %v1217_v0, %v1537_v7  ;;  %v956_v19 = vadd.f32 %v3727_v18, %v955_v40  ;;  %v3730_v20 = vpop.f32.mrf.mxu0  ;;  %v3308_v21 = vpop.f32.mrf.mxu1 }
 0x14d   : > { %vm1343_vm2 = vcmp.ge.f32.partialorder %v953_v9, 0.0  ;;  %v1471_v17 = vmul.f32 0.2, %v953_v9  ;;  %vm1407_vm3 = vcmp.ge.f32.partialorder %v1209_v13, 0.0  ;;  %v1535_v22 = vmul.f32 0.2, %v1209_v13 }
 0x14e   : > { %vm1346_vm4 = vcmp.ge.f32.partialorder %v964_v14, 0.0  ;;  %v1474_v23 = vmul.f32 0.2, %v964_v14  ;;  %vm1410_vm5 = vcmp.ge.f32.partialorder %v1220_v15, 0.0  ;;  %v1538_v8 = vmul.f32 0.2, %v1220_v15  ;;  %v3732_v25 = vpop.f32.mrf.mxu0  ;;  %v3734_v26 = vpop.f32.mrf.mxu1 }
 0x14f   : > { %v1599_v24 = vsel %vm1343_vm2, %v953_v9, %v1471_v17  ;;  %vm1344_vm6 = vcmp.ge.f32.partialorder %v956_v19, 0.0  ;;  %v1663_v27 = vsel %vm1407_vm3, %v1209_v13, %v1535_v22  ;;  %v1472_v29 = vmul.f32 0.2, %v956_v19 }
 0x150   : > { %v1602_v28 = vsel %vm1346_vm4, %v964_v14, %v1474_v23  ;;  %v1212_v30 = vadd.f32 %v3727_v18, %v3687_v41  ;;  %v1666_v32 = vsel %vm1410_vm5, %v1220_v15, %v1538_v8  ;;  %v977_v33 = vadd.f32 %v3727_v18, %v3695_v49  ;;  %v3742_v35 = vpop.f32.mrf.mxu0  ;;  %v3744_v36 = vpop.f32.mrf.mxu1 }
 0x151   : > { %v2831_v31 = vpack.c.bf16 %v1602_v28, %v1601_v12  ;;  %v1233_v34 = vadd.f32 %v3727_v18, %v3697_v50  ;;  %v2991_v37 = vpack.c.bf16 %v1666_v32, %v1665_v16  ;;  %v1600_v38 = vsel %vm1344_vm6, %v956_v19, %v1472_v29 }
 0x152   : > { %vm1408_vm7 = vcmp.ge.f32.partialorder %v1212_v30, 0.0  ;;  %v1536_v39 = vmul.f32 0.2, %v1212_v30  ;;  %v2826_v40 = vpack.c.bf16 %v1600_v38, %v1599_v24  ;;  %vm1349_vm8 = vcmp.ge.f32.partialorder %v977_v33, 0.0  ;;  %v3747_v42 = vpop.f32.mrf.mxu0  ;;  %v3749_v43 = vpop.f32.mrf.mxu1 }
 0x153   : > { %3063 = vst [vmem:[%s3571_s13 + $0xa8] sm:$0xff] %v2831_v31   ;;  %v1477_v41 = vmul.f32 0.2, %v977_v33  ;;  %vm1413_vm9 = vcmp.ge.f32.partialorder %v1233_v34, 0.0  ;;  %3095 = vst [vmem:[%s3571_s13 + $0x1a8] sm:$0xff] %v2991_v37   ;;  %v969_v46 = vadd.f32 %v3727_v18, %v3699_v55  ;;  %v1225_v47 = vadd.f32 %v3727_v18, %v3701_v56 }
 0x154   : > { %v1664_v44 = vsel %vm1408_vm7, %v1212_v30, %v1536_v39  ;;  %v1541_v45 = vmul.f32 0.2, %v1233_v34  ;;  %3062 = vst [vmem:[%s3571_s13 + $0xa0] sm:$0xff] %v2826_v40   ;;  %v980_v50 = vadd.f32 %v3727_v18, %v3706_v1  ;;  %v1236_v51 = vadd.f32 %v3727_v18, %v3708_v2  ;;  %v3248_v52 = vpop.f32.mrf.mxu0  ;;  %v3761_v53 = vpop.f32.mrf.mxu1 }
 0x155   : > { %v2986_v48 = vpack.c.bf16 %v1664_v44, %v1663_v27  ;;  %v1605_v49 = vsel %vm1349_vm8, %v977_v33, %v1477_v41  ;;  %vm1347_vm10 = vcmp.ge.f32.partialorder %v969_v46, 0.0  ;;  %v1475_v57 = vmul.f32 0.2, %v969_v46 }
 0x156   : > { %v1669_v54 = vsel %vm1413_vm9, %v1233_v34, %v1541_v45  ;;  %vm1411_vm11 = vcmp.ge.f32.partialorder %v1225_v47, 0.0  ;;  %v1539_v55 = vmul.f32 0.2, %v1225_v47  ;;  %vm1350_vm12 = vcmp.ge.f32.partialorder %v980_v50, 0.0  ;;  %v3764_v58 = vpop.f32.mrf.mxu0  ;;  %v3766_v59 = vpop.f32.mrf.mxu1 }
 0x157   : > { %3094 = vst [vmem:[%s3571_s13 + $0x1a0] sm:$0xff] %v2986_v48   ;;  %v1478_v56 = vmul.f32 0.2, %v980_v50  ;;  %vm1414_vm13 = vcmp.ge.f32.partialorder %v1236_v51, 0.0  ;;  %v1603_v60 = vsel %vm1347_vm10, %v969_v46, %v1475_v57  ;;  %v1542_v61 = vmul.f32 0.2, %v1236_v51 }
 0x158   : > { %v972_v62 = vadd.f32 %v3727_v18, %v3714_v10  ;;  %v1228_v63 = vadd.f32 %v3727_v18, %v3716_v11  ;;  %v1667_v0 = vsel %vm1411_vm11, %v1225_v47, %v1539_v55  ;;  %v993_v2 = vadd.f32 %v3727_v18, %v3730_v20  ;;  %v3775_v4 = vpop.f32.mrf.mxu0  ;;  %v3777_v5 = vpop.f32.mrf.mxu1 }
 0x159   : > { %v1606_v1 = vsel %vm1350_vm12, %v980_v50, %v1478_v56  ;;  %v1249_v3 = vadd.f32 %v3727_v18, %v3308_v21  ;;  %v1670_v7 = vsel %vm1414_vm13, %v1236_v51, %v1542_v61  ;;  %v985_v20 = vadd.f32 %v3727_v18, %v3732_v25 }
 0x15a   : > { %v2841_v6 = vpack.c.bf16 %v1606_v1, %v1605_v49  ;;  %vm1348_vm14 = vcmp.ge.f32.partialorder %v972_v62, 0.0  ;;  %v1476_v9 = vmul.f32 0.2, %v972_v62  ;;  %v3001_v10 = vpack.c.bf16 %v1670_v7, %v1669_v54  ;;  %v3779_v12 = vpop.f32.mrf.mxu0  ;;  %v3781_v13 = vpop.f32.mrf.mxu1 }
 0x15b   : > { %vm1412_vm15 = vcmp.ge.f32.partialorder %v1228_v63, 0.0  ;;  %v1540_v11 = vmul.f32 0.2, %v1228_v63  ;;  %vm1353_vm0 = vcmp.ge.f32.partialorder %v993_v2, 0.0  ;;  %v1481_v15 = vmul.f32 0.2, %v993_v2 }
 0x15c   : > { %3065 = vst [vmem:[%s3571_s13 + $0xb8] sm:$0xff] %v2841_v6   ;;  %v1604_v14 = vsel %vm1348_vm14, %v972_v62, %v1476_v9  ;;  %vm1417_vm1 = vcmp.ge.f32.partialorder %v1249_v3, 0.0  ;;  %v1545_v16 = vmul.f32 0.2, %v1249_v3  ;;  %3097 = vst [vmem:[%s3571_s13 + $0x1b8] sm:$0xff] %v3001_v10   ;;  %v1241_v21 = vadd.f32 %v3727_v18, %v3734_v26  ;;  %v3789_v22 = vpop.f32.mrf.mxu0  ;;  %v3791_v23 = vpop.f32.mrf.mxu1 }
 0x15d   : > { %v2836_v17 = vpack.c.bf16 %v1604_v14, %v1603_v60  ;;  %v1668_v19 = vsel %vm1412_vm15, %v1228_v63, %v1540_v11  ;;  %v1609_v8 = vsel %vm1353_vm0, %v993_v2, %v1481_v15  ;;  %v996_v28 = vadd.f32 %v3727_v18, %v3742_v35 }
 0x15e   : > { %v2996_v24 = vpack.c.bf16 %v1668_v19, %v1667_v0  ;;  %v1673_v27 = vsel %vm1417_vm1, %v1249_v3, %v1545_v16  ;;  %vm1351_vm2 = vcmp.ge.f32.partialorder %v985_v20, 0.0  ;;  %v1479_v29 = vmul.f32 0.2, %v985_v20  ;;  %v3805_v37 = vpop.f32.mrf.mxu0  ;;  %v3807_v38 = vpop.f32.mrf.mxu1 }
 0x15f   : > { %3064 = vst [vmem:[%s3571_s13 + $0xb0] sm:$0xff] %v2836_v17   ;;  %vm1415_vm3 = vcmp.ge.f32.partialorder %v1241_v21, 0.0  ;;  %v1543_v30 = vmul.f32 0.2, %v1241_v21  ;;  %vm1354_vm4 = vcmp.ge.f32.partialorder %v996_v28, 0.0  ;;  %v1252_v26 = vadd.f32 %v3727_v18, %v3744_v36 }
 0x160   : > { %3096 = vst [vmem:[%s3571_s13 + $0x1b0] sm:$0xff] %v2996_v24   ;;  %v1482_v25 = vmul.f32 0.2, %v996_v28  ;;  %v988_v31 = vadd.f32 %v3727_v18, %v3747_v42  ;;  %v1607_v32 = vsel %vm1351_vm2, %v985_v20, %v1479_v29  ;;  %v1244_v34 = vadd.f32 %v3727_v18, %v3749_v43  ;;  %v3253_v50 = vpop.f32.mrf.mxu0  ;;  %v3317_v51 = vpop.f32.mrf.mxu1 }
 0x161   : > { %v1671_v33 = vsel %vm1415_vm3, %v1241_v21, %v1543_v30  ;;  %v1009_v35 = vadd.f32 %v3727_v18, %v3248_v52  ;;  %vm1418_vm5 = vcmp.ge.f32.partialorder %v1252_v26, 0.0  ;;  %v1546_v40 = vmul.f32 0.2, %v1252_v26 }
 0x162   : > { %v1610_v39 = vsel %vm1354_vm4, %v996_v28, %v1482_v25  ;;  %vm1352_vm6 = vcmp.ge.f32.partialorder %v988_v31, 0.0  ;;  %v1480_v41 = vmul.f32 0.2, %v988_v31  ;;  %vm1416_vm7 = vcmp.ge.f32.partialorder %v1244_v34, 0.0  ;;  %v1019_v2 = vpop.f32.mrf.mxu0 }
 0x163   : > { %v2851_v36 = vpack.c.bf16 %v1610_v39, %v1609_v8  ;;  %v1544_v42 = vmul.f32 0.2, %v1244_v34  ;;  %v1674_v44 = vsel %vm1418_vm5, %v1252_v26, %v1546_v40  ;;  %vm1357_vm8 = vcmp.ge.f32.partialorder %v1009_v35, 0.0 }
 0x164   : > { %v1485_v45 = vmul.f32 0.2, %v1009_v35  ;;  %v1265_v43 = vadd.f32 %v3727_v18, %v3761_v53  ;;  %v3011_v46 = vpack.c.bf16 %v1674_v44, %v1673_v27  ;;  %v1608_v47 = vsel %vm1352_vm6, %v988_v31, %v1480_v41  ;;  %v3256_v16 = vpop.f32.mrf.mxu0 }
 0x165   : > { %3067 = vst [vmem:[%s3571_s13 + $0xc8] sm:$0xff] %v2851_v36   ;;  %v1672_v48 = vsel %vm1416_vm7, %v1244_v34, %v1544_v42  ;;  %v1001_v49 = vadd.f32 %v3727_v18, %v3764_v58  ;;  %v2846_v52 = vpack.c.bf16 %v1608_v47, %v1607_v32  ;;  %v1257_v53 = vadd.f32 %v3727_v18, %v3766_v59  ;;  %v1275_v59 = vpop.f32.mrf.mxu1 }
 0x166   : > { %v3006_v54 = vpack.c.bf16 %v1672_v48, %v1671_v33  ;;  %v1613_v57 = vsel %vm1357_vm8, %v1009_v35, %v1485_v45  ;;  %vm1421_vm9 = vcmp.ge.f32.partialorder %v1265_v43, 0.0  ;;  %3099 = vst [vmem:[%s3571_s13 + $0x1c8] sm:$0xff] %v3011_v46   ;;  %v1549_v55 = vmul.f32 0.2, %v1265_v43  ;;  %v1032_v26 = vpop.f32.mrf.mxu0 }
 0x167   : > { %vm1355_vm10 = vcmp.ge.f32.partialorder %v1001_v49, 0.0  ;;  %v1483_v56 = vmul.f32 0.2, %v1001_v49  ;;  %3066 = vst [vmem:[%s3571_s13 + $0xc0] sm:$0xff] %v2846_v52   ;;  %v1012_v60 = vadd.f32 %v3727_v18, %v3775_v4  ;;  %v1268_v58 = vadd.f32 %v3727_v18, %v3777_v5  ;;  %v3320_v17 = vpop.f32.mrf.mxu1 }
 0x168   : > { %3098 = vst [vmem:[%s3571_s13 + $0x1c0] sm:$0xff] %v3006_v54   ;;  %v1004_v61 = vadd.f32 %v3727_v18, %v3779_v12  ;;  %v1260_v62 = vadd.f32 %v3727_v18, %v3781_v13  ;;  %v1677_v63 = vsel %vm1421_vm9, %v1265_v43, %v1549_v55  ;;  %vm1419_vm11 = vcmp.ge.f32.partialorder %v1257_v53, 0.0  ;;  %v3257_v45 = vpop.f32.mrf.mxu0 }
 0x169   : > { %v1611_v0 = vsel %vm1355_vm10, %v1001_v49, %v1483_v56  ;;  %v1547_v1 = vmul.f32 0.2, %v1257_v53  ;;  %vm1358_vm12 = vcmp.ge.f32.partialorder %v1012_v60, 0.0  ;;  %v1486_v3 = vmul.f32 0.2, %v1012_v60  ;;  %v1288_v31 = vpop.f32.mrf.mxu1 }
 0x16a   : > { %vm1422_vm13 = vcmp.ge.f32.partialorder %v1268_v58, 0.0  ;;  %v1550_v6 = vmul.f32 0.2, %v1268_v58  ;;  %vm1356_vm14 = vcmp.ge.f32.partialorder %v1004_v61, 0.0  ;;  %v1484_v7 = vmul.f32 0.2, %v1004_v61 }
 0x16b   : > { %v1675_v4 = vsel %vm1419_vm11, %v1257_v53, %v1547_v1  ;;  %vm1420_vm15 = vcmp.ge.f32.partialorder %v1260_v62, 0.0  ;;  %v1614_v5 = vsel %vm1358_vm12, %v1012_v60, %v1486_v3  ;;  %v1548_v10 = vmul.f32 0.2, %v1260_v62  ;;  %v3321_v43 = vpop.f32.mrf.mxu1 }
 0x16c   : > { %v1678_v9 = vsel %vm1422_vm13, %v1268_v58, %v1550_v6  ;;  %v1025_v11 = vadd.f32 %v3727_v18, %v3789_v22  ;;  %v2861_v12 = vpack.c.bf16 %v1614_v5, %v1613_v57  ;;  %v1612_v14 = vsel %vm1356_vm14, %v1004_v61, %v1484_v7  ;;  %v1035_v58 = vpop.f32.mrf.mxu0 }
 0x16d   : > { %v3021_v13 = vpack.c.bf16 %v1678_v9, %v1677_v63  ;;  %v1281_v15 = vadd.f32 %v3727_v18, %v3791_v23  ;;  %v2856_v19 = vpack.c.bf16 %v1612_v14, %v1611_v0  ;;  %v1676_v20 = vsel %vm1420_vm15, %v1260_v62, %v1548_v10  ;;  %v1291_v61 = vpop.f32.mrf.mxu1 }
 0x16e   : > { %vm1361_vm0 = vcmp.ge.f32.partialorder %v1025_v11, 0.0  ;;  %v1489_v21 = vmul.f32 0.2, %v1025_v11  ;;  %3069 = vst [vmem:[%s3571_s13 + $0xd8] sm:$0xff] %v2861_v12   ;;  %v3016_v24 = vpack.c.bf16 %v1676_v20, %v1675_v4  ;;  %v1017_v22 = vadd.f32 %v3727_v18, %v3805_v37 }
 0x16f   : > { %3101 = vst [vmem:[%s3571_s13 + $0x1d8] sm:$0xff] %v3021_v13   ;;  %vm1425_vm1 = vcmp.ge.f32.partialorder %v1281_v15, 0.0  ;;  %v1553_v8 = vmul.f32 0.2, %v1281_v15  ;;  %3068 = vst [vmem:[%s3571_s13 + $0xd0] sm:$0xff] %v2856_v19   ;;  %v1273_v27 = vadd.f32 %v3727_v18, %v3807_v38  ;;  %v1028_v23 = vadd.f32 %v3727_v18, %v3253_v50 }
 0x170   : > { %v1284_v28 = vadd.f32 %v3727_v18, %v3317_v51  ;;  %3100 = vst [vmem:[%s3571_s13 + $0x1d0] sm:$0xff] %v3016_v24   ;;  %v1617_v29 = vsel %vm1361_vm0, %v1025_v11, %v1489_v21  ;;  %vm1359_vm2 = vcmp.ge.f32.partialorder %v1017_v22, 0.0  ;;  %v1487_v30 = vmul.f32 0.2, %v1017_v22 }
 0x171   : > { %v1020_v25 = vadd.f32 %v3727_v18, %v1019_v2  ;;  %v1681_v32 = vsel %vm1425_vm1, %v1281_v15, %v1553_v8  ;;  %vm1423_vm3 = vcmp.ge.f32.partialorder %v1273_v27, 0.0  ;;  %vm1362_vm4 = vcmp.ge.f32.partialorder %v1028_v23, 0.0 }
 0x172   : > { %v1490_v33 = vmul.f32 0.2, %v1028_v23  ;;  %v1551_v34 = vmul.f32 0.2, %v1273_v27  ;;  %vm1426_vm5 = vcmp.ge.f32.partialorder %v1284_v28, 0.0  ;;  %v1615_v37 = vsel %vm1359_vm2, %v1017_v22, %v1487_v30 }
 0x173   : > { %v1554_v35 = vmul.f32 0.2, %v1284_v28  ;;  %vm1360_vm6 = vcmp.ge.f32.partialorder %v1020_v25, 0.0  ;;  %v1488_v39 = vmul.f32 0.2, %v1020_v25  ;;  %v1276_v40 = vadd.f32 %v3727_v18, %v1275_v59 }
 0x174   : > { %v1618_v38 = vsel %vm1362_vm4, %v1028_v23, %v1490_v33  ;;  %v1041_v42 = vadd.f32 %v3727_v18, %v3256_v16  ;;  %v1297_v44 = vadd.f32 %v3727_v18, %v3320_v17  ;;  %v1679_v49 = vsel %vm1423_vm3, %v1273_v27, %v1551_v34 }
 0x175   : > { %v2871_v36 = vpack.c.bf16 %v1618_v38, %v1617_v29  ;;  %v1682_v41 = vsel %vm1426_vm5, %v1284_v28, %v1554_v35  ;;  %v1616_v47 = vsel %vm1360_vm6, %v1020_v25, %v1488_v39  ;;  %vm1424_vm7 = vcmp.ge.f32.partialorder %v1276_v40, 0.0 }
 0x176   : > { %v3031_v46 = vpack.c.bf16 %v1682_v41, %v1681_v32  ;;  %v1552_v48 = vmul.f32 0.2, %v1276_v40  ;;  %v2866_v50 = vpack.c.bf16 %v1616_v47, %v1615_v37  ;;  %vm1365_vm8 = vcmp.ge.f32.partialorder %v1041_v42, 0.0 }
 0x177   : > { %3071 = vst [vmem:[%s3571_s13 + $0xe8] sm:$0xff] %v2871_v36   ;;  %v1493_v51 = vmul.f32 0.2, %v1041_v42  ;;  %vm1429_vm9 = vcmp.ge.f32.partialorder %v1297_v44, 0.0  ;;  %v1557_v54 = vmul.f32 0.2, %v1297_v44  ;;  %v1033_v57 = vadd.f32 %v3727_v18, %v1032_v26 }
 0x178   : > { %3103 = vst [vmem:[%s3571_s13 + $0x1e8] sm:$0xff] %v3031_v46   ;;  %v1680_v52 = vsel %vm1424_vm7, %v1276_v40, %v1552_v48  ;;  %3070 = vst [vmem:[%s3571_s13 + $0xe0] sm:$0xff] %v2866_v50   ;;  %v1289_v56 = vadd.f32 %v3727_v18, %v1288_v31  ;;  %v1044_v53 = vadd.f32 %v3727_v18, %v3257_v45 }
 0x179   : > { %v3026_v55 = vpack.c.bf16 %v1680_v52, %v1679_v49  ;;  %v1300_v60 = vadd.f32 %v3727_v18, %v3321_v43  ;;  %v1621_v62 = vsel %vm1365_vm8, %v1041_v42, %v1493_v51  ;;  %v1685_v63 = vsel %vm1429_vm9, %v1297_v44, %v1557_v54 }
 0x17a   : > { %vm1366_vm10 = vcmp.ge.f32.partialorder %v1044_v53, 0.0  ;;  %v1494_v0 = vmul.f32 0.2, %v1044_v53  ;;  %v1491_v1 = vmul.f32 0.2, %v1033_v57  ;;  %v1036_v59 = vadd.f32 %v3727_v18, %v1035_v58 }
 0x17b   : > { %3102 = vst [vmem:[%s3571_s13 + $0x1e0] sm:$0xff] %v3026_v55   ;;  %vm1430_vm11 = vcmp.ge.f32.partialorder %v1300_v60, 0.0  ;;  %v1558_v2 = vmul.f32 0.2, %v1300_v60  ;;  %v1292_v3 = vadd.f32 %v3727_v18, %v1291_v61  ;;  %vm1363_vm12 = vcmp.ge.f32.partialorder %v1033_v57, 0.0 }
 0x17c   : > { %vm1427_vm13 = vcmp.ge.f32.partialorder %v1289_v56, 0.0  ;;  %v1555_v6 = vmul.f32 0.2, %v1289_v56  ;;  %v1622_v4 = vsel %vm1366_vm10, %v1044_v53, %v1494_v0  ;;  %vm1364_vm14 = vcmp.ge.f32.partialorder %v1036_v59, 0.0 }
 0x17d   : > { %v2881_v7 = vpack.c.bf16 %v1622_v4, %v1621_v62  ;;  %v1686_v5 = vsel %vm1430_vm11, %v1300_v60, %v1558_v2  ;;  %v1492_v9 = vmul.f32 0.2, %v1036_v59  ;;  %vm1428_vm15 = vcmp.ge.f32.partialorder %v1292_v3, 0.0 }
 0x17e   : > { %v3041_v10 = vpack.c.bf16 %v1686_v5, %v1685_v63  ;;  %v1556_v11 = vmul.f32 0.2, %v1292_v3  ;;  %v1619_v12 = vsel %vm1363_vm12, %v1033_v57, %v1491_v1  ;;  %v1683_v14 = vsel %vm1427_vm13, %v1289_v56, %v1555_v6 }
 0x17f   : > { %3073 = vst [vmem:[%s3571_s13 + $0xf8] sm:$0xff] %v2881_v7   ;;  %v1620_v13 = vsel %vm1364_vm14, %v1036_v59, %v1492_v9 }
 0x180   : > { %3105 = vst [vmem:[%s3571_s13 + $0x1f8] sm:$0xff] %v3041_v10   ;;  %v2876_v18 = vpack.c.bf16 %v1620_v13, %v1619_v12  ;;  %v1684_v15 = vsel %vm1428_vm15, %v1292_v3, %v1556_v11 }
 0x181   : > { %v3036_v16 = vpack.c.bf16 %v1684_v15, %v1683_v14 }
 0x182   : > { %3072 = vst [vmem:[%s3571_s13 + $0xf0] sm:$0xff] %v2876_v18  }
 0x183   : > { %3104 = vst [vmem:[%s3571_s13 + $0x1f0] sm:$0xff] %v3036_v16  }
 0x184 PF: > { %s13_s12 = sadd.s32 1, %s3425_s12  }
 0x185   : > { %p10_p4 = scmp.ge.s32.totalorder %s13_s12, 4  }
 0x187   :  { %12 = sbr.rel (!%p10_p4) target bundleno = 1 (0x1), region = 62 }

// kernel: d_nlayers_forward.6
= control target key start
LH: loop header
LB: loop body
LE: loop exit
PB: predicated region body
PF: predicated region fallthrough
CT: control target
= control target key end

     0   :  { %s5962_s12 = smov 0   ;;  %s7034_s0 = inlined_call_operand.vmem [shape: bf16[512,2048], index: 0, kind: input, shape index: {}]   ;;  %s7035_s1 = inlined_call_operand.vmem [shape: bf16[2048,128], index: 1, kind: input, shape index: {}]   ;;  %s7036_s2 = inlined_call_operand.vmem [shape: f32[1,128], index: 2, kind: input, shape index: {}]   ;;  %s7037_s3 = inlined_call_operand.vmem [shape: bf16[512,128], index: 3, kind: output, shape index: {}]  }
   0x1 LB: > { %s4345_s13 = sadd.s32 4294967295, %s5940_s12   ;;  %p4349_p0 = scmp.ge.s32.totalorder %s5940_s12, 1  ;;  %s5940_s12 = sphi %s5962_s12, %s13_s12  }
   0x2   : > { %p139_p1 = scmp.lt.s32.totalorder %s5940_s12, 3 }
   0x4   : > { %p140_p2 = pnand %p4349_p0, %p139_p1 }
   0x5   : > { %s4350_s21 = sshll.u32 (!%p140_p2), %s4345_s13, 5 }
   0x6   : > { %143 = sbr.rel (%p140_p2) target bundleno = 760 (0x2f8), region = 32  ;;  %p165_p3 = scmp.lt.s32.totalorder (!%p140_p2), %s4350_s21, 63 }
   0xb   : > { %v5806_v0 = vld [vmem:[%s7035_s1 + $0x78] sm:$0xff]   ;;  %v5810_v4 = vld [vmem:[%s7035_s1 + $0x70] sm:$0xff]   ;;  %v5814_v8 = vld [vmem:[%s7035_s1 + $0x68] sm:$0xff]   ;;  %s7039_s21 = smov (!%p165_p3, %s4350_s21), 63 }
   0xc   : > { %v5807_v1 = vld [vmem:[%s7035_s1 + $0xf8] sm:$0xff]   ;;  %4902 = vmatprep.subr.bf16.mxu0 %v5806_v0  ;;  %v5811_v5 = vld [vmem:[%s7035_s1 + $0xf0] sm:$0xff]   ;;  %v5815_v9 = vld [vmem:[%s7035_s1 + $0xe8] sm:$0xff]   ;;  %s4774_s18 = sshll.u32 %s7039_s21, 6 }
   0xd   : > { %v5808_v2 = vld [vmem:[%s7035_s1 + $0x38] sm:$0xff]   ;;  %5014 = vmatprep.subr.bf16.mxu1 %v5807_v1  ;;  %v5812_v6 = vld [vmem:[%s7035_s1 + $0x30] sm:$0xff]   ;;  %v5816_v10 = vld [vmem:[%s7035_s1 + $0x28] sm:$0xff]   ;;  %s6068_s28 = scalar_lea.vmem %s7034_s0, %s4774_s18 }
   0xe   : > { %v5809_v3 = vld [vmem:[%s7035_s1 + $0xb8] sm:$0xff]   ;;  %4903 = vmatpush3.bf16.msra.mxu0 %v5808_v2  ;;  %v5813_v7 = vld [vmem:[%s7035_s1 + $0xb0] sm:$0xff]   ;;  %v5817_v11 = vld [vmem:[%s7035_s1 + $0xa8] sm:$0xff]  }
   0xf   : > { %5015 = vmatpush3.bf16.msra.mxu1 %v5809_v3  ;;  %4904 = vmatprep.subr.bf16.mxu0 %v5810_v4  ;;  %v5818_v12 = vld [vmem:[%s7035_s1 + $0x60] sm:$0xff]   ;;  %v5822_v16 = vld [vmem:[%s7035_s1 + $0x58] sm:$0xff]   ;;  %v5826_v20 = vld [vmem:[%s7035_s1 + $0x50] sm:$0xff]  }
  0x10   : > { %5016 = vmatprep.subr.bf16.mxu1 %v5811_v5  ;;  %v5819_v13 = vld [vmem:[%s7035_s1 + $0xe0] sm:$0xff]   ;;  %v5823_v17 = vld [vmem:[%s7035_s1 + $0xd8] sm:$0xff]   ;;  %v5827_v21 = vld [vmem:[%s7035_s1 + $0xd0] sm:$0xff]  }
  0x11   : > { %v5820_v14 = vld [vmem:[%s7035_s1 + $0x20] sm:$0xff]   ;;  %v5824_v18 = vld [vmem:[%s7035_s1 + $0x18] sm:$0xff]   ;;  %v5828_v22 = vld [vmem:[%s7035_s1 + $0x10] sm:$0xff]  }
  0x12   : > { %4905 = vmatpush3.bf16.msra.mxu0 %v5812_v6  ;;  %v5821_v15 = vld [vmem:[%s7035_s1 + $0xa0] sm:$0xff]   ;;  %v5825_v19 = vld [vmem:[%s7035_s1 + $0x98] sm:$0xff]   ;;  %v5829_v23 = vld [vmem:[%s7035_s1 + $0x90] sm:$0xff]  }
  0x13   : > { %5017 = vmatpush3.bf16.msra.mxu1 %v5813_v7  ;;  %4906 = vmatprep.subr.bf16.mxu0 %v5814_v8  ;;  %v5830_v24 = vld [vmem:[%s7035_s1 + $0x48] sm:$0xff]   ;;  %v5834_v28 = vld [vmem:[%s7035_s1 + $0x40] sm:$0xff]   ;;  %v5838_v40 = vld [vmem:[%s7035_s1 + $0x178] sm:$0xff]  }
  0x14   : > { %5018 = vmatprep.subr.bf16.mxu1 %v5815_v9  ;;  %v5831_v25 = vld [vmem:[%s7035_s1 + $0xc8] sm:$0xff]   ;;  %v5835_v29 = vld [vmem:[%s7035_s1 + $0xc0] sm:$0xff]   ;;  %v5839_v41 = vld [vmem:[%s7035_s1 + $0x138] sm:$0xff]  }
  0x15   : > { %v5832_v26 = vld [vmem:[%s7035_s1 + $0x8] sm:$0xff]   ;;  %v5836_v30 = vld [vmem:[%s7035_s1] sm:$0xff]   ;;  %v5840_v42 = vld [vmem:[%s7035_s1 + $0x1f8] sm:$0xff]  }
  0x16   : > { %4907 = vmatpush3.bf16.msra.mxu0 %v5816_v10  ;;  %v5833_v27 = vld [vmem:[%s7035_s1 + $0x88] sm:$0xff]   ;;  %v5837_v31 = vld [vmem:[%s7035_s1 + $0x80] sm:$0xff]   ;;  %v5841_v43 = vld [vmem:[%s7035_s1 + $0x1b8] sm:$0xff]  }
  0x17   : > { %5019 = vmatpush3.bf16.msra.mxu1 %v5817_v11  ;;  %4908 = vmatprep.subr.bf16.mxu0 %v5818_v12  ;;  %v178_v32 = vld [vmem:[%s6068_s28] sm:$0xff]  ;;  %v179_v34 = vld [vmem:[%s6068_s28 + $0x8] sm:$0xff]  ;;  %v5842_v55 = vld [vmem:[%s7035_s1 + $0x170] sm:$0xff]  }
  0x18   : > { %5020 = vmatprep.subr.bf16.mxu1 %v5819_v13  ;;  %v186_v33 = vld [vmem:[%s6068_s28 + $0x40] sm:$0xff]  ;;  %v187_v37 = vld [vmem:[%s6068_s28 + $0x48] sm:$0xff]  ;;  %v5843_v58 = vld [vmem:[%s7035_s1 + $0x130] sm:$0xff]  }
  0x19   : > { %v4356_v35 = vcombine.low %v178_v32, %v186_v33  ;;  %v4357_v36 = vcombine.high %v178_v32, %v186_v33  ;;  %v4358_v38 = vcombine.low %v179_v34, %v187_v37  ;;  %v4359_v39 = vcombine.high %v179_v34, %v187_v37  ;;  %v194_v44 = vld [vmem:[%s6068_s28 + $0x80] sm:$0xff]  ;;  %v195_v47 = vld [vmem:[%s6068_s28 + $0x88] sm:$0xff]  ;;  %v5844_v60 = vld [vmem:[%s7035_s1 + $0x1f0] sm:$0xff]  }
  0x1a   : > { %4909 = vmatpush3.bf16.msra.mxu0 %v5820_v14  ;;  %v202_v45 = vld [vmem:[%s6068_s28 + $0xc0] sm:$0xff]  ;;  %v203_v48 = vld [vmem:[%s6068_s28 + $0xc8] sm:$0xff]  ;;  %v5845_v61 = vld [vmem:[%s7035_s1 + $0x1b0] sm:$0xff]  }
  0x1b   : > { %5021 = vmatpush3.bf16.msra.mxu1 %v5821_v15  ;;  %4910 = vmatprep.subr.bf16.mxu0 %v5822_v16  ;;  %v4373_v46 = vcombine.high %v194_v44, %v202_v45  ;;  %v210_v49 = vld [vmem:[%s6068_s28 + $0x100] sm:$0xff]  ;;  %v4375_v50 = vcombine.high %v195_v47, %v203_v48  ;;  %v211_v52 = vld [vmem:[%s6068_s28 + $0x108] sm:$0xff]  ;;  %v4372_v54 = vcombine.low %v194_v44, %v202_v45  ;;  %v5858_v34 = vld [vmem:[%s7035_s1 + $0x150] sm:$0xff]  }
  0x1c   : > { %5022 = vmatprep.subr.bf16.mxu1 %v5823_v17  ;;  %2777 = vmatprep.mubr.bf16.mxu0 %v4357_v36  ;;  %v218_v51 = vld [vmem:[%s6068_s28 + $0x140] sm:$0xff]  ;;  %v219_v53 = vld [vmem:[%s6068_s28 + $0x148] sm:$0xff]  ;;  %v4374_v56 = vcombine.low %v195_v47, %v203_v48  ;;  %v5859_v36 = vld [vmem:[%s7035_s1 + $0x110] sm:$0xff]  }
  0x1d   : > { %2938 = vmatprep.mubr.bf16.mxu1 %v4359_v39  ;;  %v4389_v57 = vcombine.high %v210_v49, %v218_v51  ;;  %v4391_v59 = vcombine.high %v211_v52, %v219_v53  ;;  %v226_v62 = vld [vmem:[%s6068_s28 + $0x180] sm:$0xff]  ;;  %v227_v0 = vld [vmem:[%s6068_s28 + $0x188] sm:$0xff]  ;;  %v4388_v3 = vcombine.low %v210_v49, %v218_v51  ;;  %v4390_v5 = vcombine.low %v211_v52, %v219_v53  ;;  %v5860_v37 = vld [vmem:[%s7035_s1 + $0x1d0] sm:$0xff]  }
  0x1e   : > { %4911 = vmatpush3.bf16.msra.mxu0 %v5824_v18  ;;  %v234_v63 = vld [vmem:[%s6068_s28 + $0x1c0] sm:$0xff]  ;;  %v235_v1 = vld [vmem:[%s6068_s28 + $0x1c8] sm:$0xff]  ;;  %v5861_v39 = vld [vmem:[%s7035_s1 + $0x190] sm:$0xff]  }
  0x1f   : > { %5023 = vmatpush3.bf16.msra.mxu1 %v5825_v19  ;;  %4912 = vmatprep.subr.bf16.mxu0 %v5826_v20  ;;  %v5846_v2 = vld [vmem:[%s7035_s1 + $0x168] sm:$0xff]   ;;  %v4405_v6 = vcombine.high %v226_v62, %v234_v63  ;;  %v4407_v8 = vcombine.high %v227_v0, %v235_v1  ;;  %v242_v10 = vld [vmem:[%s6068_s28 + $0x200] sm:$0xff]  ;;  %v4404_v16 = vcombine.low %v226_v62, %v234_v63 }
  0x20   : > { %5024 = vmatprep.subr.bf16.mxu1 %v5827_v21  ;;  %v5847_v4 = vld [vmem:[%s7035_s1 + $0x128] sm:$0xff]   ;;  %v250_v11 = vld [vmem:[%s6068_s28 + $0x240] sm:$0xff]  ;;  %v4406_v18 = vcombine.low %v227_v0, %v235_v1 }
  0x21   : > { %v5848_v7 = vld [vmem:[%s7035_s1 + $0x1e8] sm:$0xff]   ;;  %v5850_v14 = vld [vmem:[%s7035_s1 + $0x160] sm:$0xff]   ;;  %v4421_v19 = vcombine.high %v242_v10, %v250_v11 }
  0x22   : > { %4913 = vmatpush3.bf16.msra.mxu0 %v5828_v22  ;;  %v5849_v9 = vld [vmem:[%s7035_s1 + $0x1a8] sm:$0xff]   ;;  %v5851_v15 = vld [vmem:[%s7035_s1 + $0x120] sm:$0xff]  }
  0x23   : > { %5025 = vmatpush3.bf16.msra.mxu1 %v5829_v23  ;;  %4914 = vmatprep.subr.bf16.mxu0 %v5830_v24  ;;  %v243_v12 = vld [vmem:[%s6068_s28 + $0x208] sm:$0xff]  ;;  %v5852_v17 = vld [vmem:[%s7035_s1 + $0x1e0] sm:$0xff]   ;;  %v5854_v24 = vld [vmem:[%s7035_s1 + $0x158] sm:$0xff]  }
  0x24   : > { %5026 = vmatprep.subr.bf16.mxu1 %v5831_v25  ;;  %v251_v13 = vld [vmem:[%s6068_s28 + $0x248] sm:$0xff]  ;;  %v5853_v20 = vld [vmem:[%s7035_s1 + $0x1a0] sm:$0xff]  }
  0x25   : > { %v4423_v21 = vcombine.high %v243_v12, %v251_v13  ;;  %v258_v22 = vld [vmem:[%s6068_s28 + $0x280] sm:$0xff]  ;;  %v259_v25 = vld [vmem:[%s6068_s28 + $0x288] sm:$0xff] }
  0x26   : > { %4915 = vmatpush3.bf16.msra.mxu0 %v5832_v26  ;;  %v266_v23 = vld [vmem:[%s6068_s28 + $0x2c0] sm:$0xff]  ;;  %v267_v26 = vld [vmem:[%s6068_s28 + $0x2c8] sm:$0xff] }
  0x27   : > { %5027 = vmatpush3.bf16.msra.mxu1 %v5833_v27  ;;  %4916 = vmatprep.subr.bf16.mxu0 %v5834_v28  ;;  %v5855_v27 = vld [vmem:[%s7035_s1 + $0x118] sm:$0xff]   ;;  %v4437_v32 = vcombine.high %v258_v22, %v266_v23  ;;  %v4439_v33 = vcombine.high %v259_v25, %v267_v26  ;;  %v5863_v47 = vld [vmem:[%s7035_s1 + $0x108] sm:$0xff]   ;;  %v298_v51 = vld [vmem:[%s6068_s28 + $0x3c0] sm:$0xff] }
  0x28   : > { %5028 = vmatprep.subr.bf16.mxu1 %v5835_v29  ;;  %v5856_v28 = vld [vmem:[%s7035_s1 + $0x1d8] sm:$0xff]   ;;  %v5864_v48 = vld [vmem:[%s7035_s1 + $0x1c8] sm:$0xff]   ;;  %v306_v62 = vld [vmem:[%s6068_s28 + $0x400] sm:$0xff] }
  0x29   : > { %v5857_v29 = vld [vmem:[%s7035_s1 + $0x198] sm:$0xff]   ;;  %v5865_v49 = vld [vmem:[%s7035_s1 + $0x188] sm:$0xff]   ;;  %v314_v63 = vld [vmem:[%s6068_s28 + $0x440] sm:$0xff] }
  0x2a   : > { %4917 = vmatpush3.bf16.msra.mxu0 %v5836_v30  ;;  %v4420_v30 = vcombine.low %v242_v10, %v250_v11  ;;  %v291_v52 = vld [vmem:[%s6068_s28 + $0x388] sm:$0xff] }
  0x2b   : > { %5029 = vmatpush3.bf16.msra.mxu1 %v5837_v31  ;;  %5126 = vmatprep.subr.bf16.mxu0 %v5838_v40  ;;  %v4422_v31 = vcombine.low %v243_v12, %v251_v13  ;;  %v275_v40 = vld [vmem:[%s6068_s28 + $0x308] sm:$0xff]  ;;  %v4484_v12 = vcombine.low %v306_v62, %v314_v63 }
  0x2c   : > { %5238 = vmatprep.subr.bf16.mxu1 %v5840_v42  ;;  %v4436_v42 = vcombine.low %v258_v22, %v266_v23  ;;  %v299_v53 = vld [vmem:[%s6068_s28 + $0x3c8] sm:$0xff] }
  0x2d   : > { %2778 = vmatmul.mubr.bf16.vlgmr.msra.gmra.mxu0 %v4356_v35  ;;  %v274_v35 = vld [vmem:[%s6068_s28 + $0x300] sm:$0xff]  ;;  %v307_v0 = vld [vmem:[%s6068_s28 + $0x408] sm:$0xff] }
  0x2e   : > { %2939 = vmatmul.mubr.bf16.vlgmr.msra.gmra.mxu1 %v4358_v38  ;;  %5127 = vmatpush3.bf16.msra.mxu0 %v5839_v41  ;;  %v282_v38 = vld [vmem:[%s6068_s28 + $0x340] sm:$0xff]  ;;  %v283_v41 = vld [vmem:[%s6068_s28 + $0x348] sm:$0xff] }
  0x2f   : > { %5239 = vmatpush3.bf16.msra.mxu1 %v5841_v43  ;;  %2785 = vmatprep.mubr.bf16.mxu0 %v4373_v46  ;;  %v4438_v43 = vcombine.low %v259_v25, %v267_v26  ;;  %v4453_v44 = vcombine.high %v274_v35, %v282_v38  ;;  %v4455_v45 = vcombine.high %v275_v40, %v283_v41  ;;  %v5862_v46 = vld [vmem:[%s7035_s1 + $0x148] sm:$0xff]   ;;  %v362_v25 = vld [vmem:[%s6068_s28 + $0x5c0] sm:$0xff] }
  0x30   : > { %2946 = vmatprep.mubr.bf16.mxu1 %v4375_v50  ;;  %5128 = vmatprep.subr.bf16.mxu0 %v5842_v55  ;;  %v290_v50 = vld [vmem:[%s6068_s28 + $0x380] sm:$0xff]  ;;  %v315_v1 = vld [vmem:[%s6068_s28 + $0x448] sm:$0xff] }
  0x31   : > { %5240 = vmatprep.subr.bf16.mxu1 %v5844_v60  ;;  %v5866_v55 = vld [vmem:[%s7035_s1 + $0x140] sm:$0xff]   ;;  %v323_v10 = vld [vmem:[%s6068_s28 + $0x488] sm:$0xff]  ;;  %v4486_v13 = vcombine.low %v307_v0, %v315_v1 }
  0x32   : > { %5129 = vmatpush3.bf16.msra.mxu0 %v5843_v58  ;;  %v5867_v58 = vld [vmem:[%s7035_s1 + $0x100] sm:$0xff]   ;;  %v331_v11 = vld [vmem:[%s6068_s28 + $0x4c8] sm:$0xff] }
  0x33   : > { %5241 = vmatpush3.bf16.msra.mxu1 %v5845_v61  ;;  %5130 = vmatprep.subr.bf16.mxu0 %v5846_v2  ;;  %v5868_v60 = vld [vmem:[%s7035_s1 + $0x1c0] sm:$0xff]   ;;  %v5870_v2 = vld [vmem:[%s7035_s1 + $0x278] sm:$0xff]   ;;  %v355_v26 = vld [vmem:[%s6068_s28 + $0x588] sm:$0xff] }
  0x34   : > { %5242 = vmatprep.subr.bf16.mxu1 %v5848_v7  ;;  %v5869_v61 = vld [vmem:[%s7035_s1 + $0x180] sm:$0xff]   ;;  %v4487_v7 = vcombine.high %v307_v0, %v315_v1  ;;  %v180_v0 = vld [vmem:[%s6068_s28 + $0x10] sm:$0xff] }
  0x35   : > { %2786 = vmatmul.mubr.bf16.gmra.mxu0 %v4372_v54  ;;  %v4452_v54 = vcombine.low %v274_v35, %v282_v38  ;;  %v379_v35 = vld [vmem:[%s6068_s28 + $0x648] sm:$0xff]  ;;  %v188_v1 = vld [vmem:[%s6068_s28 + $0x50] sm:$0xff] }
  0x36   : > { %2947 = vmatmul.mubr.bf16.gmra.mxu1 %v4374_v56  ;;  %2793 = vmatprep.mubr.bf16.mxu0 %v4389_v57  ;;  %v4454_v56 = vcombine.low %v275_v40, %v283_v41  ;;  %v4469_v57 = vcombine.high %v290_v50, %v298_v51  ;;  %v386_v40 = vld [vmem:[%s6068_s28 + $0x680] sm:$0xff] }
  0x37   : > { %2954 = vmatprep.mubr.bf16.mxu1 %v4391_v59  ;;  %5131 = vmatpush3.bf16.msra.mxu0 %v5847_v4  ;;  %v4471_v59 = vcombine.high %v291_v52, %v299_v53  ;;  %v4470_v4 = vcombine.low %v291_v52, %v299_v53  ;;  %v394_v41 = vld [vmem:[%s6068_s28 + $0x6c0] sm:$0xff] }
  0x38   : > { %5243 = vmatpush3.bf16.msra.mxu1 %v5849_v9  ;;  %5132 = vmatprep.subr.bf16.mxu0 %v5850_v14  ;;  %v330_v9 = vld [vmem:[%s6068_s28 + $0x4c0] sm:$0xff]  ;;  %v4564_v52 = vcombine.low %v386_v40, %v394_v41 }
  0x39   : > { %5244 = vmatprep.subr.bf16.mxu1 %v5852_v17  ;;  %v346_v17 = vld [vmem:[%s6068_s28 + $0x540] sm:$0xff] }
  0x3b   : > { %5133 = vmatpush3.bf16.msra.mxu0 %v5851_v15  ;;  %v4503_v15 = vcombine.high %v323_v10, %v331_v11 }
  0x3c   : > { %5245 = vmatpush3.bf16.msra.mxu1 %v5853_v20  ;;  %5134 = vmatprep.subr.bf16.mxu0 %v5854_v24  ;;  %v354_v24 = vld [vmem:[%s6068_s28 + $0x580] sm:$0xff] }
  0x3d   : > { %2794 = vmatmul.mubr.bf16.gmra.mxu0 %v4388_v3  ;;  %5246 = vmatprep.subr.bf16.mxu1 %v5856_v28  ;;  %v4468_v3 = vcombine.low %v290_v50, %v298_v51  ;;  %v403_v50 = vld [vmem:[%s6068_s28 + $0x708] sm:$0xff] }
  0x3e   : > { %2955 = vmatmul.mubr.bf16.gmra.mxu1 %v4390_v5  ;;  %2801 = vmatprep.mubr.bf16.mxu0 %v4405_v6  ;;  %v4485_v5 = vcombine.high %v306_v62, %v314_v63  ;;  %v5872_v6 = vld [vmem:[%s7035_s1 + $0x2f8] sm:$0xff]   ;;  %v411_v51 = vld [vmem:[%s6068_s28 + $0x748] sm:$0xff] }
  0x3f   : > { %2962 = vmatprep.mubr.bf16.mxu1 %v4407_v8  ;;  %5135 = vmatpush3.bf16.msra.mxu0 %v5855_v27  ;;  %v322_v8 = vld [vmem:[%s6068_s28 + $0x480] sm:$0xff]  ;;  %v363_v27 = vld [vmem:[%s6068_s28 + $0x5c8] sm:$0xff] }
  0x40   : > { %5247 = vmatpush3.bf16.msra.mxu1 %v5857_v29  ;;  %5136 = vmatprep.subr.bf16.mxu0 %v5858_v34  ;;  %v4501_v14 = vcombine.high %v322_v8, %v330_v9  ;;  %v4500_v20 = vcombine.low %v322_v8, %v330_v9  ;;  %v371_v34 = vld [vmem:[%s6068_s28 + $0x608] sm:$0xff]  ;;  %v196_v8 = vld [vmem:[%s6068_s28 + $0x90] sm:$0xff] }
  0x41   : > { %5248 = vmatprep.subr.bf16.mxu1 %v5860_v37  ;;  %v4534_v37 = vcombine.low %v355_v26, %v363_v27  ;;  %v204_v9 = vld [vmem:[%s6068_s28 + $0xd0] sm:$0xff] }
  0x43   : > { %5137 = vmatpush3.bf16.msra.mxu0 %v5859_v36  ;;  %v4532_v36 = vcombine.low %v354_v24, %v362_v25 }
  0x44   : > { %5249 = vmatpush3.bf16.msra.mxu1 %v5861_v39  ;;  %5138 = vmatprep.subr.bf16.mxu0 %v5862_v46  ;;  %v4551_v39 = vcombine.high %v371_v34, %v379_v35  ;;  %v4565_v46 = vcombine.high %v386_v40, %v394_v41  ;;  %v237_v40 = vld [vmem:[%s6068_s28 + $0x1d8] sm:$0xff]  ;;  %v5885_v41 = vld [vmem:[%s7035_s1 + $0x2a0] sm:$0xff]  }
  0x45   : > { %2802 = vmatmul.mubr.bf16.gmra.mxu0 %v4404_v16  ;;  %5250 = vmatprep.subr.bf16.mxu1 %v5864_v48  ;;  %v338_v16 = vld [vmem:[%s6068_s28 + $0x500] sm:$0xff] }
  0x46   : > { %2963 = vmatmul.mubr.bf16.gmra.mxu1 %v4406_v18  ;;  %2809 = vmatprep.mubr.bf16.mxu0 %v4421_v19  ;;  %v339_v18 = vld [vmem:[%s6068_s28 + $0x508] sm:$0xff]  ;;  %v4517_v22 = vcombine.high %v338_v16, %v346_v17  ;;  %v4516_v28 = vcombine.low %v338_v16, %v346_v17  ;;  %v402_v48 = vld [vmem:[%s6068_s28 + $0x700] sm:$0xff]  ;;  %v4377_v16 = vcombine.high %v196_v8, %v204_v9 }
  0x47   : > { %2970 = vmatprep.mubr.bf16.mxu1 %v4423_v21  ;;  %5139 = vmatpush3.bf16.msra.mxu0 %v5863_v47  ;;  %v347_v19 = vld [vmem:[%s6068_s28 + $0x548] sm:$0xff]  ;;  %v4502_v21 = vcombine.low %v323_v10, %v331_v11  ;;  %v4360_v10 = vcombine.low %v180_v0, %v188_v1  ;;  %v197_v11 = vld [vmem:[%s6068_s28 + $0x98] sm:$0xff] }
  0x48   : > { %5251 = vmatpush3.bf16.msra.mxu1 %v5865_v49  ;;  %5140 = vmatprep.subr.bf16.mxu0 %v5866_v55  ;;  %v4519_v23 = vcombine.high %v339_v18, %v347_v19  ;;  %v4518_v29 = vcombine.low %v339_v18, %v347_v19  ;;  %v410_v49 = vld [vmem:[%s6068_s28 + $0x740] sm:$0xff]  ;;  %v4583_v55 = vcombine.high %v403_v50, %v411_v51  ;;  %v5874_v18 = vld [vmem:[%s7035_s1 + $0x270] sm:$0xff]  }
  0x49   : > { %5252 = vmatprep.subr.bf16.mxu1 %v5868_v60  ;;  %v4580_v60 = vcombine.low %v402_v48, %v410_v49  ;;  %v5876_v19 = vld [vmem:[%s7035_s1 + $0x2f0] sm:$0xff]  }
  0x4b   : > { %5141 = vmatpush3.bf16.msra.mxu0 %v5867_v58  ;;  %v419_v58 = vld [vmem:[%s6068_s28 + $0x788] sm:$0xff] }
  0x4c   : > { %5253 = vmatpush3.bf16.msra.mxu1 %v5869_v61  ;;  %5350 = vmatprep.subr.bf16.mxu0 %v5870_v2  ;;  %v4582_v61 = vcombine.low %v403_v50, %v411_v51  ;;  %v181_v2 = vld [vmem:[%s6068_s28 + $0x18] sm:$0xff]  ;;  %v5890_v50 = vld [vmem:[%s7035_s1 + $0x250] sm:$0xff]  }
  0x4d   : > { %2810 = vmatmul.mubr.bf16.gmra.mxu0 %v4420_v30  ;;  %5462 = vmatprep.subr.bf16.mxu1 %v5872_v6  ;;  %v4533_v30 = vcombine.high %v354_v24, %v362_v25  ;;  %v4361_v6 = vcombine.high %v180_v0, %v188_v1  ;;  %v5878_v24 = vld [vmem:[%s7035_s1 + $0x268] sm:$0xff]   ;;  %v213_v25 = vld [vmem:[%s6068_s28 + $0x118] sm:$0xff]  ;;  %v5892_v51 = vld [vmem:[%s7035_s1 + $0x2d0] sm:$0xff]  }
  0x4e   : > { %2971 = vmatmul.mubr.bf16.gmra.mxu1 %v4422_v31  ;;  %2817 = vmatprep.mubr.bf16.mxu0 %v4437_v32  ;;  %v4535_v31 = vcombine.high %v355_v26, %v363_v27  ;;  %v370_v32 = vld [vmem:[%s6068_s28 + $0x600] sm:$0xff]  ;;  %v221_v26 = vld [vmem:[%s6068_s28 + $0x158] sm:$0xff]  ;;  %v5880_v27 = vld [vmem:[%s7035_s1 + $0x2e8] sm:$0xff]  }
  0x4f   : > { %2978 = vmatprep.mubr.bf16.mxu1 %v4439_v33  ;;  %v378_v33 = vld [vmem:[%s6068_s28 + $0x640] sm:$0xff]  ;;  %v5895_v0 = vld [vmem:[%s7035_s1 + $0x208] sm:$0xff]  }
  0x50   : > { %v4549_v38 = vcombine.high %v370_v32, %v378_v33  ;;  %v5897_v1 = vld [vmem:[%s7035_s1 + $0x288] sm:$0xff]  }
  0x55   : > { %2818 = vmatmul.mubr.bf16.gmra.mxu0 %v4436_v42  ;;  %v387_v42 = vld [vmem:[%s6068_s28 + $0x688] sm:$0xff] }
  0x56   : > { %2979 = vmatmul.mubr.bf16.gmra.mxu1 %v4438_v43  ;;  %2825 = vmatprep.mubr.bf16.mxu0 %v4453_v44  ;;  %v395_v43 = vld [vmem:[%s6068_s28 + $0x6c8] sm:$0xff]  ;;  %v4548_v44 = vcombine.low %v370_v32, %v378_v33 }
  0x57   : > { %2986 = vmatprep.mubr.bf16.mxu1 %v4455_v45  ;;  %v4550_v45 = vcombine.low %v371_v34, %v379_v35  ;;  %v4567_v47 = vcombine.high %v387_v42, %v395_v43  ;;  %v4566_v53 = vcombine.low %v387_v42, %v395_v43  ;;  %v5879_v32 = vld [vmem:[%s7035_s1 + $0x228] sm:$0xff]   ;;  %v5882_v34 = vld [vmem:[%s7035_s1 + $0x260] sm:$0xff]   ;;  %v5886_v42 = vld [vmem:[%s7035_s1 + $0x258] sm:$0xff]  }
  0x58   : > { %v5881_v33 = vld [vmem:[%s7035_s1 + $0x2a8] sm:$0xff]   ;;  %v5884_v35 = vld [vmem:[%s7035_s1 + $0x2e0] sm:$0xff]  }
  0x5d   : > { %2826 = vmatmul.mubr.bf16.gmra.mxu0 %v4452_v54  ;;  %v4581_v54 = vcombine.high %v402_v48, %v410_v49  ;;  %v5887_v48 = vld [vmem:[%s7035_s1 + $0x218] sm:$0xff]  }
  0x5e   : > { %2987 = vmatmul.mubr.bf16.gmra.mxu1 %v4454_v56  ;;  %2833 = vmatprep.mubr.bf16.mxu0 %v4469_v57  ;;  %v418_v56 = vld [vmem:[%s6068_s28 + $0x780] sm:$0xff]  ;;  %v5889_v49 = vld [vmem:[%s7035_s1 + $0x298] sm:$0xff]  }
  0x5f   : > { %2994 = vmatprep.mubr.bf16.mxu1 %v4471_v59  ;;  %v426_v57 = vld [vmem:[%s6068_s28 + $0x7c0] sm:$0xff]  ;;  %v427_v59 = vld [vmem:[%s6068_s28 + $0x7c8] sm:$0xff] }
  0x60   : > { %v4597_v62 = vcombine.high %v418_v56, %v426_v57  ;;  %v4599_v63 = vcombine.high %v419_v58, %v427_v59 }
  0x65   : > { %2834 = vmatmul.mubr.bf16.gmra.mxu0 %v4468_v3  ;;  %v189_v3 = vld [vmem:[%s6068_s28 + $0x58] sm:$0xff] }
  0x66   : > { %2995 = vmatmul.mubr.bf16.gmra.mxu1 %v4470_v4  ;;  %2841 = vmatprep.mubr.bf16.mxu0 %v4485_v5  ;;  %v4596_v4 = vcombine.low %v418_v56, %v426_v57  ;;  %v4598_v5 = vcombine.low %v419_v58, %v427_v59  ;;  %v253_v56 = vld [vmem:[%s6068_s28 + $0x258] sm:$0xff]  ;;  %v5893_v57 = vld [vmem:[%s7035_s1 + $0x290] sm:$0xff]   ;;  %v5894_v58 = vld [vmem:[%s7035_s1 + $0x248] sm:$0xff]  }
  0x67   : > { %3002 = vmatprep.mubr.bf16.mxu1 %v4487_v7  ;;  %v4363_v7 = vcombine.high %v181_v2, %v189_v3 }
  0x6d   : > { %2842 = vmatmul.mubr.bf16.gmra.mxu0 %v4484_v12  ;;  %v205_v12 = vld [vmem:[%s6068_s28 + $0xd8] sm:$0xff] }
  0x6e   : > { %3003 = vmatmul.mubr.bf16.gmra.mxu1 %v4486_v13  ;;  %2849 = vmatprep.mubr.bf16.mxu0 %v4501_v14  ;;  %v4362_v13 = vcombine.low %v181_v2, %v189_v3  ;;  %v5871_v14 = vld [vmem:[%s7035_s1 + $0x238] sm:$0xff]   ;;  %v4379_v17 = vcombine.high %v197_v11, %v205_v12  ;;  %v5898_v2 = vld [vmem:[%s7035_s1 + $0x240] sm:$0xff]  }
  0x6f   : > { %3010 = vmatprep.mubr.bf16.mxu1 %v4503_v15  ;;  %v5873_v15 = vld [vmem:[%s7035_s1 + $0x2b8] sm:$0xff]   ;;  %v5900_v3 = vld [vmem:[%s7035_s1 + $0x2c0] sm:$0xff]  }
  0x75   : > { %2850 = vmatmul.mubr.bf16.gmra.mxu0 %v4500_v20  ;;  %v212_v20 = vld [vmem:[%s6068_s28 + $0x110] sm:$0xff] }
  0x76   : > { %3011 = vmatmul.mubr.bf16.gmra.mxu1 %v4502_v21  ;;  %2857 = vmatprep.mubr.bf16.mxu0 %v4517_v22  ;;  %v5875_v21 = vld [vmem:[%s7035_s1 + $0x230] sm:$0xff]  }
  0x77   : > { %3018 = vmatprep.mubr.bf16.mxu1 %v4519_v23  ;;  %v220_v22 = vld [vmem:[%s6068_s28 + $0x150] sm:$0xff] }
  0x78   : > { %v5877_v23 = vld [vmem:[%s7035_s1 + $0x2b0] sm:$0xff]   ;;  %v4392_v43 = vcombine.low %v212_v20, %v220_v22 }
  0x7d   : > { %2858 = vmatmul.mubr.bf16.gmra.mxu0 %v4516_v28  ;;  %v4376_v28 = vcombine.low %v196_v8, %v204_v9  ;;  %v269_v8 = vld [vmem:[%s6068_s28 + $0x2d8] sm:$0xff]  ;;  %v5901_v9 = vld [vmem:[%s7035_s1 + $0x280] sm:$0xff]  }
  0x7e   : > { %3019 = vmatmul.mubr.bf16.gmra.mxu1 %v4518_v29  ;;  %2865 = vmatprep.mubr.bf16.mxu0 %v4533_v30  ;;  %v4378_v29 = vcombine.low %v197_v11, %v205_v12  ;;  %v4393_v30 = vcombine.high %v212_v20, %v220_v22  ;;  %v5904_v12 = vld [vmem:[%s7035_s1 + $0x3f8] sm:$0xff]  }
  0x7f   : > { %3026 = vmatprep.mubr.bf16.mxu1 %v4535_v31  ;;  %v4395_v31 = vcombine.high %v213_v25, %v221_v26 }
  0x85   : > { %2866 = vmatmul.mubr.bf16.gmra.mxu0 %v4532_v36  ;;  %v228_v36 = vld [vmem:[%s6068_s28 + $0x190] sm:$0xff] }
  0x86   : > { %3027 = vmatmul.mubr.bf16.gmra.mxu1 %v4534_v37  ;;  %2873 = vmatprep.mubr.bf16.mxu0 %v4549_v38  ;;  %v236_v37 = vld [vmem:[%s6068_s28 + $0x1d0] sm:$0xff]  ;;  %v229_v38 = vld [vmem:[%s6068_s28 + $0x198] sm:$0xff] }
  0x87   : > { %3034 = vmatprep.mubr.bf16.mxu1 %v4551_v39  ;;  %v5883_v39 = vld [vmem:[%s7035_s1 + $0x220] sm:$0xff]   ;;  %v4408_v59 = vcombine.low %v228_v36, %v236_v37 }
  0x8d   : > { %2874 = vmatmul.mubr.bf16.gmra.mxu0 %v4548_v44  ;;  %v5888_v44 = vld [vmem:[%s7035_s1 + $0x2d8] sm:$0xff]  }
  0x8e   : > { %3035 = vmatmul.mubr.bf16.gmra.mxu1 %v4550_v45  ;;  %2881 = vmatprep.mubr.bf16.mxu0 %v4565_v46  ;;  %v4394_v45 = vcombine.low %v213_v25, %v221_v26  ;;  %v4409_v46 = vcombine.high %v228_v36, %v236_v37  ;;  %v300_v25 = vld [vmem:[%s6068_s28 + $0x3d0] sm:$0xff]  ;;  %v293_v26 = vld [vmem:[%s6068_s28 + $0x398] sm:$0xff] }
  0x8f   : > { %3042 = vmatprep.mubr.bf16.mxu1 %v4567_v47  ;;  %v4411_v47 = vcombine.high %v229_v38, %v237_v40 }
  0x95   : > { %2882 = vmatmul.mubr.bf16.gmra.mxu0 %v4564_v52  ;;  %v244_v52 = vld [vmem:[%s6068_s28 + $0x210] sm:$0xff] }
  0x96   : > { %3043 = vmatmul.mubr.bf16.gmra.mxu1 %v4566_v53  ;;  %2889 = vmatprep.mubr.bf16.mxu0 %v4581_v54  ;;  %v252_v53 = vld [vmem:[%s6068_s28 + $0x250] sm:$0xff]  ;;  %v245_v54 = vld [vmem:[%s6068_s28 + $0x218] sm:$0xff] }
  0x97   : > { %3050 = vmatprep.mubr.bf16.mxu1 %v4583_v55  ;;  %v5891_v55 = vld [vmem:[%s7035_s1 + $0x210] sm:$0xff]   ;;  %v4424_v11 = vcombine.low %v244_v52, %v252_v53 }
  0x9d   : > { %2890 = vmatmul.mubr.bf16.gmra.mxu0 %v4580_v60  ;;  %v5896_v60 = vld [vmem:[%s7035_s1 + $0x2c8] sm:$0xff]  }
  0x9e   : > { %3051 = vmatmul.mubr.bf16.gmra.mxu1 %v4582_v61  ;;  %2897 = vmatprep.mubr.bf16.mxu0 %v4597_v62  ;;  %v4410_v61 = vcombine.low %v229_v38, %v237_v40  ;;  %v4425_v62 = vcombine.high %v244_v52, %v252_v53  ;;  %v324_v40 = vld [vmem:[%s6068_s28 + $0x490] sm:$0xff] }
  0x9f   : > { %3058 = vmatprep.mubr.bf16.mxu1 %v4599_v63  ;;  %v4427_v63 = vcombine.high %v245_v54, %v253_v56  ;;  %v340_v52 = vld [vmem:[%s6068_s28 + $0x510] sm:$0xff] }
  0xa0   : > { %v348_v53 = vld [vmem:[%s6068_s28 + $0x550] sm:$0xff] }
  0xa5   : > { %2898 = vmatmul.mubr.bf16.gmra.mxu0 %v4596_v4  ;;  %v260_v4 = vld [vmem:[%s6068_s28 + $0x290] sm:$0xff] }
  0xa6   : > { %3059 = vmatmul.mubr.bf16.gmra.mxu1 %v4598_v5  ;;  %3099 = vmatprep.mubr.bf16.mxu0 %v4361_v6  ;;  %v268_v5 = vld [vmem:[%s6068_s28 + $0x2d0] sm:$0xff]  ;;  %v261_v6 = vld [vmem:[%s6068_s28 + $0x298] sm:$0xff] }
  0xa7   : > { %3260 = vmatprep.mubr.bf16.mxu1 %v4363_v7  ;;  %v5899_v7 = vld [vmem:[%s7035_s1 + $0x200] sm:$0xff]   ;;  %v4440_v20 = vcombine.low %v260_v4, %v268_v5 }
  0xad   : > { %3100 = vmatmul.mubr.bf16.vlgmr.msra.gmra.mxu0 %v4360_v10  ;;  %v5902_v10 = vld [vmem:[%s7035_s1 + $0x378] sm:$0xff]  }
  0xae   : > { %3261 = vmatmul.mubr.bf16.vlgmr.msra.gmra.mxu1 %v4362_v13  ;;  %5351 = vmatpush3.bf16.msra.mxu0 %v5871_v14  ;;  %v4426_v13 = vcombine.low %v245_v54, %v253_v56  ;;  %v4441_v14 = vcombine.high %v260_v4, %v268_v5  ;;  %v341_v56 = vld [vmem:[%s6068_s28 + $0x518] sm:$0xff] }
  0xaf   : > { %5463 = vmatpush3.bf16.msra.mxu1 %v5873_v15  ;;  %3107 = vmatprep.mubr.bf16.mxu0 %v4377_v16  ;;  %v4443_v15 = vcombine.high %v261_v6, %v269_v8  ;;  %v276_v16 = vld [vmem:[%s6068_s28 + $0x310] sm:$0xff] }
  0xb0   : > { %3268 = vmatprep.mubr.bf16.mxu1 %v4379_v17  ;;  %5352 = vmatprep.subr.bf16.mxu0 %v5874_v18  ;;  %v284_v17 = vld [vmem:[%s6068_s28 + $0x350] sm:$0xff]  ;;  %v277_v18 = vld [vmem:[%s6068_s28 + $0x318] sm:$0xff] }
  0xb1   : > { %5464 = vmatprep.subr.bf16.mxu1 %v5876_v19  ;;  %v285_v19 = vld [vmem:[%s6068_s28 + $0x358] sm:$0xff]  ;;  %v4457_v22 = vcombine.high %v276_v16, %v284_v17 }
  0xb2   : > { %5353 = vmatpush3.bf16.msra.mxu0 %v5875_v21  ;;  %v4442_v21 = vcombine.low %v261_v6, %v269_v8 }
  0xb3   : > { %5465 = vmatpush3.bf16.msra.mxu1 %v5877_v23  ;;  %5354 = vmatprep.subr.bf16.mxu0 %v5878_v24  ;;  %v4459_v23 = vcombine.high %v277_v18, %v285_v19  ;;  %v292_v24 = vld [vmem:[%s6068_s28 + $0x390] sm:$0xff] }
  0xb4   : > { %5466 = vmatprep.subr.bf16.mxu1 %v5880_v27  ;;  %v301_v27 = vld [vmem:[%s6068_s28 + $0x3d8] sm:$0xff]  ;;  %v4472_v36 = vcombine.low %v292_v24, %v300_v25 }
  0xb5   : > { %3108 = vmatmul.mubr.bf16.gmra.mxu0 %v4376_v28  ;;  %v4456_v28 = vcombine.low %v276_v16, %v284_v17  ;;  %v4474_v37 = vcombine.low %v293_v26, %v301_v27  ;;  %v357_v16 = vld [vmem:[%s6068_s28 + $0x598] sm:$0xff] }
  0xb6   : > { %3269 = vmatmul.mubr.bf16.gmra.mxu1 %v4378_v29  ;;  %3115 = vmatprep.mubr.bf16.mxu0 %v4393_v30  ;;  %v4458_v29 = vcombine.low %v277_v18, %v285_v19  ;;  %v4473_v30 = vcombine.high %v292_v24, %v300_v25  ;;  %v365_v17 = vld [vmem:[%s6068_s28 + $0x5d8] sm:$0xff] }
  0xb7   : > { %3276 = vmatprep.mubr.bf16.mxu1 %v4395_v31  ;;  %5355 = vmatpush3.bf16.msra.mxu0 %v5879_v32  ;;  %v4475_v31 = vcombine.high %v293_v26, %v301_v27  ;;  %v308_v32 = vld [vmem:[%s6068_s28 + $0x410] sm:$0xff]  ;;  %v4539_v26 = vcombine.high %v357_v16, %v365_v17 }
  0xb8   : > { %5467 = vmatpush3.bf16.msra.mxu1 %v5881_v33  ;;  %5356 = vmatprep.subr.bf16.mxu0 %v5882_v34  ;;  %v316_v33 = vld [vmem:[%s6068_s28 + $0x450] sm:$0xff]  ;;  %v309_v34 = vld [vmem:[%s6068_s28 + $0x418] sm:$0xff] }
  0xb9   : > { %5468 = vmatprep.subr.bf16.mxu1 %v5884_v35  ;;  %v317_v35 = vld [vmem:[%s6068_s28 + $0x458] sm:$0xff]  ;;  %v4489_v38 = vcombine.high %v308_v32, %v316_v33 }
  0xbb   : > { %5357 = vmatpush3.bf16.msra.mxu0 %v5883_v39  ;;  %v4491_v39 = vcombine.high %v309_v34, %v317_v35 }
  0xbc   : > { %5469 = vmatpush3.bf16.msra.mxu1 %v5885_v41  ;;  %5358 = vmatprep.subr.bf16.mxu0 %v5886_v42  ;;  %v332_v41 = vld [vmem:[%s6068_s28 + $0x4d0] sm:$0xff]  ;;  %v325_v42 = vld [vmem:[%s6068_s28 + $0x498] sm:$0xff] }
  0xbd   : > { %3116 = vmatmul.mubr.bf16.gmra.mxu0 %v4392_v43  ;;  %5470 = vmatprep.subr.bf16.mxu1 %v5888_v44  ;;  %v333_v43 = vld [vmem:[%s6068_s28 + $0x4d8] sm:$0xff]  ;;  %v4488_v44 = vcombine.low %v308_v32, %v316_v33 }
  0xbe   : > { %3277 = vmatmul.mubr.bf16.gmra.mxu1 %v4394_v45  ;;  %3123 = vmatprep.mubr.bf16.mxu0 %v4409_v46  ;;  %v4490_v45 = vcombine.low %v309_v34, %v317_v35  ;;  %v4505_v46 = vcombine.high %v324_v40, %v332_v41  ;;  %v372_v35 = vld [vmem:[%s6068_s28 + $0x610] sm:$0xff] }
  0xbf   : > { %3284 = vmatprep.mubr.bf16.mxu1 %v4411_v47  ;;  %5359 = vmatpush3.bf16.msra.mxu0 %v5887_v48  ;;  %v4507_v47 = vcombine.high %v325_v42, %v333_v43 }
  0xc0   : > { %5471 = vmatpush3.bf16.msra.mxu1 %v5889_v49  ;;  %5360 = vmatprep.subr.bf16.mxu0 %v5890_v50  ;;  %v6381_v50 = vld [vmem:[%s7036_s2] ss:$0 sm:$0xff] }
  0xc1   : > { %5472 = vmatprep.subr.bf16.mxu1 %v5892_v51 }
  0xc3   : > { %5361 = vmatpush3.bf16.msra.mxu0 %v5891_v55 }
  0xc4   : > { %5473 = vmatpush3.bf16.msra.mxu1 %v5893_v57  ;;  %5362 = vmatprep.subr.bf16.mxu0 %v5894_v58  ;;  %v349_v57 = vld [vmem:[%s6068_s28 + $0x558] sm:$0xff] }
  0xc5   : > { %3124 = vmatmul.mubr.bf16.gmra.mxu0 %v4408_v59  ;;  %5474 = vmatprep.subr.bf16.mxu1 %v5896_v60  ;;  %v4504_v60 = vcombine.low %v324_v40, %v332_v41  ;;  %v373_v40 = vld [vmem:[%s6068_s28 + $0x618] sm:$0xff] }
  0xc6   : > { %3285 = vmatmul.mubr.bf16.gmra.mxu1 %v4410_v61  ;;  %3131 = vmatprep.mubr.bf16.mxu0 %v4425_v62  ;;  %v381_v41 = vld [vmem:[%s6068_s28 + $0x658] sm:$0xff] }
  0xc7   : > { %3292 = vmatprep.mubr.bf16.mxu1 %v4427_v63  ;;  %5363 = vmatpush3.bf16.msra.mxu0 %v5895_v0  ;;  %v4506_v63 = vcombine.low %v325_v42, %v333_v43  ;;  %v4521_v0 = vcombine.high %v340_v52, %v348_v53 }
  0xc8   : > { %5475 = vmatpush3.bf16.msra.mxu1 %v5897_v1  ;;  %5364 = vmatprep.subr.bf16.mxu0 %v5898_v2  ;;  %v4523_v2 = vcombine.high %v341_v56, %v349_v57 }
  0xc9   : > { %5476 = vmatprep.subr.bf16.mxu1 %v5900_v3 }
  0xcb   : > { %5365 = vmatpush3.bf16.msra.mxu0 %v5899_v7 }
  0xcc   : > { %5477 = vmatpush3.bf16.msra.mxu1 %v5901_v9  ;;  %5574 = vmatprep.subr.bf16.mxu0 %v5902_v10 }
  0xcd   : > { %3132 = vmatmul.mubr.bf16.gmra.mxu0 %v4424_v11  ;;  %5686 = vmatprep.subr.bf16.mxu1 %v5904_v12  ;;  %v356_v11 = vld [vmem:[%s6068_s28 + $0x590] sm:$0xff] }
  0xce   : > { %3293 = vmatmul.mubr.bf16.gmra.mxu1 %v4426_v13  ;;  %3139 = vmatprep.mubr.bf16.mxu0 %v4441_v14  ;;  %v364_v12 = vld [vmem:[%s6068_s28 + $0x5d0] sm:$0xff] }
  0xcf   : > { %3300 = vmatprep.mubr.bf16.mxu1 %v4443_v15  ;;  %v4537_v24 = vcombine.high %v356_v11, %v364_v12 }
  0xd5   : > { %3140 = vmatmul.mubr.bf16.gmra.mxu0 %v4440_v20  ;;  %v4520_v20 = vcombine.low %v340_v52, %v348_v53 }
  0xd6   : > { %3301 = vmatmul.mubr.bf16.gmra.mxu1 %v4442_v21  ;;  %3147 = vmatprep.mubr.bf16.mxu0 %v4457_v22 }
  0xd7   : > { %3308 = vmatprep.mubr.bf16.mxu1 %v4459_v23  ;;  %v4522_v23 = vcombine.low %v341_v56, %v349_v57 }
  0xdd   : > { %3148 = vmatmul.mubr.bf16.gmra.mxu0 %v4456_v28 }
  0xde   : > { %3309 = vmatmul.mubr.bf16.gmra.mxu1 %v4458_v29  ;;  %3155 = vmatprep.mubr.bf16.mxu0 %v4473_v30 }
  0xdf   : > { %3316 = vmatprep.mubr.bf16.mxu1 %v4475_v31 }
  0xe5   : > { %3156 = vmatmul.mubr.bf16.gmra.mxu0 %v4472_v36  ;;  %v380_v36 = vld [vmem:[%s6068_s28 + $0x650] sm:$0xff] }
  0xe6   : > { %3317 = vmatmul.mubr.bf16.gmra.mxu1 %v4474_v37  ;;  %3163 = vmatprep.mubr.bf16.mxu0 %v4489_v38 }
  0xe7   : > { %3324 = vmatprep.mubr.bf16.mxu1 %v4491_v39 }
  0xed   : > { %v4918_v48 = vpop.f32.mrf.mxu0  ;;  %3164 = vmatmul.mubr.bf16.gmra.mxu0 %v4488_v44  ;;  %v4536_v44 = vcombine.low %v356_v11, %v364_v12 }
  0xee   : > { %v5030_v49 = vpop.f32.mrf.mxu1  ;;  %3325 = vmatmul.mubr.bf16.gmra.mxu1 %v4490_v45  ;;  %3171 = vmatprep.mubr.bf16.mxu0 %v4505_v46 }
  0xef   : > { %v4919_v51 = vpop.f32.mrf.mxu0  ;;  %3332 = vmatprep.mubr.bf16.mxu1 %v4507_v47  ;;  %v4538_v47 = vcombine.low %v357_v16, %v365_v17 }
  0xf0   : > { %v4920_v54 = vadd.f32 %v4919_v51, %v4918_v48  ;;  %v5031_v55 = vpop.f32.mrf.mxu1  ;;  %v4553_v48 = vcombine.high %v372_v35, %v380_v36  ;;  %v4555_v51 = vcombine.high %v373_v40, %v381_v41 }
  0xf1   : > { %v5032_v58 = vadd.f32 %v5031_v55, %v5030_v49  ;;  %v4921_v59 = vpop.f32.mrf.mxu0 }
  0xf2   : > { %v2780_v61 = vadd.f32 %v4920_v54, %v6381_v50  ;;  %v5033_v62 = vpop.f32.mrf.mxu1 }
  0xf3   : > { %v4922_v1 = vpop.f32.mrf.mxu0 }
  0xf4   : > { %v6388_v3 = vadd.f32 %v5032_v58, %v2780_v61  ;;  %v4923_v4 = vadd.f32 %v4922_v1, %v4921_v59  ;;  %v5034_v5 = vpop.f32.mrf.mxu1  ;;  %v396_v61 = vld [vmem:[%s6068_s28 + $0x6d0] sm:$0xff]  ;;  %v389_v1 = vld [vmem:[%s6068_s28 + $0x698] sm:$0xff] }
  0xf5   : > { %v5035_v6 = vadd.f32 %v5034_v5, %v5033_v62  ;;  %v4924_v7 = vpop.f32.mrf.mxu0  ;;  %3172 = vmatmul.mubr.bf16.gmra.mxu0 %v4504_v60  ;;  %v388_v60 = vld [vmem:[%s6068_s28 + $0x690] sm:$0xff] }
  0xf6   : > { %v2783_v8 = vadd.f32 %v4923_v4, %v6381_v50  ;;  %v5036_v9 = vpop.f32.mrf.mxu1  ;;  %3333 = vmatmul.mubr.bf16.gmra.mxu1 %v4506_v63  ;;  %3179 = vmatprep.mubr.bf16.mxu0 %v4521_v0 }
  0xf7   : > { %v4925_v10 = vpop.f32.mrf.mxu0  ;;  %3340 = vmatprep.mubr.bf16.mxu1 %v4523_v2  ;;  %v397_v2 = vld [vmem:[%s6068_s28 + $0x6d8] sm:$0xff] }
  0xf8   : > { %v6393_v13 = vadd.f32 %v5035_v6, %v2783_v8  ;;  %v4926_v14 = vadd.f32 %v4925_v10, %v4924_v7  ;;  %v5037_v15 = vpop.f32.mrf.mxu1  ;;  %v4552_v6 = vcombine.low %v372_v35, %v380_v36  ;;  %v4569_v10 = vcombine.high %v388_v60, %v396_v61 }
  0xf9   : > { %v5038_v18 = vadd.f32 %v5037_v15, %v5036_v9  ;;  %v4927_v19 = vpop.f32.mrf.mxu0  ;;  %v4554_v9 = vcombine.low %v373_v40, %v381_v41  ;;  %v4571_v12 = vcombine.high %v389_v1, %v397_v2  ;;  %v4570_v35 = vcombine.low %v389_v1, %v397_v2 }
  0xfa   : > { %v2788_v21 = vadd.f32 %v4926_v14, %v6381_v50  ;;  %v5039_v22 = vpop.f32.mrf.mxu1 }
  0xfb   : > { %v4928_v25 = vpop.f32.mrf.mxu0 }
  0xfc   : > { %v6398_v27 = vadd.f32 %v5038_v18, %v2788_v21  ;;  %v4929_v28 = vadd.f32 %v4928_v25, %v4927_v19  ;;  %v5040_v29 = vpop.f32.mrf.mxu1 }
  0xfd   : > { %v5041_v30 = vadd.f32 %v5040_v29, %v5039_v22  ;;  %v4930_v31 = vpop.f32.mrf.mxu0  ;;  %3180 = vmatmul.mubr.bf16.gmra.mxu0 %v4520_v20  ;;  %v404_v22 = vld [vmem:[%s6068_s28 + $0x710] sm:$0xff]  ;;  %v413_v29 = vld [vmem:[%s6068_s28 + $0x758] sm:$0xff] }
  0xfe   : > { %v2791_v32 = vadd.f32 %v4929_v28, %v6381_v50  ;;  %v5042_v33 = vpop.f32.mrf.mxu1  ;;  %3341 = vmatmul.mubr.bf16.gmra.mxu1 %v4522_v23  ;;  %3187 = vmatprep.mubr.bf16.mxu0 %v4537_v24  ;;  %v412_v23 = vld [vmem:[%s6068_s28 + $0x750] sm:$0xff]  ;;  %v405_v28 = vld [vmem:[%s6068_s28 + $0x718] sm:$0xff] }
  0xff   : > { %v4931_v34 = vpop.f32.mrf.mxu0  ;;  %3348 = vmatprep.mubr.bf16.mxu1 %v4539_v26  ;;  %v4585_v36 = vcombine.high %v404_v22, %v412_v23 }
 0x100   : > { %v6403_v37 = vadd.f32 %v5041_v30, %v2791_v32  ;;  %v4932_v38 = vadd.f32 %v4931_v34, %v4930_v31  ;;  %v5043_v39 = vpop.f32.mrf.mxu1  ;;  %v4568_v32 = vcombine.low %v388_v60, %v396_v61 }
 0x101   : > { %v5044_v42 = vadd.f32 %v5043_v39, %v5042_v33  ;;  %v4933_v43 = vpop.f32.mrf.mxu0  ;;  %v4587_v39 = vcombine.high %v405_v28, %v413_v29 }
 0x102   : > { %v2796_v45 = vadd.f32 %v4932_v38, %v6381_v50  ;;  %v5045_v46 = vpop.f32.mrf.mxu1 }
 0x103   : > { %v4934_v49 = vpop.f32.mrf.mxu0 }
 0x104   : > { %v6408_v52 = vadd.f32 %v5044_v42, %v2796_v45  ;;  %v4935_v53 = vadd.f32 %v4934_v49, %v4933_v43  ;;  %v5046_v54 = vpop.f32.mrf.mxu1  ;;  %v428_v49 = vld [vmem:[%s6068_s28 + $0x7d0] sm:$0xff] }
 0x105   : > { %v5047_v55 = vadd.f32 %v5046_v54, %v5045_v46  ;;  %v4936_v56 = vpop.f32.mrf.mxu0  ;;  %3188 = vmatmul.mubr.bf16.gmra.mxu0 %v4536_v44 }
 0x106   : > { %v2799_v57 = vadd.f32 %v4935_v53, %v6381_v50  ;;  %v5048_v58 = vpop.f32.mrf.mxu1  ;;  %3349 = vmatmul.mubr.bf16.gmra.mxu1 %v4538_v47  ;;  %3195 = vmatprep.mubr.bf16.mxu0 %v4553_v48  ;;  %v420_v48 = vld [vmem:[%s6068_s28 + $0x790] sm:$0xff] }
 0x107   : > { %v4937_v59 = vpop.f32.mrf.mxu0  ;;  %3356 = vmatprep.mubr.bf16.mxu1 %v4555_v51 }
 0x108   : > { %v6413_v62 = vadd.f32 %v5047_v55, %v2799_v57  ;;  %v4938_v63 = vadd.f32 %v4937_v59, %v4936_v56  ;;  %v5049_v0 = vpop.f32.mrf.mxu1  ;;  %v421_v55 = vld [vmem:[%s6068_s28 + $0x798] sm:$0xff]  ;;  %v4584_v59 = vcombine.low %v404_v22, %v412_v23  ;;  %v4600_v23 = vcombine.low %v420_v48, %v428_v49 }
 0x109   : > { %v5050_v4 = vadd.f32 %v5049_v0, %v5048_v58  ;;  %v4939_v5 = vpop.f32.mrf.mxu0  ;;  %v429_v56 = vld [vmem:[%s6068_s28 + $0x7d8] sm:$0xff]  ;;  %v4601_v0 = vcombine.high %v420_v48, %v428_v49 }
 0x10a   : > { %v2804_v7 = vadd.f32 %v4938_v63, %v6381_v50  ;;  %v5051_v8 = vpop.f32.mrf.mxu1  ;;  %v4586_v63 = vcombine.low %v405_v28, %v413_v29  ;;  %v4603_v2 = vcombine.high %v421_v55, %v429_v56  ;;  %v4602_v28 = vcombine.low %v421_v55, %v429_v56 }
 0x10b   : > { %v4940_v11 = vpop.f32.mrf.mxu0 }
 0x10c   : > { %v6418_v14 = vadd.f32 %v5050_v4, %v2804_v7  ;;  %v4941_v15 = vadd.f32 %v4940_v11, %v4939_v5  ;;  %v5052_v16 = vpop.f32.mrf.mxu1 }
 0x10d   : > { %v5053_v17 = vadd.f32 %v5052_v16, %v5051_v8  ;;  %v4942_v18 = vpop.f32.mrf.mxu0  ;;  %3196 = vmatmul.mubr.bf16.gmra.mxu0 %v4552_v6 }
 0x10e   : > { %v2807_v19 = vadd.f32 %v4941_v15, %v6381_v50  ;;  %v5054_v20 = vpop.f32.mrf.mxu1  ;;  %3357 = vmatmul.mubr.bf16.gmra.mxu1 %v4554_v9  ;;  %3203 = vmatprep.mubr.bf16.mxu0 %v4569_v10  ;;  %v190_v15 = vld [vmem:[%s6068_s28 + $0x60] sm:$0xff] }
 0x10f   : > { %v4943_v21 = vpop.f32.mrf.mxu0  ;;  %3364 = vmatprep.mubr.bf16.mxu1 %v4571_v12  ;;  %v182_v12 = vld [vmem:[%s6068_s28 + $0x20] sm:$0xff] }
 0x110   : > { %v6423_v24 = vadd.f32 %v5053_v17, %v2807_v19  ;;  %v4944_v25 = vadd.f32 %v4943_v21, %v4942_v18  ;;  %v5055_v26 = vpop.f32.mrf.mxu1  ;;  %v183_v19 = vld [vmem:[%s6068_s28 + $0x28] sm:$0xff]  ;;  %v4365_v29 = vcombine.high %v182_v12, %v190_v15  ;;  %v4364_v49 = vcombine.low %v182_v12, %v190_v15  ;;  %v5907_v12 = vld [vmem:[%s7035_s1 + $0x330] sm:$0xff]  }
 0x111   : > { %v5056_v30 = vadd.f32 %v5055_v26, %v5054_v20  ;;  %v4945_v31 = vpop.f32.mrf.mxu0  ;;  %v191_v20 = vld [vmem:[%s6068_s28 + $0x68] sm:$0xff] }
 0x112   : > { %v2812_v33 = vadd.f32 %v4944_v25, %v6381_v50  ;;  %v5057_v34 = vpop.f32.mrf.mxu1 }
 0x113   : > { %v4946_v38 = vpop.f32.mrf.mxu0 }
 0x114   : > { %v6428_v40 = vadd.f32 %v5056_v30, %v2812_v33  ;;  %v4947_v41 = vadd.f32 %v4946_v38, %v4945_v31  ;;  %v5058_v42 = vpop.f32.mrf.mxu1  ;;  %v4367_v31 = vcombine.high %v183_v19, %v191_v20 }
 0x115   : > { %v5059_v43 = vadd.f32 %v5058_v42, %v5057_v34  ;;  %v4948_v44 = vpop.f32.mrf.mxu0  ;;  %3204 = vmatmul.mubr.bf16.gmra.mxu0 %v4568_v32 }
 0x116   : > { %v2815_v45 = vadd.f32 %v4947_v41, %v6381_v50  ;;  %v5060_v46 = vpop.f32.mrf.mxu1  ;;  %3365 = vmatmul.mubr.bf16.gmra.mxu1 %v4570_v35  ;;  %3211 = vmatprep.mubr.bf16.mxu0 %v4585_v36 }
 0x117   : > { %v4949_v47 = vpop.f32.mrf.mxu0  ;;  %3372 = vmatprep.mubr.bf16.mxu1 %v4587_v39 }
 0x118   : > { %v6433_v51 = vadd.f32 %v5059_v43, %v2815_v45  ;;  %v4950_v53 = vadd.f32 %v4949_v47, %v4948_v44  ;;  %v5061_v54 = vpop.f32.mrf.mxu1  ;;  %v6454_v45 = vld [vmem:[%s6068_s28 + $0xa0] sm:$0xff] }
 0x119   : > { %v5062_v57 = vadd.f32 %v5061_v54, %v5060_v46  ;;  %v4951_v58 = vpop.f32.mrf.mxu0  ;;  %v6457_v46 = vld [vmem:[%s6068_s28 + $0xe0] sm:$0xff]  ;;  %v6463_v54 = vld [vmem:[%s6068_s28 + $0xe8] sm:$0xff] }
 0x11a   : > { %v2820_v60 = vadd.f32 %v4950_v53, %v6381_v50  ;;  %v5063_v61 = vpop.f32.mrf.mxu1  ;;  %v6460_v53 = vld [vmem:[%s6068_s28 + $0xa8] sm:$0xff] }
 0x11b   : > { %v4952_v1 = vpop.f32.mrf.mxu0 }
 0x11c   : > { %v6438_v4 = vadd.f32 %v5062_v57, %v2820_v60  ;;  %v4953_v5 = vadd.f32 %v4952_v1, %v4951_v58  ;;  %v5064_v6 = vpop.f32.mrf.mxu1  ;;  %v4366_v57 = vcombine.low %v183_v19, %v191_v20  ;;  %v5903_v58 = vld [vmem:[%s7035_s1 + $0x338] sm:$0xff]   ;;  %v5910_v19 = vld [vmem:[%s7035_s1 + $0x368] sm:$0xff]  }
 0x11d   : > { %v5065_v7 = vadd.f32 %v5064_v6, %v5063_v61  ;;  %v4954_v8 = vpop.f32.mrf.mxu0  ;;  %3212 = vmatmul.mubr.bf16.gmra.mxu0 %v4584_v59  ;;  %v5905_v60 = vld [vmem:[%s7035_s1 + $0x3b8] sm:$0xff]   ;;  %v4381_v61 = vcombine.high %v6454_v45, %v6457_v46 }
 0x11e   : > { %v2823_v9 = vadd.f32 %v4953_v5, %v6381_v50  ;;  %v5066_v10 = vpop.f32.mrf.mxu1  ;;  %3373 = vmatmul.mubr.bf16.gmra.mxu1 %v4586_v63  ;;  %3219 = vmatprep.mubr.bf16.mxu0 %v4601_v0  ;;  %v5906_v5 = vld [vmem:[%s7035_s1 + $0x370] sm:$0xff]  }
 0x11f   : > { %v4955_v11 = vpop.f32.mrf.mxu0  ;;  %3380 = vmatprep.mubr.bf16.mxu1 %v4603_v2  ;;  %v4383_v2 = vcombine.high %v6460_v53, %v6463_v54 }
 0x120   : > { %v6443_v16 = vadd.f32 %v5065_v7, %v2823_v9  ;;  %v4956_v17 = vadd.f32 %v4955_v11, %v4954_v8  ;;  %v5067_v18 = vpop.f32.mrf.mxu1  ;;  %v5908_v8 = vld [vmem:[%s7035_s1 + $0x3f0] sm:$0xff]   ;;  %v6486_v11 = vld [vmem:[%s6068_s28 + $0x120] sm:$0xff] }
 0x121   : > { %v5068_v21 = vadd.f32 %v5067_v18, %v5066_v10  ;;  %v4957_v22 = vpop.f32.mrf.mxu0  ;;  %v5909_v18 = vld [vmem:[%s7035_s1 + $0x3b0] sm:$0xff]  }
 0x122   : > { %v2828_v25 = vadd.f32 %v4956_v17, %v6381_v50  ;;  %v5069_v26 = vpop.f32.mrf.mxu1  ;;  %v6492_v17 = vld [vmem:[%s6068_s28 + $0x160] sm:$0xff] }
 0x123   : > { %v4958_v30 = vpop.f32.mrf.mxu0 }
 0x124   : > { %v6448_v32 = vadd.f32 %v5068_v21, %v2828_v25  ;;  %v4959_v33 = vadd.f32 %v4958_v30, %v4957_v22  ;;  %v5070_v34 = vpop.f32.mrf.mxu1  ;;  %v6506_v25 = vld [vmem:[%s6068_s28 + $0x168] sm:$0xff]  ;;  %v4380_v30 = vcombine.low %v6454_v45, %v6457_v46  ;;  %v5914_v46 = vld [vmem:[%s7035_s1 + $0x360] sm:$0xff]  }
 0x125   : > { %v5071_v35 = vadd.f32 %v5070_v34, %v5069_v26  ;;  %v4960_v36 = vpop.f32.mrf.mxu0  ;;  %3220 = vmatmul.mubr.bf16.gmra.mxu0 %v4600_v23  ;;  %v6503_v23 = vld [vmem:[%s6068_s28 + $0x128] sm:$0xff]  ;;  %v4382_v34 = vcombine.low %v6460_v53, %v6463_v54 }
 0x126   : > { %v2831_v38 = vadd.f32 %v4959_v33, %v6381_v50  ;;  %v5072_v39 = vpop.f32.mrf.mxu1  ;;  %3381 = vmatmul.mubr.bf16.gmra.mxu1 %v4602_v28  ;;  %3421 = vmatprep.mubr.bf16.mxu0 %v4365_v29  ;;  %v5912_v26 = vld [vmem:[%s7035_s1 + $0x3e8] sm:$0xff]  }
 0x127   : > { %v4961_v41 = vpop.f32.mrf.mxu0  ;;  %3582 = vmatprep.mubr.bf16.mxu1 %v4367_v31  ;;  %v5913_v45 = vld [vmem:[%s7035_s1 + $0x3a8] sm:$0xff]  }
 0x128   : > { %v6451_v42 = vadd.f32 %v5071_v35, %v2831_v38  ;;  %v4962_v43 = vadd.f32 %v4961_v41, %v4960_v36  ;;  %v5073_v44 = vpop.f32.mrf.mxu1  ;;  %v4397_v35 = vcombine.high %v6486_v11, %v6492_v17  ;;  %v4399_v38 = vcombine.high %v6503_v23, %v6506_v25 }
 0x129   : > { %v5074_v47 = vadd.f32 %v5073_v44, %v5072_v39  ;;  %v4963_v48 = vpop.f32.mrf.mxu0  ;;  %v5911_v39 = vld [vmem:[%s7035_s1 + $0x328] sm:$0xff]  }
 0x12a   : > { %v2836_v55 = vadd.f32 %v4962_v43, %v6381_v50  ;;  %v5075_v56 = vpop.f32.mrf.mxu1 }
 0x12b   : > { %v4964_v59 = vpop.f32.mrf.mxu0 }
 0x12c   : > { %v6474_v63 = vadd.f32 %v5074_v47, %v2836_v55  ;;  %v4965_v0 = vadd.f32 %v4964_v59, %v4963_v48  ;;  %v5076_v1 = vpop.f32.mrf.mxu1  ;;  %v6536_v55 = vld [vmem:[%s6068_s28 + $0x1a0] sm:$0xff] }
 0x12d   : > { %v5077_v6 = vadd.f32 %v5076_v1, %v5075_v56  ;;  %v4966_v7 = vpop.f32.mrf.mxu0  ;;  %3422 = vmatmul.mubr.bf16.vlgmr.msra.gmra.mxu0 %v4364_v49  ;;  %v5916_v49 = vld [vmem:[%s7035_s1 + $0x3e0] sm:$0xff]   ;;  %v6550_v1 = vld [vmem:[%s6068_s28 + $0x1e8] sm:$0xff] }
 0x12e   : > { %v2839_v9 = vadd.f32 %v4965_v0, %v6381_v50  ;;  %v5078_v10 = vpop.f32.mrf.mxu1  ;;  %3583 = vmatmul.mubr.bf16.vlgmr.msra.gmra.mxu1 %v4366_v57  ;;  %5575 = vmatpush3.bf16.msra.mxu0 %v5903_v58  ;;  %v6539_v57 = vld [vmem:[%s6068_s28 + $0x1e0] sm:$0xff]  ;;  %v6542_v58 = vld [vmem:[%s6068_s28 + $0x1a8] sm:$0xff] }
 0x12f   : > { %v4967_v15 = vpop.f32.mrf.mxu0  ;;  %5687 = vmatpush3.bf16.msra.mxu1 %v5905_v60  ;;  %3429 = vmatprep.mubr.bf16.mxu0 %v4381_v61  ;;  %v5915_v59 = vld [vmem:[%s7035_s1 + $0x320] sm:$0xff]  }
 0x130   : > { %v6500_v20 = vadd.f32 %v5077_v6, %v2839_v9  ;;  %v4968_v21 = vadd.f32 %v4967_v15, %v4966_v7  ;;  %v5079_v22 = vpop.f32.mrf.mxu1  ;;  %3590 = vmatprep.mubr.bf16.mxu1 %v4383_v2  ;;  %5576 = vmatprep.subr.bf16.mxu0 %v5906_v5  ;;  %v5917_v2 = vld [vmem:[%s7035_s1 + $0x3a0] sm:$0xff]   ;;  %v5918_v5 = vld [vmem:[%s7035_s1 + $0x358] sm:$0xff]   ;;  %v4398_v15 = vcombine.low %v6503_v23, %v6506_v25  ;;  %v5922_v25 = vld [vmem:[%s7035_s1 + $0x350] sm:$0xff]  }
 0x131   : > { %v5080_v28 = vadd.f32 %v5079_v22, %v5078_v10  ;;  %v4969_v29 = vpop.f32.mrf.mxu0  ;;  %5688 = vmatprep.subr.bf16.mxu1 %v5908_v8  ;;  %v4396_v8 = vcombine.low %v6486_v11, %v6492_v17  ;;  %v5920_v9 = vld [vmem:[%s7035_s1 + $0x3d8] sm:$0xff]  }
 0x132   : > { %v2844_v31 = vadd.f32 %v4968_v21, %v6381_v50  ;;  %v5081_v33 = vpop.f32.mrf.mxu1  ;;  %5577 = vmatpush3.bf16.msra.mxu0 %v5907_v12  ;;  %v4415_v21 = vcombine.high %v6542_v58, %v6550_v1  ;;  %v5919_v11 = vld [vmem:[%s7035_s1 + $0x318] sm:$0xff]  }
 0x133   : > { %v4970_v36 = vpop.f32.mrf.mxu0  ;;  %5689 = vmatpush3.bf16.msra.mxu1 %v5909_v18  ;;  %5578 = vmatprep.subr.bf16.mxu0 %v5910_v19  ;;  %v4413_v18 = vcombine.high %v6536_v55, %v6539_v57  ;;  %v5921_v23 = vld [vmem:[%s7035_s1 + $0x398] sm:$0xff]  }
 0x134   : > { %v6523_v41 = vadd.f32 %v5080_v28, %v2844_v31  ;;  %v4971_v43 = vadd.f32 %v4970_v36, %v4969_v29  ;;  %v5082_v44 = vpop.f32.mrf.mxu1  ;;  %5690 = vmatprep.subr.bf16.mxu1 %v5912_v26  ;;  %v6589_v36 = vld [vmem:[%s6068_s28 + $0x260] sm:$0xff] }
 0x135   : > { %v5083_v47 = vadd.f32 %v5082_v44, %v5081_v33  ;;  %v4972_v48 = vpop.f32.mrf.mxu0  ;;  %3430 = vmatmul.mubr.bf16.gmra.mxu0 %v4380_v30  ;;  %v5924_v30 = vld [vmem:[%s7035_s1 + $0x3d0] sm:$0xff]  }
 0x136   : > { %v2847_v53 = vadd.f32 %v4971_v43, %v6381_v50  ;;  %v5084_v54 = vpop.f32.mrf.mxu1  ;;  %3591 = vmatmul.mubr.bf16.gmra.mxu1 %v4382_v34  ;;  %3437 = vmatprep.mubr.bf16.mxu0 %v4397_v35  ;;  %v6586_v34 = vld [vmem:[%s6068_s28 + $0x220] sm:$0xff] }
 0x137   : > { %v4973_v56 = vpop.f32.mrf.mxu0  ;;  %3598 = vmatprep.mubr.bf16.mxu1 %v4399_v38  ;;  %5579 = vmatpush3.bf16.msra.mxu0 %v5911_v39  ;;  %v6592_v38 = vld [vmem:[%s6068_s28 + $0x228] sm:$0xff]  ;;  %v5923_v39 = vld [vmem:[%s7035_s1 + $0x310] sm:$0xff]  }
 0x138   : > { %v6547_v60 = vadd.f32 %v5083_v47, %v2847_v53  ;;  %v4974_v61 = vadd.f32 %v4973_v56, %v4972_v48  ;;  %v5085_v0 = vpop.f32.mrf.mxu1  ;;  %5691 = vmatpush3.bf16.msra.mxu1 %v5913_v45  ;;  %5580 = vmatprep.subr.bf16.mxu0 %v5914_v46  ;;  %v6600_v46 = vld [vmem:[%s6068_s28 + $0x268] sm:$0xff]  ;;  %v5925_v47 = vld [vmem:[%s7035_s1 + $0x390] sm:$0xff]  }
 0x139   : > { %v5086_v6 = vadd.f32 %v5085_v0, %v5084_v54  ;;  %v4975_v7 = vpop.f32.mrf.mxu0  ;;  %5692 = vmatprep.subr.bf16.mxu1 %v5916_v49  ;;  %v5926_v48 = vld [vmem:[%s7035_s1 + $0x348] sm:$0xff]   ;;  %v4412_v54 = vcombine.low %v6536_v55, %v6539_v57  ;;  %v4414_v0 = vcombine.low %v6542_v58, %v6550_v1  ;;  %v5930_v1 = vld [vmem:[%s7035_s1 + $0x340] sm:$0xff]  }
 0x13a   : > { %v2852_v10 = vadd.f32 %v4974_v61, %v6381_v50  ;;  %v5087_v12 = vpop.f32.mrf.mxu1  ;;  %v5928_v56 = vld [vmem:[%s7035_s1 + $0x3c8] sm:$0xff]  }
 0x13b   : > { %v4976_v19 = vpop.f32.mrf.mxu0  ;;  %5581 = vmatpush3.bf16.msra.mxu0 %v5915_v59  ;;  %v5927_v55 = vld [vmem:[%s7035_s1 + $0x308] sm:$0xff]  }
 0x13c   : > { %v6573_v17 = vadd.f32 %v5086_v6, %v2852_v10  ;;  %v4977_v22 = vadd.f32 %v4976_v19, %v4975_v7  ;;  %v5088_v26 = vpop.f32.mrf.mxu1  ;;  %5693 = vmatpush3.bf16.msra.mxu1 %v5917_v2  ;;  %5582 = vmatprep.subr.bf16.mxu0 %v5918_v5  ;;  %v4429_v2 = vcombine.high %v6586_v34, %v6589_v36  ;;  %v5929_v58 = vld [vmem:[%s7035_s1 + $0x388] sm:$0xff]  }
 0x13d   : > { %v5089_v28 = vadd.f32 %v5088_v26, %v5087_v12  ;;  %v4978_v29 = vpop.f32.mrf.mxu0  ;;  %3438 = vmatmul.mubr.bf16.gmra.mxu0 %v4396_v8  ;;  %5694 = vmatprep.subr.bf16.mxu1 %v5920_v9  ;;  %v4431_v6 = vcombine.high %v6592_v38, %v6600_v46  ;;  %v5932_v12 = vld [vmem:[%s7035_s1 + $0x3c0] sm:$0xff]  }
 0x13e   : > { %v2855_v31 = vadd.f32 %v4977_v22, %v6381_v50  ;;  %v5090_v33 = vpop.f32.mrf.mxu1  ;;  %3599 = vmatmul.mubr.bf16.gmra.mxu1 %v4398_v15  ;;  %3445 = vmatprep.mubr.bf16.mxu0 %v4413_v18  ;;  %v5931_v22 = vld [vmem:[%s7035_s1 + $0x300] sm:$0xff]  }
 0x13f   : > { %v4979_v35 = vpop.f32.mrf.mxu0  ;;  %3606 = vmatprep.mubr.bf16.mxu1 %v4415_v21  ;;  %5583 = vmatpush3.bf16.msra.mxu0 %v5919_v11  ;;  %v262_v21 = vld [vmem:[%s6068_s28 + $0x2a0] sm:$0xff] }
 0x140   : > { %v6597_v43 = vadd.f32 %v5089_v28, %v2855_v31  ;;  %v4980_v44 = vadd.f32 %v4979_v35, %v4978_v29  ;;  %v5091_v45 = vpop.f32.mrf.mxu1  ;;  %5695 = vmatpush3.bf16.msra.mxu1 %v5921_v23  ;;  %5584 = vmatprep.subr.bf16.mxu0 %v5922_v25  ;;  %v270_v11 = vld [vmem:[%s6068_s28 + $0x2e0] sm:$0xff]  ;;  %v263_v28 = vld [vmem:[%s6068_s28 + $0x2a8] sm:$0xff]  ;;  %v4428_v35 = vcombine.low %v6586_v34, %v6589_v36 }
 0x141   : > { %v5092_v49 = vadd.f32 %v5091_v45, %v5090_v33  ;;  %v4981_v53 = vpop.f32.mrf.mxu0  ;;  %5696 = vmatprep.subr.bf16.mxu1 %v5924_v30  ;;  %v271_v29 = vld [vmem:[%s6068_s28 + $0x2e8] sm:$0xff]  ;;  %v5933_v30 = vld [vmem:[%s7035_s1 + $0x380] sm:$0xff]   ;;  %v4430_v45 = vcombine.low %v6592_v38, %v6600_v46 }
 0x142   : > { %v2860_v59 = vadd.f32 %v4980_v44, %v6381_v50  ;;  %v5093_v61 = vpop.f32.mrf.mxu1  ;;  %v278_v46 = vld [vmem:[%s6068_s28 + $0x320] sm:$0xff] }
 0x143   : > { %v4982_v5 = vpop.f32.mrf.mxu0  ;;  %5585 = vmatpush3.bf16.msra.mxu0 %v5923_v39 }
 0x144   : > { %v6623_v57 = vadd.f32 %v5092_v49, %v2860_v59  ;;  %v4983_v7 = vadd.f32 %v4982_v5, %v4981_v53  ;;  %v5094_v8 = vpop.f32.mrf.mxu1  ;;  %5697 = vmatpush3.bf16.msra.mxu1 %v5925_v47  ;;  %5586 = vmatprep.subr.bf16.mxu0 %v5926_v48  ;;  %v4445_v47 = vcombine.high %v262_v21, %v270_v11 }
 0x145   : > { %v5095_v9 = vadd.f32 %v5094_v8, %v5093_v61  ;;  %v4984_v10 = vpop.f32.mrf.mxu0  ;;  %3446 = vmatmul.mubr.bf16.gmra.mxu0 %v4412_v54  ;;  %5698 = vmatprep.subr.bf16.mxu1 %v5928_v56  ;;  %v4447_v49 = vcombine.high %v263_v28, %v271_v29 }
 0x146   : > { %v2863_v15 = vadd.f32 %v4983_v7, %v6381_v50  ;;  %v5096_v18 = vpop.f32.mrf.mxu1  ;;  %3607 = vmatmul.mubr.bf16.gmra.mxu1 %v4414_v0  ;;  %3453 = vmatprep.mubr.bf16.mxu0 %v4429_v2  ;;  %v286_v0 = vld [vmem:[%s6068_s28 + $0x360] sm:$0xff]  ;;  %v287_v7 = vld [vmem:[%s6068_s28 + $0x368] sm:$0xff] }
 0x147   : > { %v4985_v19 = vpop.f32.mrf.mxu0  ;;  %3614 = vmatprep.mubr.bf16.mxu1 %v4431_v6  ;;  %5587 = vmatpush3.bf16.msra.mxu0 %v5927_v55  ;;  %v279_v55 = vld [vmem:[%s6068_s28 + $0x328] sm:$0xff] }
 0x148   : > { %v6640_v26 = vadd.f32 %v5095_v9, %v2863_v15  ;;  %v4986_v23 = vadd.f32 %v4985_v19, %v4984_v10  ;;  %v5097_v25 = vpop.f32.mrf.mxu1  ;;  %5699 = vmatpush3.bf16.msra.mxu1 %v5929_v58  ;;  %5588 = vmatprep.subr.bf16.mxu0 %v5930_v1  ;;  %v4444_v1 = vcombine.low %v262_v21, %v270_v11 }
 0x149   : > { %v5098_v31 = vadd.f32 %v5097_v25, %v5096_v18  ;;  %v4987_v33 = vpop.f32.mrf.mxu0  ;;  %5700 = vmatprep.subr.bf16.mxu1 %v5932_v12  ;;  %v4446_v12 = vcombine.low %v263_v28, %v271_v29  ;;  %v4461_v15 = vcombine.high %v278_v46, %v286_v0  ;;  %v4463_v19 = vcombine.high %v279_v55, %v287_v7  ;;  %v294_v29 = vld [vmem:[%s6068_s28 + $0x3a0] sm:$0xff] }
 0x14a   : > { %v2868_v39 = vadd.f32 %v4986_v23, %v6381_v50  ;;  %v5099_v44 = vpop.f32.mrf.mxu1 }
 0x14b   : > { %v4988_v48 = vpop.f32.mrf.mxu0  ;;  %5589 = vmatpush3.bf16.msra.mxu0 %v5931_v22 }
 0x14c   : > { %v6652_v53 = vadd.f32 %v5098_v31, %v2868_v39  ;;  %v4989_v54 = vadd.f32 %v4988_v48, %v4987_v33  ;;  %v5100_v56 = vpop.f32.mrf.mxu1  ;;  %5701 = vmatpush3.bf16.msra.mxu1 %v5933_v30  ;;  %v302_v33 = vld [vmem:[%s6068_s28 + $0x3e0] sm:$0xff] }
 0x14d   : > { %v5101_v34 = vadd.f32 %v5100_v56, %v5099_v44  ;;  %v4990_v36 = vpop.f32.mrf.mxu0  ;;  %3454 = vmatmul.mubr.bf16.gmra.mxu0 %v4428_v35 }
 0x14e   : > { %v2871_v59 = vadd.f32 %v4989_v54, %v6381_v50  ;;  %v5102_v61 = vpop.f32.mrf.mxu1  ;;  %3615 = vmatmul.mubr.bf16.gmra.mxu1 %v4430_v45  ;;  %3461 = vmatprep.mubr.bf16.mxu0 %v4445_v47  ;;  %v295_v45 = vld [vmem:[%s6068_s28 + $0x3a8] sm:$0xff]  ;;  %v4460_v54 = vcombine.low %v278_v46, %v286_v0 }
 0x14f   : > { %v4991_v38 = vpop.f32.mrf.mxu0  ;;  %3622 = vmatprep.mubr.bf16.mxu1 %v4447_v49  ;;  %v303_v47 = vld [vmem:[%s6068_s28 + $0x3e8] sm:$0xff] }
 0x150   : > { %v6657_v2 = vadd.f32 %v5101_v34, %v2871_v59  ;;  %v4992_v5 = vadd.f32 %v4991_v38, %v4990_v36  ;;  %v5103_v6 = vpop.f32.mrf.mxu1  ;;  %v4462_v36 = vcombine.low %v279_v55, %v287_v7  ;;  %v4477_v59 = vcombine.high %v294_v29, %v302_v33  ;;  %v310_v7 = vld [vmem:[%s6068_s28 + $0x420] sm:$0xff] }
 0x151   : > { %v5104_v8 = vadd.f32 %v5103_v6, %v5102_v61  ;;  %v4993_v58 = vpop.f32.mrf.mxu0  ;;  %v4479_v38 = vcombine.high %v295_v45, %v303_v47 }
 0x152   : > { %v2876_v9 = vadd.f32 %v4992_v5, %v6381_v50  ;;  %v5105_v10 = vpop.f32.mrf.mxu1 }
 0x153   : > { %v4994_v18 = vpop.f32.mrf.mxu0 }
 0x154   : > { %v6662_v22 = vadd.f32 %v5104_v8, %v2876_v9  ;;  %v4995_v23 = vadd.f32 %v4994_v18, %v4993_v58  ;;  %v5106_v25 = vpop.f32.mrf.mxu1  ;;  %v318_v9 = vld [vmem:[%s6068_s28 + $0x460] sm:$0xff]  ;;  %v311_v18 = vld [vmem:[%s6068_s28 + $0x428] sm:$0xff] }
 0x155   : > { %v5107_v30 = vadd.f32 %v5106_v25, %v5105_v10  ;;  %v4996_v31 = vpop.f32.mrf.mxu0  ;;  %3462 = vmatmul.mubr.bf16.gmra.mxu0 %v4444_v1 }
 0x156   : > { %v2879_v21 = vadd.f32 %v4995_v23, %v6381_v50  ;;  %v5108_v11 = vpop.f32.mrf.mxu1  ;;  %3623 = vmatmul.mubr.bf16.gmra.mxu1 %v4446_v12  ;;  %3469 = vmatprep.mubr.bf16.mxu0 %v4461_v15 }
 0x157   : > { %v4997_v28 = vpop.f32.mrf.mxu0  ;;  %3630 = vmatprep.mubr.bf16.mxu1 %v4463_v19  ;;  %v319_v19 = vld [vmem:[%s6068_s28 + $0x468] sm:$0xff] }
 0x158   : > { %v6667_v35 = vadd.f32 %v5107_v30, %v2879_v21  ;;  %v4998_v39 = vadd.f32 %v4997_v28, %v4996_v31  ;;  %v5109_v44 = vpop.f32.mrf.mxu1  ;;  %v4476_v30 = vcombine.low %v294_v29, %v302_v33  ;;  %v4493_v28 = vcombine.high %v310_v7, %v318_v9 }
 0x159   : > { %v5110_v48 = vadd.f32 %v5109_v44, %v5108_v11  ;;  %v4999_v49 = vpop.f32.mrf.mxu0  ;;  %v4478_v11 = vcombine.low %v295_v45, %v303_v47  ;;  %v4495_v44 = vcombine.high %v311_v18, %v319_v19  ;;  %v326_v47 = vld [vmem:[%s6068_s28 + $0x4a0] sm:$0xff] }
 0x15a   : > { %v2884_v56 = vadd.f32 %v4998_v39, %v6381_v50  ;;  %v5111_v34 = vpop.f32.mrf.mxu1 }
 0x15b   : > { %v5000_v61 = vpop.f32.mrf.mxu0 }
 0x15c   : > { %v6672_v5 = vadd.f32 %v5110_v48, %v2884_v56  ;;  %v5001_v6 = vadd.f32 %v5000_v61, %v4999_v49  ;;  %v5112_v8 = vpop.f32.mrf.mxu1 }
 0x15d   : > { %v5113_v58 = vadd.f32 %v5112_v8, %v5111_v34  ;;  %v5002_v1 = vpop.f32.mrf.mxu0  ;;  %3470 = vmatmul.mubr.bf16.gmra.mxu0 %v4460_v54  ;;  %v335_v8 = vld [vmem:[%s6068_s28 + $0x4e8] sm:$0xff] }
 0x15e   : > { %v2887_v46 = vadd.f32 %v5001_v6, %v6381_v50  ;;  %v5114_v0 = vpop.f32.mrf.mxu1  ;;  %3631 = vmatmul.mubr.bf16.gmra.mxu1 %v4462_v36  ;;  %3477 = vmatprep.mubr.bf16.mxu0 %v4477_v59  ;;  %v334_v36 = vld [vmem:[%s6068_s28 + $0x4e0] sm:$0xff]  ;;  %v327_v6 = vld [vmem:[%s6068_s28 + $0x4a8] sm:$0xff] }
 0x15f   : > { %v5003_v55 = vpop.f32.mrf.mxu0  ;;  %3638 = vmatprep.mubr.bf16.mxu1 %v4479_v38 }
 0x160   : > { %v6677_v10 = vadd.f32 %v5113_v58, %v2887_v46  ;;  %v5004_v12 = vadd.f32 %v5003_v55, %v5002_v1  ;;  %v5115_v15 = vpop.f32.mrf.mxu1  ;;  %v4492_v46 = vcombine.low %v310_v7, %v318_v9 }
 0x161   : > { %v5116_v23 = vadd.f32 %v5115_v15, %v5114_v0  ;;  %v5005_v25 = vpop.f32.mrf.mxu0  ;;  %v4509_v15 = vcombine.high %v326_v47, %v334_v36 }
 0x162   : > { %v2892_v31 = vadd.f32 %v5004_v12, %v6381_v50  ;;  %v5117_v21 = vpop.f32.mrf.mxu1  ;;  %v4494_v12 = vcombine.low %v311_v18, %v319_v19  ;;  %v342_v19 = vld [vmem:[%s6068_s28 + $0x520] sm:$0xff] }
 0x163   : > { %v5006_v39 = vpop.f32.mrf.mxu0 }
 0x164   : > { %v6682_v48 = vadd.f32 %v5116_v23, %v2892_v31  ;;  %v5007_v49 = vadd.f32 %v5006_v39, %v5005_v25  ;;  %v5118_v54 = vpop.f32.mrf.mxu1  ;;  %v4511_v25 = vcombine.high %v327_v6, %v335_v8  ;;  %v350_v39 = vld [vmem:[%s6068_s28 + $0x560] sm:$0xff] }
 0x165   : > { %v5119_v56 = vadd.f32 %v5118_v54, %v5117_v21  ;;  %v5008_v34 = vpop.f32.mrf.mxu0  ;;  %3478 = vmatmul.mubr.bf16.gmra.mxu0 %v4476_v30 }
 0x166   : > { %v2895_v29 = vadd.f32 %v5007_v49, %v6381_v50  ;;  %v5120_v33 = vpop.f32.mrf.mxu1  ;;  %3639 = vmatmul.mubr.bf16.gmra.mxu1 %v4478_v11  ;;  %3485 = vmatprep.mubr.bf16.mxu0 %v4493_v28 }
 0x167   : > { %v5009_v45 = vpop.f32.mrf.mxu0  ;;  %3646 = vmatprep.mubr.bf16.mxu1 %v4495_v44 }
 0x168   : > { %v6687_v59 = vadd.f32 %v5119_v56, %v2895_v29  ;;  %v5010_v61 = vadd.f32 %v5009_v45, %v5008_v34  ;;  %v5121_v38 = vpop.f32.mrf.mxu1  ;;  %v343_v56 = vld [vmem:[%s6068_s28 + $0x528] sm:$0xff]  ;;  %v4508_v45 = vcombine.low %v326_v47, %v334_v36 }
 0x169   : > { %v5122_v58 = vadd.f32 %v5121_v38, %v5120_v33  ;;  %v5011_v1 = vpop.f32.mrf.mxu0  ;;  %v351_v34 = vld [vmem:[%s6068_s28 + $0x568] sm:$0xff] }
 0x16a   : > { %v2900_v0 = vadd.f32 %v5010_v61, %v6381_v50  ;;  %v5123_v55 = vpop.f32.mrf.mxu1 }
 0x16b   : > { %v5012_v23 = vpop.f32.mrf.mxu0 }
 0x16c   : > { %v6692_v30 = vadd.f32 %v5122_v58, %v2900_v0  ;;  %v5013_v31 = vadd.f32 %v5012_v23, %v5011_v1  ;;  %v5124_v21 = vpop.f32.mrf.mxu1  ;;  %v4525_v58 = vcombine.high %v342_v19, %v350_v39 }
 0x16d   : > { %v5125_v11 = vadd.f32 %v5124_v21, %v5123_v55  ;;  %v5142_v28 = vpop.f32.mrf.mxu0  ;;  %3486 = vmatmul.mubr.bf16.gmra.mxu0 %v4492_v46  ;;  %v4527_v46 = vcombine.high %v343_v56, %v351_v34 }
 0x16e   : > { %v2903_v7 = vadd.f32 %v5013_v31, %v6381_v50  ;;  %v5254_v9 = vpop.f32.mrf.mxu1  ;;  %3647 = vmatmul.mubr.bf16.gmra.mxu1 %v4494_v12  ;;  %3493 = vmatprep.mubr.bf16.mxu0 %v4509_v15  ;;  %v4510_v50 = vcombine.low %v327_v6, %v335_v8  ;;  %v358_v6 = vld [vmem:[%s6068_s28 + $0x5a0] sm:$0xff] }
 0x16f   : > { %v5143_v18 = vpop.f32.mrf.mxu0  ;;  %3654 = vmatprep.mubr.bf16.mxu1 %v4511_v25  ;;  %v366_v8 = vld [vmem:[%s6068_s28 + $0x5e0] sm:$0xff] }
 0x170   : > { %v6697_v44 = vadd.f32 %v5125_v11, %v2903_v7  ;;  %v5144_v49 = vadd.f32 %v5143_v18, %v5142_v28  ;;  %v5255_v54 = vpop.f32.mrf.mxu1  ;;  %v359_v11 = vld [vmem:[%s6068_s28 + $0x5a8] sm:$0xff]  ;;  %v4524_v18 = vcombine.low %v342_v19, %v350_v39 }
 0x171   : > { %v5256_v29 = vadd.f32 %v5255_v54, %v5254_v9  ;;  %v5145_v33 = vpop.f32.mrf.mxu0  ;;  %v367_v28 = vld [vmem:[%s6068_s28 + $0x5e8] sm:$0xff] }
 0x172   : > { %v3102_v61 = vadd.f32 %v5144_v49, %v6388_v3  ;;  %v5257_v38 = vpop.f32.mrf.mxu1 }
 0x173   : > { %v5146_v1 = vpop.f32.mrf.mxu0 }
 0x174   : > { %v6702_v0 = vadd.f32 %v5256_v29, %v3102_v61  ;;  %v5147_v55 = vadd.f32 %v5146_v1, %v5145_v33  ;;  %v5258_v12 = vpop.f32.mrf.mxu1  ;;  %v4541_v29 = vcombine.high %v358_v6, %v366_v8 }
 0x175   : > { %v5259_v15 = vadd.f32 %v5258_v12, %v5257_v38  ;;  %v5148_v23 = vpop.f32.mrf.mxu0  ;;  %3494 = vmatmul.mubr.bf16.gmra.mxu0 %v4508_v45  ;;  %v4543_v45 = vcombine.high %v359_v11, %v367_v28 }
 0x176   : > { %v3105_v47 = vadd.f32 %v5147_v55, %v6393_v13  ;;  %v5260_v36 = vpop.f32.mrf.mxu1  ;;  %3655 = vmatmul.mubr.bf16.gmra.mxu1 %v4510_v50  ;;  %3501 = vmatprep.mubr.bf16.mxu0 %v4525_v58  ;;  %v4526_v13 = vcombine.low %v343_v56, %v351_v34  ;;  %v374_v56 = vld [vmem:[%s6068_s28 + $0x620] sm:$0xff] }
 0x177   : > { %v5149_v3 = vpop.f32.mrf.mxu0  ;;  %3662 = vmatprep.mubr.bf16.mxu1 %v4527_v46  ;;  %v382_v34 = vld [vmem:[%s6068_s28 + $0x660] sm:$0xff] }
 0x178   : > { %v6707_v25 = vadd.f32 %v5259_v15, %v3105_v47  ;;  %v5150_v31 = vadd.f32 %v5149_v3, %v5148_v23  ;;  %v5261_v21 = vpop.f32.mrf.mxu1  ;;  %v375_v15 = vld [vmem:[%s6068_s28 + $0x628] sm:$0xff]  ;;  %v4540_v3 = vcombine.low %v358_v6, %v366_v8 }
 0x179   : > { %v5262_v7 = vadd.f32 %v5261_v21, %v5260_v36  ;;  %v5151_v9 = vpop.f32.mrf.mxu0  ;;  %v383_v23 = vld [vmem:[%s6068_s28 + $0x668] sm:$0xff] }
 0x17a   : > { %v3110_v49 = vadd.f32 %v5150_v31, %v6398_v27  ;;  %v5263_v54 = vpop.f32.mrf.mxu1 }
 0x17b   : > { %v5152_v33 = vpop.f32.mrf.mxu0 }
 0x17c   : > { %v6712_v61 = vadd.f32 %v5262_v7, %v3110_v49  ;;  %v5153_v38 = vadd.f32 %v5152_v33, %v5151_v9  ;;  %v5264_v50 = vpop.f32.mrf.mxu1  ;;  %v4557_v7 = vcombine.high %v374_v56, %v382_v34 }
 0x17d   : > { %v5265_v58 = vadd.f32 %v5264_v50, %v5263_v54  ;;  %v5154_v1 = vpop.f32.mrf.mxu0  ;;  %3502 = vmatmul.mubr.bf16.gmra.mxu0 %v4524_v18  ;;  %v4559_v18 = vcombine.high %v375_v15, %v383_v23 }
 0x17e   : > { %v3113_v19 = vadd.f32 %v5153_v38, %v6403_v37  ;;  %v5266_v39 = vpop.f32.mrf.mxu1  ;;  %3663 = vmatmul.mubr.bf16.gmra.mxu1 %v4526_v13  ;;  %3509 = vmatprep.mubr.bf16.mxu0 %v4541_v29  ;;  %v4542_v37 = vcombine.low %v359_v11, %v367_v28  ;;  %v390_v11 = vld [vmem:[%s6068_s28 + $0x6a0] sm:$0xff] }
 0x17f   : > { %v5155_v27 = vpop.f32.mrf.mxu0  ;;  %3670 = vmatprep.mubr.bf16.mxu1 %v4543_v45  ;;  %v398_v28 = vld [vmem:[%s6068_s28 + $0x6e0] sm:$0xff] }
 0x180   : > { %v6717_v46 = vadd.f32 %v5265_v58, %v3113_v19  ;;  %v5156_v55 = vadd.f32 %v5155_v27, %v5154_v1  ;;  %v5267_v12 = vpop.f32.mrf.mxu1  ;;  %v391_v58 = vld [vmem:[%s6068_s28 + $0x6a8] sm:$0xff]  ;;  %v4556_v27 = vcombine.low %v374_v56, %v382_v34 }
 0x181   : > { %v5268_v47 = vadd.f32 %v5267_v12, %v5266_v39  ;;  %v5157_v36 = vpop.f32.mrf.mxu0  ;;  %v399_v1 = vld [vmem:[%s6068_s28 + $0x6e8] sm:$0xff] }
 0x182   : > { %v3118_v31 = vadd.f32 %v5156_v55, %v6408_v52  ;;  %v5269_v21 = vpop.f32.mrf.mxu1 }
 0x183   : > { %v5158_v9 = vpop.f32.mrf.mxu0 }
 0x184   : > { %v6722_v49 = vadd.f32 %v5268_v47, %v3118_v31  ;;  %v5159_v54 = vadd.f32 %v5158_v9, %v5157_v36  ;;  %v5270_v13 = vpop.f32.mrf.mxu1  ;;  %v4573_v47 = vcombine.high %v390_v11, %v398_v28 }
 0x185   : > { %v5271_v29 = vadd.f32 %v5270_v13, %v5269_v21  ;;  %v5160_v33 = vpop.f32.mrf.mxu0  ;;  %3510 = vmatmul.mubr.bf16.gmra.mxu0 %v4540_v3  ;;  %v4575_v3 = vcombine.high %v391_v58, %v399_v1 }
 0x186   : > { %v3121_v6 = vadd.f32 %v5159_v54, %v6413_v62  ;;  %v5272_v8 = vpop.f32.mrf.mxu1  ;;  %3671 = vmatmul.mubr.bf16.gmra.mxu1 %v4542_v37  ;;  %3517 = vmatprep.mubr.bf16.mxu0 %v4557_v7  ;;  %v4558_v62 = vcombine.low %v375_v15, %v383_v23  ;;  %v406_v15 = vld [vmem:[%s6068_s28 + $0x720] sm:$0xff] }
 0x187   : > { %v5161_v52 = vpop.f32.mrf.mxu0  ;;  %3678 = vmatprep.mubr.bf16.mxu1 %v4559_v18  ;;  %v414_v23 = vld [vmem:[%s6068_s28 + $0x760] sm:$0xff] }
 0x188   : > { %v6727_v45 = vadd.f32 %v5271_v29, %v3121_v6  ;;  %v5162_v38 = vadd.f32 %v5161_v52, %v5160_v33  ;;  %v5273_v50 = vpop.f32.mrf.mxu1  ;;  %v407_v29 = vld [vmem:[%s6068_s28 + $0x728] sm:$0xff]  ;;  %v4572_v52 = vcombine.low %v390_v11, %v398_v28 }
 0x189   : > { %v5274_v19 = vadd.f32 %v5273_v50, %v5272_v8  ;;  %v5163_v39 = vpop.f32.mrf.mxu0  ;;  %v415_v33 = vld [vmem:[%s6068_s28 + $0x768] sm:$0xff] }
 0x18a   : > { %v3126_v55 = vadd.f32 %v5162_v38, %v6418_v14  ;;  %v5275_v12 = vpop.f32.mrf.mxu1 }
 0x18b   : > { %v5164_v36 = vpop.f32.mrf.mxu0 }
 0x18c   : > { %v6732_v31 = vadd.f32 %v5274_v19, %v3126_v55  ;;  %v5165_v21 = vadd.f32 %v5164_v36, %v5163_v39  ;;  %v5276_v37 = vpop.f32.mrf.mxu1  ;;  %v4589_v19 = vcombine.high %v406_v15, %v414_v23 }
 0x18d   : > { %v5277_v7 = vadd.f32 %v5276_v37, %v5275_v12  ;;  %v5166_v9 = vpop.f32.mrf.mxu0  ;;  %3518 = vmatmul.mubr.bf16.gmra.mxu0 %v4556_v27  ;;  %v4591_v27 = vcombine.high %v407_v29, %v415_v33 }
 0x18e   : > { %v3129_v56 = vadd.f32 %v5165_v21, %v6423_v24  ;;  %v5278_v34 = vpop.f32.mrf.mxu1  ;;  %3679 = vmatmul.mubr.bf16.gmra.mxu1 %v4558_v62  ;;  %3525 = vmatprep.mubr.bf16.mxu0 %v4573_v47  ;;  %v4574_v24 = vcombine.low %v391_v58, %v399_v1  ;;  %v422_v58 = vld [vmem:[%s6068_s28 + $0x7a0] sm:$0xff] }
 0x18f   : > { %v5167_v14 = vpop.f32.mrf.mxu0  ;;  %3686 = vmatprep.mubr.bf16.mxu1 %v4575_v3  ;;  %v430_v1 = vld [vmem:[%s6068_s28 + $0x7e0] sm:$0xff] }
 0x190   : > { %v6737_v18 = vadd.f32 %v5277_v7, %v3129_v56  ;;  %v5168_v54 = vadd.f32 %v5167_v14, %v5166_v9  ;;  %v5279_v13 = vpop.f32.mrf.mxu1  ;;  %v423_v7 = vld [vmem:[%s6068_s28 + $0x7a8] sm:$0xff]  ;;  %v4588_v14 = vcombine.low %v406_v15, %v414_v23 }
 0x191   : > { %v5280_v6 = vadd.f32 %v5279_v13, %v5278_v34  ;;  %v5169_v8 = vpop.f32.mrf.mxu0  ;;  %v431_v9 = vld [vmem:[%s6068_s28 + $0x7e8] sm:$0xff] }
 0x192   : > { %v3134_v38 = vadd.f32 %v5168_v54, %v6428_v40  ;;  %v5281_v50 = vpop.f32.mrf.mxu1 }
 0x193   : > { %v5170_v39 = vpop.f32.mrf.mxu0 }
 0x194   : > { %v6742_v55 = vadd.f32 %v5280_v6, %v3134_v38  ;;  %v5171_v12 = vadd.f32 %v5170_v39, %v5169_v8  ;;  %v5282_v62 = vpop.f32.mrf.mxu1  ;;  %v4605_v6 = vcombine.high %v422_v58, %v430_v1 }
 0x195   : > { %v5283_v47 = vadd.f32 %v5282_v62, %v5281_v50  ;;  %v5172_v36 = vpop.f32.mrf.mxu0  ;;  %3526 = vmatmul.mubr.bf16.gmra.mxu0 %v4572_v52  ;;  %v4607_v52 = vcombine.high %v423_v7, %v431_v9 }
 0x196   : > { %v3137_v11 = vadd.f32 %v5171_v12, %v6433_v51  ;;  %v5284_v28 = vpop.f32.mrf.mxu1  ;;  %3687 = vmatmul.mubr.bf16.gmra.mxu1 %v4574_v24  ;;  %3533 = vmatprep.mubr.bf16.mxu0 %v4589_v19  ;;  %v4590_v51 = vcombine.low %v407_v29, %v415_v33  ;;  %v184_v29 = vld [vmem:[%s6068_s28 + $0x30] sm:$0xff] }
 0x197   : > { %v5173_v40 = vpop.f32.mrf.mxu0  ;;  %3694 = vmatprep.mubr.bf16.mxu1 %v4591_v27  ;;  %v192_v33 = vld [vmem:[%s6068_s28 + $0x70] sm:$0xff] }
 0x198   : > { %v6747_v3 = vadd.f32 %v5283_v47, %v3137_v11  ;;  %v5174_v21 = vadd.f32 %v5173_v40, %v5172_v36  ;;  %v5285_v37 = vpop.f32.mrf.mxu1  ;;  %v185_v47 = vld [vmem:[%s6068_s28 + $0x38] sm:$0xff]  ;;  %v4604_v40 = vcombine.low %v422_v58, %v430_v1 }
 0x199   : > { %v5286_v56 = vadd.f32 %v5285_v37, %v5284_v28  ;;  %v5175_v34 = vpop.f32.mrf.mxu0  ;;  %v193_v36 = vld [vmem:[%s6068_s28 + $0x78] sm:$0xff] }
 0x19a   : > { %v3142_v54 = vadd.f32 %v5174_v21, %v6438_v4  ;;  %v5287_v13 = vpop.f32.mrf.mxu1 }
 0x19b   : > { %v5176_v8 = vpop.f32.mrf.mxu0 }
 0x19c   : > { %v6752_v38 = vadd.f32 %v5286_v56, %v3142_v54  ;;  %v5177_v50 = vadd.f32 %v5176_v8, %v5175_v34  ;;  %v5288_v24 = vpop.f32.mrf.mxu1  ;;  %v4369_v56 = vcombine.high %v184_v29, %v192_v33 }
 0x19d   : > { %v5289_v19 = vadd.f32 %v5288_v24, %v5287_v13  ;;  %v5178_v39 = vpop.f32.mrf.mxu0  ;;  %3534 = vmatmul.mubr.bf16.gmra.mxu0 %v4588_v14  ;;  %v4371_v14 = vcombine.high %v185_v47, %v193_v36 }
 0x19e   : > { %v3145_v15 = vadd.f32 %v5177_v50, %v6443_v16  ;;  %v5290_v23 = vpop.f32.mrf.mxu1  ;;  %3695 = vmatmul.mubr.bf16.gmra.mxu1 %v4590_v51  ;;  %3541 = vmatprep.mubr.bf16.mxu0 %v4605_v6  ;;  %v4606_v16 = vcombine.low %v423_v7, %v431_v9  ;;  %v200_v7 = vld [vmem:[%s6068_s28 + $0xb0] sm:$0xff] }
 0x19f   : > { %v5179_v4 = vpop.f32.mrf.mxu0  ;;  %3702 = vmatprep.mubr.bf16.mxu1 %v4607_v52  ;;  %v208_v9 = vld [vmem:[%s6068_s28 + $0xf0] sm:$0xff] }
 0x1a0   : > { %v6757_v27 = vadd.f32 %v5289_v19, %v3145_v15  ;;  %v5180_v12 = vadd.f32 %v5179_v4, %v5178_v39  ;;  %v5291_v62 = vpop.f32.mrf.mxu1  ;;  %v201_v19 = vld [vmem:[%s6068_s28 + $0xb8] sm:$0xff]  ;;  %v4368_v4 = vcombine.low %v184_v29, %v192_v33 }
 0x1a1   : > { %v5292_v11 = vadd.f32 %v5291_v62, %v5290_v23  ;;  %v5181_v28 = vpop.f32.mrf.mxu0  ;;  %v209_v39 = vld [vmem:[%s6068_s28 + $0xf8] sm:$0xff] }
 0x1a2   : > { %v3150_v21 = vadd.f32 %v5180_v12, %v6448_v32  ;;  %v5293_v37 = vpop.f32.mrf.mxu1 }
 0x1a3   : > { %v5182_v34 = vpop.f32.mrf.mxu0 }
 0x1a4   : > { %v6762_v54 = vadd.f32 %v5292_v11, %v3150_v21  ;;  %v5183_v13 = vadd.f32 %v5182_v34, %v5181_v28  ;;  %v5294_v51 = vpop.f32.mrf.mxu1  ;;  %v4385_v11 = vcombine.high %v200_v7, %v208_v9 }
 0x1a5   : > { %v5295_v6 = vadd.f32 %v5294_v51, %v5293_v37  ;;  %v5184_v8 = vpop.f32.mrf.mxu0  ;;  %3542 = vmatmul.mubr.bf16.gmra.mxu0 %v4604_v40  ;;  %v4387_v40 = vcombine.high %v201_v19, %v209_v39 }
 0x1a6   : > { %v3153_v58 = vadd.f32 %v5183_v13, %v6451_v42  ;;  %v5296_v1 = vpop.f32.mrf.mxu1  ;;  %3703 = vmatmul.mubr.bf16.gmra.mxu1 %v4606_v16  ;;  %3743 = vmatprep.mubr.bf16.mxu0 %v4369_v56  ;;  %v4370_v42 = vcombine.low %v185_v47, %v193_v36  ;;  %v216_v47 = vld [vmem:[%s6068_s28 + $0x130] sm:$0xff] }
 0x1a7   : > { %v5185_v32 = vpop.f32.mrf.mxu0  ;;  %3904 = vmatprep.mubr.bf16.mxu1 %v4371_v14  ;;  %v224_v36 = vld [vmem:[%s6068_s28 + $0x170] sm:$0xff] }
 0x1a8   : > { %v6767_v52 = vadd.f32 %v5295_v6, %v3153_v58  ;;  %v5186_v50 = vadd.f32 %v5185_v32, %v5184_v8  ;;  %v5297_v24 = vpop.f32.mrf.mxu1  ;;  %v217_v6 = vld [vmem:[%s6068_s28 + $0x138] sm:$0xff]  ;;  %v4384_v32 = vcombine.low %v200_v7, %v208_v9 }
 0x1a9   : > { %v5298_v15 = vadd.f32 %v5297_v24, %v5296_v1  ;;  %v5187_v23 = vpop.f32.mrf.mxu0  ;;  %v225_v8 = vld [vmem:[%s6068_s28 + $0x178] sm:$0xff] }
 0x1aa   : > { %v3158_v12 = vadd.f32 %v5186_v50, %v6474_v63  ;;  %v5299_v62 = vpop.f32.mrf.mxu1 }
 0x1ab   : > { %v5188_v28 = vpop.f32.mrf.mxu0 }
 0x1ac   : > { %v6772_v21 = vadd.f32 %v5298_v15, %v3158_v12  ;;  %v5189_v37 = vadd.f32 %v5188_v28, %v5187_v23  ;;  %v5300_v16 = vpop.f32.mrf.mxu1  ;;  %v4401_v15 = vcombine.high %v216_v47, %v224_v36 }
 0x1ad   : > { %v5301_v56 = vadd.f32 %v5300_v16, %v5299_v62  ;;  %v5190_v34 = vpop.f32.mrf.mxu0  ;;  %3744 = vmatmul.mubr.bf16.vlgmr.msra.gmra.mxu0 %v4368_v4  ;;  %v4403_v4 = vcombine.high %v217_v6, %v225_v8 }
 0x1ae   : > { %v3161_v29 = vadd.f32 %v5189_v37, %v6500_v20  ;;  %v5302_v33 = vpop.f32.mrf.mxu1  ;;  %3905 = vmatmul.mubr.bf16.vlgmr.msra.gmra.mxu1 %v4370_v42  ;;  %3751 = vmatprep.mubr.bf16.mxu0 %v4385_v11  ;;  %v4386_v20 = vcombine.low %v201_v19, %v209_v39  ;;  %v232_v19 = vld [vmem:[%s6068_s28 + $0x1b0] sm:$0xff] }
 0x1af   : > { %v5191_v63 = vpop.f32.mrf.mxu0  ;;  %3912 = vmatprep.mubr.bf16.mxu1 %v4387_v40  ;;  %v240_v39 = vld [vmem:[%s6068_s28 + $0x1f0] sm:$0xff] }
 0x1b0   : > { %v6777_v14 = vadd.f32 %v5301_v56, %v3161_v29  ;;  %v5192_v13 = vadd.f32 %v5191_v63, %v5190_v34  ;;  %v5303_v51 = vpop.f32.mrf.mxu1  ;;  %v233_v56 = vld [vmem:[%s6068_s28 + $0x1b8] sm:$0xff]  ;;  %v4400_v63 = vcombine.low %v216_v47, %v224_v36 }
 0x1b1   : > { %v5304_v58 = vadd.f32 %v5303_v51, %v5302_v33  ;;  %v5193_v1 = vpop.f32.mrf.mxu0  ;;  %v241_v34 = vld [vmem:[%s6068_s28 + $0x1f8] sm:$0xff] }
 0x1b2   : > { %v3166_v50 = vadd.f32 %v5192_v13, %v6523_v41  ;;  %v5305_v24 = vpop.f32.mrf.mxu1 }
 0x1b3   : > { %v5194_v23 = vpop.f32.mrf.mxu0 }
 0x1b4   : > { %v6782_v12 = vadd.f32 %v5304_v58, %v3166_v50  ;;  %v5195_v62 = vadd.f32 %v5194_v23, %v5193_v1  ;;  %v5306_v42 = vpop.f32.mrf.mxu1  ;;  %v4417_v58 = vcombine.high %v232_v19, %v240_v39 }
 0x1b5   : > { %v5307_v11 = vadd.f32 %v5306_v42, %v5305_v24  ;;  %v5196_v28 = vpop.f32.mrf.mxu0  ;;  %3752 = vmatmul.mubr.bf16.gmra.mxu0 %v4384_v32  ;;  %v4419_v32 = vcombine.high %v233_v56, %v241_v34 }
 0x1b6   : > { %v3169_v7 = vadd.f32 %v5195_v62, %v6547_v60  ;;  %v5308_v9 = vpop.f32.mrf.mxu1  ;;  %3913 = vmatmul.mubr.bf16.gmra.mxu1 %v4386_v20  ;;  %3759 = vmatprep.mubr.bf16.mxu0 %v4401_v15  ;;  %v4402_v60 = vcombine.low %v217_v6, %v225_v8  ;;  %v248_v6 = vld [vmem:[%s6068_s28 + $0x230] sm:$0xff] }
 0x1b7   : > { %v5197_v41 = vpop.f32.mrf.mxu0  ;;  %3920 = vmatprep.mubr.bf16.mxu1 %v4403_v4  ;;  %v256_v8 = vld [vmem:[%s6068_s28 + $0x270] sm:$0xff] }
 0x1b8   : > { %v6787_v40 = vadd.f32 %v5307_v11, %v3169_v7  ;;  %v5198_v37 = vadd.f32 %v5197_v41, %v5196_v28  ;;  %v5309_v16 = vpop.f32.mrf.mxu1  ;;  %v249_v11 = vld [vmem:[%s6068_s28 + $0x238] sm:$0xff]  ;;  %v4416_v41 = vcombine.low %v232_v19, %v240_v39 }
 0x1b9   : > { %v5310_v29 = vadd.f32 %v5309_v16, %v5308_v9  ;;  %v5199_v33 = vpop.f32.mrf.mxu0  ;;  %v257_v28 = vld [vmem:[%s6068_s28 + $0x278] sm:$0xff] }
 0x1ba   : > { %v3174_v13 = vadd.f32 %v5198_v37, %v6573_v17  ;;  %v5311_v51 = vpop.f32.mrf.mxu1 }
 0x1bb   : > { %v5200_v1 = vpop.f32.mrf.mxu0 }
 0x1bc   : > { %v6792_v50 = vadd.f32 %v5310_v29, %v3174_v13  ;;  %v5201_v24 = vadd.f32 %v5200_v1, %v5199_v33  ;;  %v5312_v20 = vpop.f32.mrf.mxu1  ;;  %v4433_v29 = vcombine.high %v248_v6, %v256_v8 }
 0x1bd   : > { %v5313_v15 = vadd.f32 %v5312_v20, %v5311_v51  ;;  %v5202_v23 = vpop.f32.mrf.mxu0  ;;  %3760 = vmatmul.mubr.bf16.gmra.mxu0 %v4400_v63  ;;  %v4435_v63 = vcombine.high %v249_v11, %v257_v28 }
 0x1be   : > { %v3177_v47 = vadd.f32 %v5201_v24, %v6597_v43  ;;  %v5314_v36 = vpop.f32.mrf.mxu1  ;;  %3921 = vmatmul.mubr.bf16.gmra.mxu1 %v4402_v60  ;;  %3767 = vmatprep.mubr.bf16.mxu0 %v4417_v58  ;;  %v4418_v43 = vcombine.low %v233_v56, %v241_v34  ;;  %v264_v56 = vld [vmem:[%s6068_s28 + $0x2b0] sm:$0xff] }
 0x1bf   : > { %v5203_v17 = vpop.f32.mrf.mxu0  ;;  %3928 = vmatprep.mubr.bf16.mxu1 %v4419_v32  ;;  %v272_v34 = vld [vmem:[%s6068_s28 + $0x2f0] sm:$0xff] }
 0x1c0   : > { %v6797_v4 = vadd.f32 %v5313_v15, %v3177_v47  ;;  %v5204_v62 = vadd.f32 %v5203_v17, %v5202_v23  ;;  %v5315_v42 = vpop.f32.mrf.mxu1  ;;  %v265_v15 = vld [vmem:[%s6068_s28 + $0x2b8] sm:$0xff]  ;;  %v4432_v17 = vcombine.low %v248_v6, %v256_v8 }
 0x1c1   : > { %v5316_v7 = vadd.f32 %v5315_v42, %v5314_v36  ;;  %v5205_v9 = vpop.f32.mrf.mxu0  ;;  %v273_v23 = vld [vmem:[%s6068_s28 + $0x2f8] sm:$0xff] }
 0x1c2   : > { %v3182_v37 = vadd.f32 %v5204_v62, %v6623_v57  ;;  %v5317_v16 = vpop.f32.mrf.mxu1 }
 0x1c3   : > { %v5206_v33 = vpop.f32.mrf.mxu0 }
 0x1c4   : > { %v6802_v13 = vadd.f32 %v5316_v7, %v3182_v37  ;;  %v5207_v51 = vadd.f32 %v5206_v33, %v5205_v9  ;;  %v5318_v60 = vpop.f32.mrf.mxu1  ;;  %v4449_v7 = vcombine.high %v264_v56, %v272_v34 }
 0x1c5   : > { %v5319_v58 = vadd.f32 %v5318_v60, %v5317_v16  ;;  %v5208_v1 = vpop.f32.mrf.mxu0  ;;  %3768 = vmatmul.mubr.bf16.gmra.mxu0 %v4416_v41  ;;  %v4451_v41 = vcombine.high %v265_v15, %v273_v23 }
 0x1c6   : > { %v3185_v19 = vadd.f32 %v5207_v51, %v6640_v26  ;;  %v5320_v39 = vpop.f32.mrf.mxu1  ;;  %3929 = vmatmul.mubr.bf16.gmra.mxu1 %v4418_v43  ;;  %3775 = vmatprep.mubr.bf16.mxu0 %v4433_v29  ;;  %v4434_v26 = vcombine.low %v249_v11, %v257_v28  ;;  %v280_v11 = vld [vmem:[%s6068_s28 + $0x330] sm:$0xff] }
 0x1c7   : > { %v5209_v57 = vpop.f32.mrf.mxu0  ;;  %3936 = vmatprep.mubr.bf16.mxu1 %v4435_v63  ;;  %v288_v28 = vld [vmem:[%s6068_s28 + $0x370] sm:$0xff] }
 0x1c8   : > { %v6807_v32 = vadd.f32 %v5319_v58, %v3185_v19  ;;  %v5210_v24 = vadd.f32 %v5209_v57, %v5208_v1  ;;  %v5321_v20 = vpop.f32.mrf.mxu1  ;;  %v281_v58 = vld [vmem:[%s6068_s28 + $0x338] sm:$0xff]  ;;  %v4448_v57 = vcombine.low %v264_v56, %v272_v34 }
 0x1c9   : > { %v5322_v47 = vadd.f32 %v5321_v20, %v5320_v39  ;;  %v5211_v36 = vpop.f32.mrf.mxu0  ;;  %v289_v1 = vld [vmem:[%s6068_s28 + $0x378] sm:$0xff] }
 0x1ca   : > { %v3190_v62 = vadd.f32 %v5210_v24, %v6652_v53  ;;  %v5323_v42 = vpop.f32.mrf.mxu1 }
 0x1cb   : > { %v5212_v9 = vpop.f32.mrf.mxu0 }
 0x1cc   : > { %v6812_v37 = vadd.f32 %v5322_v47, %v3190_v62  ;;  %v5213_v16 = vadd.f32 %v5212_v9, %v5211_v36  ;;  %v5324_v43 = vpop.f32.mrf.mxu1  ;;  %v4465_v47 = vcombine.high %v280_v11, %v288_v28 }
 0x1cd   : > { %v5325_v29 = vadd.f32 %v5324_v43, %v5323_v42  ;;  %v5214_v33 = vpop.f32.mrf.mxu0  ;;  %3776 = vmatmul.mubr.bf16.gmra.mxu0 %v4432_v17  ;;  %v4467_v17 = vcombine.high %v281_v58, %v289_v1 }
 0x1ce   : > { %v3193_v6 = vadd.f32 %v5213_v16, %v6657_v2  ;;  %v5326_v8 = vpop.f32.mrf.mxu1  ;;  %3937 = vmatmul.mubr.bf16.gmra.mxu1 %v4434_v26  ;;  %3783 = vmatprep.mubr.bf16.mxu0 %v4449_v7  ;;  %v4450_v2 = vcombine.low %v265_v15, %v273_v23  ;;  %v296_v15 = vld [vmem:[%s6068_s28 + $0x3b0] sm:$0xff] }
 0x1cf   : > { %v5215_v53 = vpop.f32.mrf.mxu0  ;;  %3944 = vmatprep.mubr.bf16.mxu1 %v4451_v41  ;;  %v304_v23 = vld [vmem:[%s6068_s28 + $0x3f0] sm:$0xff] }
 0x1d0   : > { %v6817_v63 = vadd.f32 %v5325_v29, %v3193_v6  ;;  %v5216_v51 = vadd.f32 %v5215_v53, %v5214_v33  ;;  %v5327_v60 = vpop.f32.mrf.mxu1  ;;  %v297_v29 = vld [vmem:[%s6068_s28 + $0x3b8] sm:$0xff]  ;;  %v4464_v53 = vcombine.low %v280_v11, %v288_v28 }
 0x1d1   : > { %v5328_v19 = vadd.f32 %v5327_v60, %v5326_v8  ;;  %v5217_v39 = vpop.f32.mrf.mxu0  ;;  %v305_v33 = vld [vmem:[%s6068_s28 + $0x3f8] sm:$0xff] }
 0x1d2   : > { %v3198_v24 = vadd.f32 %v5216_v51, %v6662_v22  ;;  %v5329_v20 = vpop.f32.mrf.mxu1 }
 0x1d3   : > { %v5218_v36 = vpop.f32.mrf.mxu0 }
 0x1d4   : > { %v6822_v62 = vadd.f32 %v5328_v19, %v3198_v24  ;;  %v5219_v42 = vadd.f32 %v5218_v36, %v5217_v39  ;;  %v5330_v26 = vpop.f32.mrf.mxu1  ;;  %v4481_v19 = vcombine.high %v296_v15, %v304_v23 }
 0x1d5   : > { %v5331_v7 = vadd.f32 %v5330_v26, %v5329_v20  ;;  %v5220_v9 = vpop.f32.mrf.mxu0  ;;  %3784 = vmatmul.mubr.bf16.gmra.mxu0 %v4448_v57  ;;  %v4483_v57 = vcombine.high %v297_v29, %v305_v33 }
 0x1d6   : > { %v3201_v56 = vadd.f32 %v5219_v42, %v6667_v35  ;;  %v5332_v34 = vpop.f32.mrf.mxu1  ;;  %3945 = vmatmul.mubr.bf16.gmra.mxu1 %v4450_v2  ;;  %3791 = vmatprep.mubr.bf16.mxu0 %v4465_v47  ;;  %v4466_v35 = vcombine.low %v281_v58, %v289_v1  ;;  %v312_v58 = vld [vmem:[%s6068_s28 + $0x430] sm:$0xff] }
 0x1d7   : > { %v5221_v22 = vpop.f32.mrf.mxu0  ;;  %3952 = vmatprep.mubr.bf16.mxu1 %v4467_v17  ;;  %v320_v1 = vld [vmem:[%s6068_s28 + $0x470] sm:$0xff] }
 0x1d8   : > { %v6827_v41 = vadd.f32 %v5331_v7, %v3201_v56  ;;  %v5222_v16 = vadd.f32 %v5221_v22, %v5220_v9  ;;  %v5333_v43 = vpop.f32.mrf.mxu1  ;;  %v313_v7 = vld [vmem:[%s6068_s28 + $0x438] sm:$0xff]  ;;  %v4480_v22 = vcombine.low %v296_v15, %v304_v23 }
 0x1d9   : > { %v5334_v6 = vadd.f32 %v5333_v43, %v5332_v34  ;;  %v5223_v8 = vpop.f32.mrf.mxu0  ;;  %v321_v9 = vld [vmem:[%s6068_s28 + $0x478] sm:$0xff] }
 0x1da   : > { %v3206_v51 = vadd.f32 %v5222_v16, %v6672_v5  ;;  %v5335_v60 = vpop.f32.mrf.mxu1 }
 0x1db   : > { %v5224_v39 = vpop.f32.mrf.mxu0 }
 0x1dc   : > { %v6832_v24 = vadd.f32 %v5334_v6, %v3206_v51  ;;  %v5225_v20 = vadd.f32 %v5224_v39, %v5223_v8  ;;  %v5336_v2 = vpop.f32.mrf.mxu1  ;;  %v4497_v6 = vcombine.high %v312_v58, %v320_v1 }
 0x1dd   : > { %v5337_v47 = vadd.f32 %v5336_v2, %v5335_v60  ;;  %v5226_v36 = vpop.f32.mrf.mxu0  ;;  %3792 = vmatmul.mubr.bf16.gmra.mxu0 %v4464_v53  ;;  %v4499_v53 = vcombine.high %v313_v7, %v321_v9 }
 0x1de   : > { %v3209_v11 = vadd.f32 %v5225_v20, %v6677_v10  ;;  %v5338_v28 = vpop.f32.mrf.mxu1  ;;  %3953 = vmatmul.mubr.bf16.gmra.mxu1 %v4466_v35  ;;  %3799 = vmatprep.mubr.bf16.mxu0 %v4481_v19  ;;  %v4482_v10 = vcombine.low %v297_v29, %v305_v33  ;;  %v328_v29 = vld [vmem:[%s6068_s28 + $0x4b0] sm:$0xff] }
 0x1df   : > { %v5227_v5 = vpop.f32.mrf.mxu0  ;;  %3960 = vmatprep.mubr.bf16.mxu1 %v4483_v57  ;;  %v336_v33 = vld [vmem:[%s6068_s28 + $0x4f0] sm:$0xff] }
 0x1e0   : > { %v6837_v17 = vadd.f32 %v5337_v47, %v3209_v11  ;;  %v5228_v42 = vadd.f32 %v5227_v5, %v5226_v36  ;;  %v5339_v26 = vpop.f32.mrf.mxu1  ;;  %v329_v47 = vld [vmem:[%s6068_s28 + $0x4b8] sm:$0xff]  ;;  %v4496_v5 = vcombine.low %v312_v58, %v320_v1 }
 0x1e1   : > { %v5340_v56 = vadd.f32 %v5339_v26, %v5338_v28  ;;  %v5229_v34 = vpop.f32.mrf.mxu0  ;;  %v337_v36 = vld [vmem:[%s6068_s28 + $0x4f8] sm:$0xff] }
 0x1e2   : > { %v3214_v16 = vadd.f32 %v5228_v42, %v6682_v48  ;;  %v5341_v43 = vpop.f32.mrf.mxu1 }
 0x1e3   : > { %v5230_v8 = vpop.f32.mrf.mxu0 }
 0x1e4   : > { %v6842_v51 = vadd.f32 %v5340_v56, %v3214_v16  ;;  %v5231_v60 = vadd.f32 %v5230_v8, %v5229_v34  ;;  %v5342_v35 = vpop.f32.mrf.mxu1  ;;  %v4513_v56 = vcombine.high %v328_v29, %v336_v33 }
 0x1e5   : > { %v5343_v19 = vadd.f32 %v5342_v35, %v5341_v43  ;;  %v5232_v39 = vpop.f32.mrf.mxu0  ;;  %3800 = vmatmul.mubr.bf16.gmra.mxu0 %v4480_v22  ;;  %v4515_v22 = vcombine.high %v329_v47, %v337_v36 }
 0x1e6   : > { %v3217_v15 = vadd.f32 %v5231_v60, %v6687_v59  ;;  %v5344_v23 = vpop.f32.mrf.mxu1  ;;  %3961 = vmatmul.mubr.bf16.gmra.mxu1 %v4482_v10  ;;  %3807 = vmatprep.mubr.bf16.mxu0 %v4497_v6  ;;  %v4498_v59 = vcombine.low %v313_v7, %v321_v9  ;;  %v344_v7 = vld [vmem:[%s6068_s28 + $0x530] sm:$0xff] }
 0x1e7   : > { %v5233_v48 = vpop.f32.mrf.mxu0  ;;  %3968 = vmatprep.mubr.bf16.mxu1 %v4499_v53  ;;  %v352_v9 = vld [vmem:[%s6068_s28 + $0x570] sm:$0xff] }
 0x1e8   : > { %v6847_v57 = vadd.f32 %v5343_v19, %v3217_v15  ;;  %v5234_v20 = vadd.f32 %v5233_v48, %v5232_v39  ;;  %v5345_v2 = vpop.f32.mrf.mxu1  ;;  %v345_v19 = vld [vmem:[%s6068_s28 + $0x538] sm:$0xff]  ;;  %v4512_v48 = vcombine.low %v328_v29, %v336_v33 }
 0x1e9   : > { %v5346_v11 = vadd.f32 %v5345_v2, %v5344_v23  ;;  %v5235_v28 = vpop.f32.mrf.mxu0  ;;  %v353_v39 = vld [vmem:[%s6068_s28 + $0x578] sm:$0xff] }
 0x1ea   : > { %v3222_v42 = vadd.f32 %v5234_v20, %v6692_v30  ;;  %v5347_v26 = vpop.f32.mrf.mxu1 }
 0x1eb   : > { %v5236_v34 = vpop.f32.mrf.mxu0 }
 0x1ec   : > { %v6852_v16 = vadd.f32 %v5346_v11, %v3222_v42  ;;  %v5237_v43 = vadd.f32 %v5236_v34, %v5235_v28  ;;  %v5348_v10 = vpop.f32.mrf.mxu1  ;;  %v4529_v11 = vcombine.high %v344_v7, %v352_v9 }
 0x1ed   : > { %v5349_v6 = vadd.f32 %v5348_v10, %v5347_v26  ;;  %v5366_v8 = vpop.f32.mrf.mxu0  ;;  %3808 = vmatmul.mubr.bf16.gmra.mxu0 %v4496_v5  ;;  %v4531_v5 = vcombine.high %v345_v19, %v353_v39 }
 0x1ee   : > { %v3225_v58 = vadd.f32 %v5237_v43, %v6697_v44  ;;  %v5478_v1 = vpop.f32.mrf.mxu1  ;;  %3969 = vmatmul.mubr.bf16.gmra.mxu1 %v4498_v59  ;;  %3815 = vmatprep.mubr.bf16.mxu0 %v4513_v56  ;;  %v4514_v44 = vcombine.low %v329_v47, %v337_v36  ;;  %v360_v47 = vld [vmem:[%s6068_s28 + $0x5b0] sm:$0xff] }
 0x1ef   : > { %v5367_v30 = vpop.f32.mrf.mxu0  ;;  %3976 = vmatprep.mubr.bf16.mxu1 %v4515_v22  ;;  %v368_v36 = vld [vmem:[%s6068_s28 + $0x5f0] sm:$0xff] }
 0x1f0   : > { %v6857_v53 = vadd.f32 %v5349_v6, %v3225_v58  ;;  %v5368_v60 = vadd.f32 %v5367_v30, %v5366_v8  ;;  %v5479_v35 = vpop.f32.mrf.mxu1  ;;  %v361_v6 = vld [vmem:[%s6068_s28 + $0x5b8] sm:$0xff]  ;;  %v4528_v30 = vcombine.low %v344_v7, %v352_v9 }
 0x1f1   : > { %v5480_v15 = vadd.f32 %v5479_v35, %v5478_v1  ;;  %v5369_v23 = vpop.f32.mrf.mxu0  ;;  %v369_v8 = vld [vmem:[%s6068_s28 + $0x5f8] sm:$0xff] }
 0x1f2   : > { %v3424_v20 = vadd.f32 %v5368_v60, %v6702_v0  ;;  %v5481_v2 = vpop.f32.mrf.mxu1 }
 0x1f3   : > { %v5370_v28 = vpop.f32.mrf.mxu0 }
 0x1f4   : > { %v6862_v42 = vadd.f32 %v5480_v15, %v3424_v20  ;;  %v5371_v26 = vadd.f32 %v5370_v28, %v5369_v23  ;;  %v5482_v59 = vpop.f32.mrf.mxu1  ;;  %v4545_v15 = vcombine.high %v360_v47, %v368_v36 }
 0x1f5   : > { %v5483_v56 = vadd.f32 %v5482_v59, %v5481_v2  ;;  %v5372_v34 = vpop.f32.mrf.mxu0  ;;  %3816 = vmatmul.mubr.bf16.gmra.mxu0 %v4512_v48  ;;  %v4547_v48 = vcombine.high %v361_v6, %v369_v8 }
 0x1f6   : > { %v3427_v29 = vadd.f32 %v5371_v26, %v6707_v25  ;;  %v5484_v33 = vpop.f32.mrf.mxu1  ;;  %3977 = vmatmul.mubr.bf16.gmra.mxu1 %v4514_v44  ;;  %3823 = vmatprep.mubr.bf16.mxu0 %v4529_v11  ;;  %v4530_v25 = vcombine.low %v345_v19, %v353_v39  ;;  %v376_v19 = vld [vmem:[%s6068_s28 + $0x630] sm:$0xff] }
 0x1f7   : > { %v5373_v0 = vpop.f32.mrf.mxu0  ;;  %3984 = vmatprep.mubr.bf16.mxu1 %v4531_v5  ;;  %v384_v39 = vld [vmem:[%s6068_s28 + $0x670] sm:$0xff] }
 0x1f8   : > { %v6867_v22 = vadd.f32 %v5483_v56, %v3427_v29  ;;  %v5374_v43 = vadd.f32 %v5373_v0, %v5372_v34  ;;  %v5485_v10 = vpop.f32.mrf.mxu1  ;;  %v377_v56 = vld [vmem:[%s6068_s28 + $0x638] sm:$0xff]  ;;  %v4544_v0 = vcombine.low %v360_v47, %v368_v36 }
 0x1f9   : > { %v5486_v58 = vadd.f32 %v5485_v10, %v5484_v33  ;;  %v5375_v1 = vpop.f32.mrf.mxu0  ;;  %v385_v34 = vld [vmem:[%s6068_s28 + $0x678] sm:$0xff] }
 0x1fa   : > { %v3432_v60 = vadd.f32 %v5374_v43, %v6712_v61  ;;  %v5487_v35 = vpop.f32.mrf.mxu1 }
 0x1fb   : > { %v5376_v23 = vpop.f32.mrf.mxu0 }
 0x1fc   : > { %v6872_v20 = vadd.f32 %v5486_v58, %v3432_v60  ;;  %v5377_v2 = vadd.f32 %v5376_v23, %v5375_v1  ;;  %v5488_v44 = vpop.f32.mrf.mxu1  ;;  %v4561_v58 = vcombine.high %v376_v19, %v384_v39 }
 0x1fd   : > { %v5489_v11 = vadd.f32 %v5488_v44, %v5487_v35  ;;  %v5378_v28 = vpop.f32.mrf.mxu0  ;;  %3824 = vmatmul.mubr.bf16.gmra.mxu0 %v4528_v30  ;;  %v4563_v30 = vcombine.high %v377_v56, %v385_v34 }
 0x1fe   : > { %v3435_v7 = vadd.f32 %v5377_v2, %v6717_v46  ;;  %v5490_v9 = vpop.f32.mrf.mxu1  ;;  %3985 = vmatmul.mubr.bf16.gmra.mxu1 %v4530_v25  ;;  %3831 = vmatprep.mubr.bf16.mxu0 %v4545_v15  ;;  %v4546_v46 = vcombine.low %v361_v6, %v369_v8  ;;  %v392_v6 = vld [vmem:[%s6068_s28 + $0x6b0] sm:$0xff] }
 0x1ff   : > { %v5379_v61 = vpop.f32.mrf.mxu0  ;;  %3992 = vmatprep.mubr.bf16.mxu1 %v4547_v48  ;;  %v400_v8 = vld [vmem:[%s6068_s28 + $0x6f0] sm:$0xff] }
 0x200   : > { %v6877_v5 = vadd.f32 %v5489_v11, %v3435_v7  ;;  %v5380_v26 = vadd.f32 %v5379_v61, %v5378_v28  ;;  %v5491_v59 = vpop.f32.mrf.mxu1  ;;  %v393_v11 = vld [vmem:[%s6068_s28 + $0x6b8] sm:$0xff]  ;;  %v4560_v61 = vcombine.low %v376_v19, %v384_v39 }
 0x201   : > { %v5492_v29 = vadd.f32 %v5491_v59, %v5490_v9  ;;  %v5381_v33 = vpop.f32.mrf.mxu0  ;;  %v401_v28 = vld [vmem:[%s6068_s28 + $0x6f8] sm:$0xff] }
 0x202   : > { %v3440_v43 = vadd.f32 %v5380_v26, %v6722_v49  ;;  %v5493_v10 = vpop.f32.mrf.mxu1 }
 0x203   : > { %v5382_v1 = vpop.f32.mrf.mxu0 }
 0x204   : > { %v6882_v60 = vadd.f32 %v5492_v29, %v3440_v43  ;;  %v5383_v35 = vadd.f32 %v5382_v1, %v5381_v33  ;;  %v5494_v25 = vpop.f32.mrf.mxu1  ;;  %v4577_v29 = vcombine.high %v392_v6, %v400_v8 }
 0x205   : > { %v5495_v15 = vadd.f32 %v5494_v25, %v5493_v10  ;;  %v5384_v23 = vpop.f32.mrf.mxu0  ;;  %3832 = vmatmul.mubr.bf16.gmra.mxu0 %v4544_v0  ;;  %v4579_v0 = vcombine.high %v393_v11, %v401_v28 }
 0x206   : > { %v3443_v47 = vadd.f32 %v5383_v35, %v6727_v45  ;;  %v5496_v36 = vpop.f32.mrf.mxu1  ;;  %3993 = vmatmul.mubr.bf16.gmra.mxu1 %v4546_v46  ;;  %3839 = vmatprep.mubr.bf16.mxu0 %v4561_v58  ;;  %v4562_v45 = vcombine.low %v377_v56, %v385_v34  ;;  %v408_v56 = vld [vmem:[%s6068_s28 + $0x730] sm:$0xff] }
 0x207   : > { %v5385_v49 = vpop.f32.mrf.mxu0  ;;  %4000 = vmatprep.mubr.bf16.mxu1 %v4563_v30  ;;  %v416_v34 = vld [vmem:[%s6068_s28 + $0x770] sm:$0xff] }
 0x208   : > { %v6887_v48 = vadd.f32 %v5495_v15, %v3443_v47  ;;  %v5386_v2 = vadd.f32 %v5385_v49, %v5384_v23  ;;  %v5497_v44 = vpop.f32.mrf.mxu1  ;;  %v409_v15 = vld [vmem:[%s6068_s28 + $0x738] sm:$0xff]  ;;  %v4576_v49 = vcombine.low %v392_v6, %v400_v8 }
 0x209   : > { %v5498_v7 = vadd.f32 %v5497_v44, %v5496_v36  ;;  %v5387_v9 = vpop.f32.mrf.mxu0  ;;  %v417_v23 = vld [vmem:[%s6068_s28 + $0x778] sm:$0xff] }
 0x20a   : > { %v3448_v26 = vadd.f32 %v5386_v2, %v6732_v31  ;;  %v5499_v59 = vpop.f32.mrf.mxu1 }
 0x20b   : > { %v5388_v33 = vpop.f32.mrf.mxu0 }
 0x20c   : > { %v6892_v43 = vadd.f32 %v5498_v7, %v3448_v26  ;;  %v5389_v10 = vadd.f32 %v5388_v33, %v5387_v9  ;;  %v5500_v46 = vpop.f32.mrf.mxu1  ;;  %v4593_v7 = vcombine.high %v408_v56, %v416_v34 }
 0x20d   : > { %v5501_v58 = vadd.f32 %v5500_v46, %v5499_v59  ;;  %v5390_v1 = vpop.f32.mrf.mxu0  ;;  %3840 = vmatmul.mubr.bf16.gmra.mxu0 %v4560_v61  ;;  %v4595_v61 = vcombine.high %v409_v15, %v417_v23 }
 0x20e   : > { %v3451_v19 = vadd.f32 %v5389_v10, %v6737_v18  ;;  %v5502_v39 = vpop.f32.mrf.mxu1  ;;  %4001 = vmatmul.mubr.bf16.gmra.mxu1 %v4562_v45  ;;  %3847 = vmatprep.mubr.bf16.mxu0 %v4577_v29  ;;  %v4578_v18 = vcombine.low %v393_v11, %v401_v28  ;;  %v424_v11 = vld [vmem:[%s6068_s28 + $0x7b0] sm:$0xff] }
 0x20f   : > { %v5391_v31 = vpop.f32.mrf.mxu0  ;;  %4008 = vmatprep.mubr.bf16.mxu1 %v4579_v0  ;;  %v432_v28 = vld [vmem:[%s6068_s28 + $0x7f0] sm:$0xff] }
 0x210   : > { %v6897_v30 = vadd.f32 %v5501_v58, %v3451_v19  ;;  %v5392_v35 = vadd.f32 %v5391_v31, %v5390_v1  ;;  %v5503_v25 = vpop.f32.mrf.mxu1  ;;  %v425_v58 = vld [vmem:[%s6068_s28 + $0x7b8] sm:$0xff]  ;;  %v4592_v31 = vcombine.low %v408_v56, %v416_v34 }
 0x211   : > { %v5504_v47 = vadd.f32 %v5503_v25, %v5502_v39  ;;  %v5393_v36 = vpop.f32.mrf.mxu0  ;;  %v433_v1 = vld [vmem:[%s6068_s28 + $0x7f8] sm:$0xff]  ;;  %s4354_s28 = sshll.u32 %s7039_s21, 2 }
 0x212   : > { %v3456_v2 = vadd.f32 %v5392_v35, %v6742_v55  ;;  %v5505_v44 = vpop.f32.mrf.mxu1  ;;  %s6984_s9 = scalar_lea.vmem %s7037_s3, %s4354_s28 }
 0x213   : > { %v5394_v9 = vpop.f32.mrf.mxu0 }
 0x214   : > { %v6902_v26 = vadd.f32 %v5504_v47, %v3456_v2  ;;  %v5395_v59 = vadd.f32 %v5394_v9, %v5393_v36  ;;  %v5506_v45 = vpop.f32.mrf.mxu1  ;;  %v4609_v47 = vcombine.high %v424_v11, %v432_v28 }
 0x215   : > { %v5507_v29 = vadd.f32 %v5506_v45, %v5505_v44  ;;  %v5396_v33 = vpop.f32.mrf.mxu0  ;;  %3848 = vmatmul.mubr.bf16.gmra.mxu0 %v4576_v49  ;;  %v4611_v49 = vcombine.high %v425_v58, %v433_v1 }
 0x216   : > { %v3459_v6 = vadd.f32 %v5395_v59, %v6747_v3  ;;  %v5508_v8 = vpop.f32.mrf.mxu1  ;;  %4009 = vmatmul.mubr.bf16.gmra.mxu1 %v4578_v18  ;;  %3855 = vmatprep.mubr.bf16.mxu0 %v4593_v7  ;;  %v4594_v3 = vcombine.low %v409_v15, %v417_v23 }
 0x217   : > { %v5397_v55 = vpop.f32.mrf.mxu0  ;;  %4016 = vmatprep.mubr.bf16.mxu1 %v4595_v61 }
 0x218   : > { %v6907_v0 = vadd.f32 %v5507_v29, %v3459_v6  ;;  %v5398_v10 = vadd.f32 %v5397_v55, %v5396_v33  ;;  %v5509_v46 = vpop.f32.mrf.mxu1  ;;  %v4608_v29 = vcombine.low %v424_v11, %v432_v28 }
 0x219   : > { %v5510_v19 = vadd.f32 %v5509_v46, %v5508_v8  ;;  %v5399_v39 = vpop.f32.mrf.mxu0  ;;  %v4610_v8 = vcombine.low %v425_v58, %v433_v1 }
 0x21a   : > { %v3464_v35 = vadd.f32 %v5398_v10, %v6752_v38  ;;  %v5511_v25 = vpop.f32.mrf.mxu1 }
 0x21b   : > { %v5400_v36 = vpop.f32.mrf.mxu0 }
 0x21c   : > { %v6912_v2 = vadd.f32 %v5510_v19, %v3464_v35  ;;  %v5401_v44 = vadd.f32 %v5400_v36, %v5399_v39  ;;  %v5512_v18 = vpop.f32.mrf.mxu1 }
 0x21d   : > { %v5513_v7 = vadd.f32 %v5512_v18, %v5511_v25  ;;  %v5402_v9 = vpop.f32.mrf.mxu0  ;;  %3856 = vmatmul.mubr.bf16.gmra.mxu0 %v4592_v31 }
 0x21e   : > { %v3467_v61 = vadd.f32 %v5401_v44, %v6757_v27  ;;  %v5514_v59 = vpop.f32.mrf.mxu1  ;;  %4017 = vmatmul.mubr.bf16.gmra.mxu1 %v4594_v3  ;;  %3863 = vmatprep.mubr.bf16.mxu0 %v4609_v47 }
 0x21f   : > { %v5403_v56 = vpop.f32.mrf.mxu0  ;;  %4024 = vmatprep.mubr.bf16.mxu1 %v4611_v49 }
 0x220   : > { %v6915_v38 = vadd.f32 %v5513_v7, %v3467_v61  ;;  %v5404_v34 = vadd.f32 %v5403_v56, %v5402_v9  ;;  %v5515_v15 = vpop.f32.mrf.mxu1 }
 0x221   : > { %v5516_v23 = vadd.f32 %v5515_v15, %v5514_v59  ;;  %v5405_v45 = vpop.f32.mrf.mxu0 }
 0x222   : > { %v3472_v33 = vadd.f32 %v5404_v34, %v6762_v54  ;;  %v5517_v6 = vpop.f32.mrf.mxu1 }
 0x223   : > { %v5406_v55 = vpop.f32.mrf.mxu0 }
 0x224   : > { %v6918_v10 = vadd.f32 %v5516_v23, %v3472_v33  ;;  %v5407_v27 = vadd.f32 %v5406_v55, %v5405_v45  ;;  %v5518_v46 = vpop.f32.mrf.mxu1 }
 0x225   : > { %v5519_v19 = vadd.f32 %v5518_v46, %v5517_v6  ;;  %v5408_v39 = vpop.f32.mrf.mxu0  ;;  %3864 = vmatmul.mubr.bf16.gmra.mxu0 %v4608_v29 }
 0x226   : > { %v3475_v31 = vadd.f32 %v5407_v27, %v6767_v52  ;;  %v5520_v35 = vpop.f32.mrf.mxu1  ;;  %4025 = vmatmul.mubr.bf16.gmra.mxu1 %v4610_v8 }
 0x227   : > { %v5409_v25 = vpop.f32.mrf.mxu0 }
 0x228   : > { %v6921_v3 = vadd.f32 %v5519_v19, %v3475_v31  ;;  %v5410_v11 = vadd.f32 %v5409_v25, %v5408_v39  ;;  %v5521_v28 = vpop.f32.mrf.mxu1 }
 0x229   : > { %v5522_v54 = vadd.f32 %v5521_v28, %v5520_v35  ;;  %v5411_v47 = vpop.f32.mrf.mxu0 }
 0x22a   : > { %v3480_v58 = vadd.f32 %v5410_v11, %v6772_v21  ;;  %v5523_v1 = vpop.f32.mrf.mxu1 }
 0x22b   : > { %v5412_v36 = vpop.f32.mrf.mxu0 }
 0x22c   : > { %v6924_v49 = vadd.f32 %v5522_v54, %v3480_v58  ;;  %v5413_v44 = vadd.f32 %v5412_v36, %v5411_v47  ;;  %v5524_v18 = vpop.f32.mrf.mxu1 }
 0x22d   : > { %v5525_v7 = vadd.f32 %v5524_v18, %v5523_v1  ;;  %v5414_v9 = vpop.f32.mrf.mxu0 }
 0x22e   : > { %v3483_v52 = vadd.f32 %v5413_v44, %v6777_v14  ;;  %v5526_v61 = vpop.f32.mrf.mxu1 }
 0x22f   : > { %v5415_v59 = vpop.f32.mrf.mxu0 }
 0x230   : > { %v6927_v56 = vadd.f32 %v5525_v7, %v3483_v52  ;;  %v5416_v34 = vadd.f32 %v5415_v59, %v5414_v9  ;;  %v5527_v15 = vpop.f32.mrf.mxu1 }
 0x231   : > { %v5528_v23 = vadd.f32 %v5527_v15, %v5526_v61  ;;  %v5417_v45 = vpop.f32.mrf.mxu0 }
 0x232   : > { %v3488_v21 = vadd.f32 %v5416_v34, %v6782_v12  ;;  %v5529_v29 = vpop.f32.mrf.mxu1 }
 0x233   : > { %v5418_v33 = vpop.f32.mrf.mxu0 }
 0x234   : > { %v6930_v6 = vadd.f32 %v5528_v23, %v3488_v21  ;;  %v5419_v8 = vadd.f32 %v5418_v33, %v5417_v45  ;;  %v5530_v55 = vpop.f32.mrf.mxu1 }
 0x235   : > { %v5531_v27 = vadd.f32 %v5530_v55, %v5529_v29  ;;  %v5420_v46 = vpop.f32.mrf.mxu0 }
 0x236   : > { %v3491_v14 = vadd.f32 %v5419_v8, %v6787_v40  ;;  %v5532_v19 = vpop.f32.mrf.mxu1 }
 0x237   : > { %v5421_v39 = vpop.f32.mrf.mxu0 }
 0x238   : > { %v6933_v31 = vadd.f32 %v5531_v27, %v3491_v14  ;;  %v5422_v35 = vadd.f32 %v5421_v39, %v5420_v46  ;;  %v5533_v25 = vpop.f32.mrf.mxu1 }
 0x239   : > { %v5534_v11 = vadd.f32 %v5533_v25, %v5532_v19  ;;  %v5423_v28 = vpop.f32.mrf.mxu0 }
 0x23a   : > { %v3496_v12 = vadd.f32 %v5422_v35, %v6792_v50  ;;  %v5535_v54 = vpop.f32.mrf.mxu1 }
 0x23b   : > { %v5424_v47 = vpop.f32.mrf.mxu0 }
 0x23c   : > { %v6936_v58 = vadd.f32 %v5534_v11, %v3496_v12  ;;  %v5425_v1 = vadd.f32 %v5424_v47, %v5423_v28  ;;  %v5536_v36 = vpop.f32.mrf.mxu1 }
 0x23d   : > { %v5537_v44 = vadd.f32 %v5536_v36, %v5535_v54  ;;  %v5426_v18 = vpop.f32.mrf.mxu0 }
 0x23e   : > { %v3499_v40 = vadd.f32 %v5425_v1, %v6797_v4  ;;  %v5538_v7 = vpop.f32.mrf.mxu1 }
 0x23f   : > { %v5427_v9 = vpop.f32.mrf.mxu0 }
 0x240   : > { %v6939_v52 = vadd.f32 %v5537_v44, %v3499_v40  ;;  %v5428_v61 = vadd.f32 %v5427_v9, %v5426_v18  ;;  %v5539_v59 = vpop.f32.mrf.mxu1 }
 0x241   : > { %v5540_v34 = vadd.f32 %v5539_v59, %v5538_v7  ;;  %v5429_v15 = vpop.f32.mrf.mxu0 }
 0x242   : > { %v3504_v50 = vadd.f32 %v5428_v61, %v6802_v13  ;;  %v5541_v23 = vpop.f32.mrf.mxu1 }
 0x243   : > { %v5430_v45 = vpop.f32.mrf.mxu0 }
 0x244   : > { %v6942_v21 = vadd.f32 %v5540_v34, %v3504_v50  ;;  %v5431_v29 = vadd.f32 %v5430_v45, %v5429_v15  ;;  %v5542_v33 = vpop.f32.mrf.mxu1 }
 0x245   : > { %v5543_v8 = vadd.f32 %v5542_v33, %v5541_v23  ;;  %v5432_v55 = vpop.f32.mrf.mxu0 }
 0x246   : > { %v3507_v4 = vadd.f32 %v5431_v29, %v6807_v32  ;;  %v5544_v27 = vpop.f32.mrf.mxu1 }
 0x247   : > { %v5433_v46 = vpop.f32.mrf.mxu0 }
 0x248   : > { %v6945_v14 = vadd.f32 %v5543_v8, %v3507_v4  ;;  %v5434_v19 = vadd.f32 %v5433_v46, %v5432_v55  ;;  %v5545_v39 = vpop.f32.mrf.mxu1 }
 0x249   : > { %v5546_v35 = vadd.f32 %v5545_v39, %v5544_v27  ;;  %v5435_v25 = vpop.f32.mrf.mxu0 }
 0x24a   : > { %v3512_v13 = vadd.f32 %v5434_v19, %v6812_v37  ;;  %v5547_v11 = vpop.f32.mrf.mxu1 }
 0x24b   : > { %v5436_v28 = vpop.f32.mrf.mxu0 }
 0x24c   : > { %v6948_v12 = vadd.f32 %v5546_v35, %v3512_v13  ;;  %v5437_v54 = vadd.f32 %v5436_v28, %v5435_v25  ;;  %v5548_v47 = vpop.f32.mrf.mxu1 }
 0x24d   : > { %v5549_v1 = vadd.f32 %v5548_v47, %v5547_v11  ;;  %v5438_v36 = vpop.f32.mrf.mxu0 }
 0x24e   : > { %v3515_v32 = vadd.f32 %v5437_v54, %v6817_v63  ;;  %v5550_v44 = vpop.f32.mrf.mxu1 }
 0x24f   : > { %v5439_v18 = vpop.f32.mrf.mxu0 }
 0x250   : > { %v6951_v40 = vadd.f32 %v5549_v1, %v3515_v32  ;;  %v5440_v7 = vadd.f32 %v5439_v18, %v5438_v36  ;;  %v5551_v9 = vpop.f32.mrf.mxu1 }
 0x251   : > { %v5552_v61 = vadd.f32 %v5551_v9, %v5550_v44  ;;  %v5441_v59 = vpop.f32.mrf.mxu0 }
 0x252   : > { %v3520_v37 = vadd.f32 %v5440_v7, %v6822_v62  ;;  %v5553_v34 = vpop.f32.mrf.mxu1 }
 0x253   : > { %v5442_v15 = vpop.f32.mrf.mxu0 }
 0x254   : > { %v6954_v50 = vadd.f32 %v5552_v61, %v3520_v37  ;;  %v5443_v23 = vadd.f32 %v5442_v15, %v5441_v59  ;;  %v5554_v45 = vpop.f32.mrf.mxu1 }
 0x255   : > { %v5555_v29 = vadd.f32 %v5554_v45, %v5553_v34  ;;  %v5444_v33 = vpop.f32.mrf.mxu0 }
 0x256   : > { %v3523_v63 = vadd.f32 %v5443_v23, %v6827_v41  ;;  %v5556_v8 = vpop.f32.mrf.mxu1 }
 0x257   : > { %v5445_v55 = vpop.f32.mrf.mxu0 }
 0x258   : > { %v6957_v4 = vadd.f32 %v5555_v29, %v3523_v63  ;;  %v5446_v27 = vadd.f32 %v5445_v55, %v5444_v33  ;;  %v5557_v46 = vpop.f32.mrf.mxu1 }
 0x259   : > { %v5558_v19 = vadd.f32 %v5557_v46, %v5556_v8  ;;  %v5447_v39 = vpop.f32.mrf.mxu0 }
 0x25a   : > { %v3528_v62 = vadd.f32 %v5446_v27, %v6832_v24  ;;  %v5559_v35 = vpop.f32.mrf.mxu1 }
 0x25b   : > { %v5448_v25 = vpop.f32.mrf.mxu0 }
 0x25c   : > { %v6960_v13 = vadd.f32 %v5558_v19, %v3528_v62  ;;  %v5449_v11 = vadd.f32 %v5448_v25, %v5447_v39  ;;  %v5560_v28 = vpop.f32.mrf.mxu1 }
 0x25d   : > { %v5561_v54 = vadd.f32 %v5560_v28, %v5559_v35  ;;  %v5450_v47 = vpop.f32.mrf.mxu0 }
 0x25e   : > { %v3531_v41 = vadd.f32 %v5449_v11, %v6837_v17  ;;  %v5562_v1 = vpop.f32.mrf.mxu1 }
 0x25f   : > { %v5451_v36 = vpop.f32.mrf.mxu0 }
 0x260   : > { %v6963_v32 = vadd.f32 %v5561_v54, %v3531_v41  ;;  %v5452_v44 = vadd.f32 %v5451_v36, %v5450_v47  ;;  %v5563_v18 = vpop.f32.mrf.mxu1 }
 0x261   : > { %v5564_v7 = vadd.f32 %v5563_v18, %v5562_v1  ;;  %v5453_v9 = vpop.f32.mrf.mxu0 }
 0x262   : > { %v3536_v24 = vadd.f32 %v5452_v44, %v6842_v51  ;;  %v5565_v61 = vpop.f32.mrf.mxu1 }
 0x263   : > { %v5454_v59 = vpop.f32.mrf.mxu0 }
 0x264   : > { %v6966_v37 = vadd.f32 %v5564_v7, %v3536_v24  ;;  %v5455_v34 = vadd.f32 %v5454_v59, %v5453_v9  ;;  %v5566_v15 = vpop.f32.mrf.mxu1 }
 0x265   : > { %v5567_v23 = vadd.f32 %v5566_v15, %v5565_v61  ;;  %v5456_v45 = vpop.f32.mrf.mxu0 }
 0x266   : > { %v3539_v17 = vadd.f32 %v5455_v34, %v6847_v57  ;;  %v5568_v29 = vpop.f32.mrf.mxu1 }
 0x267   : > { %v5457_v33 = vpop.f32.mrf.mxu0 }
 0x268   : > { %v6969_v63 = vadd.f32 %v5567_v23, %v3539_v17  ;;  %v5458_v8 = vadd.f32 %v5457_v33, %v5456_v45  ;;  %v5569_v55 = vpop.f32.mrf.mxu1 }
 0x269   : > { %v5570_v27 = vadd.f32 %v5569_v55, %v5568_v29  ;;  %v5459_v46 = vpop.f32.mrf.mxu0 }
 0x26a   : > { %v3544_v51 = vadd.f32 %v5458_v8, %v6852_v16  ;;  %v5571_v19 = vpop.f32.mrf.mxu1 }
 0x26b   : > { %v5460_v39 = vpop.f32.mrf.mxu0 }
 0x26c   : > { %v6972_v62 = vadd.f32 %v5570_v27, %v3544_v51  ;;  %v5461_v35 = vadd.f32 %v5460_v39, %v5459_v46  ;;  %v5572_v25 = vpop.f32.mrf.mxu1 }
 0x26d   : > { %v5573_v11 = vadd.f32 %v5572_v25, %v5571_v19  ;;  %v5590_v28 = vpop.f32.mrf.mxu0 }
 0x26e   : > { %v3547_v57 = vadd.f32 %v5461_v35, %v6857_v53  ;;  %v5702_v54 = vpop.f32.mrf.mxu1 }
 0x26f   : > { %v5591_v47 = vpop.f32.mrf.mxu0 }
 0x270   : > { %v6975_v41 = vadd.f32 %v5573_v11, %v3547_v57  ;;  %v5592_v1 = vadd.f32 %v5591_v47, %v5590_v28  ;;  %v5703_v36 = vpop.f32.mrf.mxu1 }
 0x271   : > { %v5593_v44 = vpop.f32.mrf.mxu0  ;;  %v5704_v16 = vadd.f32 %v5703_v36, %v5702_v54 }
 0x272   : > { %v3746_v18 = vadd.f32 %v5592_v1, %v6862_v42  ;;  %v5705_v7 = vpop.f32.mrf.mxu1 }
 0x273   : > { %v5594_v9 = vpop.f32.mrf.mxu0 }
 0x274   : > { %v3907_v24 = vadd.f32 %v5704_v16, %v3746_v18  ;;  %v5595_v61 = vadd.f32 %v5594_v9, %v5593_v44  ;;  %v5706_v59 = vpop.f32.mrf.mxu1 }
 0x275   : > { %v5596_v34 = vpop.f32.mrf.mxu0  ;;  %v5707_v53 = vadd.f32 %v5706_v59, %v5705_v7 }
 0x276   : > { %v3749_v15 = vadd.f32 %v5595_v61, %v6867_v22  ;;  %v5708_v23 = vpop.f32.mrf.mxu1  ;;  %v4065_v17 = vmul.f32 0.2, %v3907_v24  ;;  %vm4033_vm0 = vcmp.ge.f32.partialorder %v3907_v24, 0.0 }
 0x277   : > { %v5597_v45 = vpop.f32.mrf.mxu0 }
 0x278   : > { %v3910_v29 = vadd.f32 %v5707_v53, %v3749_v15  ;;  %v5598_v33 = vadd.f32 %v5597_v45, %v5596_v34  ;;  %v5709_v8 = vpop.f32.mrf.mxu1  ;;  %v4097_v39 = vsel %vm4033_vm0, %v3907_v24, %v4065_v17 }
 0x279   : > { %v5599_v42 = vpop.f32.mrf.mxu0  ;;  %v5710_v46 = vadd.f32 %v5709_v8, %v5708_v23 }
 0x27a   : > { %vm4034_vm1 = vcmp.ge.f32.partialorder %v3910_v29, 0.0  ;;  %v4066_v55 = vmul.f32 0.2, %v3910_v29  ;;  %v3754_v27 = vadd.f32 %v5598_v33, %v6872_v20  ;;  %v5711_v51 = vpop.f32.mrf.mxu1 }
 0x27b   : > { %v5600_v19 = vpop.f32.mrf.mxu0 }
 0x27c   : > { %v4098_v22 = vsel %vm4034_vm1, %v3910_v29, %v4066_v55  ;;  %v3915_v35 = vadd.f32 %v5710_v46, %v3754_v27  ;;  %v5601_v25 = vadd.f32 %v5600_v19, %v5599_v42  ;;  %v5712_v11 = vpop.f32.mrf.mxu1 }
 0x27d   : > { %v4810_v28 = vpack.c.bf16 %v4098_v22, %v4097_v39  ;;  %v5602_v57 = vpop.f32.mrf.mxu0  ;;  %v5713_v47 = vadd.f32 %v5712_v11, %v5711_v51 }
 0x27e   : > { %v3757_v54 = vadd.f32 %v5601_v25, %v6877_v5  ;;  %v5714_v20 = vpop.f32.mrf.mxu1  ;;  %v4067_v36 = vmul.f32 0.2, %v3915_v35  ;;  %vm4035_vm2 = vcmp.ge.f32.partialorder %v3915_v35, 0.0 }
 0x27f   : > { %4811 = vst [vmem:[%s6984_s9] sm:$0xff] %v4810_v28   ;;  %v5603_v1 = vpop.f32.mrf.mxu0 }
 0x280   : > { %v3918_v44 = vadd.f32 %v5713_v47, %v3757_v54  ;;  %v5604_v18 = vadd.f32 %v5603_v1, %v5602_v57  ;;  %v5715_v16 = vpop.f32.mrf.mxu1  ;;  %v4099_v15 = vsel %vm4035_vm2, %v3915_v35, %v4067_v36 }
 0x281   : > { %v5605_v7 = vpop.f32.mrf.mxu0  ;;  %v5716_v61 = vadd.f32 %v5715_v16, %v5714_v20 }
 0x282   : > { %vm4036_vm3 = vcmp.ge.f32.partialorder %v3918_v44, 0.0  ;;  %v4068_v9 = vmul.f32 0.2, %v3918_v44  ;;  %v3762_v24 = vadd.f32 %v5604_v18, %v6882_v60  ;;  %v5717_v59 = vpop.f32.mrf.mxu1 }
 0x283   : > { %v5606_v34 = vpop.f32.mrf.mxu0 }
 0x284   : > { %v4100_v5 = vsel %vm4036_vm3, %v3918_v44, %v4068_v9  ;;  %v3923_v53 = vadd.f32 %v5716_v61, %v3762_v24  ;;  %v5607_v23 = vadd.f32 %v5606_v34, %v5605_v7  ;;  %v5718_v45 = vpop.f32.mrf.mxu1 }
 0x285   : > { %v4815_v17 = vpack.c.bf16 %v4100_v5, %v4099_v15  ;;  %v5608_v29 = vpop.f32.mrf.mxu0  ;;  %v5719_v8 = vadd.f32 %v5718_v45, %v5717_v59 }
 0x286   : > { %v3765_v33 = vadd.f32 %v5607_v23, %v6887_v48  ;;  %v5720_v42 = vpop.f32.mrf.mxu1  ;;  %v4069_v27 = vmul.f32 0.2, %v3923_v53  ;;  %vm4037_vm4 = vcmp.ge.f32.partialorder %v3923_v53, 0.0 }
 0x287   : > { %4887 = vst [vmem:[%s6984_s9 + $0x8] sm:$0xff] %v4815_v17   ;;  %v5609_v55 = vpop.f32.mrf.mxu0 }
 0x288   : > { %v3926_v46 = vadd.f32 %v5719_v8, %v3765_v33  ;;  %v5610_v51 = vadd.f32 %v5609_v55, %v5608_v29  ;;  %v5721_v60 = vpop.f32.mrf.mxu1  ;;  %v4101_v28 = vsel %vm4037_vm4, %v3923_v53, %v4069_v27 }
 0x289   : > { %v5611_v19 = vpop.f32.mrf.mxu0  ;;  %v5722_v35 = vadd.f32 %v5721_v60, %v5720_v42 }
 0x28a   : > { %vm4038_vm5 = vcmp.ge.f32.partialorder %v3926_v46, 0.0  ;;  %v4070_v39 = vmul.f32 0.2, %v3926_v46  ;;  %v3770_v22 = vadd.f32 %v5610_v51, %v6892_v43  ;;  %v5723_v25 = vpop.f32.mrf.mxu1 }
 0x28b   : > { %v5612_v11 = vpop.f32.mrf.mxu0 }
 0x28c   : > { %v4102_v48 = vsel %vm4038_vm5, %v3926_v46, %v4070_v39  ;;  %v3931_v57 = vadd.f32 %v5722_v35, %v3770_v22  ;;  %v5613_v54 = vadd.f32 %v5612_v11, %v5611_v19  ;;  %v5724_v47 = vpop.f32.mrf.mxu1 }
 0x28d   : > { %v4820_v20 = vpack.c.bf16 %v4102_v48, %v4101_v28  ;;  %v5614_v1 = vpop.f32.mrf.mxu0  ;;  %v5725_v44 = vadd.f32 %v5724_v47, %v5723_v25 }
 0x28e   : > { %v3773_v36 = vadd.f32 %v5613_v54, %v6897_v30  ;;  %v5726_v18 = vpop.f32.mrf.mxu1  ;;  %v4071_v7 = vmul.f32 0.2, %v3931_v57  ;;  %vm4039_vm6 = vcmp.ge.f32.partialorder %v3931_v57, 0.0 }
 0x28f   : > { %4888 = vst [vmem:[%s6984_s9 + $0x10] sm:$0xff] %v4820_v20   ;;  %v5615_v16 = vpop.f32.mrf.mxu0 }
 0x290   : > { %v3934_v9 = vadd.f32 %v5725_v44, %v3773_v36  ;;  %v5616_v24 = vadd.f32 %v5615_v16, %v5614_v1  ;;  %v5727_v43 = vpop.f32.mrf.mxu1  ;;  %v4103_v23 = vsel %vm4039_vm6, %v3931_v57, %v4071_v7 }
 0x291   : > { %v5617_v61 = vpop.f32.mrf.mxu0  ;;  %v5728_v15 = vadd.f32 %v5727_v43, %v5726_v18 }
 0x292   : > { %vm4040_vm7 = vcmp.ge.f32.partialorder %v3934_v9, 0.0  ;;  %v4072_v59 = vmul.f32 0.2, %v3934_v9  ;;  %v3778_v34 = vadd.f32 %v5616_v24, %v6902_v26  ;;  %v5729_v5 = vpop.f32.mrf.mxu1 }
 0x293   : > { %v5618_v53 = vpop.f32.mrf.mxu0 }
 0x294   : > { %v4104_v30 = vsel %vm4040_vm7, %v3934_v9, %v4072_v59  ;;  %v3939_v45 = vadd.f32 %v5728_v15, %v3778_v34  ;;  %v5619_v17 = vadd.f32 %v5618_v53, %v5617_v61  ;;  %v5730_v29 = vpop.f32.mrf.mxu1 }
 0x295   : > { %v4825_v33 = vpack.c.bf16 %v4104_v30, %v4103_v23  ;;  %v5620_v8 = vpop.f32.mrf.mxu0  ;;  %v5731_v55 = vadd.f32 %v5730_v29, %v5729_v5 }
 0x296   : > { %v3781_v42 = vadd.f32 %v5619_v17, %v6907_v0  ;;  %v5732_v27 = vpop.f32.mrf.mxu1  ;;  %v4073_v51 = vmul.f32 0.2, %v3939_v45  ;;  %vm4041_vm8 = vcmp.ge.f32.partialorder %v3939_v45, 0.0 }
 0x297   : > { %4889 = vst [vmem:[%s6984_s9 + $0x18] sm:$0xff] %v4825_v33   ;;  %v5621_v46 = vpop.f32.mrf.mxu0 }
 0x298   : > { %v3942_v60 = vadd.f32 %v5731_v55, %v3781_v42  ;;  %v5622_v19 = vadd.f32 %v5621_v46, %v5620_v8  ;;  %v5733_v26 = vpop.f32.mrf.mxu1  ;;  %v4105_v48 = vsel %vm4041_vm8, %v3939_v45, %v4073_v51 }
 0x299   : > { %v5623_v39 = vpop.f32.mrf.mxu0  ;;  %v5734_v25 = vadd.f32 %v5733_v26, %v5732_v27 }
 0x29a   : > { %vm4042_vm9 = vcmp.ge.f32.partialorder %v3942_v60, 0.0  ;;  %v4074_v22 = vmul.f32 0.2, %v3942_v60  ;;  %v3786_v35 = vadd.f32 %v5622_v19, %v6912_v2  ;;  %v5735_v11 = vpop.f32.mrf.mxu1 }
 0x29b   : > { %v5624_v28 = vpop.f32.mrf.mxu0 }
 0x29c   : > { %v4106_v0 = vsel %vm4042_vm9, %v3942_v60, %v4074_v22  ;;  %v3947_v57 = vadd.f32 %v5734_v25, %v3786_v35  ;;  %v5625_v54 = vadd.f32 %v5624_v28, %v5623_v39  ;;  %v5736_v47 = vpop.f32.mrf.mxu1 }
 0x29d   : > { %v4830_v20 = vpack.c.bf16 %v4106_v0, %v4105_v48  ;;  %v5626_v1 = vpop.f32.mrf.mxu0  ;;  %v5737_v44 = vadd.f32 %v5736_v47, %v5735_v11 }
 0x29e   : > { %v3789_v36 = vadd.f32 %v5625_v54, %v6915_v38  ;;  %v5738_v18 = vpop.f32.mrf.mxu1  ;;  %v4075_v7 = vmul.f32 0.2, %v3947_v57  ;;  %vm4043_vm10 = vcmp.ge.f32.partialorder %v3947_v57, 0.0 }
 0x29f   : > { %4890 = vst [vmem:[%s6984_s9 + $0x20] sm:$0xff] %v4830_v20   ;;  %v5627_v16 = vpop.f32.mrf.mxu0 }
 0x2a0   : > { %v3950_v9 = vadd.f32 %v5737_v44, %v3789_v36  ;;  %v5628_v24 = vadd.f32 %v5627_v16, %v5626_v1  ;;  %v5739_v2 = vpop.f32.mrf.mxu1  ;;  %v4107_v53 = vsel %vm4043_vm10, %v3947_v57, %v4075_v7 }
 0x2a1   : > { %v5629_v43 = vpop.f32.mrf.mxu0  ;;  %v5740_v34 = vadd.f32 %v5739_v2, %v5738_v18 }
 0x2a2   : > { %vm4044_vm11 = vcmp.ge.f32.partialorder %v3950_v9, 0.0  ;;  %v4076_v61 = vmul.f32 0.2, %v3950_v9  ;;  %v3794_v59 = vadd.f32 %v5628_v24, %v6918_v10  ;;  %v5741_v15 = vpop.f32.mrf.mxu1 }
 0x2a3   : > { %v5630_v5 = vpop.f32.mrf.mxu0 }
 0x2a4   : > { %v4108_v38 = vsel %vm4044_vm11, %v3950_v9, %v4076_v61  ;;  %v3955_v23 = vadd.f32 %v5740_v34, %v3794_v59  ;;  %v5631_v30 = vadd.f32 %v5630_v5, %v5629_v43  ;;  %v5742_v45 = vpop.f32.mrf.mxu1 }
 0x2a5   : > { %v4835_v17 = vpack.c.bf16 %v4108_v38, %v4107_v53  ;;  %v5632_v29 = vpop.f32.mrf.mxu0  ;;  %v5743_v8 = vadd.f32 %v5742_v45, %v5741_v15 }
 0x2a6   : > { %v3797_v33 = vadd.f32 %v5631_v30, %v6921_v3  ;;  %v5744_v42 = vpop.f32.mrf.mxu1  ;;  %v4077_v27 = vmul.f32 0.2, %v3955_v23  ;;  %vm4045_vm12 = vcmp.ge.f32.partialorder %v3955_v23, 0.0 }
 0x2a7   : > { %4891 = vst [vmem:[%s6984_s9 + $0x28] sm:$0xff] %v4835_v17   ;;  %v5633_v55 = vpop.f32.mrf.mxu0 }
 0x2a8   : > { %v3958_v46 = vadd.f32 %v5743_v8, %v3797_v33  ;;  %v5634_v51 = vadd.f32 %v5633_v55, %v5632_v29  ;;  %v5745_v10 = vpop.f32.mrf.mxu1  ;;  %v4109_v25 = vsel %vm4045_vm12, %v3955_v23, %v4077_v27 }
 0x2a9   : > { %v5635_v60 = vpop.f32.mrf.mxu0  ;;  %v5746_v39 = vadd.f32 %v5745_v10, %v5744_v42 }
 0x2aa   : > { %vm4046_vm13 = vcmp.ge.f32.partialorder %v3958_v46, 0.0  ;;  %v4078_v19 = vmul.f32 0.2, %v3958_v46  ;;  %v3802_v26 = vadd.f32 %v5634_v51, %v6924_v49  ;;  %v5747_v22 = vpop.f32.mrf.mxu1 }
 0x2ab   : > { %v5636_v35 = vpop.f32.mrf.mxu0 }
 0x2ac   : > { %v4110_v3 = vsel %vm4046_vm13, %v3958_v46, %v4078_v19  ;;  %v3963_v11 = vadd.f32 %v5746_v39, %v3802_v26  ;;  %v5637_v28 = vadd.f32 %v5636_v35, %v5635_v60  ;;  %v5748_v48 = vpop.f32.mrf.mxu1 }
 0x2ad   : > { %v4840_v0 = vpack.c.bf16 %v4110_v3, %v4109_v25  ;;  %v5638_v57 = vpop.f32.mrf.mxu0  ;;  %v5749_v47 = vadd.f32 %v5748_v48, %v5747_v22 }
 0x2ae   : > { %v3805_v54 = vadd.f32 %v5637_v28, %v6927_v56  ;;  %v5750_v20 = vpop.f32.mrf.mxu1  ;;  %v4079_v36 = vmul.f32 0.2, %v3963_v11  ;;  %vm4047_vm14 = vcmp.ge.f32.partialorder %v3963_v11, 0.0 }
 0x2af   : > { %4892 = vst [vmem:[%s6984_s9 + $0x30] sm:$0xff] %v4840_v0   ;;  %v5639_v1 = vpop.f32.mrf.mxu0 }
 0x2b0   : > { %v3966_v44 = vadd.f32 %v5749_v47, %v3805_v54  ;;  %v5640_v18 = vadd.f32 %v5639_v1, %v5638_v57  ;;  %v5751_v49 = vpop.f32.mrf.mxu1  ;;  %v4111_v61 = vsel %vm4047_vm14, %v3963_v11, %v4079_v36 }
 0x2b1   : > { %v5641_v16 = vpop.f32.mrf.mxu0  ;;  %v5752_v24 = vadd.f32 %v5751_v49, %v5750_v20 }
 0x2b2   : > { %vm4048_vm15 = vcmp.ge.f32.partialorder %v3966_v44, 0.0  ;;  %v4080_v7 = vmul.f32 0.2, %v3966_v44  ;;  %v3810_v9 = vadd.f32 %v5640_v18, %v6930_v6  ;;  %v5753_v2 = vpop.f32.mrf.mxu1 }
 0x2b3   : > { %v5642_v43 = vpop.f32.mrf.mxu0 }
 0x2b4   : > { %v4112_v56 = vsel %vm4048_vm15, %v3966_v44, %v4080_v7  ;;  %v3971_v59 = vadd.f32 %v5752_v24, %v3810_v9  ;;  %v5643_v34 = vadd.f32 %v5642_v43, %v5641_v16  ;;  %v5754_v15 = vpop.f32.mrf.mxu1 }
 0x2b5   : > { %v4845_v5 = vpack.c.bf16 %v4112_v56, %v4111_v61  ;;  %v5644_v53 = vpop.f32.mrf.mxu0  ;;  %v5755_v23 = vadd.f32 %v5754_v15, %v5753_v2 }
 0x2b6   : > { %v3813_v38 = vadd.f32 %v5643_v34, %v6933_v31  ;;  %v5756_v30 = vpop.f32.mrf.mxu1  ;;  %v4081_v17 = vmul.f32 0.2, %v3971_v59  ;;  %vm4049_vm0 = vcmp.ge.f32.partialorder %v3971_v59, 0.0 }
 0x2b7   : > { %4893 = vst [vmem:[%s6984_s9 + $0x38] sm:$0xff] %v4845_v5   ;;  %v5645_v45 = vpop.f32.mrf.mxu0 }
 0x2b8   : > { %v3974_v29 = vadd.f32 %v5755_v23, %v3813_v38  ;;  %v5646_v33 = vadd.f32 %v5645_v45, %v5644_v53  ;;  %v5757_v6 = vpop.f32.mrf.mxu1  ;;  %v4113_v10 = vsel %vm4049_vm0, %v3971_v59, %v4081_v17 }
 0x2b9   : > { %v5647_v8 = vpop.f32.mrf.mxu0  ;;  %v5758_v27 = vadd.f32 %v5757_v6, %v5756_v30 }
 0x2ba   : > { %vm4050_vm1 = vcmp.ge.f32.partialorder %v3974_v29, 0.0  ;;  %v4082_v42 = vmul.f32 0.2, %v3974_v29  ;;  %v3818_v55 = vadd.f32 %v5646_v33, %v6936_v58  ;;  %v5759_v46 = vpop.f32.mrf.mxu1 }
 0x2bb   : > { %v5648_v51 = vpop.f32.mrf.mxu0 }
 0x2bc   : > { %v4114_v31 = vsel %vm4050_vm1, %v3974_v29, %v4082_v42  ;;  %v3979_v60 = vadd.f32 %v5758_v27, %v3818_v55  ;;  %v5649_v19 = vadd.f32 %v5648_v51, %v5647_v8  ;;  %v5760_v26 = vpop.f32.mrf.mxu1 }
 0x2bd   : > { %v4850_v39 = vpack.c.bf16 %v4114_v31, %v4113_v10  ;;  %v5650_v22 = vpop.f32.mrf.mxu0  ;;  %v5761_v25 = vadd.f32 %v5760_v26, %v5759_v46 }
 0x2be   : > { %v3821_v35 = vadd.f32 %v5649_v19, %v6939_v52  ;;  %v5762_v3 = vpop.f32.mrf.mxu1  ;;  %v4083_v28 = vmul.f32 0.2, %v3979_v60  ;;  %vm4051_vm2 = vcmp.ge.f32.partialorder %v3979_v60, 0.0 }
 0x2bf   : > { %4894 = vst [vmem:[%s6984_s9 + $0x40] sm:$0xff] %v4850_v39   ;;  %v5651_v11 = vpop.f32.mrf.mxu0 }
 0x2c0   : > { %v3982_v48 = vadd.f32 %v5761_v25, %v3821_v35  ;;  %v5652_v0 = vadd.f32 %v5651_v11, %v5650_v22  ;;  %v5763_v58 = vpop.f32.mrf.mxu1  ;;  %v4115_v44 = vsel %vm4051_vm2, %v3979_v60, %v4083_v28 }
 0x2c1   : > { %v5653_v57 = vpop.f32.mrf.mxu0  ;;  %v5764_v20 = vadd.f32 %v5763_v58, %v5762_v3 }
 0x2c2   : > { %vm4052_vm3 = vcmp.ge.f32.partialorder %v3982_v48, 0.0  ;;  %v4084_v54 = vmul.f32 0.2, %v3982_v48  ;;  %v3826_v47 = vadd.f32 %v5652_v0, %v6942_v21  ;;  %v5765_v1 = vpop.f32.mrf.mxu1 }
 0x2c3   : > { %v5654_v36 = vpop.f32.mrf.mxu0 }
 0x2c4   : > { %v4116_v52 = vsel %vm4052_vm3, %v3982_v48, %v4084_v54  ;;  %v3987_v18 = vadd.f32 %v5764_v20, %v3826_v47  ;;  %v5655_v49 = vadd.f32 %v5654_v36, %v5653_v57  ;;  %v5766_v16 = vpop.f32.mrf.mxu1 }
 0x2c5   : > { %v4855_v7 = vpack.c.bf16 %v4116_v52, %v4115_v44  ;;  %v5656_v9 = vpop.f32.mrf.mxu0  ;;  %v5767_v2 = vadd.f32 %v5766_v16, %v5765_v1 }
 0x2c6   : > { %v3829_v24 = vadd.f32 %v5655_v49, %v6945_v14  ;;  %v5768_v43 = vpop.f32.mrf.mxu1  ;;  %v4085_v56 = vmul.f32 0.2, %v3987_v18  ;;  %vm4053_vm4 = vcmp.ge.f32.partialorder %v3987_v18, 0.0 }
 0x2c7   : > { %4895 = vst [vmem:[%s6984_s9 + $0x48] sm:$0xff] %v4855_v7   ;;  %v5657_v61 = vpop.f32.mrf.mxu0 }
 0x2c8   : > { %v3990_v59 = vadd.f32 %v5767_v2, %v3829_v24  ;;  %v5658_v34 = vadd.f32 %v5657_v61, %v5656_v9  ;;  %v5769_v21 = vpop.f32.mrf.mxu1  ;;  %v4117_v45 = vsel %vm4053_vm4, %v3987_v18, %v4085_v56 }
 0x2c9   : > { %v5659_v15 = vpop.f32.mrf.mxu0  ;;  %v5770_v38 = vadd.f32 %v5769_v21, %v5768_v43 }
 0x2ca   : > { %vm4054_vm5 = vcmp.ge.f32.partialorder %v3990_v59, 0.0  ;;  %v4086_v5 = vmul.f32 0.2, %v3990_v59  ;;  %v3834_v53 = vadd.f32 %v5658_v34, %v6948_v12  ;;  %v5771_v23 = vpop.f32.mrf.mxu1 }
 0x2cb   : > { %v5660_v30 = vpop.f32.mrf.mxu0 }
 0x2cc   : > { %v4118_v14 = vsel %vm4054_vm5, %v3990_v59, %v4086_v5  ;;  %v3995_v17 = vadd.f32 %v5770_v38, %v3834_v53  ;;  %v5661_v29 = vadd.f32 %v5660_v30, %v5659_v15  ;;  %v5772_v33 = vpop.f32.mrf.mxu1 }
 0x2cd   : > { %v4860_v6 = vpack.c.bf16 %v4118_v14, %v4117_v45  ;;  %v5662_v8 = vpop.f32.mrf.mxu0  ;;  %v5773_v55 = vadd.f32 %v5772_v33, %v5771_v23 }
 0x2ce   : > { %v3837_v42 = vadd.f32 %v5661_v29, %v6951_v40  ;;  %v5774_v27 = vpop.f32.mrf.mxu1  ;;  %v4087_v51 = vmul.f32 0.2, %v3995_v17  ;;  %vm4055_vm6 = vcmp.ge.f32.partialorder %v3995_v17, 0.0 }
 0x2cf   : > { %4896 = vst [vmem:[%s6984_s9 + $0x50] sm:$0xff] %v4860_v6   ;;  %v5663_v46 = vpop.f32.mrf.mxu0 }
 0x2d0   : > { %v3998_v10 = vadd.f32 %v5773_v55, %v3837_v42  ;;  %v5664_v31 = vadd.f32 %v5663_v46, %v5662_v8  ;;  %v5775_v12 = vpop.f32.mrf.mxu1  ;;  %v4119_v25 = vsel %vm4055_vm6, %v3995_v17, %v4087_v51 }
 0x2d1   : > { %v5665_v60 = vpop.f32.mrf.mxu0  ;;  %v5776_v39 = vadd.f32 %v5775_v12, %v5774_v27 }
 0x2d2   : > { %vm4056_vm7 = vcmp.ge.f32.partialorder %v3998_v10, 0.0  ;;  %v4088_v19 = vmul.f32 0.2, %v3998_v10  ;;  %v3842_v26 = vadd.f32 %v5664_v31, %v6954_v50  ;;  %v5777_v22 = vpop.f32.mrf.mxu1 }
 0x2d3   : > { %v5666_v35 = vpop.f32.mrf.mxu0 }
 0x2d4   : > { %v4120_v40 = vsel %vm4056_vm7, %v3998_v10, %v4088_v19  ;;  %v4003_v3 = vadd.f32 %v5776_v39, %v3842_v26  ;;  %v5667_v11 = vadd.f32 %v5666_v35, %v5665_v60  ;;  %v5778_v28 = vpop.f32.mrf.mxu1 }
 0x2d5   : > { %v4865_v48 = vpack.c.bf16 %v4120_v40, %v4119_v25  ;;  %v5668_v0 = vpop.f32.mrf.mxu0  ;;  %v5779_v57 = vadd.f32 %v5778_v28, %v5777_v22 }
 0x2d6   : > { %v3845_v58 = vadd.f32 %v5667_v11, %v6957_v4  ;;  %v5780_v54 = vpop.f32.mrf.mxu1  ;;  %v4089_v20 = vmul.f32 0.2, %v4003_v3  ;;  %vm4057_vm8 = vcmp.ge.f32.partialorder %v4003_v3, 0.0 }
 0x2d7   : > { %4897 = vst [vmem:[%s6984_s9 + $0x58] sm:$0xff] %v4865_v48   ;;  %v5669_v47 = vpop.f32.mrf.mxu0 }
 0x2d8   : > { %v4006_v1 = vadd.f32 %v5779_v57, %v3845_v58  ;;  %v5670_v36 = vadd.f32 %v5669_v47, %v5668_v0  ;;  %v5781_v50 = vpop.f32.mrf.mxu1  ;;  %v4121_v9 = vsel %vm4057_vm8, %v4003_v3, %v4089_v20 }
 0x2d9   : > { %v5671_v44 = vpop.f32.mrf.mxu0  ;;  %v5782_v49 = vadd.f32 %v5781_v50, %v5780_v54 }
 0x2da   : > { %vm4058_vm9 = vcmp.ge.f32.partialorder %v4006_v1, 0.0  ;;  %v4090_v52 = vmul.f32 0.2, %v4006_v1  ;;  %v3850_v18 = vadd.f32 %v5670_v36, %v6960_v13  ;;  %v5783_v16 = vpop.f32.mrf.mxu1 }
 0x2db   : > { %v5672_v7 = vpop.f32.mrf.mxu0 }
 0x2dc   : > { %v4122_v4 = vsel %vm4058_vm9, %v4006_v1, %v4090_v52  ;;  %v4011_v24 = vadd.f32 %v5782_v49, %v3850_v18  ;;  %v5673_v2 = vadd.f32 %v5672_v7, %v5671_v44  ;;  %v5784_v43 = vpop.f32.mrf.mxu1 }
 0x2dd   : > { %v4870_v61 = vpack.c.bf16 %v4122_v4, %v4121_v9  ;;  %v5674_v56 = vpop.f32.mrf.mxu0  ;;  %v5785_v34 = vadd.f32 %v5784_v43, %v5783_v16 }
 0x2de   : > { %v3853_v59 = vadd.f32 %v5673_v2, %v6963_v32  ;;  %v5786_v21 = vpop.f32.mrf.mxu1  ;;  %v4091_v5 = vmul.f32 0.2, %v4011_v24  ;;  %vm4059_vm10 = vcmp.ge.f32.partialorder %v4011_v24, 0.0 }
 0x2df   : > { %4898 = vst [vmem:[%s6984_s9 + $0x60] sm:$0xff] %v4870_v61   ;;  %v5675_v15 = vpop.f32.mrf.mxu0 }
 0x2e0   : > { %v4014_v53 = vadd.f32 %v5785_v34, %v3853_v59  ;;  %v5676_v38 = vadd.f32 %v5675_v15, %v5674_v56  ;;  %v5787_v13 = vpop.f32.mrf.mxu1  ;;  %v4123_v33 = vsel %vm4059_vm10, %v4011_v24, %v4091_v5 }
 0x2e1   : > { %v5677_v23 = vpop.f32.mrf.mxu0  ;;  %v5788_v14 = vadd.f32 %v5787_v13, %v5786_v21 }
 0x2e2   : > { %vm4060_vm11 = vcmp.ge.f32.partialorder %v4014_v53, 0.0  ;;  %v4092_v30 = vmul.f32 0.2, %v4014_v53  ;;  %v3858_v45 = vadd.f32 %v5676_v38, %v6966_v37  ;;  %v5789_v17 = vpop.f32.mrf.mxu1 }
 0x2e3   : > { %v5678_v29 = vpop.f32.mrf.mxu0 }
 0x2e4   : > { %v4124_v32 = vsel %vm4060_vm11, %v4014_v53, %v4092_v30  ;;  %v4019_v6 = vadd.f32 %v5788_v14, %v3858_v45  ;;  %v5679_v8 = vadd.f32 %v5678_v29, %v5677_v23  ;;  %v5790_v42 = vpop.f32.mrf.mxu1 }
 0x2e5   : > { %v4875_v55 = vpack.c.bf16 %v4124_v32, %v4123_v33  ;;  %v5680_v27 = vpop.f32.mrf.mxu0  ;;  %v5791_v51 = vadd.f32 %v5790_v42, %v5789_v17 }
 0x2e6   : > { %v3861_v46 = vadd.f32 %v5679_v8, %v6969_v63  ;;  %v5792_v10 = vpop.f32.mrf.mxu1  ;;  %v4093_v12 = vmul.f32 0.2, %v4019_v6  ;;  %vm4061_vm12 = vcmp.ge.f32.partialorder %v4019_v6, 0.0 }
 0x2e7   : > { %4899 = vst [vmem:[%s6984_s9 + $0x68] sm:$0xff] %v4875_v55   ;;  %v5681_v31 = vpop.f32.mrf.mxu0 }
 0x2e8   : > { %v4022_v60 = vadd.f32 %v5791_v51, %v3861_v46  ;;  %v5682_v19 = vadd.f32 %v5681_v31, %v5680_v27  ;;  %v5793_v37 = vpop.f32.mrf.mxu1  ;;  %v4125_v3 = vsel %vm4061_vm12, %v4019_v6, %v4093_v12 }
 0x2e9   : > { %v5683_v26 = vpop.f32.mrf.mxu0  ;;  %v5794_v35 = vadd.f32 %v5793_v37, %v5792_v10 }
 0x2ea   : > { %vm4062_vm13 = vcmp.ge.f32.partialorder %v4022_v60, 0.0  ;;  %v4094_v39 = vmul.f32 0.2, %v4022_v60  ;;  %v3866_v22 = vadd.f32 %v5682_v19, %v6972_v62  ;;  %v5795_v25 = vpop.f32.mrf.mxu1 }
 0x2eb   : > { %v5684_v40 = vpop.f32.mrf.mxu0 }
 0x2ec   : > { %v4126_v63 = vsel %vm4062_vm13, %v4022_v60, %v4094_v39  ;;  %v4027_v11 = vadd.f32 %v5794_v35, %v3866_v22  ;;  %v5685_v28 = vadd.f32 %v5684_v40, %v5683_v26  ;;  %v5796_v48 = vpop.f32.mrf.mxu1 }
 0x2ed   : > { %v4880_v0 = vpack.c.bf16 %v4126_v63, %v4125_v3  ;;  %v5797_v57 = vadd.f32 %v5796_v48, %v5795_v25 }
 0x2ee   : > { %v3869_v58 = vadd.f32 %v5685_v28, %v6975_v41  ;;  %v4095_v54 = vmul.f32 0.2, %v4027_v11  ;;  %vm4063_vm14 = vcmp.ge.f32.partialorder %v4027_v11, 0.0 }
 0x2ef   : > { %4900 = vst [vmem:[%s6984_s9 + $0x70] sm:$0xff] %v4880_v0  }
 0x2f0   : > { %v4030_v47 = vadd.f32 %v5797_v57, %v3869_v58  ;;  %v4127_v62 = vsel %vm4063_vm14, %v4027_v11, %v4095_v54 }
 0x2f2   : > { %vm4064_vm15 = vcmp.ge.f32.partialorder %v4030_v47, 0.0  ;;  %v4096_v20 = vmul.f32 0.2, %v4030_v47 }
 0x2f4   : > { %v4128_v1 = vsel %vm4064_vm15, %v4030_v47, %v4096_v20 }
 0x2f5   : > { %v4885_v36 = vpack.c.bf16 %v4128_v1, %v4127_v62 }
 0x2f7   : > { %4901 = vst [vmem:[%s6984_s9 + $0x78] sm:$0xff] %v4885_v36  }
 0x2f8 PF: > { %s13_s12 = sadd.s32 1, %s5940_s12  }
 0x2f9   : > { %p10_p4 = scmp.ge.s32.totalorder %s13_s12, 4  }
 0x2fb   :  { %12 = sbr.rel (!%p10_p4) target bundleno = 1 (0x1), region = 62 }

// kernel: d_nlayers_forward.7
= control target key start
LH: loop header
LB: loop body
LE: loop exit
PB: predicated region body
PF: predicated region fallthrough
CT: control target
= control target key end

     0   :  { %s4747_s1 = inlined_call_operand.vmem [shape: bf16[2048,128], index: 1, kind: input, shape index: {}]   ;;  %s4748_s0 = inlined_call_operand.vmem [shape: bf16[128,2048], index: 0, kind: input, shape index: {}]   ;;  %s4749_s2 = inlined_call_operand.vmem [shape: f32[1,128], index: 2, kind: input, shape index: {}]   ;;  %s4750_s3 = inlined_call_operand.vmem [shape: bf16[128,128], index: 3, kind: output, shape index: {}]  }
   0x1   :  { %v3570_v0 = vld [vmem:[%s4747_s1 + $0x78] sm:$0xff]   ;;  %v3574_v4 = vld [vmem:[%s4747_s1 + $0x70] sm:$0xff]   ;;  %v3578_v8 = vld [vmem:[%s4747_s1 + $0x68] sm:$0xff]  }
   0x2   :  { %v3571_v1 = vld [vmem:[%s4747_s1 + $0xf8] sm:$0xff]   ;;  %3058 = vmatprep.subr.bf16.mxu0 %v3570_v0  ;;  %v3575_v5 = vld [vmem:[%s4747_s1 + $0xf0] sm:$0xff]   ;;  %v3579_v9 = vld [vmem:[%s4747_s1 + $0xe8] sm:$0xff]  }
   0x3   :  { %v3572_v2 = vld [vmem:[%s4747_s1 + $0x38] sm:$0xff]   ;;  %3122 = vmatprep.subr.bf16.mxu1 %v3571_v1  ;;  %v3576_v6 = vld [vmem:[%s4747_s1 + $0x30] sm:$0xff]   ;;  %v3580_v10 = vld [vmem:[%s4747_s1 + $0x28] sm:$0xff]  }
   0x4   :  { %v3573_v3 = vld [vmem:[%s4747_s1 + $0xb8] sm:$0xff]   ;;  %3059 = vmatpush3.bf16.msra.mxu0 %v3572_v2  ;;  %v3577_v7 = vld [vmem:[%s4747_s1 + $0xb0] sm:$0xff]   ;;  %v3581_v11 = vld [vmem:[%s4747_s1 + $0xa8] sm:$0xff]  }
   0x5   :  { %3123 = vmatpush3.bf16.msra.mxu1 %v3573_v3  ;;  %3060 = vmatprep.subr.bf16.mxu0 %v3574_v4  ;;  %v3582_v12 = vld [vmem:[%s4747_s1 + $0x60] sm:$0xff]   ;;  %v3586_v16 = vld [vmem:[%s4747_s1 + $0x58] sm:$0xff]   ;;  %v3590_v20 = vld [vmem:[%s4747_s1 + $0x50] sm:$0xff]  }
   0x6   :  { %3124 = vmatprep.subr.bf16.mxu1 %v3575_v5  ;;  %v3583_v13 = vld [vmem:[%s4747_s1 + $0xe0] sm:$0xff]   ;;  %v3587_v17 = vld [vmem:[%s4747_s1 + $0xd8] sm:$0xff]   ;;  %v3591_v21 = vld [vmem:[%s4747_s1 + $0xd0] sm:$0xff]  }
   0x7   :  { %v3584_v14 = vld [vmem:[%s4747_s1 + $0x20] sm:$0xff]   ;;  %v3588_v18 = vld [vmem:[%s4747_s1 + $0x18] sm:$0xff]   ;;  %v3592_v22 = vld [vmem:[%s4747_s1 + $0x10] sm:$0xff]  }
   0x8   :  { %3061 = vmatpush3.bf16.msra.mxu0 %v3576_v6  ;;  %v3585_v15 = vld [vmem:[%s4747_s1 + $0xa0] sm:$0xff]   ;;  %v3589_v19 = vld [vmem:[%s4747_s1 + $0x98] sm:$0xff]   ;;  %v3593_v23 = vld [vmem:[%s4747_s1 + $0x90] sm:$0xff]  }
   0x9   :  { %3125 = vmatpush3.bf16.msra.mxu1 %v3577_v7  ;;  %3062 = vmatprep.subr.bf16.mxu0 %v3578_v8  ;;  %v3594_v24 = vld [vmem:[%s4747_s1 + $0x48] sm:$0xff]   ;;  %v3598_v28 = vld [vmem:[%s4747_s1 + $0x40] sm:$0xff]   ;;  %v3602_v40 = vld [vmem:[%s4747_s1 + $0x178] sm:$0xff]  }
   0xa   :  { %3126 = vmatprep.subr.bf16.mxu1 %v3579_v9  ;;  %v3595_v25 = vld [vmem:[%s4747_s1 + $0xc8] sm:$0xff]   ;;  %v3599_v29 = vld [vmem:[%s4747_s1 + $0xc0] sm:$0xff]   ;;  %v3603_v41 = vld [vmem:[%s4747_s1 + $0x138] sm:$0xff]  }
   0xb   :  { %v3596_v26 = vld [vmem:[%s4747_s1 + $0x8] sm:$0xff]   ;;  %v3600_v30 = vld [vmem:[%s4747_s1] sm:$0xff]   ;;  %v3604_v42 = vld [vmem:[%s4747_s1 + $0x1f8] sm:$0xff]  }
   0xc   :  { %3063 = vmatpush3.bf16.msra.mxu0 %v3580_v10  ;;  %v3597_v27 = vld [vmem:[%s4747_s1 + $0x88] sm:$0xff]   ;;  %v3601_v31 = vld [vmem:[%s4747_s1 + $0x80] sm:$0xff]   ;;  %v3605_v43 = vld [vmem:[%s4747_s1 + $0x1b8] sm:$0xff]  }
   0xd   :  { %3127 = vmatpush3.bf16.msra.mxu1 %v3581_v11  ;;  %3064 = vmatprep.subr.bf16.mxu0 %v3582_v12  ;;  %v15_v32 = vld [vmem:[%s4748_s0] sm:$0xff]  ;;  %v16_v34 = vld [vmem:[%s4748_s0 + $0x8] sm:$0xff]  ;;  %v3606_v50 = vld [vmem:[%s4747_s1 + $0x170] sm:$0xff]  }
   0xe   :  { %3128 = vmatprep.subr.bf16.mxu1 %v3583_v13  ;;  %v23_v33 = vld [vmem:[%s4748_s0 + $0x40] sm:$0xff]  ;;  %v24_v37 = vld [vmem:[%s4748_s0 + $0x48] sm:$0xff]  ;;  %v3607_v52 = vld [vmem:[%s4747_s1 + $0x130] sm:$0xff]  }
   0xf   :  { %v2723_v35 = vcombine.low %v15_v32, %v23_v33  ;;  %v2724_v36 = vcombine.high %v15_v32, %v23_v33  ;;  %v2725_v38 = vcombine.low %v16_v34, %v24_v37  ;;  %v2726_v39 = vcombine.high %v16_v34, %v24_v37  ;;  %v31_v44 = vld [vmem:[%s4748_s0 + $0x80] sm:$0xff]  ;;  %v32_v47 = vld [vmem:[%s4748_s0 + $0x88] sm:$0xff]  ;;  %v3608_v54 = vld [vmem:[%s4747_s1 + $0x1f0] sm:$0xff]  }
  0x10   :  { %3065 = vmatpush3.bf16.msra.mxu0 %v3584_v14  ;;  %v39_v45 = vld [vmem:[%s4748_s0 + $0xc0] sm:$0xff]  ;;  %v40_v48 = vld [vmem:[%s4748_s0 + $0xc8] sm:$0xff]  ;;  %v3609_v55 = vld [vmem:[%s4747_s1 + $0x1b0] sm:$0xff]  }
  0x11   :  { %3129 = vmatpush3.bf16.msra.mxu1 %v3585_v15  ;;  %3066 = vmatprep.subr.bf16.mxu0 %v3586_v16  ;;  %v2740_v46 = vcombine.high %v31_v44, %v39_v45  ;;  %v2742_v49 = vcombine.high %v32_v47, %v40_v48  ;;  %v2739_v51 = vcombine.low %v31_v44, %v39_v45  ;;  %v47_v56 = vld [vmem:[%s4748_s0 + $0x100] sm:$0xff]  ;;  %v48_v58 = vld [vmem:[%s4748_s0 + $0x108] sm:$0xff]  ;;  %v3624_v32 = vld [vmem:[%s4747_s1 + $0x1d0] sm:$0xff]  }
  0x12   :  { %3130 = vmatprep.subr.bf16.mxu1 %v3587_v17  ;;  %1846 = vmatprep.mubr.bf16.mxu0 %v2724_v36  ;;  %v2741_v53 = vcombine.low %v32_v47, %v40_v48  ;;  %v55_v57 = vld [vmem:[%s4748_s0 + $0x140] sm:$0xff]  ;;  %v56_v59 = vld [vmem:[%s4748_s0 + $0x148] sm:$0xff]  ;;  %v3625_v33 = vld [vmem:[%s4747_s1 + $0x190] sm:$0xff]  }
  0x13   :  { %1943 = vmatprep.mubr.bf16.mxu1 %v2726_v39  ;;  %v2756_v60 = vcombine.high %v47_v56, %v55_v57  ;;  %v2758_v61 = vcombine.high %v48_v58, %v56_v59  ;;  %v3610_v62 = vld [vmem:[%s4747_s1 + $0x168] sm:$0xff]   ;;  %v2755_v2 = vcombine.low %v47_v56, %v55_v57  ;;  %v63_v3 = vld [vmem:[%s4748_s0 + $0x180] sm:$0xff]  ;;  %v2757_v6 = vcombine.low %v48_v58, %v56_v59  ;;  %v3634_v56 = vld [vmem:[%s4747_s1 + $0x278] sm:$0xff]  }
  0x14   :  { %3067 = vmatpush3.bf16.msra.mxu0 %v3588_v18  ;;  %v3611_v63 = vld [vmem:[%s4747_s1 + $0x128] sm:$0xff]   ;;  %v71_v4 = vld [vmem:[%s4748_s0 + $0x1c0] sm:$0xff]  ;;  %v3618_v18 = vld [vmem:[%s4747_s1 + $0x158] sm:$0xff]  }
  0x15   :  { %3131 = vmatpush3.bf16.msra.mxu1 %v3589_v19  ;;  %3068 = vmatprep.subr.bf16.mxu0 %v3590_v20  ;;  %v3612_v0 = vld [vmem:[%s4747_s1 + $0x1e8] sm:$0xff]   ;;  %v2772_v7 = vcombine.high %v63_v3, %v71_v4  ;;  %v3614_v10 = vld [vmem:[%s4747_s1 + $0x160] sm:$0xff]   ;;  %v2771_v19 = vcombine.low %v63_v3, %v71_v4  ;;  %v3619_v20 = vld [vmem:[%s4747_s1 + $0x118] sm:$0xff]  }
  0x16   :  { %3132 = vmatprep.subr.bf16.mxu1 %v3591_v21  ;;  %v3613_v1 = vld [vmem:[%s4747_s1 + $0x1a8] sm:$0xff]   ;;  %v3615_v11 = vld [vmem:[%s4747_s1 + $0x120] sm:$0xff]   ;;  %v3636_v58 = vld [vmem:[%s4747_s1 + $0x2f8] sm:$0xff]  }
  0x17   :  { %v64_v5 = vld [vmem:[%s4748_s0 + $0x188] sm:$0xff]  ;;  %v3616_v12 = vld [vmem:[%s4747_s1 + $0x1e0] sm:$0xff]   ;;  %v26_v3 = vld [vmem:[%s4748_s0 + $0x58] sm:$0xff] }
  0x18   :  { %3069 = vmatpush3.bf16.msra.mxu0 %v3592_v22  ;;  %v72_v8 = vld [vmem:[%s4748_s0 + $0x1c8] sm:$0xff]  ;;  %v3617_v13 = vld [vmem:[%s4747_s1 + $0x1a0] sm:$0xff]  }
  0x19   :  { %3133 = vmatpush3.bf16.msra.mxu1 %v3593_v23  ;;  %3070 = vmatprep.subr.bf16.mxu0 %v3594_v24  ;;  %v2774_v9 = vcombine.high %v64_v5, %v72_v8  ;;  %v79_v14 = vld [vmem:[%s4748_s0 + $0x200] sm:$0xff]  ;;  %v80_v16 = vld [vmem:[%s4748_s0 + $0x208] sm:$0xff]  ;;  %v2773_v21 = vcombine.low %v64_v5, %v72_v8  ;;  %v3620_v23 = vld [vmem:[%s4747_s1 + $0x1d8] sm:$0xff]  }
  0x1a   :  { %3134 = vmatprep.subr.bf16.mxu1 %v3595_v25  ;;  %v87_v15 = vld [vmem:[%s4748_s0 + $0x240] sm:$0xff]  ;;  %v88_v17 = vld [vmem:[%s4748_s0 + $0x248] sm:$0xff]  ;;  %v3621_v25 = vld [vmem:[%s4747_s1 + $0x198] sm:$0xff]  }
  0x1b   :  { %v2788_v22 = vcombine.high %v79_v14, %v87_v15  ;;  %v2790_v24 = vcombine.high %v80_v16, %v88_v17  ;;  %v2787_v34 = vcombine.low %v79_v14, %v87_v15  ;;  %v3627_v39 = vld [vmem:[%s4747_s1 + $0x108] sm:$0xff]   ;;  %v3631_v48 = vld [vmem:[%s4747_s1 + $0x100] sm:$0xff]   ;;  %v33_v8 = vld [vmem:[%s4748_s0 + $0x90] sm:$0xff] }
  0x1c   :  { %3071 = vmatpush3.bf16.msra.mxu0 %v3596_v26  ;;  %v95_v26 = vld [vmem:[%s4748_s0 + $0x280] sm:$0xff]  ;;  %v112_v44 = vld [vmem:[%s4748_s0 + $0x308] sm:$0xff]  ;;  %v3637_v15 = vld [vmem:[%s4747_s1 + $0x2b8] sm:$0xff]  }
  0x1d   :  { %3135 = vmatpush3.bf16.msra.mxu1 %v3597_v27  ;;  %3072 = vmatprep.subr.bf16.mxu0 %v3598_v28  ;;  %v103_v27 = vld [vmem:[%s4748_s0 + $0x2c0] sm:$0xff]  ;;  %v3622_v28 = vld [vmem:[%s4747_s1 + $0x150] sm:$0xff]   ;;  %v120_v45 = vld [vmem:[%s4748_s0 + $0x348] sm:$0xff] }
  0x1e   :  { %3136 = vmatprep.subr.bf16.mxu1 %v3599_v29  ;;  %v96_v29 = vld [vmem:[%s4748_s0 + $0x288] sm:$0xff]  ;;  %v2804_v36 = vcombine.high %v95_v26, %v103_v27  ;;  %v2803_v47 = vcombine.low %v95_v26, %v103_v27 }
  0x1f   :  { %v128_v57 = vld [vmem:[%s4748_s0 + $0x388] sm:$0xff] }
  0x20   :  { %3073 = vmatpush3.bf16.msra.mxu0 %v3600_v30  ;;  %v104_v30 = vld [vmem:[%s4748_s0 + $0x2c8] sm:$0xff] }
  0x21   :  { %3137 = vmatpush3.bf16.msra.mxu1 %v3601_v31  ;;  %3186 = vmatprep.subr.bf16.mxu0 %v3602_v40  ;;  %v3623_v31 = vld [vmem:[%s4747_s1 + $0x110] sm:$0xff]   ;;  %v2806_v37 = vcombine.high %v96_v29, %v104_v30  ;;  %v3628_v40 = vld [vmem:[%s4747_s1 + $0x1c8] sm:$0xff]  }
  0x22   :  { %3250 = vmatprep.subr.bf16.mxu1 %v3604_v42  ;;  %v119_v42 = vld [vmem:[%s4748_s0 + $0x340] sm:$0xff]  ;;  %v136_v59 = vld [vmem:[%s4748_s0 + $0x3c8] sm:$0xff] }
  0x23   :  { %1847 = vmatmul.mubr.bf16.vlgmr.msra.gmra.mxu0 %v2723_v35  ;;  %v2789_v35 = vcombine.low %v80_v16, %v88_v17  ;;  %v2837_v5 = vcombine.low %v128_v57, %v136_v59  ;;  %v3638_v17 = vld [vmem:[%s4747_s1 + $0x270] sm:$0xff]   ;;  %v3642_v26 = vld [vmem:[%s4747_s1 + $0x268] sm:$0xff]  }
  0x24   :  { %1944 = vmatmul.mubr.bf16.vlgmr.msra.gmra.mxu1 %v2725_v38  ;;  %3187 = vmatpush3.bf16.msra.mxu0 %v3603_v41  ;;  %v3626_v38 = vld [vmem:[%s4747_s1 + $0x148] sm:$0xff]   ;;  %v111_v41 = vld [vmem:[%s4748_s0 + $0x300] sm:$0xff] }
  0x25   :  { %3251 = vmatpush3.bf16.msra.mxu1 %v3605_v43  ;;  %1854 = vmatprep.mubr.bf16.mxu0 %v2740_v46  ;;  %v3629_v43 = vld [vmem:[%s4747_s1 + $0x188] sm:$0xff]   ;;  %v3630_v46 = vld [vmem:[%s4747_s1 + $0x140] sm:$0xff]  }
  0x26   :  { %1951 = vmatprep.mubr.bf16.mxu1 %v2742_v49  ;;  %3188 = vmatprep.subr.bf16.mxu0 %v3606_v50  ;;  %v2805_v49 = vcombine.low %v96_v29, %v104_v30  ;;  %v2820_v50 = vcombine.high %v111_v41, %v119_v42  ;;  %v3644_v27 = vld [vmem:[%s4747_s1 + $0x2e8] sm:$0xff]  }
  0x27   :  { %3252 = vmatprep.subr.bf16.mxu1 %v3608_v54  ;;  %v127_v54 = vld [vmem:[%s4748_s0 + $0x380] sm:$0xff] }
  0x28   :  { %3189 = vmatpush3.bf16.msra.mxu0 %v3607_v52  ;;  %v2822_v52 = vcombine.high %v112_v44, %v120_v45 }
  0x29   :  { %3253 = vmatpush3.bf16.msra.mxu1 %v3609_v55  ;;  %3190 = vmatprep.subr.bf16.mxu0 %v3610_v62  ;;  %v135_v55 = vld [vmem:[%s4748_s0 + $0x3c0] sm:$0xff] }
  0x2a   :  { %3254 = vmatprep.subr.bf16.mxu1 %v3612_v0  ;;  %v2836_v62 = vcombine.high %v127_v54, %v135_v55  ;;  %v17_v0 = vld [vmem:[%s4748_s0 + $0x10] sm:$0xff]  ;;  %v2835_v4 = vcombine.low %v127_v54, %v135_v55  ;;  %v82_v54 = vld [vmem:[%s4748_s0 + $0x218] sm:$0xff] }
  0x2b   :  { %1855 = vmatmul.mubr.bf16.gmra.mxu0 %v2739_v51  ;;  %v3632_v51 = vld [vmem:[%s4747_s1 + $0x1c0] sm:$0xff]   ;;  %v90_v55 = vld [vmem:[%s4748_s0 + $0x258] sm:$0xff] }
  0x2c   :  { %1952 = vmatmul.mubr.bf16.gmra.mxu1 %v2741_v53  ;;  %1862 = vmatprep.mubr.bf16.mxu0 %v2756_v60  ;;  %v3633_v53 = vld [vmem:[%s4747_s1 + $0x180] sm:$0xff]   ;;  %v2819_v60 = vcombine.low %v111_v41, %v119_v42  ;;  %v3650_v42 = vld [vmem:[%s4747_s1 + $0x258] sm:$0xff]  }
  0x2d   :  { %1959 = vmatprep.mubr.bf16.mxu1 %v2758_v61  ;;  %3191 = vmatpush3.bf16.msra.mxu0 %v3611_v63  ;;  %v2821_v61 = vcombine.low %v112_v44, %v120_v45  ;;  %v2838_v63 = vcombine.high %v128_v57, %v136_v59  ;;  %v3649_v41 = vld [vmem:[%s4747_s1 + $0x2a0] sm:$0xff]   ;;  %v3652_v44 = vld [vmem:[%s4747_s1 + $0x2d8] sm:$0xff]   ;;  %v3657_v57 = vld [vmem:[%s4747_s1 + $0x290] sm:$0xff]  }
  0x2e   :  { %3255 = vmatpush3.bf16.msra.mxu1 %v3613_v1  ;;  %3192 = vmatprep.subr.bf16.mxu0 %v3614_v10  ;;  %v25_v1 = vld [vmem:[%s4748_s0 + $0x50] sm:$0xff] }
  0x2f   :  { %3256 = vmatprep.subr.bf16.mxu1 %v3616_v12  ;;  %v2727_v10 = vcombine.low %v17_v0, %v25_v1  ;;  %v34_v12 = vld [vmem:[%s4748_s0 + $0x98] sm:$0xff] }
  0x31   :  { %3193 = vmatpush3.bf16.msra.mxu0 %v3615_v11  ;;  %v3635_v11 = vld [vmem:[%s4747_s1 + $0x238] sm:$0xff]  }
  0x32   :  { %3257 = vmatpush3.bf16.msra.mxu1 %v3617_v13  ;;  %3194 = vmatprep.subr.bf16.mxu0 %v3618_v18  ;;  %v42_v13 = vld [vmem:[%s4748_s0 + $0xd8] sm:$0xff] }
  0x33   :  { %1863 = vmatmul.mubr.bf16.gmra.mxu0 %v2755_v2  ;;  %3258 = vmatprep.subr.bf16.mxu1 %v3620_v23  ;;  %v18_v2 = vld [vmem:[%s4748_s0 + $0x18] sm:$0xff]  ;;  %v2746_v18 = vcombine.high %v34_v12, %v42_v13  ;;  %v57_v23 = vld [vmem:[%s4748_s0 + $0x150] sm:$0xff]  ;;  %v2745_v29 = vcombine.low %v34_v12, %v42_v13  ;;  %v2793_v13 = vcombine.low %v82_v54, %v90_v55 }
  0x34   :  { %1960 = vmatmul.mubr.bf16.gmra.mxu1 %v2757_v6  ;;  %1870 = vmatprep.mubr.bf16.mxu0 %v2772_v7  ;;  %v2728_v6 = vcombine.high %v17_v0, %v25_v1  ;;  %v2730_v7 = vcombine.high %v18_v2, %v26_v3  ;;  %v2729_v14 = vcombine.low %v18_v2, %v26_v3  ;;  %v3659_v0 = vld [vmem:[%s4747_s1 + $0x208] sm:$0xff]   ;;  %v3662_v2 = vld [vmem:[%s4747_s1 + $0x240] sm:$0xff]   ;;  %v97_v3 = vld [vmem:[%s4748_s0 + $0x290] sm:$0xff] }
  0x35   :  { %1967 = vmatprep.mubr.bf16.mxu1 %v2774_v9  ;;  %3195 = vmatpush3.bf16.msra.mxu0 %v3619_v20  ;;  %v41_v9 = vld [vmem:[%s4748_s0 + $0xd0] sm:$0xff]  ;;  %v3661_v1 = vld [vmem:[%s4747_s1 + $0x288] sm:$0xff]   ;;  %v3668_v12 = vld [vmem:[%s4747_s1 + $0x3f8] sm:$0xff]  }
  0x36   :  { %3259 = vmatpush3.bf16.msra.mxu1 %v3621_v25  ;;  %3196 = vmatprep.subr.bf16.mxu0 %v3622_v28  ;;  %v2744_v16 = vcombine.high %v33_v8, %v41_v9  ;;  %v3640_v20 = vld [vmem:[%s4747_s1 + $0x2f0] sm:$0xff]   ;;  %v58_v25 = vld [vmem:[%s4748_s0 + $0x158] sm:$0xff]  ;;  %v2743_v28 = vcombine.low %v33_v8, %v41_v9  ;;  %v3663_v8 = vld [vmem:[%s4747_s1 + $0x200] sm:$0xff]  }
  0x37   :  { %3260 = vmatprep.subr.bf16.mxu1 %v3624_v32  ;;  %v3643_v32 = vld [vmem:[%s4747_s1 + $0x228] sm:$0xff]   ;;  %v3665_v9 = vld [vmem:[%s4747_s1 + $0x280] sm:$0xff]  }
  0x39   :  { %3197 = vmatpush3.bf16.msra.mxu0 %v3623_v31 }
  0x3a   :  { %3261 = vmatpush3.bf16.msra.mxu1 %v3625_v33  ;;  %3198 = vmatprep.subr.bf16.mxu0 %v3626_v38  ;;  %v3645_v33 = vld [vmem:[%s4747_s1 + $0x2a8] sm:$0xff]   ;;  %v66_v38 = vld [vmem:[%s4748_s0 + $0x198] sm:$0xff] }
  0x3b   :  { %1871 = vmatmul.mubr.bf16.gmra.mxu0 %v2771_v19  ;;  %3262 = vmatprep.subr.bf16.mxu1 %v3628_v40  ;;  %v3639_v19 = vld [vmem:[%s4747_s1 + $0x230] sm:$0xff]   ;;  %v3647_v40 = vld [vmem:[%s4747_s1 + $0x220] sm:$0xff]  }
  0x3c   :  { %1968 = vmatmul.mubr.bf16.gmra.mxu1 %v2773_v21  ;;  %1878 = vmatprep.mubr.bf16.mxu0 %v2788_v22  ;;  %v3641_v21 = vld [vmem:[%s4747_s1 + $0x2b0] sm:$0xff]  }
  0x3d   :  { %1975 = vmatprep.mubr.bf16.mxu1 %v2790_v24  ;;  %3199 = vmatpush3.bf16.msra.mxu0 %v3627_v39  ;;  %v49_v22 = vld [vmem:[%s4748_s0 + $0x110] sm:$0xff]  ;;  %v50_v24 = vld [vmem:[%s4748_s0 + $0x118] sm:$0xff] }
  0x3e   :  { %3263 = vmatpush3.bf16.msra.mxu1 %v3629_v43  ;;  %3200 = vmatprep.subr.bf16.mxu0 %v3630_v46  ;;  %v2760_v30 = vcombine.high %v49_v22, %v57_v23  ;;  %v2762_v31 = vcombine.high %v50_v24, %v58_v25  ;;  %v74_v39 = vld [vmem:[%s4748_s0 + $0x1d8] sm:$0xff]  ;;  %v2759_v43 = vcombine.low %v49_v22, %v57_v23 }
  0x3f   :  { %3264 = vmatprep.subr.bf16.mxu1 %v3632_v51  ;;  %v2761_v45 = vcombine.low %v50_v24, %v58_v25  ;;  %v81_v51 = vld [vmem:[%s4748_s0 + $0x210] sm:$0xff] }
  0x40   :  { %v129_v24 = vld [vmem:[%s4748_s0 + $0x390] sm:$0xff] }
  0x41   :  { %3201 = vmatpush3.bf16.msra.mxu0 %v3631_v48  ;;  %v2778_v48 = vcombine.high %v66_v38, %v74_v39  ;;  %v137_v25 = vld [vmem:[%s4748_s0 + $0x3d0] sm:$0xff] }
  0x42   :  { %3265 = vmatpush3.bf16.msra.mxu1 %v3633_v53  ;;  %3314 = vmatprep.subr.bf16.mxu0 %v3634_v56  ;;  %v89_v53 = vld [vmem:[%s4748_s0 + $0x250] sm:$0xff] }
  0x43   :  { %1879 = vmatmul.mubr.bf16.gmra.mxu0 %v2787_v34  ;;  %3378 = vmatprep.subr.bf16.mxu1 %v3636_v58  ;;  %v3646_v34 = vld [vmem:[%s4747_s1 + $0x260] sm:$0xff]   ;;  %v3655_v56 = vld [vmem:[%s4747_s1 + $0x210] sm:$0xff]   ;;  %v3658_v58 = vld [vmem:[%s4747_s1 + $0x248] sm:$0xff]  }
  0x44   :  { %1976 = vmatmul.mubr.bf16.gmra.mxu1 %v2789_v35  ;;  %1886 = vmatprep.mubr.bf16.mxu0 %v2804_v36  ;;  %v65_v35 = vld [vmem:[%s4748_s0 + $0x190] sm:$0xff] }
  0x45   :  { %1983 = vmatprep.mubr.bf16.mxu1 %v2806_v37  ;;  %v73_v36 = vld [vmem:[%s4748_s0 + $0x1d0] sm:$0xff]  ;;  %v3648_v37 = vld [vmem:[%s4747_s1 + $0x2e0] sm:$0xff]  }
  0x46   :  { %v2776_v46 = vcombine.high %v65_v35, %v73_v36  ;;  %v2775_v59 = vcombine.low %v65_v35, %v73_v36  ;;  %v28_v35 = vld [vmem:[%s4748_s0 + $0x68] sm:$0xff]  ;;  %v2839_v36 = vcombine.low %v129_v24, %v137_v25 }
  0x4b   :  { %1887 = vmatmul.mubr.bf16.gmra.mxu0 %v2803_v47  ;;  %v3651_v47 = vld [vmem:[%s4747_s1 + $0x218] sm:$0xff]  }
  0x4c   :  { %1984 = vmatmul.mubr.bf16.gmra.mxu1 %v2805_v49  ;;  %1894 = vmatprep.mubr.bf16.mxu0 %v2820_v50  ;;  %v3653_v49 = vld [vmem:[%s4747_s1 + $0x298] sm:$0xff]   ;;  %v3654_v50 = vld [vmem:[%s4747_s1 + $0x250] sm:$0xff]  }
  0x4d   :  { %1991 = vmatprep.mubr.bf16.mxu1 %v2822_v52  ;;  %v3656_v52 = vld [vmem:[%s4747_s1 + $0x2d0] sm:$0xff]  }
  0x53   :  { %1895 = vmatmul.mubr.bf16.gmra.mxu0 %v2819_v60  ;;  %v3660_v60 = vld [vmem:[%s4747_s1 + $0x2c8] sm:$0xff]  }
  0x54   :  { %1992 = vmatmul.mubr.bf16.gmra.mxu1 %v2821_v61  ;;  %1902 = vmatprep.mubr.bf16.mxu0 %v2836_v62  ;;  %v2777_v61 = vcombine.low %v66_v38, %v74_v39  ;;  %v2792_v62 = vcombine.high %v81_v51, %v89_v53 }
  0x55   :  { %1999 = vmatprep.mubr.bf16.mxu1 %v2838_v63  ;;  %v2794_v63 = vcombine.high %v82_v54, %v90_v55  ;;  %v51_v54 = vld [vmem:[%s4748_s0 + $0x120] sm:$0xff] }
  0x56   :  { %v59_v55 = vld [vmem:[%s4748_s0 + $0x160] sm:$0xff] }
  0x5b   :  { %1903 = vmatmul.mubr.bf16.gmra.mxu0 %v2835_v4  ;;  %v105_v4 = vld [vmem:[%s4748_s0 + $0x2d0] sm:$0xff] }
  0x5c   :  { %2000 = vmatmul.mubr.bf16.gmra.mxu1 %v2837_v5  ;;  %2040 = vmatprep.mubr.bf16.mxu0 %v2728_v6  ;;  %v3664_v5 = vld [vmem:[%s4747_s1 + $0x2c0] sm:$0xff]   ;;  %v98_v6 = vld [vmem:[%s4748_s0 + $0x298] sm:$0xff] }
  0x5d   :  { %2137 = vmatprep.mubr.bf16.mxu1 %v2730_v7  ;;  %v106_v7 = vld [vmem:[%s4748_s0 + $0x2d8] sm:$0xff] }
  0x63   :  { %2041 = vmatmul.mubr.bf16.vlgmr.msra.gmra.mxu0 %v2727_v10  ;;  %v3666_v10 = vld [vmem:[%s4747_s1 + $0x378] sm:$0xff]  }
  0x64   :  { %2138 = vmatmul.mubr.bf16.vlgmr.msra.gmra.mxu1 %v2729_v14  ;;  %3315 = vmatpush3.bf16.msra.mxu0 %v3635_v11  ;;  %v2791_v11 = vcombine.low %v81_v51, %v89_v53  ;;  %v2808_v14 = vcombine.high %v97_v3, %v105_v4  ;;  %v3672_v51 = vld [vmem:[%s4747_s1 + $0x3f0] sm:$0xff]  }
  0x65   :  { %3379 = vmatpush3.bf16.msra.mxu1 %v3637_v15  ;;  %2048 = vmatprep.mubr.bf16.mxu0 %v2744_v16  ;;  %v2810_v15 = vcombine.high %v98_v6, %v106_v7  ;;  %v113_v16 = vld [vmem:[%s4748_s0 + $0x310] sm:$0xff] }
  0x66   :  { %2145 = vmatprep.mubr.bf16.mxu1 %v2746_v18  ;;  %3316 = vmatprep.subr.bf16.mxu0 %v3638_v17  ;;  %v121_v17 = vld [vmem:[%s4748_s0 + $0x350] sm:$0xff]  ;;  %v114_v18 = vld [vmem:[%s4748_s0 + $0x318] sm:$0xff] }
  0x67   :  { %3380 = vmatprep.subr.bf16.mxu1 %v3640_v20  ;;  %v2807_v20 = vcombine.low %v97_v3, %v105_v4  ;;  %v2824_v22 = vcombine.high %v113_v16, %v121_v17  ;;  %v3673_v53 = vld [vmem:[%s4747_s1 + $0x3b0] sm:$0xff]   ;;  %v3680_v3 = vld [vmem:[%s4747_s1 + $0x3e0] sm:$0xff]  }
  0x68   :  { %3317 = vmatpush3.bf16.msra.mxu0 %v3639_v19  ;;  %v122_v19 = vld [vmem:[%s4748_s0 + $0x358] sm:$0xff]  ;;  %v67_v4 = vld [vmem:[%s4748_s0 + $0x1a0] sm:$0xff] }
  0x69   :  { %3381 = vmatpush3.bf16.msra.mxu1 %v3641_v21  ;;  %3318 = vmatprep.subr.bf16.mxu0 %v3642_v26  ;;  %v2809_v21 = vcombine.low %v98_v6, %v106_v7  ;;  %v2826_v23 = vcombine.high %v114_v18, %v122_v19  ;;  %v130_v26 = vld [vmem:[%s4748_s0 + $0x398] sm:$0xff]  ;;  %v68_v6 = vld [vmem:[%s4748_s0 + $0x1a8] sm:$0xff]  ;;  %v3679_v7 = vld [vmem:[%s4747_s1 + $0x320] sm:$0xff]  }
  0x6a   :  { %3382 = vmatprep.subr.bf16.mxu1 %v3644_v27  ;;  %v138_v27 = vld [vmem:[%s4748_s0 + $0x3d8] sm:$0xff] }
  0x6b   :  { %2049 = vmatmul.mubr.bf16.gmra.mxu0 %v2743_v28  ;;  %v2823_v28 = vcombine.low %v113_v16, %v121_v17  ;;  %v3683_v16 = vld [vmem:[%s4747_s1 + $0x318] sm:$0xff]  }
  0x6c   :  { %2146 = vmatmul.mubr.bf16.gmra.mxu1 %v2745_v29  ;;  %2056 = vmatprep.mubr.bf16.mxu0 %v2760_v30  ;;  %v2825_v29 = vcombine.low %v114_v18, %v122_v19  ;;  %v2840_v30 = vcombine.high %v129_v24, %v137_v25  ;;  %v3685_v17 = vld [vmem:[%s4747_s1 + $0x398] sm:$0xff]   ;;  %v3686_v18 = vld [vmem:[%s4747_s1 + $0x350] sm:$0xff]   ;;  %v92_v24 = vld [vmem:[%s4748_s0 + $0x268] sm:$0xff] }
  0x6d   :  { %2153 = vmatprep.mubr.bf16.mxu1 %v2762_v31  ;;  %3319 = vmatpush3.bf16.msra.mxu0 %v3643_v32  ;;  %v2842_v31 = vcombine.high %v130_v26, %v138_v27  ;;  %v19_v32 = vld [vmem:[%s4748_s0 + $0x20] sm:$0xff]  ;;  %v3688_v19 = vld [vmem:[%s4747_s1 + $0x3d0] sm:$0xff]  }
  0x6e   :  { %3383 = vmatpush3.bf16.msra.mxu1 %v3645_v33  ;;  %3320 = vmatprep.subr.bf16.mxu0 %v3646_v34  ;;  %v27_v33 = vld [vmem:[%s4748_s0 + $0x60] sm:$0xff]  ;;  %v20_v34 = vld [vmem:[%s4748_s0 + $0x28] sm:$0xff]  ;;  %v3689_v25 = vld [vmem:[%s4747_s1 + $0x390] sm:$0xff]  }
  0x6f   :  { %3384 = vmatprep.subr.bf16.mxu1 %v3648_v37  ;;  %v2841_v37 = vcombine.low %v130_v26, %v138_v27  ;;  %v2732_v38 = vcombine.high %v19_v32, %v27_v33  ;;  %v2734_v39 = vcombine.high %v20_v34, %v28_v35  ;;  %v3690_v26 = vld [vmem:[%s4747_s1 + $0x348] sm:$0xff]  }
  0x71   :  { %3321 = vmatpush3.bf16.msra.mxu0 %v3647_v40  ;;  %v35_v40 = vld [vmem:[%s4748_s0 + $0xa0] sm:$0xff] }
  0x72   :  { %3385 = vmatpush3.bf16.msra.mxu1 %v3649_v41  ;;  %3322 = vmatprep.subr.bf16.mxu0 %v3650_v42  ;;  %v43_v41 = vld [vmem:[%s4748_s0 + $0xe0] sm:$0xff]  ;;  %v2731_v42 = vcombine.low %v19_v32, %v27_v33  ;;  %v3691_v32 = vld [vmem:[%s4747_s1 + $0x308] sm:$0xff]  }
  0x73   :  { %2057 = vmatmul.mubr.bf16.gmra.mxu0 %v2759_v43  ;;  %3386 = vmatprep.subr.bf16.mxu1 %v3652_v44  ;;  %v36_v43 = vld [vmem:[%s4748_s0 + $0xa8] sm:$0xff] }
  0x74   :  { %2154 = vmatmul.mubr.bf16.gmra.mxu1 %v2761_v45  ;;  %2064 = vmatprep.mubr.bf16.mxu0 %v2776_v46  ;;  %v44_v44 = vld [vmem:[%s4748_s0 + $0xe8] sm:$0xff]  ;;  %v2733_v45 = vcombine.low %v20_v34, %v28_v35  ;;  %v3667_v46 = vld [vmem:[%s4747_s1 + $0x338] sm:$0xff]   ;;  %v3694_v34 = vld [vmem:[%s4747_s1 + $0x340] sm:$0xff]  }
  0x75   :  { %2161 = vmatprep.mubr.bf16.mxu1 %v2778_v48  ;;  %3323 = vmatpush3.bf16.msra.mxu0 %v3651_v47  ;;  %v3669_v47 = vld [vmem:[%s4747_s1 + $0x3b8] sm:$0xff]   ;;  %v2748_v48 = vcombine.high %v35_v40, %v43_v41  ;;  %v3693_v33 = vld [vmem:[%s4747_s1 + $0x388] sm:$0xff]   ;;  %v3696_v35 = vld [vmem:[%s4747_s1 + $0x3c0] sm:$0xff]  }
  0x76   :  { %3387 = vmatpush3.bf16.msra.mxu1 %v3653_v49  ;;  %3324 = vmatprep.subr.bf16.mxu0 %v3654_v50  ;;  %v2750_v49 = vcombine.high %v36_v43, %v44_v44  ;;  %v3670_v50 = vld [vmem:[%s4747_s1 + $0x370] sm:$0xff]  }
  0x77   :  { %3388 = vmatprep.subr.bf16.mxu1 %v3656_v52  ;;  %v3671_v52 = vld [vmem:[%s4747_s1 + $0x330] sm:$0xff]  }
  0x79   :  { %3325 = vmatpush3.bf16.msra.mxu0 %v3655_v56  ;;  %v3674_v56 = vld [vmem:[%s4747_s1 + $0x368] sm:$0xff]  }
  0x7a   :  { %3389 = vmatpush3.bf16.msra.mxu1 %v3657_v57  ;;  %3326 = vmatprep.subr.bf16.mxu0 %v3658_v58  ;;  %v52_v57 = vld [vmem:[%s4748_s0 + $0x128] sm:$0xff] }
  0x7b   :  { %2065 = vmatmul.mubr.bf16.gmra.mxu0 %v2775_v59  ;;  %3390 = vmatprep.subr.bf16.mxu1 %v3660_v60  ;;  %v60_v58 = vld [vmem:[%s4748_s0 + $0x168] sm:$0xff]  ;;  %v2747_v60 = vcombine.low %v35_v40, %v43_v41  ;;  %v3697_v41 = vld [vmem:[%s4747_s1 + $0x380] sm:$0xff]  }
  0x7c   :  { %2162 = vmatmul.mubr.bf16.gmra.mxu1 %v2777_v61  ;;  %2072 = vmatprep.mubr.bf16.mxu0 %v2792_v62  ;;  %v3676_v59 = vld [vmem:[%s4747_s1 + $0x3e8] sm:$0xff]   ;;  %v2749_v61 = vcombine.low %v36_v43, %v44_v44  ;;  %v2764_v62 = vcombine.high %v51_v54, %v59_v55 }
  0x7d   :  { %2169 = vmatprep.mubr.bf16.mxu1 %v2794_v63  ;;  %3327 = vmatpush3.bf16.msra.mxu0 %v3659_v0  ;;  %v2766_v63 = vcombine.high %v52_v57, %v60_v58  ;;  %v3675_v0 = vld [vmem:[%s4747_s1 + $0x328] sm:$0xff]  }
  0x7e   :  { %3391 = vmatpush3.bf16.msra.mxu1 %v3661_v1  ;;  %3328 = vmatprep.subr.bf16.mxu0 %v3662_v2  ;;  %v3677_v1 = vld [vmem:[%s4747_s1 + $0x3a8] sm:$0xff]   ;;  %v3678_v2 = vld [vmem:[%s4747_s1 + $0x360] sm:$0xff]  }
  0x7f   :  { %3392 = vmatprep.subr.bf16.mxu1 %v3664_v5  ;;  %v75_v5 = vld [vmem:[%s4748_s0 + $0x1e0] sm:$0xff]  ;;  %v108_v40 = vld [vmem:[%s4748_s0 + $0x2e8] sm:$0xff] }
  0x80   :  { %v2779_v27 = vcombine.low %v67_v4, %v75_v5 }
  0x81   :  { %3329 = vmatpush3.bf16.msra.mxu0 %v3663_v8  ;;  %v76_v8 = vld [vmem:[%s4748_s0 + $0x1e8] sm:$0xff] }
  0x82   :  { %3393 = vmatpush3.bf16.msra.mxu1 %v3665_v9  ;;  %3442 = vmatprep.subr.bf16.mxu0 %v3666_v10  ;;  %v3681_v9 = vld [vmem:[%s4747_s1 + $0x3a0] sm:$0xff]   ;;  %v3682_v10 = vld [vmem:[%s4747_s1 + $0x358] sm:$0xff]  }
  0x83   :  { %2073 = vmatmul.mubr.bf16.gmra.mxu0 %v2791_v11  ;;  %3506 = vmatprep.subr.bf16.mxu1 %v3668_v12  ;;  %v2763_v11 = vcombine.low %v51_v54, %v59_v55  ;;  %v3684_v12 = vld [vmem:[%s4747_s1 + $0x3d8] sm:$0xff]   ;;  %v131_v54 = vld [vmem:[%s4748_s0 + $0x3a0] sm:$0xff] }
  0x84   :  { %2170 = vmatmul.mubr.bf16.gmra.mxu1 %v2793_v13  ;;  %2080 = vmatprep.mubr.bf16.mxu0 %v2808_v14  ;;  %v2765_v13 = vcombine.low %v52_v57, %v60_v58  ;;  %v2780_v14 = vcombine.high %v67_v4, %v75_v5  ;;  %v139_v55 = vld [vmem:[%s4748_s0 + $0x3e0] sm:$0xff]  ;;  %v140_v57 = vld [vmem:[%s4748_s0 + $0x3e8] sm:$0xff] }
  0x85   :  { %2177 = vmatprep.mubr.bf16.mxu1 %v2810_v15  ;;  %v2782_v15 = vcombine.high %v68_v6, %v76_v8 }
  0x8b   :  { %2081 = vmatmul.mubr.bf16.gmra.mxu0 %v2807_v20  ;;  %v83_v20 = vld [vmem:[%s4748_s0 + $0x220] sm:$0xff] }
  0x8c   :  { %2178 = vmatmul.mubr.bf16.gmra.mxu1 %v2809_v21  ;;  %2088 = vmatprep.mubr.bf16.mxu0 %v2824_v22  ;;  %v91_v21 = vld [vmem:[%s4748_s0 + $0x260] sm:$0xff]  ;;  %v84_v22 = vld [vmem:[%s4748_s0 + $0x228] sm:$0xff] }
  0x8d   :  { %2185 = vmatprep.mubr.bf16.mxu1 %v2826_v23  ;;  %v3687_v23 = vld [vmem:[%s4747_s1 + $0x310] sm:$0xff]   ;;  %v2797_v43 = vcombine.low %v84_v22, %v92_v24 }
  0x93   :  { %2089 = vmatmul.mubr.bf16.gmra.mxu0 %v2823_v28  ;;  %v3692_v28 = vld [vmem:[%s4747_s1 + $0x3c8] sm:$0xff]  }
  0x94   :  { %2186 = vmatmul.mubr.bf16.gmra.mxu1 %v2825_v29  ;;  %2096 = vmatprep.mubr.bf16.mxu0 %v2840_v30  ;;  %v2781_v29 = vcombine.low %v68_v6, %v76_v8  ;;  %v2796_v30 = vcombine.high %v83_v20, %v91_v21  ;;  %v37_v6 = vld [vmem:[%s4748_s0 + $0xb0] sm:$0xff]  ;;  %v38_v8 = vld [vmem:[%s4748_s0 + $0xb8] sm:$0xff] }
  0x95   :  { %2193 = vmatprep.mubr.bf16.mxu1 %v2842_v31  ;;  %v2798_v31 = vcombine.high %v84_v22, %v92_v24  ;;  %v54_v22 = vld [vmem:[%s4748_s0 + $0x138] sm:$0xff] }
  0x9b   :  { %2097 = vmatmul.mubr.bf16.gmra.mxu0 %v2839_v36  ;;  %v99_v36 = vld [vmem:[%s4748_s0 + $0x2a0] sm:$0xff] }
  0x9c   :  { %2194 = vmatmul.mubr.bf16.gmra.mxu1 %v2841_v37  ;;  %2234 = vmatprep.mubr.bf16.mxu0 %v2732_v38  ;;  %v107_v37 = vld [vmem:[%s4748_s0 + $0x2e0] sm:$0xff] }
  0x9d   :  { %2331 = vmatprep.mubr.bf16.mxu1 %v2734_v39  ;;  %v3695_v38 = vld [vmem:[%s4747_s1 + $0x300] sm:$0xff]   ;;  %v100_v39 = vld [vmem:[%s4748_s0 + $0x2a8] sm:$0xff]  ;;  %v2812_v44 = vcombine.high %v99_v36, %v107_v37 }
  0xa3   :  { %2235 = vmatmul.mubr.bf16.vlgmr.msra.gmra.mxu0 %v2731_v42  ;;  %v2795_v42 = vcombine.low %v83_v20, %v91_v21 }
  0xa4   :  { %2332 = vmatmul.mubr.bf16.vlgmr.msra.gmra.mxu1 %v2733_v45  ;;  %3443 = vmatpush3.bf16.msra.mxu0 %v3667_v46  ;;  %v2814_v45 = vcombine.high %v100_v39, %v108_v40  ;;  %v115_v46 = vld [vmem:[%s4748_s0 + $0x320] sm:$0xff] }
  0xa5   :  { %3507 = vmatpush3.bf16.msra.mxu1 %v3669_v47  ;;  %2242 = vmatprep.mubr.bf16.mxu0 %v2748_v48  ;;  %v123_v47 = vld [vmem:[%s4748_s0 + $0x360] sm:$0xff]  ;;  %v116_v48 = vld [vmem:[%s4748_s0 + $0x328] sm:$0xff] }
  0xa6   :  { %2339 = vmatprep.mubr.bf16.mxu1 %v2750_v49  ;;  %3444 = vmatprep.subr.bf16.mxu0 %v3670_v50  ;;  %v124_v49 = vld [vmem:[%s4748_s0 + $0x368] sm:$0xff]  ;;  %v2811_v50 = vcombine.low %v99_v36, %v107_v37  ;;  %v2827_v58 = vcombine.low %v115_v46, %v123_v47 }
  0xa7   :  { %3508 = vmatprep.subr.bf16.mxu1 %v3672_v51  ;;  %v2813_v51 = vcombine.low %v100_v39, %v108_v40 }
  0xa8   :  { %3445 = vmatpush3.bf16.msra.mxu0 %v3671_v52  ;;  %v2828_v52 = vcombine.high %v115_v46, %v123_v47  ;;  %v70_v46 = vld [vmem:[%s4748_s0 + $0x1b8] sm:$0xff] }
  0xa9   :  { %3509 = vmatpush3.bf16.msra.mxu1 %v3673_v53  ;;  %3446 = vmatprep.subr.bf16.mxu0 %v3674_v56  ;;  %v2830_v53 = vcombine.high %v116_v48, %v124_v49  ;;  %v132_v56 = vld [vmem:[%s4748_s0 + $0x3a8] sm:$0xff]  ;;  %v78_v47 = vld [vmem:[%s4748_s0 + $0x1f8] sm:$0xff] }
  0xaa   :  { %3510 = vmatprep.subr.bf16.mxu1 %v3676_v59  ;;  %v2829_v59 = vcombine.low %v116_v48, %v124_v49 }
  0xab   :  { %2243 = vmatmul.mubr.bf16.gmra.mxu0 %v2747_v60  ;;  %v2844_v60 = vcombine.high %v131_v54, %v139_v55 }
  0xac   :  { %2340 = vmatmul.mubr.bf16.gmra.mxu1 %v2749_v61  ;;  %2250 = vmatprep.mubr.bf16.mxu0 %v2764_v62  ;;  %v2846_v61 = vcombine.high %v132_v56, %v140_v57  ;;  %v21_v62 = vld [vmem:[%s4748_s0 + $0x30] sm:$0xff] }
  0xad   :  { %2347 = vmatprep.mubr.bf16.mxu1 %v2766_v63  ;;  %3447 = vmatpush3.bf16.msra.mxu0 %v3675_v0  ;;  %v29_v63 = vld [vmem:[%s4748_s0 + $0x70] sm:$0xff]  ;;  %v22_v0 = vld [vmem:[%s4748_s0 + $0x38] sm:$0xff] }
  0xae   :  { %3511 = vmatpush3.bf16.msra.mxu1 %v3677_v1  ;;  %3448 = vmatprep.subr.bf16.mxu0 %v3678_v2  ;;  %v30_v1 = vld [vmem:[%s4748_s0 + $0x78] sm:$0xff]  ;;  %v2843_v2 = vcombine.low %v131_v54, %v139_v55  ;;  %v2736_v4 = vcombine.high %v21_v62, %v29_v63 }
  0xaf   :  { %3512 = vmatprep.subr.bf16.mxu1 %v3680_v3  ;;  %v2845_v3 = vcombine.low %v132_v56, %v140_v57  ;;  %v2738_v5 = vcombine.high %v22_v0, %v30_v1  ;;  %v2786_v56 = vcombine.high %v70_v46, %v78_v47 }
  0xb1   :  { %3449 = vmatpush3.bf16.msra.mxu0 %v3679_v7  ;;  %v45_v7 = vld [vmem:[%s4748_s0 + $0xf0] sm:$0xff] }
  0xb2   :  { %3513 = vmatpush3.bf16.msra.mxu1 %v3681_v9  ;;  %3450 = vmatprep.subr.bf16.mxu0 %v3682_v10  ;;  %v46_v9 = vld [vmem:[%s4748_s0 + $0xf8] sm:$0xff]  ;;  %v2735_v10 = vcombine.low %v21_v62, %v29_v63 }
  0xb3   :  { %2251 = vmatmul.mubr.bf16.gmra.mxu0 %v2763_v11  ;;  %3514 = vmatprep.subr.bf16.mxu1 %v3684_v12  ;;  %v2737_v11 = vcombine.low %v22_v0, %v30_v1  ;;  %v2752_v12 = vcombine.high %v37_v6, %v45_v7  ;;  %v85_v1 = vld [vmem:[%s4748_s0 + $0x230] sm:$0xff] }
  0xb4   :  { %2348 = vmatmul.mubr.bf16.gmra.mxu1 %v2765_v13  ;;  %2258 = vmatprep.mubr.bf16.mxu0 %v2780_v14  ;;  %v2754_v13 = vcombine.high %v38_v8, %v46_v9 }
  0xb5   :  { %2355 = vmatprep.mubr.bf16.mxu1 %v2782_v15  ;;  %3451 = vmatpush3.bf16.msra.mxu0 %v3683_v16  ;;  %v4417_v16 = vld [vmem:[%s4749_s2] ss:$0 sm:$0xff] }
  0xb6   :  { %3515 = vmatpush3.bf16.msra.mxu1 %v3685_v17  ;;  %3452 = vmatprep.subr.bf16.mxu0 %v3686_v18  ;;  %v53_v18 = vld [vmem:[%s4748_s0 + $0x130] sm:$0xff] }
  0xb7   :  { %3516 = vmatprep.subr.bf16.mxu1 %v3688_v19  ;;  %v61_v19 = vld [vmem:[%s4748_s0 + $0x170] sm:$0xff] }
  0xb9   :  { %3453 = vmatpush3.bf16.msra.mxu0 %v3687_v23  ;;  %v62_v23 = vld [vmem:[%s4748_s0 + $0x178] sm:$0xff] }
  0xba   :  { %3517 = vmatpush3.bf16.msra.mxu1 %v3689_v25  ;;  %3454 = vmatprep.subr.bf16.mxu0 %v3690_v26  ;;  %v2751_v26 = vcombine.low %v37_v6, %v45_v7  ;;  %v86_v6 = vld [vmem:[%s4748_s0 + $0x238] sm:$0xff] }
  0xbb   :  { %2259 = vmatmul.mubr.bf16.gmra.mxu0 %v2779_v27  ;;  %3518 = vmatprep.subr.bf16.mxu1 %v3692_v28  ;;  %v94_v7 = vld [vmem:[%s4748_s0 + $0x278] sm:$0xff] }
  0xbc   :  { %2356 = vmatmul.mubr.bf16.gmra.mxu1 %v2781_v29  ;;  %2266 = vmatprep.mubr.bf16.mxu0 %v2796_v30  ;;  %v2753_v29 = vcombine.low %v38_v8, %v46_v9  ;;  %v2768_v30 = vcombine.high %v53_v18, %v61_v19 }
  0xbd   :  { %2363 = vmatprep.mubr.bf16.mxu1 %v2798_v31  ;;  %3455 = vmatpush3.bf16.msra.mxu0 %v3691_v32  ;;  %v2770_v32 = vcombine.high %v54_v22, %v62_v23 }
  0xbe   :  { %3519 = vmatpush3.bf16.msra.mxu1 %v3693_v33  ;;  %3456 = vmatprep.subr.bf16.mxu0 %v3694_v34 }
  0xbf   :  { %3520 = vmatprep.subr.bf16.mxu1 %v3696_v35 }
  0xc1   :  { %3457 = vmatpush3.bf16.msra.mxu0 %v3695_v38 }
  0xc2   :  { %3521 = vmatpush3.bf16.msra.mxu1 %v3697_v41  ;;  %v69_v41 = vld [vmem:[%s4748_s0 + $0x1b0] sm:$0xff] }
  0xc3   :  { %2267 = vmatmul.mubr.bf16.gmra.mxu0 %v2795_v42  ;;  %v77_v42 = vld [vmem:[%s4748_s0 + $0x1f0] sm:$0xff] }
  0xc4   :  { %2364 = vmatmul.mubr.bf16.gmra.mxu1 %v2797_v43  ;;  %2274 = vmatprep.mubr.bf16.mxu0 %v2812_v44  ;;  %v2784_v54 = vcombine.high %v69_v41, %v77_v42 }
  0xc5   :  { %2371 = vmatprep.mubr.bf16.mxu1 %v2814_v45 }
  0xcb   :  { %2275 = vmatmul.mubr.bf16.gmra.mxu0 %v2811_v50  ;;  %v2767_v50 = vcombine.low %v53_v18, %v61_v19 }
  0xcc   :  { %2372 = vmatmul.mubr.bf16.gmra.mxu1 %v2813_v51  ;;  %2282 = vmatprep.mubr.bf16.mxu0 %v2828_v52 }
  0xcd   :  { %2379 = vmatprep.mubr.bf16.mxu1 %v2830_v53  ;;  %v2769_v53 = vcombine.low %v54_v22, %v62_v23 }
  0xd3   :  { %2283 = vmatmul.mubr.bf16.gmra.mxu0 %v2827_v58 }
  0xd4   :  { %2380 = vmatmul.mubr.bf16.gmra.mxu1 %v2829_v59  ;;  %2290 = vmatprep.mubr.bf16.mxu0 %v2844_v60 }
  0xd5   :  { %2387 = vmatprep.mubr.bf16.mxu1 %v2846_v61 }
  0xdb   :  { %2291 = vmatmul.mubr.bf16.gmra.mxu0 %v2843_v2  ;;  %v93_v2 = vld [vmem:[%s4748_s0 + $0x270] sm:$0xff] }
  0xdc   :  { %2388 = vmatmul.mubr.bf16.gmra.mxu1 %v2845_v3  ;;  %2428 = vmatprep.mubr.bf16.mxu0 %v2736_v4 }
  0xdd   :  { %2525 = vmatprep.mubr.bf16.mxu1 %v2738_v5 }
  0xe3   :  { %v3074_v14 = vpop.f32.mrf.mxu0  ;;  %2429 = vmatmul.mubr.bf16.vlgmr.msra.gmra.mxu0 %v2735_v10  ;;  %v2783_v10 = vcombine.low %v69_v41, %v77_v42 }
  0xe4   :  { %v3138_v15 = vpop.f32.mrf.mxu1  ;;  %2526 = vmatmul.mubr.bf16.vlgmr.msra.gmra.mxu1 %v2737_v11  ;;  %2436 = vmatprep.mubr.bf16.mxu0 %v2752_v12 }
  0xe5   :  { %v3075_v17 = vpop.f32.mrf.mxu0  ;;  %2533 = vmatprep.mubr.bf16.mxu1 %v2754_v13  ;;  %v2785_v13 = vcombine.low %v70_v46, %v78_v47 }
  0xe6   :  { %v3076_v20 = vadd.f32 %v3075_v17, %v3074_v14  ;;  %v3139_v21 = vpop.f32.mrf.mxu1  ;;  %v2800_v14 = vcombine.high %v85_v1, %v93_v2  ;;  %v2802_v17 = vcombine.high %v86_v6, %v94_v7 }
  0xe7   :  { %v3140_v24 = vadd.f32 %v3139_v21, %v3138_v15  ;;  %v3077_v25 = vpop.f32.mrf.mxu0 }
  0xe8   :  { %v1849_v27 = vadd.f32 %v3076_v20, %v4417_v16  ;;  %v3141_v28 = vpop.f32.mrf.mxu1 }
  0xe9   :  { %v3078_v31 = vpop.f32.mrf.mxu0 }
  0xea   :  { %v4432_v33 = vadd.f32 %v3140_v24, %v1849_v27  ;;  %v3079_v34 = vadd.f32 %v3078_v31, %v3077_v25  ;;  %v3142_v35 = vpop.f32.mrf.mxu1  ;;  %v109_v27 = vld [vmem:[%s4748_s0 + $0x2f0] sm:$0xff]  ;;  %v102_v31 = vld [vmem:[%s4748_s0 + $0x2b8] sm:$0xff] }
  0xeb   :  { %v3143_v36 = vadd.f32 %v3142_v35, %v3141_v28  ;;  %v3080_v37 = vpop.f32.mrf.mxu0  ;;  %2437 = vmatmul.mubr.bf16.gmra.mxu0 %v2751_v26  ;;  %v101_v26 = vld [vmem:[%s4748_s0 + $0x2b0] sm:$0xff] }
  0xec   :  { %v1852_v38 = vadd.f32 %v3079_v34, %v4417_v16  ;;  %v3144_v39 = vpop.f32.mrf.mxu1  ;;  %2534 = vmatmul.mubr.bf16.gmra.mxu1 %v2753_v29  ;;  %2444 = vmatprep.mubr.bf16.mxu0 %v2768_v30 }
  0xed   :  { %v3081_v40 = vpop.f32.mrf.mxu0  ;;  %2541 = vmatprep.mubr.bf16.mxu1 %v2770_v32  ;;  %v110_v32 = vld [vmem:[%s4748_s0 + $0x2f8] sm:$0xff] }
  0xee   :  { %v4441_v43 = vadd.f32 %v3143_v36, %v1852_v38  ;;  %v3082_v44 = vadd.f32 %v3081_v40, %v3080_v37  ;;  %v3145_v45 = vpop.f32.mrf.mxu1  ;;  %v2799_v36 = vcombine.low %v85_v1, %v93_v2  ;;  %v2816_v40 = vcombine.high %v101_v26, %v109_v27 }
  0xef   :  { %v3146_v48 = vadd.f32 %v3145_v45, %v3144_v39  ;;  %v3083_v49 = vpop.f32.mrf.mxu0  ;;  %v2801_v39 = vcombine.low %v86_v6, %v94_v7  ;;  %v2818_v42 = vcombine.high %v102_v31, %v110_v32  ;;  %v2817_v1 = vcombine.low %v102_v31, %v110_v32 }
  0xf0   :  { %v1857_v51 = vadd.f32 %v3082_v44, %v4417_v16  ;;  %v3147_v52 = vpop.f32.mrf.mxu1 }
  0xf1   :  { %v3084_v55 = vpop.f32.mrf.mxu0 }
  0xf2   :  { %v4450_v57 = vadd.f32 %v3146_v48, %v1857_v51  ;;  %v3085_v58 = vadd.f32 %v3084_v55, %v3083_v49  ;;  %v3148_v59 = vpop.f32.mrf.mxu1 }
  0xf3   :  { %v3149_v60 = vadd.f32 %v3148_v59, %v3147_v52  ;;  %v3086_v61 = vpop.f32.mrf.mxu0  ;;  %2445 = vmatmul.mubr.bf16.gmra.mxu0 %v2767_v50  ;;  %v117_v52 = vld [vmem:[%s4748_s0 + $0x330] sm:$0xff]  ;;  %v126_v59 = vld [vmem:[%s4748_s0 + $0x378] sm:$0xff] }
  0xf4   :  { %v1860_v62 = vadd.f32 %v3085_v58, %v4417_v16  ;;  %v3150_v63 = vpop.f32.mrf.mxu1  ;;  %2542 = vmatmul.mubr.bf16.gmra.mxu1 %v2769_v53  ;;  %2452 = vmatprep.mubr.bf16.mxu0 %v2784_v54  ;;  %v125_v53 = vld [vmem:[%s4748_s0 + $0x370] sm:$0xff]  ;;  %v118_v58 = vld [vmem:[%s4748_s0 + $0x338] sm:$0xff] }
  0xf5   :  { %v3087_v0 = vpop.f32.mrf.mxu0  ;;  %2549 = vmatprep.mubr.bf16.mxu1 %v2786_v56  ;;  %v2832_v2 = vcombine.high %v117_v52, %v125_v53 }
  0xf6   :  { %v4459_v3 = vadd.f32 %v3149_v60, %v1860_v62  ;;  %v3088_v4 = vadd.f32 %v3087_v0, %v3086_v61  ;;  %v3151_v5 = vpop.f32.mrf.mxu1  ;;  %v2815_v62 = vcombine.low %v101_v26, %v109_v27 }
  0xf7   :  { %v3152_v8 = vadd.f32 %v3151_v5, %v3150_v63  ;;  %v3089_v9 = vpop.f32.mrf.mxu0  ;;  %v2834_v5 = vcombine.high %v118_v58, %v126_v59 }
  0xf8   :  { %v1865_v11 = vadd.f32 %v3088_v4, %v4417_v16  ;;  %v3153_v12 = vpop.f32.mrf.mxu1 }
  0xf9   :  { %v3090_v15 = vpop.f32.mrf.mxu0 }
  0xfa   :  { %v4468_v18 = vadd.f32 %v3152_v8, %v1865_v11  ;;  %v3091_v19 = vadd.f32 %v3090_v15, %v3089_v9  ;;  %v3154_v20 = vpop.f32.mrf.mxu1  ;;  %v141_v15 = vld [vmem:[%s4748_s0 + $0x3f0] sm:$0xff] }
  0xfb   :  { %v3155_v21 = vadd.f32 %v3154_v20, %v3153_v12  ;;  %v3092_v22 = vpop.f32.mrf.mxu0  ;;  %2453 = vmatmul.mubr.bf16.gmra.mxu0 %v2783_v10 }
  0xfc   :  { %v1868_v23 = vadd.f32 %v3091_v19, %v4417_v16  ;;  %v3156_v24 = vpop.f32.mrf.mxu1  ;;  %2550 = vmatmul.mubr.bf16.gmra.mxu1 %v2785_v13  ;;  %2460 = vmatprep.mubr.bf16.mxu0 %v2800_v14  ;;  %v133_v14 = vld [vmem:[%s4748_s0 + $0x3b0] sm:$0xff] }
  0xfd   :  { %v3093_v25 = vpop.f32.mrf.mxu0  ;;  %2557 = vmatprep.mubr.bf16.mxu1 %v2802_v17 }
  0xfe   :  { %v4477_v28 = vadd.f32 %v3155_v21, %v1868_v23  ;;  %v3094_v29 = vadd.f32 %v3093_v25, %v3092_v22  ;;  %v3157_v30 = vpop.f32.mrf.mxu1  ;;  %v134_v21 = vld [vmem:[%s4748_s0 + $0x3b8] sm:$0xff]  ;;  %v2831_v25 = vcombine.low %v117_v52, %v125_v53 }
  0xff   :  { %v3158_v34 = vadd.f32 %v3157_v30, %v3156_v24  ;;  %v3095_v35 = vpop.f32.mrf.mxu0  ;;  %v142_v22 = vld [vmem:[%s4748_s0 + $0x3f8] sm:$0xff]  ;;  %v2848_v30 = vcombine.high %v133_v14, %v141_v15 }
 0x100   :  { %v1873_v37 = vadd.f32 %v3094_v29, %v4417_v16  ;;  %v3159_v38 = vpop.f32.mrf.mxu1  ;;  %v2833_v29 = vcombine.low %v118_v58, %v126_v59  ;;  %v2850_v32 = vcombine.high %v134_v21, %v142_v22  ;;  %v2849_v52 = vcombine.low %v134_v21, %v142_v22 }
 0x101   :  { %v3096_v41 = vpop.f32.mrf.mxu0 }
 0x102   :  { %v4486_v44 = vadd.f32 %v3158_v34, %v1873_v37  ;;  %v3097_v45 = vadd.f32 %v3096_v41, %v3095_v35  ;;  %v3160_v46 = vpop.f32.mrf.mxu1 }
 0x103   :  { %v3161_v47 = vadd.f32 %v3160_v46, %v3159_v38  ;;  %v3098_v48 = vpop.f32.mrf.mxu0  ;;  %2461 = vmatmul.mubr.bf16.gmra.mxu0 %v2799_v36 }
 0x104   :  { %v1876_v49 = vadd.f32 %v3097_v45, %v4417_v16  ;;  %v3162_v50 = vpop.f32.mrf.mxu1  ;;  %2558 = vmatmul.mubr.bf16.gmra.mxu1 %v2801_v39  ;;  %2468 = vmatprep.mubr.bf16.mxu0 %v2816_v40 }
 0x105   :  { %v3099_v51 = vpop.f32.mrf.mxu0  ;;  %2565 = vmatprep.mubr.bf16.mxu1 %v2818_v42 }
 0x106   :  { %v4495_v54 = vadd.f32 %v3161_v47, %v1876_v49  ;;  %v3100_v55 = vadd.f32 %v3099_v51, %v3098_v48  ;;  %v3163_v56 = vpop.f32.mrf.mxu1  ;;  %v2847_v49 = vcombine.low %v133_v14, %v141_v15 }
 0x107   :  { %v3164_v60 = vadd.f32 %v3163_v56, %v3162_v50  ;;  %v3101_v61 = vpop.f32.mrf.mxu0 }
 0x108   :  { %v1881_v63 = vadd.f32 %v3100_v55, %v4417_v16  ;;  %v3165_v0 = vpop.f32.mrf.mxu1 }
 0x109   :  { %v3102_v4 = vpop.f32.mrf.mxu0 }
 0x10a   :  { %v4504_v6 = vadd.f32 %v3164_v60, %v1881_v63  ;;  %v3103_v7 = vadd.f32 %v3102_v4, %v3101_v61  ;;  %v3166_v8 = vpop.f32.mrf.mxu1 }
 0x10b   :  { %v3167_v9 = vadd.f32 %v3166_v8, %v3165_v0  ;;  %v3104_v10 = vpop.f32.mrf.mxu0  ;;  %2469 = vmatmul.mubr.bf16.gmra.mxu0 %v2815_v62 }
 0x10c   :  { %v1884_v11 = vadd.f32 %v3103_v7, %v4417_v16  ;;  %v3168_v12 = vpop.f32.mrf.mxu1  ;;  %2566 = vmatmul.mubr.bf16.gmra.mxu1 %v2817_v1  ;;  %2476 = vmatprep.mubr.bf16.mxu0 %v2832_v2 }
 0x10d   :  { %v3105_v13 = vpop.f32.mrf.mxu0  ;;  %2573 = vmatprep.mubr.bf16.mxu1 %v2834_v5 }
 0x10e   :  { %v4513_v17 = vadd.f32 %v3167_v9, %v1884_v11  ;;  %v3106_v19 = vadd.f32 %v3105_v13, %v3104_v10  ;;  %v3169_v20 = vpop.f32.mrf.mxu1 }
 0x10f   :  { %v3170_v23 = vadd.f32 %v3169_v20, %v3168_v12  ;;  %v3107_v24 = vpop.f32.mrf.mxu0 }
 0x110   :  { %v1889_v26 = vadd.f32 %v3106_v19, %v4417_v16  ;;  %v3171_v27 = vpop.f32.mrf.mxu1 }
 0x111   :  { %v3108_v31 = vpop.f32.mrf.mxu0 }
 0x112   :  { %v4522_v34 = vadd.f32 %v3170_v23, %v1889_v26  ;;  %v3109_v35 = vadd.f32 %v3108_v31, %v3107_v24  ;;  %v3172_v36 = vpop.f32.mrf.mxu1 }
 0x113   :  { %v3173_v37 = vadd.f32 %v3172_v36, %v3171_v27  ;;  %v3110_v38 = vpop.f32.mrf.mxu0  ;;  %2477 = vmatmul.mubr.bf16.gmra.mxu0 %v2831_v25 }
 0x114   :  { %v1892_v39 = vadd.f32 %v3109_v35, %v4417_v16  ;;  %v3174_v40 = vpop.f32.mrf.mxu1  ;;  %2574 = vmatmul.mubr.bf16.gmra.mxu1 %v2833_v29  ;;  %2484 = vmatprep.mubr.bf16.mxu0 %v2848_v30 }
 0x115   :  { %v3111_v41 = vpop.f32.mrf.mxu0  ;;  %2581 = vmatprep.mubr.bf16.mxu1 %v2850_v32 }
 0x116   :  { %v4525_v42 = vadd.f32 %v3173_v37, %v1892_v39  ;;  %v3112_v45 = vadd.f32 %v3111_v41, %v3110_v38  ;;  %v3175_v46 = vpop.f32.mrf.mxu1 }
 0x117   :  { %v3176_v47 = vadd.f32 %v3175_v46, %v3174_v40  ;;  %v3113_v48 = vpop.f32.mrf.mxu0 }
 0x118   :  { %v1897_v50 = vadd.f32 %v3112_v45, %v4417_v16  ;;  %v3177_v51 = vpop.f32.mrf.mxu1 }
 0x119   :  { %v3114_v53 = vpop.f32.mrf.mxu0 }
 0x11a   :  { %v4528_v55 = vadd.f32 %v3176_v47, %v1897_v50  ;;  %v3115_v56 = vadd.f32 %v3114_v53, %v3113_v48  ;;  %v3178_v58 = vpop.f32.mrf.mxu1 }
 0x11b   :  { %v3179_v59 = vadd.f32 %v3178_v58, %v3177_v51  ;;  %v3116_v60 = vpop.f32.mrf.mxu0  ;;  %2485 = vmatmul.mubr.bf16.gmra.mxu0 %v2847_v49 }
 0x11c   :  { %v1900_v61 = vadd.f32 %v3115_v56, %v4417_v16  ;;  %v3180_v62 = vpop.f32.mrf.mxu1  ;;  %2582 = vmatmul.mubr.bf16.gmra.mxu1 %v2849_v52 }
 0x11d   :  { %v3117_v63 = vpop.f32.mrf.mxu0 }
 0x11e   :  { %v4531_v0 = vadd.f32 %v3179_v59, %v1900_v61  ;;  %v3118_v1 = vadd.f32 %v3117_v63, %v3116_v60  ;;  %v3181_v2 = vpop.f32.mrf.mxu1 }
 0x11f   :  { %v3182_v4 = vadd.f32 %v3181_v2, %v3180_v62  ;;  %v3119_v5 = vpop.f32.mrf.mxu0 }
 0x120   :  { %v1905_v7 = vadd.f32 %v3118_v1, %v4417_v16  ;;  %v3183_v8 = vpop.f32.mrf.mxu1 }
 0x121   :  { %v3120_v9 = vpop.f32.mrf.mxu0 }
 0x122   :  { %v4534_v10 = vadd.f32 %v3182_v4, %v1905_v7  ;;  %v3121_v11 = vadd.f32 %v3120_v9, %v3119_v5  ;;  %v3184_v12 = vpop.f32.mrf.mxu1 }
 0x123   :  { %v3185_v13 = vadd.f32 %v3184_v12, %v3183_v8  ;;  %v3202_v14 = vpop.f32.mrf.mxu0 }
 0x124   :  { %v1908_v15 = vadd.f32 %v3121_v11, %v4417_v16  ;;  %v3266_v19 = vpop.f32.mrf.mxu1 }
 0x125   :  { %v3203_v20 = vpop.f32.mrf.mxu0 }
 0x126   :  { %v4537_v21 = vadd.f32 %v3185_v13, %v1908_v15  ;;  %v3204_v22 = vadd.f32 %v3203_v20, %v3202_v14  ;;  %v3267_v23 = vpop.f32.mrf.mxu1 }
 0x127   :  { %v3268_v24 = vadd.f32 %v3267_v23, %v3266_v19  ;;  %v3205_v25 = vpop.f32.mrf.mxu0 }
 0x128   :  { %v2043_v26 = vadd.f32 %v3204_v22, %v4432_v33  ;;  %v3269_v27 = vpop.f32.mrf.mxu1 }
 0x129   :  { %v3206_v29 = vpop.f32.mrf.mxu0 }
 0x12a   :  { %v4540_v30 = vadd.f32 %v3268_v24, %v2043_v26  ;;  %v3207_v31 = vadd.f32 %v3206_v29, %v3205_v25  ;;  %v3270_v32 = vpop.f32.mrf.mxu1 }
 0x12b   :  { %v3271_v35 = vadd.f32 %v3270_v32, %v3269_v27  ;;  %v3208_v36 = vpop.f32.mrf.mxu0 }
 0x12c   :  { %v2046_v16 = vadd.f32 %v3207_v31, %v4441_v43  ;;  %v3272_v37 = vpop.f32.mrf.mxu1 }
 0x12d   :  { %v3209_v38 = vpop.f32.mrf.mxu0 }
 0x12e   :  { %v4543_v39 = vadd.f32 %v3271_v35, %v2046_v16  ;;  %v3210_v40 = vadd.f32 %v3209_v38, %v3208_v36  ;;  %v3273_v41 = vpop.f32.mrf.mxu1 }
 0x12f   :  { %v3274_v45 = vadd.f32 %v3273_v41, %v3272_v37  ;;  %v3211_v46 = vpop.f32.mrf.mxu0 }
 0x130   :  { %v2051_v33 = vadd.f32 %v3210_v40, %v4450_v57  ;;  %v3275_v47 = vpop.f32.mrf.mxu1 }
 0x131   :  { %v3212_v48 = vpop.f32.mrf.mxu0 }
 0x132   :  { %v4546_v49 = vadd.f32 %v3274_v45, %v2051_v33  ;;  %v3213_v50 = vadd.f32 %v3212_v48, %v3211_v46  ;;  %v3276_v51 = vpop.f32.mrf.mxu1 }
 0x133   :  { %v3277_v52 = vadd.f32 %v3276_v51, %v3275_v47  ;;  %v3214_v53 = vpop.f32.mrf.mxu0 }
 0x134   :  { %v2054_v43 = vadd.f32 %v3213_v50, %v4459_v3  ;;  %v3278_v56 = vpop.f32.mrf.mxu1 }
 0x135   :  { %v3215_v58 = vpop.f32.mrf.mxu0 }
 0x136   :  { %v4549_v59 = vadd.f32 %v3277_v52, %v2054_v43  ;;  %v3216_v60 = vadd.f32 %v3215_v58, %v3214_v53  ;;  %v3279_v61 = vpop.f32.mrf.mxu1 }
 0x137   :  { %v3280_v62 = vadd.f32 %v3279_v61, %v3278_v56  ;;  %v3217_v63 = vpop.f32.mrf.mxu0 }
 0x138   :  { %v2059_v57 = vadd.f32 %v3216_v60, %v4468_v18  ;;  %v3281_v1 = vpop.f32.mrf.mxu1 }
 0x139   :  { %v3218_v2 = vpop.f32.mrf.mxu0 }
 0x13a   :  { %v4552_v4 = vadd.f32 %v3280_v62, %v2059_v57  ;;  %v3219_v5 = vadd.f32 %v3218_v2, %v3217_v63  ;;  %v3282_v7 = vpop.f32.mrf.mxu1 }
 0x13b   :  { %v3283_v8 = vadd.f32 %v3282_v7, %v3281_v1  ;;  %v3220_v9 = vpop.f32.mrf.mxu0 }
 0x13c   :  { %v2062_v3 = vadd.f32 %v3219_v5, %v4477_v28  ;;  %v3284_v11 = vpop.f32.mrf.mxu1 }
 0x13d   :  { %v3221_v12 = vpop.f32.mrf.mxu0 }
 0x13e   :  { %v4555_v13 = vadd.f32 %v3283_v8, %v2062_v3  ;;  %v3222_v14 = vadd.f32 %v3221_v12, %v3220_v9  ;;  %v3285_v15 = vpop.f32.mrf.mxu1 }
 0x13f   :  { %v3286_v19 = vadd.f32 %v3285_v15, %v3284_v11  ;;  %v3223_v20 = vpop.f32.mrf.mxu0 }
 0x140   :  { %v2067_v18 = vadd.f32 %v3222_v14, %v4486_v44  ;;  %v3287_v22 = vpop.f32.mrf.mxu1 }
 0x141   :  { %v3224_v23 = vpop.f32.mrf.mxu0 }
 0x142   :  { %v4558_v24 = vadd.f32 %v3286_v19, %v2067_v18  ;;  %v3225_v25 = vadd.f32 %v3224_v23, %v3223_v20  ;;  %v3288_v26 = vpop.f32.mrf.mxu1 }
 0x143   :  { %v3289_v27 = vadd.f32 %v3288_v26, %v3287_v22  ;;  %v3226_v29 = vpop.f32.mrf.mxu0 }
 0x144   :  { %v2070_v28 = vadd.f32 %v3225_v25, %v4495_v54  ;;  %v3290_v31 = vpop.f32.mrf.mxu1 }
 0x145   :  { %v3227_v32 = vpop.f32.mrf.mxu0 }
 0x146   :  { %v4561_v35 = vadd.f32 %v3289_v27, %v2070_v28  ;;  %v3228_v36 = vadd.f32 %v3227_v32, %v3226_v29  ;;  %v3291_v16 = vpop.f32.mrf.mxu1 }
 0x147   :  { %v3292_v37 = vadd.f32 %v3291_v16, %v3290_v31  ;;  %v3229_v38 = vpop.f32.mrf.mxu0 }
 0x148   :  { %v2075_v44 = vadd.f32 %v3228_v36, %v4504_v6  ;;  %v3293_v40 = vpop.f32.mrf.mxu1 }
 0x149   :  { %v3230_v41 = vpop.f32.mrf.mxu0 }
 0x14a   :  { %v4564_v45 = vadd.f32 %v3292_v37, %v2075_v44  ;;  %v3231_v46 = vadd.f32 %v3230_v41, %v3229_v38  ;;  %v3294_v33 = vpop.f32.mrf.mxu1 }
 0x14b   :  { %v3295_v47 = vadd.f32 %v3294_v33, %v3293_v40  ;;  %v3232_v48 = vpop.f32.mrf.mxu0 }
 0x14c   :  { %v2078_v54 = vadd.f32 %v3231_v46, %v4513_v17  ;;  %v3296_v50 = vpop.f32.mrf.mxu1 }
 0x14d   :  { %v3233_v51 = vpop.f32.mrf.mxu0 }
 0x14e   :  { %v4567_v52 = vadd.f32 %v3295_v47, %v2078_v54  ;;  %v3234_v53 = vadd.f32 %v3233_v51, %v3232_v48  ;;  %v3297_v43 = vpop.f32.mrf.mxu1 }
 0x14f   :  { %v3298_v56 = vadd.f32 %v3297_v43, %v3296_v50  ;;  %v3235_v58 = vpop.f32.mrf.mxu0 }
 0x150   :  { %v2083_v6 = vadd.f32 %v3234_v53, %v4522_v34  ;;  %v3299_v60 = vpop.f32.mrf.mxu1 }
 0x151   :  { %v3236_v61 = vpop.f32.mrf.mxu0 }
 0x152   :  { %v4570_v62 = vadd.f32 %v3298_v56, %v2083_v6  ;;  %v3237_v63 = vadd.f32 %v3236_v61, %v3235_v58  ;;  %v3300_v57 = vpop.f32.mrf.mxu1 }
 0x153   :  { %v3301_v1 = vadd.f32 %v3300_v57, %v3299_v60  ;;  %v3238_v2 = vpop.f32.mrf.mxu0 }
 0x154   :  { %v2086_v17 = vadd.f32 %v3237_v63, %v4525_v42  ;;  %v3302_v5 = vpop.f32.mrf.mxu1 }
 0x155   :  { %v3239_v7 = vpop.f32.mrf.mxu0 }
 0x156   :  { %v4573_v8 = vadd.f32 %v3301_v1, %v2086_v17  ;;  %v3240_v9 = vadd.f32 %v3239_v7, %v3238_v2  ;;  %v3303_v3 = vpop.f32.mrf.mxu1 }
 0x157   :  { %v3304_v11 = vadd.f32 %v3303_v3, %v3302_v5  ;;  %v3241_v12 = vpop.f32.mrf.mxu0 }
 0x158   :  { %v2091_v34 = vadd.f32 %v3240_v9, %v4528_v55  ;;  %v3305_v14 = vpop.f32.mrf.mxu1 }
 0x159   :  { %v3242_v15 = vpop.f32.mrf.mxu0 }
 0x15a   :  { %v4576_v19 = vadd.f32 %v3304_v11, %v2091_v34  ;;  %v3243_v20 = vadd.f32 %v3242_v15, %v3241_v12  ;;  %v3306_v18 = vpop.f32.mrf.mxu1 }
 0x15b   :  { %v3307_v22 = vadd.f32 %v3306_v18, %v3305_v14  ;;  %v3244_v23 = vpop.f32.mrf.mxu0 }
 0x15c   :  { %v2094_v42 = vadd.f32 %v3243_v20, %v4531_v0  ;;  %v3308_v25 = vpop.f32.mrf.mxu1 }
 0x15d   :  { %v3245_v26 = vpop.f32.mrf.mxu0 }
 0x15e   :  { %v4579_v27 = vadd.f32 %v3307_v22, %v2094_v42  ;;  %v3246_v29 = vadd.f32 %v3245_v26, %v3244_v23  ;;  %v3309_v28 = vpop.f32.mrf.mxu1 }
 0x15f   :  { %v3310_v31 = vadd.f32 %v3309_v28, %v3308_v25  ;;  %v3247_v32 = vpop.f32.mrf.mxu0 }
 0x160   :  { %v2099_v55 = vadd.f32 %v3246_v29, %v4534_v10  ;;  %v3311_v36 = vpop.f32.mrf.mxu1 }
 0x161   :  { %v3248_v16 = vpop.f32.mrf.mxu0 }
 0x162   :  { %v4582_v37 = vadd.f32 %v3310_v31, %v2099_v55  ;;  %v3249_v38 = vadd.f32 %v3248_v16, %v3247_v32  ;;  %v3312_v44 = vpop.f32.mrf.mxu1 }
 0x163   :  { %v3313_v40 = vadd.f32 %v3312_v44, %v3311_v36  ;;  %v3330_v41 = vpop.f32.mrf.mxu0 }
 0x164   :  { %v2102_v0 = vadd.f32 %v3249_v38, %v4537_v21  ;;  %v3394_v46 = vpop.f32.mrf.mxu1 }
 0x165   :  { %v3331_v33 = vpop.f32.mrf.mxu0 }
 0x166   :  { %v4585_v47 = vadd.f32 %v3313_v40, %v2102_v0  ;;  %v3332_v48 = vadd.f32 %v3331_v33, %v3330_v41  ;;  %v3395_v54 = vpop.f32.mrf.mxu1 }
 0x167   :  { %v3396_v50 = vadd.f32 %v3395_v54, %v3394_v46  ;;  %v4587_v51 = vpop.f32.mrf.mxu0 }
 0x168   :  { %v2237_v10 = vadd.f32 %v3332_v48, %v4540_v30  ;;  %v4590_v53 = vpop.f32.mrf.mxu1 }
 0x169   :  { %v4592_v43 = vpop.f32.mrf.mxu0 }
 0x16a   :  { %v4594_v56 = vadd.f32 %v3396_v50, %v2237_v10  ;;  %v4596_v58 = vpop.f32.mrf.mxu1 }
 0x16b   :  { %v3336_v21 = vpop.f32.mrf.mxu0 }
 0x16c   :  { %v3400_v6 = vpop.f32.mrf.mxu1 }
 0x16d   :  { %v3337_v60 = vpop.f32.mrf.mxu0 }
 0x16e   :  { %v3338_v61 = vadd.f32 %v3337_v60, %v3336_v21  ;;  %v3401_v63 = vpop.f32.mrf.mxu1 }
 0x16f   :  { %v3402_v57 = vadd.f32 %v3401_v63, %v3400_v6  ;;  %v4598_v1 = vpop.f32.mrf.mxu0 }
 0x170   :  { %v2245_v2 = vadd.f32 %v3338_v61, %v4546_v49  ;;  %v4601_v17 = vpop.f32.mrf.mxu1 }
 0x171   :  { %v4603_v30 = vpop.f32.mrf.mxu0 }
 0x172   :  { %v4605_v5 = vadd.f32 %v3402_v57, %v2245_v2  ;;  %v4607_v7 = vpop.f32.mrf.mxu1 }
 0x173   :  { %v3342_v9 = vpop.f32.mrf.mxu0 }
 0x174   :  { %v3406_v3 = vpop.f32.mrf.mxu1 }
 0x175   :  { %v3343_v11 = vpop.f32.mrf.mxu0 }
 0x176   :  { %v3344_v12 = vadd.f32 %v3343_v11, %v3342_v9  ;;  %v3407_v34 = vpop.f32.mrf.mxu1 }
 0x177   :  { %v3408_v14 = vadd.f32 %v3407_v34, %v3406_v3  ;;  %v4609_v15 = vpop.f32.mrf.mxu0 }
 0x178   :  { %v2253_v20 = vadd.f32 %v3344_v12, %v4552_v4  ;;  %v4612_v18 = vpop.f32.mrf.mxu1 }
 0x179   :  { %v4614_v49 = vpop.f32.mrf.mxu0 }
 0x17a   :  { %v4616_v22 = vadd.f32 %v3408_v14, %v2253_v20  ;;  %v4618_v23 = vpop.f32.mrf.mxu1 }
 0x17b   :  { %v3348_v42 = vpop.f32.mrf.mxu0 }
 0x17c   :  { %v3412_v25 = vpop.f32.mrf.mxu1 }
 0x17d   :  { %v3349_v26 = vpop.f32.mrf.mxu0 }
 0x17e   :  { %v3350_v29 = vadd.f32 %v3349_v26, %v3348_v42  ;;  %v3413_v28 = vpop.f32.mrf.mxu1 }
 0x17f   :  { %v3414_v31 = vadd.f32 %v3413_v28, %v3412_v25  ;;  %v4620_v32 = vpop.f32.mrf.mxu0 }
 0x180   :  { %v2261_v55 = vadd.f32 %v3350_v29, %v4558_v24  ;;  %v4623_v36 = vpop.f32.mrf.mxu1 }
 0x181   :  { %v4625_v4 = vpop.f32.mrf.mxu0 }
 0x182   :  { %v4627_v16 = vadd.f32 %v3414_v31, %v2261_v55  ;;  %v4629_v38 = vpop.f32.mrf.mxu1 }
 0x183   :  { %v3354_v44 = vpop.f32.mrf.mxu0 }
 0x184   :  { %v3418_v40 = vpop.f32.mrf.mxu1 }
 0x185   :  { %v3355_v41 = vpop.f32.mrf.mxu0 }
 0x186   :  { %v3356_v0 = vadd.f32 %v3355_v41, %v3354_v44  ;;  %v3419_v46 = vpop.f32.mrf.mxu1 }
 0x187   :  { %v3420_v33 = vadd.f32 %v3419_v46, %v3418_v40  ;;  %v4631_v48 = vpop.f32.mrf.mxu0 }
 0x188   :  { %v2269_v54 = vadd.f32 %v3356_v0, %v4564_v45  ;;  %v4634_v50 = vpop.f32.mrf.mxu1 }
 0x189   :  { %v4636_v24 = vpop.f32.mrf.mxu0 }
 0x18a   :  { %v4638_v10 = vadd.f32 %v3420_v33, %v2269_v54  ;;  %v4640_v21 = vpop.f32.mrf.mxu1 }
 0x18b   :  { %v3360_v6 = vpop.f32.mrf.mxu0 }
 0x18c   :  { %v3424_v60 = vpop.f32.mrf.mxu1 }
 0x18d   :  { %v3361_v61 = vpop.f32.mrf.mxu0 }
 0x18e   :  { %v3362_v63 = vadd.f32 %v3361_v61, %v3360_v6  ;;  %v3425_v57 = vpop.f32.mrf.mxu1 }
 0x18f   :  { %v3426_v2 = vadd.f32 %v3425_v57, %v3424_v60  ;;  %v4642_v9 = vpop.f32.mrf.mxu0  ;;  %v3335_v57 = vadd.f32 %v4592_v43, %v4587_v51  ;;  %v3341_v51 = vadd.f32 %v4603_v30, %v4598_v1 }
 0x190   :  { %v2277_v3 = vadd.f32 %v3362_v63, %v4570_v62  ;;  %v4645_v11 = vpop.f32.mrf.mxu1 }
 0x191   :  { %v4647_v45 = vpop.f32.mrf.mxu0 }
 0x192   :  { %v4649_v12 = vadd.f32 %v3426_v2, %v2277_v3  ;;  %v4651_v34 = vpop.f32.mrf.mxu1 }
 0x193   :  { %v3366_v14 = vpop.f32.mrf.mxu0 }
 0x194   :  { %v3430_v20 = vpop.f32.mrf.mxu1 }
 0x195   :  { %v3367_v42 = vpop.f32.mrf.mxu0 }
 0x196   :  { %v3368_v25 = vadd.f32 %v3367_v42, %v3366_v14  ;;  %v3431_v26 = vpop.f32.mrf.mxu1 }
 0x197   :  { %v3432_v29 = vadd.f32 %v3431_v26, %v3430_v20  ;;  %v4653_v28 = vpop.f32.mrf.mxu0 }
 0x198   :  { %v2285_v31 = vadd.f32 %v3368_v25, %v4576_v19  ;;  %v4656_v55 = vpop.f32.mrf.mxu1  ;;  %v2240_v25 = vadd.f32 %v3335_v57, %v4543_v39 }
 0x199   :  { %v4658_v62 = vpop.f32.mrf.mxu0 }
 0x19a   :  { %v4660_v44 = vadd.f32 %v3432_v29, %v2285_v31  ;;  %v4662_v40 = vpop.f32.mrf.mxu1 }
 0x19b   :  { %v3372_v41 = vpop.f32.mrf.mxu0 }
 0x19c   :  { %v3436_v0 = vpop.f32.mrf.mxu1 }
 0x19d   :  { %v3373_v46 = vpop.f32.mrf.mxu0 }
 0x19e   :  { %v3374_v33 = vadd.f32 %v3373_v46, %v3372_v41  ;;  %v3437_v54 = vpop.f32.mrf.mxu1 }
 0x19f   :  { %v3438_v6 = vadd.f32 %v3437_v54, %v3436_v0  ;;  %v4664_v60 = vpop.f32.mrf.mxu0 }
 0x1a0   :  { %v2293_v61 = vadd.f32 %v3374_v33, %v4582_v37  ;;  %v4667_v63 = vpop.f32.mrf.mxu1  ;;  %v3399_v37 = vadd.f32 %v4596_v58, %v4590_v53 }
 0x1a1   :  { %v4669_v19 = vpop.f32.mrf.mxu0 }
 0x1a2   :  { %v4673_v2 = vadd.f32 %v3438_v6, %v2293_v61  ;;  %v4675_v3 = vpop.f32.mrf.mxu1  ;;  %v2337_v33 = vadd.f32 %v3399_v37, %v2240_v25 }
 0x1a3   :  { %4752 = vst [vmem:[#allocation3_spill] sm:$0xff] %v4675_v3  ;;  %v3458_v14 = vpop.f32.mrf.mxu0 }
 0x1a4   :  { %4751 = vst [vmem:[#allocation2_spill] sm:$0xff] %v4673_v2  ;;  %v3522_v20 = vpop.f32.mrf.mxu1 }
 0x1a5   :  { %v3459_v42 = vpop.f32.mrf.mxu0 }
 0x1a6   :  { %v3460_v26 = vadd.f32 %v3459_v42, %v3458_v14  ;;  %v3523_v29 = vpop.f32.mrf.mxu1  ;;  %v2248_v42 = vadd.f32 %v3341_v51, %v4549_v59  ;;  %v3347_v59 = vadd.f32 %v4614_v49, %v4609_v15 }
 0x1a7   :  { %v3461_v31 = vpop.f32.mrf.mxu0  ;;  %v3524_v0 = vadd.f32 %v3523_v29, %v3522_v20 }
 0x1a8   :  { %v2431_v41 = vadd.f32 %v3460_v26, %v4594_v56  ;;  %v3525_v46 = vpop.f32.mrf.mxu1  ;;  %v3405_v26 = vadd.f32 %v4607_v7, %v4601_v17 }
 0x1a9   :  { %v3462_v43 = vpop.f32.mrf.mxu0 }
 0x1aa   :  { %v2528_v54 = vadd.f32 %v3524_v0, %v2431_v41  ;;  %v3463_v6 = vadd.f32 %v3462_v43, %v3461_v31  ;;  %v3526_v61 = vpop.f32.mrf.mxu1  ;;  %v2345_v37 = vadd.f32 %v3405_v26, %v2248_v42 }
 0x1ab   :  { %v3464_v2 = vpop.f32.mrf.mxu0  ;;  %v3527_v57 = vadd.f32 %v3526_v61, %v3525_v46  ;;  %v2256_v61 = vadd.f32 %v3347_v59, %v4555_v13 }
 0x1ac   :  { %v2434_v39 = vadd.f32 %v3463_v6, %v2337_v33  ;;  %v3528_v14 = vpop.f32.mrf.mxu1  ;;  %v2606_v53 = vmul.f32 0.2, %v2528_v54  ;;  %vm2590_vm0 = vcmp.ge.f32.partialorder %v2528_v54, 0.0 }
 0x1ad   :  { %v3465_v3 = vpop.f32.mrf.mxu0 }
 0x1ae   :  { %v2531_v58 = vadd.f32 %v3527_v57, %v2434_v39  ;;  %v3466_v56 = vadd.f32 %v3465_v3, %v3464_v2  ;;  %v3529_v20 = vpop.f32.mrf.mxu1  ;;  %v2622_v0 = vsel %vm2590_vm0, %v2528_v54, %v2606_v53  ;;  %v3411_v57 = vadd.f32 %v4618_v23, %v4612_v18 }
 0x1af   :  { %v3467_v1 = vpop.f32.mrf.mxu0  ;;  %v3530_v29 = vadd.f32 %v3529_v20, %v3528_v14  ;;  %v3353_v20 = vadd.f32 %v4625_v4, %v4620_v32 }
 0x1b0   :  { %vm2591_vm1 = vcmp.ge.f32.partialorder %v2531_v58, 0.0  ;;  %v2607_v30 = vmul.f32 0.2, %v2531_v58  ;;  %v2439_v25 = vadd.f32 %v3466_v56, %v4605_v5  ;;  %v3531_v31 = vpop.f32.mrf.mxu1  ;;  %v2353_v56 = vadd.f32 %v3411_v57, %v2256_v61 }
 0x1b1   :  { %v3468_v41 = vpop.f32.mrf.mxu0 }
 0x1b2   :  { %v2623_v46 = vsel %vm2591_vm1, %v2531_v58, %v2607_v30  ;;  %v2536_v2 = vadd.f32 %v3530_v29, %v2439_v25  ;;  %v3469_v3 = vadd.f32 %v3468_v41, %v3467_v1  ;;  %v3532_v51 = vpop.f32.mrf.mxu1 }
 0x1b3   :  { %v3014_v43 = vpack.c.bf16 %v2623_v46, %v2622_v0  ;;  %v3470_v17 = vpop.f32.mrf.mxu0  ;;  %v3533_v33 = vadd.f32 %v3532_v51, %v3531_v31  ;;  %v2264_v0 = vadd.f32 %v3353_v20, %v4561_v35 }
 0x1b4   :  { %v2442_v7 = vadd.f32 %v3469_v3, %v2345_v37  ;;  %v3534_v6 = vpop.f32.mrf.mxu1  ;;  %v2608_v39 = vmul.f32 0.2, %v2536_v2  ;;  %vm2592_vm2 = vcmp.ge.f32.partialorder %v2536_v2, 0.0  ;;  %v3417_v3 = vadd.f32 %v4629_v38, %v4623_v36 }
 0x1b5   :  { %3015 = vst [vmem:[%s4750_s3] sm:$0xff] %v3014_v43   ;;  %v3471_v5 = vpop.f32.mrf.mxu0 }
 0x1b6   :  { %v2539_v15 = vadd.f32 %v3533_v33, %v2442_v7  ;;  %v3472_v49 = vadd.f32 %v3471_v5, %v3470_v17  ;;  %v3535_v54 = vpop.f32.mrf.mxu1  ;;  %v2624_v1 = vsel %vm2592_vm2, %v2536_v2, %v2608_v39  ;;  %v2361_v33 = vadd.f32 %v3417_v3, %v2264_v0 }
 0x1b7   :  { %v3473_v14 = vpop.f32.mrf.mxu0  ;;  %v3536_v58 = vadd.f32 %v3535_v54, %v3534_v6  ;;  %v3359_v6 = vadd.f32 %v4636_v24, %v4631_v48  ;;  %v3429_v3 = vadd.f32 %v4651_v34, %v4645_v11 }
 0x1b8   :  { %vm2593_vm3 = vcmp.ge.f32.partialorder %v2539_v15, 0.0  ;;  %v2609_v42 = vmul.f32 0.2, %v2539_v15  ;;  %v2447_v53 = vadd.f32 %v3472_v49, %v4616_v22  ;;  %v3537_v13 = vpop.f32.mrf.mxu1 }
 0x1b9   :  { %v3474_v26 = vpop.f32.mrf.mxu0 }
 0x1ba   :  { %v2625_v30 = vsel %vm2593_vm3, %v2539_v15, %v2609_v42  ;;  %v2544_v25 = vadd.f32 %v3536_v58, %v2447_v53  ;;  %v3475_v29 = vadd.f32 %v3474_v26, %v3473_v14  ;;  %v3538_v31 = vpop.f32.mrf.mxu1  ;;  %v2272_v53 = vadd.f32 %v3359_v6, %v4567_v52 }
 0x1bb   :  { %v3019_v37 = vpack.c.bf16 %v2625_v30, %v2624_v1  ;;  %v3476_v18 = vpop.f32.mrf.mxu0  ;;  %v3539_v59 = vadd.f32 %v3538_v31, %v3537_v13 }
 0x1bc   :  { %v2450_v23 = vadd.f32 %v3475_v29, %v2353_v56  ;;  %v3540_v41 = vpop.f32.mrf.mxu1  ;;  %v2610_v46 = vmul.f32 0.2, %v2544_v25  ;;  %vm2594_vm4 = vcmp.ge.f32.partialorder %v2544_v25, 0.0  ;;  %v3423_v56 = vadd.f32 %v4640_v21, %v4634_v50 }
 0x1bd   :  { %3051 = vst [vmem:[%s4750_s3 + $0x8] sm:$0xff] %v3019_v37   ;;  %v3477_v22 = vpop.f32.mrf.mxu0  ;;  %v3365_v29 = vadd.f32 %v4647_v45, %v4642_v9 }
 0x1be   :  { %v2547_v32 = vadd.f32 %v3539_v59, %v2450_v23  ;;  %v3478_v4 = vadd.f32 %v3477_v22, %v3476_v18  ;;  %v3541_v2 = vpop.f32.mrf.mxu1  ;;  %v2626_v5 = vsel %vm2594_vm4, %v2544_v25, %v2610_v46  ;;  %v2369_v25 = vadd.f32 %v3423_v56, %v2272_v53 }
 0x1bf   :  { %v3479_v51 = vpop.f32.mrf.mxu0  ;;  %v3542_v7 = vadd.f32 %v3541_v2, %v3540_v41  ;;  %v3435_v53 = vadd.f32 %v4662_v40, %v4656_v55  ;;  %v3377_v56 = vadd.f32 %v4669_v19, %v4664_v60 }
 0x1c0   :  { %vm2595_vm5 = vcmp.ge.f32.partialorder %v2547_v32, 0.0  ;;  %v2611_v43 = vmul.f32 0.2, %v2547_v32  ;;  %v2455_v17 = vadd.f32 %v3478_v4, %v4627_v16  ;;  %v3543_v35 = vpop.f32.mrf.mxu1 }
 0x1c1   :  { %v3480_v61 = vpop.f32.mrf.mxu0 }
 0x1c2   :  { %v2627_v39 = vsel %vm2595_vm5, %v2547_v32, %v2611_v43  ;;  %v2552_v15 = vadd.f32 %v3542_v7, %v2455_v17  ;;  %v3481_v49 = vadd.f32 %v3480_v61, %v3479_v51  ;;  %v3544_v54 = vpop.f32.mrf.mxu1  ;;  %v2280_v32 = vadd.f32 %v3365_v29, %v4573_v8 }
 0x1c3   :  { %v3024_v57 = vpack.c.bf16 %v2627_v39, %v2626_v5  ;;  %v3482_v36 = vpop.f32.mrf.mxu0  ;;  %v3545_v14 = vadd.f32 %v3544_v54, %v3543_v35 }
 0x1c4   :  { %v2458_v38 = vadd.f32 %v3481_v49, %v2361_v33  ;;  %v3546_v42 = vpop.f32.mrf.mxu1  ;;  %v2612_v58 = vmul.f32 0.2, %v2552_v15  ;;  %vm2596_vm6 = vcmp.ge.f32.partialorder %v2552_v15, 0.0  ;;  %v2377_v35 = vadd.f32 %v3429_v3, %v2280_v32 }
 0x1c5   :  { %3052 = vst [vmem:[%s4750_s3 + $0x10] sm:$0xff] %v3024_v57   ;;  %v3483_v16 = vpop.f32.mrf.mxu0  ;;  %v3371_v33 = vadd.f32 %v4658_v62, %v4653_v28 }
 0x1c6   :  { %v2555_v48 = vadd.f32 %v3545_v14, %v2458_v38  ;;  %v3484_v24 = vadd.f32 %v3483_v16, %v3482_v36  ;;  %v3547_v13 = vpop.f32.mrf.mxu1  ;;  %v2628_v37 = vsel %vm2596_vm6, %v2552_v15, %v2612_v58 }
 0x1c7   :  { %v3485_v20 = vpop.f32.mrf.mxu0  ;;  %v3548_v30 = vadd.f32 %v3547_v13, %v3546_v42  ;;  %v2288_v38 = vadd.f32 %v3371_v33, %v4579_v27 }
 0x1c8   :  { %vm2597_vm7 = vcmp.ge.f32.partialorder %v2555_v48, 0.0  ;;  %v2613_v26 = vmul.f32 0.2, %v2555_v48  ;;  %v2463_v1 = vadd.f32 %v3484_v24, %v4638_v10  ;;  %v3549_v52 = vpop.f32.mrf.mxu1 }
 0x1c9   :  { %v3486_v31 = vpop.f32.mrf.mxu0  ;;  %v2385_v13 = vadd.f32 %v3435_v53, %v2288_v38 }
 0x1ca   :  { %v2629_v18 = vsel %vm2597_vm7, %v2555_v48, %v2613_v26  ;;  %v2560_v23 = vadd.f32 %v3548_v30, %v2463_v1  ;;  %v3487_v59 = vadd.f32 %v3486_v31, %v3485_v20  ;;  %v3550_v41 = vpop.f32.mrf.mxu1 }
 0x1cb   :  { %v3029_v0 = vpack.c.bf16 %v2629_v18, %v2628_v37  ;;  %v3488_v50 = vpop.f32.mrf.mxu0  ;;  %v3551_v22 = vadd.f32 %v3550_v41, %v3549_v52  ;;  %v2296_v18 = vadd.f32 %v3377_v56, %v4585_v47  ;;  %v4753_v41 = vld [vmem:[#allocation3_spill] sm:$0xff] }
 0x1cc   :  { %v2466_v21 = vadd.f32 %v3487_v59, %v2369_v25  ;;  %v3552_v46 = vpop.f32.mrf.mxu1  ;;  %v2614_v4 = vmul.f32 0.2, %v2560_v23  ;;  %vm2598_vm8 = vcmp.ge.f32.partialorder %v2560_v23, 0.0 }
 0x1cd   :  { %3053 = vst [vmem:[%s4750_s3 + $0x18] sm:$0xff] %v3029_v0   ;;  %v3489_v10 = vpop.f32.mrf.mxu0  ;;  %v3441_v0 = vadd.f32 %v4753_v41, %v4667_v63 }
 0x1ce   :  { %v2563_v9 = vadd.f32 %v3551_v22, %v2466_v21  ;;  %v3490_v45 = vadd.f32 %v3489_v10, %v3488_v50  ;;  %v3553_v2 = vpop.f32.mrf.mxu1  ;;  %v2630_v61 = vsel %vm2598_vm8, %v2560_v23, %v2614_v4  ;;  %v4754_v22 = vld [vmem:[#allocation2_spill] sm:$0xff] }
 0x1cf   :  { %v3491_v51 = vpop.f32.mrf.mxu0  ;;  %v3554_v7 = vadd.f32 %v3553_v2, %v3552_v46  ;;  %v2393_v10 = vadd.f32 %v3441_v0, %v2296_v18 }
 0x1d0   :  { %vm2599_vm9 = vcmp.ge.f32.partialorder %v2563_v9, 0.0  ;;  %v2615_v43 = vmul.f32 0.2, %v2563_v9  ;;  %v2471_v17 = vadd.f32 %v3490_v45, %v4649_v12  ;;  %v3555_v8 = vpop.f32.mrf.mxu1 }
 0x1d1   :  { %v3492_v6 = vpop.f32.mrf.mxu0 }
 0x1d2   :  { %v2631_v5 = vsel %vm2599_vm9, %v2563_v9, %v2615_v43  ;;  %v2568_v39 = vadd.f32 %v3554_v7, %v2471_v17  ;;  %v3493_v15 = vadd.f32 %v3492_v6, %v3491_v51  ;;  %v3556_v49 = vpop.f32.mrf.mxu1 }
 0x1d3   :  { %v3034_v54 = vpack.c.bf16 %v2631_v5, %v2630_v61  ;;  %v3494_v11 = vpop.f32.mrf.mxu0  ;;  %v3557_v57 = vadd.f32 %v3556_v49, %v3555_v8 }
 0x1d4   :  { %v2474_v34 = vadd.f32 %v3493_v15, %v2377_v35  ;;  %v3558_v36 = vpop.f32.mrf.mxu1  ;;  %v2616_v14 = vmul.f32 0.2, %v2568_v39  ;;  %vm2600_vm10 = vcmp.ge.f32.partialorder %v2568_v39, 0.0 }
 0x1d5   :  { %3054 = vst [vmem:[%s4750_s3 + $0x20] sm:$0xff] %v3034_v54   ;;  %v3495_v12 = vpop.f32.mrf.mxu0 }
 0x1d6   :  { %v2571_v28 = vadd.f32 %v3557_v57, %v2474_v34  ;;  %v3496_v62 = vadd.f32 %v3495_v12, %v3494_v11  ;;  %v3559_v42 = vpop.f32.mrf.mxu1  ;;  %v2632_v26 = vsel %vm2600_vm10, %v2568_v39, %v2616_v14 }
 0x1d7   :  { %v3497_v16 = vpop.f32.mrf.mxu0  ;;  %v3560_v24 = vadd.f32 %v3559_v42, %v3558_v36 }
 0x1d8   :  { %vm2601_vm11 = vcmp.ge.f32.partialorder %v2571_v28, 0.0  ;;  %v2617_v58 = vmul.f32 0.2, %v2571_v28  ;;  %v2479_v48 = vadd.f32 %v3496_v62, %v4660_v44  ;;  %v3561_v27 = vpop.f32.mrf.mxu1 }
 0x1d9   :  { %v3498_v20 = vpop.f32.mrf.mxu0 }
 0x1da   :  { %v2633_v1 = vsel %vm2601_vm11, %v2571_v28, %v2617_v58  ;;  %v2576_v30 = vadd.f32 %v3560_v24, %v2479_v48  ;;  %v3499_v52 = vadd.f32 %v3498_v20, %v3497_v16  ;;  %v3562_v25 = vpop.f32.mrf.mxu1 }
 0x1db   :  { %v3039_v29 = vpack.c.bf16 %v2633_v1, %v2632_v26  ;;  %v3500_v55 = vpop.f32.mrf.mxu0  ;;  %v3563_v31 = vadd.f32 %v3562_v25, %v3561_v27 }
 0x1dc   :  { %v2482_v40 = vadd.f32 %v3499_v52, %v2385_v13  ;;  %v3564_v37 = vpop.f32.mrf.mxu1  ;;  %v2618_v23 = vmul.f32 0.2, %v2576_v30  ;;  %vm2602_vm12 = vcmp.ge.f32.partialorder %v2576_v30, 0.0 }
 0x1dd   :  { %3055 = vst [vmem:[%s4750_s3 + $0x28] sm:$0xff] %v3039_v29   ;;  %v3501_v44 = vpop.f32.mrf.mxu0 }
 0x1de   :  { %v2579_v60 = vadd.f32 %v3563_v31, %v2482_v40  ;;  %v3502_v19 = vadd.f32 %v3501_v44, %v3500_v55  ;;  %v3565_v59 = vpop.f32.mrf.mxu1  ;;  %v2634_v9 = vsel %vm2602_vm12, %v2576_v30, %v2618_v23 }
 0x1df   :  { %v3503_v50 = vpop.f32.mrf.mxu0  ;;  %v3566_v32 = vadd.f32 %v3565_v59, %v3564_v37 }
 0x1e0   :  { %vm2603_vm13 = vcmp.ge.f32.partialorder %v2579_v60, 0.0  ;;  %v2619_v21 = vmul.f32 0.2, %v2579_v60  ;;  %v2487_v46 = vadd.f32 %v3502_v19, %v4754_v22  ;;  %v3567_v47 = vpop.f32.mrf.mxu1 }
 0x1e1   :  { %v3504_v4 = vpop.f32.mrf.mxu0 }
 0x1e2   :  { %v2635_v45 = vsel %vm2603_vm13, %v2579_v60, %v2619_v21  ;;  %v2584_v2 = vadd.f32 %v3566_v32, %v2487_v46  ;;  %v3505_v3 = vadd.f32 %v3504_v4, %v3503_v50  ;;  %v3568_v51 = vpop.f32.mrf.mxu1 }
 0x1e3   :  { %v3044_v43 = vpack.c.bf16 %v2635_v45, %v2634_v9  ;;  %v3569_v7 = vadd.f32 %v3568_v51, %v3567_v47 }
 0x1e4   :  { %v2490_v17 = vadd.f32 %v3505_v3, %v2393_v10  ;;  %v2620_v63 = vmul.f32 0.2, %v2584_v2  ;;  %vm2604_vm14 = vcmp.ge.f32.partialorder %v2584_v2, 0.0 }
 0x1e5   :  { %3056 = vst [vmem:[%s4750_s3 + $0x30] sm:$0xff] %v3044_v43  }
 0x1e6   :  { %v2587_v8 = vadd.f32 %v3569_v7, %v2490_v17  ;;  %v2636_v33 = vsel %vm2604_vm14, %v2584_v2, %v2620_v63 }
 0x1e8   :  { %vm2605_vm15 = vcmp.ge.f32.partialorder %v2587_v8, 0.0  ;;  %v2621_v35 = vmul.f32 0.2, %v2587_v8 }
 0x1ea   :  { %v2637_v6 = vsel %vm2605_vm15, %v2587_v8, %v2621_v35 }
 0x1eb   :  { %v3049_v61 = vpack.c.bf16 %v2637_v6, %v2636_v33 }
 0x1ed   :  { %3057 = vst [vmem:[%s4750_s3 + $0x38] sm:$0xff] %v3049_v61  }

// kernel: d_nlayers_forward.9
= control target key start
LH: loop header
LB: loop body
LE: loop exit
PB: predicated region body
PF: predicated region fallthrough
CT: control target
= control target key end

     0   :  { %s4640_s1 = inlined_call_operand.vmem [shape: bf16[2048,128], index: 1, kind: input, shape index: {}]   ;;  %s4641_s0 = inlined_call_operand.vmem [shape: bf16[128,2048], index: 0, kind: input, shape index: {}]   ;;  %s4642_s2 = inlined_call_operand.vmem [shape: f32[1,128], index: 2, kind: input, shape index: {}]   ;;  %s4643_s3 = inlined_call_operand.vmem [shape: f32[128,128], index: 3, kind: output, shape index: {}]  }
   0x1   :  { %v3379_v0 = vld [vmem:[%s4640_s1 + $0x78] sm:$0xff]   ;;  %v3383_v4 = vld [vmem:[%s4640_s1 + $0x70] sm:$0xff]   ;;  %v3387_v8 = vld [vmem:[%s4640_s1 + $0x68] sm:$0xff]  }
   0x2   :  { %v3380_v1 = vld [vmem:[%s4640_s1 + $0xf8] sm:$0xff]   ;;  %2867 = vmatprep.subr.bf16.mxu0 %v3379_v0  ;;  %v3384_v5 = vld [vmem:[%s4640_s1 + $0xf0] sm:$0xff]   ;;  %v3388_v9 = vld [vmem:[%s4640_s1 + $0xe8] sm:$0xff]  }
   0x3   :  { %v3381_v2 = vld [vmem:[%s4640_s1 + $0x38] sm:$0xff]   ;;  %2931 = vmatprep.subr.bf16.mxu1 %v3380_v1  ;;  %v3385_v6 = vld [vmem:[%s4640_s1 + $0x30] sm:$0xff]   ;;  %v3389_v10 = vld [vmem:[%s4640_s1 + $0x28] sm:$0xff]  }
   0x4   :  { %v3382_v3 = vld [vmem:[%s4640_s1 + $0xb8] sm:$0xff]   ;;  %2868 = vmatpush3.bf16.msra.mxu0 %v3381_v2  ;;  %v3386_v7 = vld [vmem:[%s4640_s1 + $0xb0] sm:$0xff]   ;;  %v3390_v11 = vld [vmem:[%s4640_s1 + $0xa8] sm:$0xff]  }
   0x5   :  { %2932 = vmatpush3.bf16.msra.mxu1 %v3382_v3  ;;  %2869 = vmatprep.subr.bf16.mxu0 %v3383_v4  ;;  %v3391_v12 = vld [vmem:[%s4640_s1 + $0x60] sm:$0xff]   ;;  %v3395_v16 = vld [vmem:[%s4640_s1 + $0x58] sm:$0xff]   ;;  %v3399_v20 = vld [vmem:[%s4640_s1 + $0x50] sm:$0xff]  }
   0x6   :  { %2933 = vmatprep.subr.bf16.mxu1 %v3384_v5  ;;  %v3392_v13 = vld [vmem:[%s4640_s1 + $0xe0] sm:$0xff]   ;;  %v3396_v17 = vld [vmem:[%s4640_s1 + $0xd8] sm:$0xff]   ;;  %v3400_v21 = vld [vmem:[%s4640_s1 + $0xd0] sm:$0xff]  }
   0x7   :  { %v3393_v14 = vld [vmem:[%s4640_s1 + $0x20] sm:$0xff]   ;;  %v3397_v18 = vld [vmem:[%s4640_s1 + $0x18] sm:$0xff]   ;;  %v3401_v22 = vld [vmem:[%s4640_s1 + $0x10] sm:$0xff]  }
   0x8   :  { %2870 = vmatpush3.bf16.msra.mxu0 %v3385_v6  ;;  %v3394_v15 = vld [vmem:[%s4640_s1 + $0xa0] sm:$0xff]   ;;  %v3398_v19 = vld [vmem:[%s4640_s1 + $0x98] sm:$0xff]   ;;  %v3402_v23 = vld [vmem:[%s4640_s1 + $0x90] sm:$0xff]  }
   0x9   :  { %2934 = vmatpush3.bf16.msra.mxu1 %v3386_v7  ;;  %2871 = vmatprep.subr.bf16.mxu0 %v3387_v8  ;;  %v3403_v24 = vld [vmem:[%s4640_s1 + $0x48] sm:$0xff]   ;;  %v3407_v28 = vld [vmem:[%s4640_s1 + $0x40] sm:$0xff]   ;;  %v3411_v40 = vld [vmem:[%s4640_s1 + $0x178] sm:$0xff]  }
   0xa   :  { %2935 = vmatprep.subr.bf16.mxu1 %v3388_v9  ;;  %v3404_v25 = vld [vmem:[%s4640_s1 + $0xc8] sm:$0xff]   ;;  %v3408_v29 = vld [vmem:[%s4640_s1 + $0xc0] sm:$0xff]   ;;  %v3412_v41 = vld [vmem:[%s4640_s1 + $0x138] sm:$0xff]  }
   0xb   :  { %v3405_v26 = vld [vmem:[%s4640_s1 + $0x8] sm:$0xff]   ;;  %v3409_v30 = vld [vmem:[%s4640_s1] sm:$0xff]   ;;  %v3413_v42 = vld [vmem:[%s4640_s1 + $0x1f8] sm:$0xff]  }
   0xc   :  { %2872 = vmatpush3.bf16.msra.mxu0 %v3389_v10  ;;  %v3406_v27 = vld [vmem:[%s4640_s1 + $0x88] sm:$0xff]   ;;  %v3410_v31 = vld [vmem:[%s4640_s1 + $0x80] sm:$0xff]   ;;  %v3414_v43 = vld [vmem:[%s4640_s1 + $0x1b8] sm:$0xff]  }
   0xd   :  { %2936 = vmatpush3.bf16.msra.mxu1 %v3390_v11  ;;  %2873 = vmatprep.subr.bf16.mxu0 %v3391_v12  ;;  %v15_v32 = vld [vmem:[%s4641_s0] sm:$0xff]  ;;  %v16_v34 = vld [vmem:[%s4641_s0 + $0x8] sm:$0xff]  ;;  %v3415_v50 = vld [vmem:[%s4640_s1 + $0x170] sm:$0xff]  }
   0xe   :  { %2937 = vmatprep.subr.bf16.mxu1 %v3392_v13  ;;  %v23_v33 = vld [vmem:[%s4641_s0 + $0x40] sm:$0xff]  ;;  %v24_v37 = vld [vmem:[%s4641_s0 + $0x48] sm:$0xff]  ;;  %v3416_v52 = vld [vmem:[%s4640_s1 + $0x130] sm:$0xff]  }
   0xf   :  { %v2611_v35 = vcombine.low %v15_v32, %v23_v33  ;;  %v2612_v36 = vcombine.high %v15_v32, %v23_v33  ;;  %v2613_v38 = vcombine.low %v16_v34, %v24_v37  ;;  %v2614_v39 = vcombine.high %v16_v34, %v24_v37  ;;  %v31_v44 = vld [vmem:[%s4641_s0 + $0x80] sm:$0xff]  ;;  %v32_v47 = vld [vmem:[%s4641_s0 + $0x88] sm:$0xff]  ;;  %v3417_v54 = vld [vmem:[%s4640_s1 + $0x1f0] sm:$0xff]  }
  0x10   :  { %2874 = vmatpush3.bf16.msra.mxu0 %v3393_v14  ;;  %v39_v45 = vld [vmem:[%s4641_s0 + $0xc0] sm:$0xff]  ;;  %v40_v48 = vld [vmem:[%s4641_s0 + $0xc8] sm:$0xff]  ;;  %v3418_v55 = vld [vmem:[%s4640_s1 + $0x1b0] sm:$0xff]  }
  0x11   :  { %2938 = vmatpush3.bf16.msra.mxu1 %v3394_v15  ;;  %2875 = vmatprep.subr.bf16.mxu0 %v3395_v16  ;;  %v2628_v46 = vcombine.high %v31_v44, %v39_v45  ;;  %v2630_v49 = vcombine.high %v32_v47, %v40_v48  ;;  %v2627_v51 = vcombine.low %v31_v44, %v39_v45  ;;  %v47_v56 = vld [vmem:[%s4641_s0 + $0x100] sm:$0xff]  ;;  %v48_v58 = vld [vmem:[%s4641_s0 + $0x108] sm:$0xff]  ;;  %v3433_v32 = vld [vmem:[%s4640_s1 + $0x1d0] sm:$0xff]  }
  0x12   :  { %2939 = vmatprep.subr.bf16.mxu1 %v3396_v17  ;;  %1846 = vmatprep.mubr.bf16.mxu0 %v2612_v36  ;;  %v2629_v53 = vcombine.low %v32_v47, %v40_v48  ;;  %v55_v57 = vld [vmem:[%s4641_s0 + $0x140] sm:$0xff]  ;;  %v56_v59 = vld [vmem:[%s4641_s0 + $0x148] sm:$0xff]  ;;  %v3434_v33 = vld [vmem:[%s4640_s1 + $0x190] sm:$0xff]  }
  0x13   :  { %1943 = vmatprep.mubr.bf16.mxu1 %v2614_v39  ;;  %v2644_v60 = vcombine.high %v47_v56, %v55_v57  ;;  %v2646_v61 = vcombine.high %v48_v58, %v56_v59  ;;  %v3419_v62 = vld [vmem:[%s4640_s1 + $0x168] sm:$0xff]   ;;  %v2643_v2 = vcombine.low %v47_v56, %v55_v57  ;;  %v63_v3 = vld [vmem:[%s4641_s0 + $0x180] sm:$0xff]  ;;  %v2645_v6 = vcombine.low %v48_v58, %v56_v59  ;;  %v3443_v56 = vld [vmem:[%s4640_s1 + $0x278] sm:$0xff]  }
  0x14   :  { %2876 = vmatpush3.bf16.msra.mxu0 %v3397_v18  ;;  %v3420_v63 = vld [vmem:[%s4640_s1 + $0x128] sm:$0xff]   ;;  %v71_v4 = vld [vmem:[%s4641_s0 + $0x1c0] sm:$0xff]  ;;  %v3427_v18 = vld [vmem:[%s4640_s1 + $0x158] sm:$0xff]  }
  0x15   :  { %2940 = vmatpush3.bf16.msra.mxu1 %v3398_v19  ;;  %2877 = vmatprep.subr.bf16.mxu0 %v3399_v20  ;;  %v3421_v0 = vld [vmem:[%s4640_s1 + $0x1e8] sm:$0xff]   ;;  %v2660_v7 = vcombine.high %v63_v3, %v71_v4  ;;  %v3423_v10 = vld [vmem:[%s4640_s1 + $0x160] sm:$0xff]   ;;  %v2659_v19 = vcombine.low %v63_v3, %v71_v4  ;;  %v3428_v20 = vld [vmem:[%s4640_s1 + $0x118] sm:$0xff]  }
  0x16   :  { %2941 = vmatprep.subr.bf16.mxu1 %v3400_v21  ;;  %v3422_v1 = vld [vmem:[%s4640_s1 + $0x1a8] sm:$0xff]   ;;  %v3424_v11 = vld [vmem:[%s4640_s1 + $0x120] sm:$0xff]   ;;  %v3445_v58 = vld [vmem:[%s4640_s1 + $0x2f8] sm:$0xff]  }
  0x17   :  { %v64_v5 = vld [vmem:[%s4641_s0 + $0x188] sm:$0xff]  ;;  %v3425_v12 = vld [vmem:[%s4640_s1 + $0x1e0] sm:$0xff]   ;;  %v26_v3 = vld [vmem:[%s4641_s0 + $0x58] sm:$0xff] }
  0x18   :  { %2878 = vmatpush3.bf16.msra.mxu0 %v3401_v22  ;;  %v72_v8 = vld [vmem:[%s4641_s0 + $0x1c8] sm:$0xff]  ;;  %v3426_v13 = vld [vmem:[%s4640_s1 + $0x1a0] sm:$0xff]  }
  0x19   :  { %2942 = vmatpush3.bf16.msra.mxu1 %v3402_v23  ;;  %2879 = vmatprep.subr.bf16.mxu0 %v3403_v24  ;;  %v2662_v9 = vcombine.high %v64_v5, %v72_v8  ;;  %v79_v14 = vld [vmem:[%s4641_s0 + $0x200] sm:$0xff]  ;;  %v80_v16 = vld [vmem:[%s4641_s0 + $0x208] sm:$0xff]  ;;  %v2661_v21 = vcombine.low %v64_v5, %v72_v8  ;;  %v3429_v23 = vld [vmem:[%s4640_s1 + $0x1d8] sm:$0xff]  }
  0x1a   :  { %2943 = vmatprep.subr.bf16.mxu1 %v3404_v25  ;;  %v87_v15 = vld [vmem:[%s4641_s0 + $0x240] sm:$0xff]  ;;  %v88_v17 = vld [vmem:[%s4641_s0 + $0x248] sm:$0xff]  ;;  %v3430_v25 = vld [vmem:[%s4640_s1 + $0x198] sm:$0xff]  }
  0x1b   :  { %v2676_v22 = vcombine.high %v79_v14, %v87_v15  ;;  %v2678_v24 = vcombine.high %v80_v16, %v88_v17  ;;  %v2675_v34 = vcombine.low %v79_v14, %v87_v15  ;;  %v3436_v39 = vld [vmem:[%s4640_s1 + $0x108] sm:$0xff]   ;;  %v3440_v48 = vld [vmem:[%s4640_s1 + $0x100] sm:$0xff]   ;;  %v33_v8 = vld [vmem:[%s4641_s0 + $0x90] sm:$0xff] }
  0x1c   :  { %2880 = vmatpush3.bf16.msra.mxu0 %v3405_v26  ;;  %v95_v26 = vld [vmem:[%s4641_s0 + $0x280] sm:$0xff]  ;;  %v112_v44 = vld [vmem:[%s4641_s0 + $0x308] sm:$0xff]  ;;  %v3446_v15 = vld [vmem:[%s4640_s1 + $0x2b8] sm:$0xff]  }
  0x1d   :  { %2944 = vmatpush3.bf16.msra.mxu1 %v3406_v27  ;;  %2881 = vmatprep.subr.bf16.mxu0 %v3407_v28  ;;  %v103_v27 = vld [vmem:[%s4641_s0 + $0x2c0] sm:$0xff]  ;;  %v3431_v28 = vld [vmem:[%s4640_s1 + $0x150] sm:$0xff]   ;;  %v120_v45 = vld [vmem:[%s4641_s0 + $0x348] sm:$0xff] }
  0x1e   :  { %2945 = vmatprep.subr.bf16.mxu1 %v3408_v29  ;;  %v96_v29 = vld [vmem:[%s4641_s0 + $0x288] sm:$0xff]  ;;  %v2692_v36 = vcombine.high %v95_v26, %v103_v27  ;;  %v2691_v47 = vcombine.low %v95_v26, %v103_v27 }
  0x1f   :  { %v128_v57 = vld [vmem:[%s4641_s0 + $0x388] sm:$0xff] }
  0x20   :  { %2882 = vmatpush3.bf16.msra.mxu0 %v3409_v30  ;;  %v104_v30 = vld [vmem:[%s4641_s0 + $0x2c8] sm:$0xff] }
  0x21   :  { %2946 = vmatpush3.bf16.msra.mxu1 %v3410_v31  ;;  %2995 = vmatprep.subr.bf16.mxu0 %v3411_v40  ;;  %v3432_v31 = vld [vmem:[%s4640_s1 + $0x110] sm:$0xff]   ;;  %v2694_v37 = vcombine.high %v96_v29, %v104_v30  ;;  %v3437_v40 = vld [vmem:[%s4640_s1 + $0x1c8] sm:$0xff]  }
  0x22   :  { %3059 = vmatprep.subr.bf16.mxu1 %v3413_v42  ;;  %v119_v42 = vld [vmem:[%s4641_s0 + $0x340] sm:$0xff]  ;;  %v136_v59 = vld [vmem:[%s4641_s0 + $0x3c8] sm:$0xff] }
  0x23   :  { %1847 = vmatmul.mubr.bf16.vlgmr.msra.gmra.mxu0 %v2611_v35  ;;  %v2677_v35 = vcombine.low %v80_v16, %v88_v17  ;;  %v2725_v5 = vcombine.low %v128_v57, %v136_v59  ;;  %v3447_v17 = vld [vmem:[%s4640_s1 + $0x270] sm:$0xff]   ;;  %v3451_v26 = vld [vmem:[%s4640_s1 + $0x268] sm:$0xff]  }
  0x24   :  { %1944 = vmatmul.mubr.bf16.vlgmr.msra.gmra.mxu1 %v2613_v38  ;;  %2996 = vmatpush3.bf16.msra.mxu0 %v3412_v41  ;;  %v3435_v38 = vld [vmem:[%s4640_s1 + $0x148] sm:$0xff]   ;;  %v111_v41 = vld [vmem:[%s4641_s0 + $0x300] sm:$0xff] }
  0x25   :  { %3060 = vmatpush3.bf16.msra.mxu1 %v3414_v43  ;;  %1854 = vmatprep.mubr.bf16.mxu0 %v2628_v46  ;;  %v3438_v43 = vld [vmem:[%s4640_s1 + $0x188] sm:$0xff]   ;;  %v3439_v46 = vld [vmem:[%s4640_s1 + $0x140] sm:$0xff]  }
  0x26   :  { %1951 = vmatprep.mubr.bf16.mxu1 %v2630_v49  ;;  %2997 = vmatprep.subr.bf16.mxu0 %v3415_v50  ;;  %v2693_v49 = vcombine.low %v96_v29, %v104_v30  ;;  %v2708_v50 = vcombine.high %v111_v41, %v119_v42  ;;  %v3453_v27 = vld [vmem:[%s4640_s1 + $0x2e8] sm:$0xff]  }
  0x27   :  { %3061 = vmatprep.subr.bf16.mxu1 %v3417_v54  ;;  %v127_v54 = vld [vmem:[%s4641_s0 + $0x380] sm:$0xff] }
  0x28   :  { %2998 = vmatpush3.bf16.msra.mxu0 %v3416_v52  ;;  %v2710_v52 = vcombine.high %v112_v44, %v120_v45 }
  0x29   :  { %3062 = vmatpush3.bf16.msra.mxu1 %v3418_v55  ;;  %2999 = vmatprep.subr.bf16.mxu0 %v3419_v62  ;;  %v135_v55 = vld [vmem:[%s4641_s0 + $0x3c0] sm:$0xff] }
  0x2a   :  { %3063 = vmatprep.subr.bf16.mxu1 %v3421_v0  ;;  %v2724_v62 = vcombine.high %v127_v54, %v135_v55  ;;  %v17_v0 = vld [vmem:[%s4641_s0 + $0x10] sm:$0xff]  ;;  %v2723_v4 = vcombine.low %v127_v54, %v135_v55  ;;  %v82_v54 = vld [vmem:[%s4641_s0 + $0x218] sm:$0xff] }
  0x2b   :  { %1855 = vmatmul.mubr.bf16.gmra.mxu0 %v2627_v51  ;;  %v3441_v51 = vld [vmem:[%s4640_s1 + $0x1c0] sm:$0xff]   ;;  %v90_v55 = vld [vmem:[%s4641_s0 + $0x258] sm:$0xff] }
  0x2c   :  { %1952 = vmatmul.mubr.bf16.gmra.mxu1 %v2629_v53  ;;  %1862 = vmatprep.mubr.bf16.mxu0 %v2644_v60  ;;  %v3442_v53 = vld [vmem:[%s4640_s1 + $0x180] sm:$0xff]   ;;  %v2707_v60 = vcombine.low %v111_v41, %v119_v42  ;;  %v3459_v42 = vld [vmem:[%s4640_s1 + $0x258] sm:$0xff]  }
  0x2d   :  { %1959 = vmatprep.mubr.bf16.mxu1 %v2646_v61  ;;  %3000 = vmatpush3.bf16.msra.mxu0 %v3420_v63  ;;  %v2709_v61 = vcombine.low %v112_v44, %v120_v45  ;;  %v2726_v63 = vcombine.high %v128_v57, %v136_v59  ;;  %v3458_v41 = vld [vmem:[%s4640_s1 + $0x2a0] sm:$0xff]   ;;  %v3461_v44 = vld [vmem:[%s4640_s1 + $0x2d8] sm:$0xff]   ;;  %v3466_v57 = vld [vmem:[%s4640_s1 + $0x290] sm:$0xff]  }
  0x2e   :  { %3064 = vmatpush3.bf16.msra.mxu1 %v3422_v1  ;;  %3001 = vmatprep.subr.bf16.mxu0 %v3423_v10  ;;  %v25_v1 = vld [vmem:[%s4641_s0 + $0x50] sm:$0xff] }
  0x2f   :  { %3065 = vmatprep.subr.bf16.mxu1 %v3425_v12  ;;  %v2615_v10 = vcombine.low %v17_v0, %v25_v1  ;;  %v34_v12 = vld [vmem:[%s4641_s0 + $0x98] sm:$0xff] }
  0x31   :  { %3002 = vmatpush3.bf16.msra.mxu0 %v3424_v11  ;;  %v3444_v11 = vld [vmem:[%s4640_s1 + $0x238] sm:$0xff]  }
  0x32   :  { %3066 = vmatpush3.bf16.msra.mxu1 %v3426_v13  ;;  %3003 = vmatprep.subr.bf16.mxu0 %v3427_v18  ;;  %v42_v13 = vld [vmem:[%s4641_s0 + $0xd8] sm:$0xff] }
  0x33   :  { %1863 = vmatmul.mubr.bf16.gmra.mxu0 %v2643_v2  ;;  %3067 = vmatprep.subr.bf16.mxu1 %v3429_v23  ;;  %v18_v2 = vld [vmem:[%s4641_s0 + $0x18] sm:$0xff]  ;;  %v2634_v18 = vcombine.high %v34_v12, %v42_v13  ;;  %v57_v23 = vld [vmem:[%s4641_s0 + $0x150] sm:$0xff]  ;;  %v2633_v29 = vcombine.low %v34_v12, %v42_v13  ;;  %v2681_v13 = vcombine.low %v82_v54, %v90_v55 }
  0x34   :  { %1960 = vmatmul.mubr.bf16.gmra.mxu1 %v2645_v6  ;;  %1870 = vmatprep.mubr.bf16.mxu0 %v2660_v7  ;;  %v2616_v6 = vcombine.high %v17_v0, %v25_v1  ;;  %v2618_v7 = vcombine.high %v18_v2, %v26_v3  ;;  %v2617_v14 = vcombine.low %v18_v2, %v26_v3  ;;  %v3468_v0 = vld [vmem:[%s4640_s1 + $0x208] sm:$0xff]   ;;  %v3471_v2 = vld [vmem:[%s4640_s1 + $0x240] sm:$0xff]   ;;  %v97_v3 = vld [vmem:[%s4641_s0 + $0x290] sm:$0xff] }
  0x35   :  { %1967 = vmatprep.mubr.bf16.mxu1 %v2662_v9  ;;  %3004 = vmatpush3.bf16.msra.mxu0 %v3428_v20  ;;  %v41_v9 = vld [vmem:[%s4641_s0 + $0xd0] sm:$0xff]  ;;  %v3470_v1 = vld [vmem:[%s4640_s1 + $0x288] sm:$0xff]   ;;  %v3477_v12 = vld [vmem:[%s4640_s1 + $0x3f8] sm:$0xff]  }
  0x36   :  { %3068 = vmatpush3.bf16.msra.mxu1 %v3430_v25  ;;  %3005 = vmatprep.subr.bf16.mxu0 %v3431_v28  ;;  %v2632_v16 = vcombine.high %v33_v8, %v41_v9  ;;  %v3449_v20 = vld [vmem:[%s4640_s1 + $0x2f0] sm:$0xff]   ;;  %v58_v25 = vld [vmem:[%s4641_s0 + $0x158] sm:$0xff]  ;;  %v2631_v28 = vcombine.low %v33_v8, %v41_v9  ;;  %v3472_v8 = vld [vmem:[%s4640_s1 + $0x200] sm:$0xff]  }
  0x37   :  { %3069 = vmatprep.subr.bf16.mxu1 %v3433_v32  ;;  %v3452_v32 = vld [vmem:[%s4640_s1 + $0x228] sm:$0xff]   ;;  %v3474_v9 = vld [vmem:[%s4640_s1 + $0x280] sm:$0xff]  }
  0x39   :  { %3006 = vmatpush3.bf16.msra.mxu0 %v3432_v31 }
  0x3a   :  { %3070 = vmatpush3.bf16.msra.mxu1 %v3434_v33  ;;  %3007 = vmatprep.subr.bf16.mxu0 %v3435_v38  ;;  %v3454_v33 = vld [vmem:[%s4640_s1 + $0x2a8] sm:$0xff]   ;;  %v66_v38 = vld [vmem:[%s4641_s0 + $0x198] sm:$0xff] }
  0x3b   :  { %1871 = vmatmul.mubr.bf16.gmra.mxu0 %v2659_v19  ;;  %3071 = vmatprep.subr.bf16.mxu1 %v3437_v40  ;;  %v3448_v19 = vld [vmem:[%s4640_s1 + $0x230] sm:$0xff]   ;;  %v3456_v40 = vld [vmem:[%s4640_s1 + $0x220] sm:$0xff]  }
  0x3c   :  { %1968 = vmatmul.mubr.bf16.gmra.mxu1 %v2661_v21  ;;  %1878 = vmatprep.mubr.bf16.mxu0 %v2676_v22  ;;  %v3450_v21 = vld [vmem:[%s4640_s1 + $0x2b0] sm:$0xff]  }
  0x3d   :  { %1975 = vmatprep.mubr.bf16.mxu1 %v2678_v24  ;;  %3008 = vmatpush3.bf16.msra.mxu0 %v3436_v39  ;;  %v49_v22 = vld [vmem:[%s4641_s0 + $0x110] sm:$0xff]  ;;  %v50_v24 = vld [vmem:[%s4641_s0 + $0x118] sm:$0xff] }
  0x3e   :  { %3072 = vmatpush3.bf16.msra.mxu1 %v3438_v43  ;;  %3009 = vmatprep.subr.bf16.mxu0 %v3439_v46  ;;  %v2648_v30 = vcombine.high %v49_v22, %v57_v23  ;;  %v2650_v31 = vcombine.high %v50_v24, %v58_v25  ;;  %v74_v39 = vld [vmem:[%s4641_s0 + $0x1d8] sm:$0xff]  ;;  %v2647_v43 = vcombine.low %v49_v22, %v57_v23 }
  0x3f   :  { %3073 = vmatprep.subr.bf16.mxu1 %v3441_v51  ;;  %v2649_v45 = vcombine.low %v50_v24, %v58_v25  ;;  %v81_v51 = vld [vmem:[%s4641_s0 + $0x210] sm:$0xff] }
  0x40   :  { %v129_v24 = vld [vmem:[%s4641_s0 + $0x390] sm:$0xff] }
  0x41   :  { %3010 = vmatpush3.bf16.msra.mxu0 %v3440_v48  ;;  %v2666_v48 = vcombine.high %v66_v38, %v74_v39  ;;  %v137_v25 = vld [vmem:[%s4641_s0 + $0x3d0] sm:$0xff] }
  0x42   :  { %3074 = vmatpush3.bf16.msra.mxu1 %v3442_v53  ;;  %3123 = vmatprep.subr.bf16.mxu0 %v3443_v56  ;;  %v89_v53 = vld [vmem:[%s4641_s0 + $0x250] sm:$0xff] }
  0x43   :  { %1879 = vmatmul.mubr.bf16.gmra.mxu0 %v2675_v34  ;;  %3187 = vmatprep.subr.bf16.mxu1 %v3445_v58  ;;  %v3455_v34 = vld [vmem:[%s4640_s1 + $0x260] sm:$0xff]   ;;  %v3464_v56 = vld [vmem:[%s4640_s1 + $0x210] sm:$0xff]   ;;  %v3467_v58 = vld [vmem:[%s4640_s1 + $0x248] sm:$0xff]  }
  0x44   :  { %1976 = vmatmul.mubr.bf16.gmra.mxu1 %v2677_v35  ;;  %1886 = vmatprep.mubr.bf16.mxu0 %v2692_v36  ;;  %v65_v35 = vld [vmem:[%s4641_s0 + $0x190] sm:$0xff] }
  0x45   :  { %1983 = vmatprep.mubr.bf16.mxu1 %v2694_v37  ;;  %v73_v36 = vld [vmem:[%s4641_s0 + $0x1d0] sm:$0xff]  ;;  %v3457_v37 = vld [vmem:[%s4640_s1 + $0x2e0] sm:$0xff]  }
  0x46   :  { %v2664_v46 = vcombine.high %v65_v35, %v73_v36  ;;  %v2663_v59 = vcombine.low %v65_v35, %v73_v36  ;;  %v28_v35 = vld [vmem:[%s4641_s0 + $0x68] sm:$0xff]  ;;  %v2727_v36 = vcombine.low %v129_v24, %v137_v25 }
  0x4b   :  { %1887 = vmatmul.mubr.bf16.gmra.mxu0 %v2691_v47  ;;  %v3460_v47 = vld [vmem:[%s4640_s1 + $0x218] sm:$0xff]  }
  0x4c   :  { %1984 = vmatmul.mubr.bf16.gmra.mxu1 %v2693_v49  ;;  %1894 = vmatprep.mubr.bf16.mxu0 %v2708_v50  ;;  %v3462_v49 = vld [vmem:[%s4640_s1 + $0x298] sm:$0xff]   ;;  %v3463_v50 = vld [vmem:[%s4640_s1 + $0x250] sm:$0xff]  }
  0x4d   :  { %1991 = vmatprep.mubr.bf16.mxu1 %v2710_v52  ;;  %v3465_v52 = vld [vmem:[%s4640_s1 + $0x2d0] sm:$0xff]  }
  0x53   :  { %1895 = vmatmul.mubr.bf16.gmra.mxu0 %v2707_v60  ;;  %v3469_v60 = vld [vmem:[%s4640_s1 + $0x2c8] sm:$0xff]  }
  0x54   :  { %1992 = vmatmul.mubr.bf16.gmra.mxu1 %v2709_v61  ;;  %1902 = vmatprep.mubr.bf16.mxu0 %v2724_v62  ;;  %v2665_v61 = vcombine.low %v66_v38, %v74_v39  ;;  %v2680_v62 = vcombine.high %v81_v51, %v89_v53 }
  0x55   :  { %1999 = vmatprep.mubr.bf16.mxu1 %v2726_v63  ;;  %v2682_v63 = vcombine.high %v82_v54, %v90_v55  ;;  %v51_v54 = vld [vmem:[%s4641_s0 + $0x120] sm:$0xff] }
  0x56   :  { %v59_v55 = vld [vmem:[%s4641_s0 + $0x160] sm:$0xff] }
  0x5b   :  { %1903 = vmatmul.mubr.bf16.gmra.mxu0 %v2723_v4  ;;  %v105_v4 = vld [vmem:[%s4641_s0 + $0x2d0] sm:$0xff] }
  0x5c   :  { %2000 = vmatmul.mubr.bf16.gmra.mxu1 %v2725_v5  ;;  %2040 = vmatprep.mubr.bf16.mxu0 %v2616_v6  ;;  %v3473_v5 = vld [vmem:[%s4640_s1 + $0x2c0] sm:$0xff]   ;;  %v98_v6 = vld [vmem:[%s4641_s0 + $0x298] sm:$0xff] }
  0x5d   :  { %2137 = vmatprep.mubr.bf16.mxu1 %v2618_v7  ;;  %v106_v7 = vld [vmem:[%s4641_s0 + $0x2d8] sm:$0xff] }
  0x63   :  { %2041 = vmatmul.mubr.bf16.vlgmr.msra.gmra.mxu0 %v2615_v10  ;;  %v3475_v10 = vld [vmem:[%s4640_s1 + $0x378] sm:$0xff]  }
  0x64   :  { %2138 = vmatmul.mubr.bf16.vlgmr.msra.gmra.mxu1 %v2617_v14  ;;  %3124 = vmatpush3.bf16.msra.mxu0 %v3444_v11  ;;  %v2679_v11 = vcombine.low %v81_v51, %v89_v53  ;;  %v2696_v14 = vcombine.high %v97_v3, %v105_v4  ;;  %v3481_v51 = vld [vmem:[%s4640_s1 + $0x3f0] sm:$0xff]  }
  0x65   :  { %3188 = vmatpush3.bf16.msra.mxu1 %v3446_v15  ;;  %2048 = vmatprep.mubr.bf16.mxu0 %v2632_v16  ;;  %v2698_v15 = vcombine.high %v98_v6, %v106_v7  ;;  %v113_v16 = vld [vmem:[%s4641_s0 + $0x310] sm:$0xff] }
  0x66   :  { %2145 = vmatprep.mubr.bf16.mxu1 %v2634_v18  ;;  %3125 = vmatprep.subr.bf16.mxu0 %v3447_v17  ;;  %v121_v17 = vld [vmem:[%s4641_s0 + $0x350] sm:$0xff]  ;;  %v114_v18 = vld [vmem:[%s4641_s0 + $0x318] sm:$0xff] }
  0x67   :  { %3189 = vmatprep.subr.bf16.mxu1 %v3449_v20  ;;  %v2695_v20 = vcombine.low %v97_v3, %v105_v4  ;;  %v2712_v22 = vcombine.high %v113_v16, %v121_v17  ;;  %v3482_v53 = vld [vmem:[%s4640_s1 + $0x3b0] sm:$0xff]   ;;  %v3489_v3 = vld [vmem:[%s4640_s1 + $0x3e0] sm:$0xff]  }
  0x68   :  { %3126 = vmatpush3.bf16.msra.mxu0 %v3448_v19  ;;  %v122_v19 = vld [vmem:[%s4641_s0 + $0x358] sm:$0xff]  ;;  %v67_v4 = vld [vmem:[%s4641_s0 + $0x1a0] sm:$0xff] }
  0x69   :  { %3190 = vmatpush3.bf16.msra.mxu1 %v3450_v21  ;;  %3127 = vmatprep.subr.bf16.mxu0 %v3451_v26  ;;  %v2697_v21 = vcombine.low %v98_v6, %v106_v7  ;;  %v2714_v23 = vcombine.high %v114_v18, %v122_v19  ;;  %v130_v26 = vld [vmem:[%s4641_s0 + $0x398] sm:$0xff]  ;;  %v68_v6 = vld [vmem:[%s4641_s0 + $0x1a8] sm:$0xff]  ;;  %v3488_v7 = vld [vmem:[%s4640_s1 + $0x320] sm:$0xff]  }
  0x6a   :  { %3191 = vmatprep.subr.bf16.mxu1 %v3453_v27  ;;  %v138_v27 = vld [vmem:[%s4641_s0 + $0x3d8] sm:$0xff] }
  0x6b   :  { %2049 = vmatmul.mubr.bf16.gmra.mxu0 %v2631_v28  ;;  %v2711_v28 = vcombine.low %v113_v16, %v121_v17  ;;  %v3492_v16 = vld [vmem:[%s4640_s1 + $0x318] sm:$0xff]  }
  0x6c   :  { %2146 = vmatmul.mubr.bf16.gmra.mxu1 %v2633_v29  ;;  %2056 = vmatprep.mubr.bf16.mxu0 %v2648_v30  ;;  %v2713_v29 = vcombine.low %v114_v18, %v122_v19  ;;  %v2728_v30 = vcombine.high %v129_v24, %v137_v25  ;;  %v3494_v17 = vld [vmem:[%s4640_s1 + $0x398] sm:$0xff]   ;;  %v3495_v18 = vld [vmem:[%s4640_s1 + $0x350] sm:$0xff]   ;;  %v92_v24 = vld [vmem:[%s4641_s0 + $0x268] sm:$0xff] }
  0x6d   :  { %2153 = vmatprep.mubr.bf16.mxu1 %v2650_v31  ;;  %3128 = vmatpush3.bf16.msra.mxu0 %v3452_v32  ;;  %v2730_v31 = vcombine.high %v130_v26, %v138_v27  ;;  %v19_v32 = vld [vmem:[%s4641_s0 + $0x20] sm:$0xff]  ;;  %v3497_v19 = vld [vmem:[%s4640_s1 + $0x3d0] sm:$0xff]  }
  0x6e   :  { %3192 = vmatpush3.bf16.msra.mxu1 %v3454_v33  ;;  %3129 = vmatprep.subr.bf16.mxu0 %v3455_v34  ;;  %v27_v33 = vld [vmem:[%s4641_s0 + $0x60] sm:$0xff]  ;;  %v20_v34 = vld [vmem:[%s4641_s0 + $0x28] sm:$0xff]  ;;  %v3498_v25 = vld [vmem:[%s4640_s1 + $0x390] sm:$0xff]  }
  0x6f   :  { %3193 = vmatprep.subr.bf16.mxu1 %v3457_v37  ;;  %v2729_v37 = vcombine.low %v130_v26, %v138_v27  ;;  %v2620_v38 = vcombine.high %v19_v32, %v27_v33  ;;  %v2622_v39 = vcombine.high %v20_v34, %v28_v35  ;;  %v3499_v26 = vld [vmem:[%s4640_s1 + $0x348] sm:$0xff]  }
  0x71   :  { %3130 = vmatpush3.bf16.msra.mxu0 %v3456_v40  ;;  %v35_v40 = vld [vmem:[%s4641_s0 + $0xa0] sm:$0xff] }
  0x72   :  { %3194 = vmatpush3.bf16.msra.mxu1 %v3458_v41  ;;  %3131 = vmatprep.subr.bf16.mxu0 %v3459_v42  ;;  %v43_v41 = vld [vmem:[%s4641_s0 + $0xe0] sm:$0xff]  ;;  %v2619_v42 = vcombine.low %v19_v32, %v27_v33  ;;  %v3500_v32 = vld [vmem:[%s4640_s1 + $0x308] sm:$0xff]  }
  0x73   :  { %2057 = vmatmul.mubr.bf16.gmra.mxu0 %v2647_v43  ;;  %3195 = vmatprep.subr.bf16.mxu1 %v3461_v44  ;;  %v36_v43 = vld [vmem:[%s4641_s0 + $0xa8] sm:$0xff] }
  0x74   :  { %2154 = vmatmul.mubr.bf16.gmra.mxu1 %v2649_v45  ;;  %2064 = vmatprep.mubr.bf16.mxu0 %v2664_v46  ;;  %v44_v44 = vld [vmem:[%s4641_s0 + $0xe8] sm:$0xff]  ;;  %v2621_v45 = vcombine.low %v20_v34, %v28_v35  ;;  %v3476_v46 = vld [vmem:[%s4640_s1 + $0x338] sm:$0xff]   ;;  %v3503_v34 = vld [vmem:[%s4640_s1 + $0x340] sm:$0xff]  }
  0x75   :  { %2161 = vmatprep.mubr.bf16.mxu1 %v2666_v48  ;;  %3132 = vmatpush3.bf16.msra.mxu0 %v3460_v47  ;;  %v3478_v47 = vld [vmem:[%s4640_s1 + $0x3b8] sm:$0xff]   ;;  %v2636_v48 = vcombine.high %v35_v40, %v43_v41  ;;  %v3502_v33 = vld [vmem:[%s4640_s1 + $0x388] sm:$0xff]   ;;  %v3505_v35 = vld [vmem:[%s4640_s1 + $0x3c0] sm:$0xff]  }
  0x76   :  { %3196 = vmatpush3.bf16.msra.mxu1 %v3462_v49  ;;  %3133 = vmatprep.subr.bf16.mxu0 %v3463_v50  ;;  %v2638_v49 = vcombine.high %v36_v43, %v44_v44  ;;  %v3479_v50 = vld [vmem:[%s4640_s1 + $0x370] sm:$0xff]  }
  0x77   :  { %3197 = vmatprep.subr.bf16.mxu1 %v3465_v52  ;;  %v3480_v52 = vld [vmem:[%s4640_s1 + $0x330] sm:$0xff]  }
  0x79   :  { %3134 = vmatpush3.bf16.msra.mxu0 %v3464_v56  ;;  %v3483_v56 = vld [vmem:[%s4640_s1 + $0x368] sm:$0xff]  }
  0x7a   :  { %3198 = vmatpush3.bf16.msra.mxu1 %v3466_v57  ;;  %3135 = vmatprep.subr.bf16.mxu0 %v3467_v58  ;;  %v52_v57 = vld [vmem:[%s4641_s0 + $0x128] sm:$0xff] }
  0x7b   :  { %2065 = vmatmul.mubr.bf16.gmra.mxu0 %v2663_v59  ;;  %3199 = vmatprep.subr.bf16.mxu1 %v3469_v60  ;;  %v60_v58 = vld [vmem:[%s4641_s0 + $0x168] sm:$0xff]  ;;  %v2635_v60 = vcombine.low %v35_v40, %v43_v41  ;;  %v3506_v41 = vld [vmem:[%s4640_s1 + $0x380] sm:$0xff]  }
  0x7c   :  { %2162 = vmatmul.mubr.bf16.gmra.mxu1 %v2665_v61  ;;  %2072 = vmatprep.mubr.bf16.mxu0 %v2680_v62  ;;  %v3485_v59 = vld [vmem:[%s4640_s1 + $0x3e8] sm:$0xff]   ;;  %v2637_v61 = vcombine.low %v36_v43, %v44_v44  ;;  %v2652_v62 = vcombine.high %v51_v54, %v59_v55 }
  0x7d   :  { %2169 = vmatprep.mubr.bf16.mxu1 %v2682_v63  ;;  %3136 = vmatpush3.bf16.msra.mxu0 %v3468_v0  ;;  %v2654_v63 = vcombine.high %v52_v57, %v60_v58  ;;  %v3484_v0 = vld [vmem:[%s4640_s1 + $0x328] sm:$0xff]  }
  0x7e   :  { %3200 = vmatpush3.bf16.msra.mxu1 %v3470_v1  ;;  %3137 = vmatprep.subr.bf16.mxu0 %v3471_v2  ;;  %v3486_v1 = vld [vmem:[%s4640_s1 + $0x3a8] sm:$0xff]   ;;  %v3487_v2 = vld [vmem:[%s4640_s1 + $0x360] sm:$0xff]  }
  0x7f   :  { %3201 = vmatprep.subr.bf16.mxu1 %v3473_v5  ;;  %v75_v5 = vld [vmem:[%s4641_s0 + $0x1e0] sm:$0xff]  ;;  %v108_v40 = vld [vmem:[%s4641_s0 + $0x2e8] sm:$0xff] }
  0x80   :  { %v2667_v27 = vcombine.low %v67_v4, %v75_v5 }
  0x81   :  { %3138 = vmatpush3.bf16.msra.mxu0 %v3472_v8  ;;  %v76_v8 = vld [vmem:[%s4641_s0 + $0x1e8] sm:$0xff] }
  0x82   :  { %3202 = vmatpush3.bf16.msra.mxu1 %v3474_v9  ;;  %3251 = vmatprep.subr.bf16.mxu0 %v3475_v10  ;;  %v3490_v9 = vld [vmem:[%s4640_s1 + $0x3a0] sm:$0xff]   ;;  %v3491_v10 = vld [vmem:[%s4640_s1 + $0x358] sm:$0xff]  }
  0x83   :  { %2073 = vmatmul.mubr.bf16.gmra.mxu0 %v2679_v11  ;;  %3315 = vmatprep.subr.bf16.mxu1 %v3477_v12  ;;  %v2651_v11 = vcombine.low %v51_v54, %v59_v55  ;;  %v3493_v12 = vld [vmem:[%s4640_s1 + $0x3d8] sm:$0xff]   ;;  %v131_v54 = vld [vmem:[%s4641_s0 + $0x3a0] sm:$0xff] }
  0x84   :  { %2170 = vmatmul.mubr.bf16.gmra.mxu1 %v2681_v13  ;;  %2080 = vmatprep.mubr.bf16.mxu0 %v2696_v14  ;;  %v2653_v13 = vcombine.low %v52_v57, %v60_v58  ;;  %v2668_v14 = vcombine.high %v67_v4, %v75_v5  ;;  %v139_v55 = vld [vmem:[%s4641_s0 + $0x3e0] sm:$0xff]  ;;  %v140_v57 = vld [vmem:[%s4641_s0 + $0x3e8] sm:$0xff] }
  0x85   :  { %2177 = vmatprep.mubr.bf16.mxu1 %v2698_v15  ;;  %v2670_v15 = vcombine.high %v68_v6, %v76_v8 }
  0x8b   :  { %2081 = vmatmul.mubr.bf16.gmra.mxu0 %v2695_v20  ;;  %v83_v20 = vld [vmem:[%s4641_s0 + $0x220] sm:$0xff] }
  0x8c   :  { %2178 = vmatmul.mubr.bf16.gmra.mxu1 %v2697_v21  ;;  %2088 = vmatprep.mubr.bf16.mxu0 %v2712_v22  ;;  %v91_v21 = vld [vmem:[%s4641_s0 + $0x260] sm:$0xff]  ;;  %v84_v22 = vld [vmem:[%s4641_s0 + $0x228] sm:$0xff] }
  0x8d   :  { %2185 = vmatprep.mubr.bf16.mxu1 %v2714_v23  ;;  %v3496_v23 = vld [vmem:[%s4640_s1 + $0x310] sm:$0xff]   ;;  %v2685_v43 = vcombine.low %v84_v22, %v92_v24 }
  0x93   :  { %2089 = vmatmul.mubr.bf16.gmra.mxu0 %v2711_v28  ;;  %v3501_v28 = vld [vmem:[%s4640_s1 + $0x3c8] sm:$0xff]  }
  0x94   :  { %2186 = vmatmul.mubr.bf16.gmra.mxu1 %v2713_v29  ;;  %2096 = vmatprep.mubr.bf16.mxu0 %v2728_v30  ;;  %v2669_v29 = vcombine.low %v68_v6, %v76_v8  ;;  %v2684_v30 = vcombine.high %v83_v20, %v91_v21  ;;  %v37_v6 = vld [vmem:[%s4641_s0 + $0xb0] sm:$0xff]  ;;  %v38_v8 = vld [vmem:[%s4641_s0 + $0xb8] sm:$0xff] }
  0x95   :  { %2193 = vmatprep.mubr.bf16.mxu1 %v2730_v31  ;;  %v2686_v31 = vcombine.high %v84_v22, %v92_v24  ;;  %v54_v22 = vld [vmem:[%s4641_s0 + $0x138] sm:$0xff] }
  0x9b   :  { %2097 = vmatmul.mubr.bf16.gmra.mxu0 %v2727_v36  ;;  %v99_v36 = vld [vmem:[%s4641_s0 + $0x2a0] sm:$0xff] }
  0x9c   :  { %2194 = vmatmul.mubr.bf16.gmra.mxu1 %v2729_v37  ;;  %2234 = vmatprep.mubr.bf16.mxu0 %v2620_v38  ;;  %v107_v37 = vld [vmem:[%s4641_s0 + $0x2e0] sm:$0xff] }
  0x9d   :  { %2331 = vmatprep.mubr.bf16.mxu1 %v2622_v39  ;;  %v3504_v38 = vld [vmem:[%s4640_s1 + $0x300] sm:$0xff]   ;;  %v100_v39 = vld [vmem:[%s4641_s0 + $0x2a8] sm:$0xff]  ;;  %v2700_v44 = vcombine.high %v99_v36, %v107_v37 }
  0xa3   :  { %2235 = vmatmul.mubr.bf16.vlgmr.msra.gmra.mxu0 %v2619_v42  ;;  %v2683_v42 = vcombine.low %v83_v20, %v91_v21 }
  0xa4   :  { %2332 = vmatmul.mubr.bf16.vlgmr.msra.gmra.mxu1 %v2621_v45  ;;  %3252 = vmatpush3.bf16.msra.mxu0 %v3476_v46  ;;  %v2702_v45 = vcombine.high %v100_v39, %v108_v40  ;;  %v115_v46 = vld [vmem:[%s4641_s0 + $0x320] sm:$0xff] }
  0xa5   :  { %3316 = vmatpush3.bf16.msra.mxu1 %v3478_v47  ;;  %2242 = vmatprep.mubr.bf16.mxu0 %v2636_v48  ;;  %v123_v47 = vld [vmem:[%s4641_s0 + $0x360] sm:$0xff]  ;;  %v116_v48 = vld [vmem:[%s4641_s0 + $0x328] sm:$0xff] }
  0xa6   :  { %2339 = vmatprep.mubr.bf16.mxu1 %v2638_v49  ;;  %3253 = vmatprep.subr.bf16.mxu0 %v3479_v50  ;;  %v124_v49 = vld [vmem:[%s4641_s0 + $0x368] sm:$0xff]  ;;  %v2699_v50 = vcombine.low %v99_v36, %v107_v37  ;;  %v2715_v58 = vcombine.low %v115_v46, %v123_v47 }
  0xa7   :  { %3317 = vmatprep.subr.bf16.mxu1 %v3481_v51  ;;  %v2701_v51 = vcombine.low %v100_v39, %v108_v40 }
  0xa8   :  { %3254 = vmatpush3.bf16.msra.mxu0 %v3480_v52  ;;  %v2716_v52 = vcombine.high %v115_v46, %v123_v47  ;;  %v70_v46 = vld [vmem:[%s4641_s0 + $0x1b8] sm:$0xff] }
  0xa9   :  { %3318 = vmatpush3.bf16.msra.mxu1 %v3482_v53  ;;  %3255 = vmatprep.subr.bf16.mxu0 %v3483_v56  ;;  %v2718_v53 = vcombine.high %v116_v48, %v124_v49  ;;  %v132_v56 = vld [vmem:[%s4641_s0 + $0x3a8] sm:$0xff]  ;;  %v78_v47 = vld [vmem:[%s4641_s0 + $0x1f8] sm:$0xff] }
  0xaa   :  { %3319 = vmatprep.subr.bf16.mxu1 %v3485_v59  ;;  %v2717_v59 = vcombine.low %v116_v48, %v124_v49 }
  0xab   :  { %2243 = vmatmul.mubr.bf16.gmra.mxu0 %v2635_v60  ;;  %v2732_v60 = vcombine.high %v131_v54, %v139_v55 }
  0xac   :  { %2340 = vmatmul.mubr.bf16.gmra.mxu1 %v2637_v61  ;;  %2250 = vmatprep.mubr.bf16.mxu0 %v2652_v62  ;;  %v2734_v61 = vcombine.high %v132_v56, %v140_v57  ;;  %v21_v62 = vld [vmem:[%s4641_s0 + $0x30] sm:$0xff] }
  0xad   :  { %2347 = vmatprep.mubr.bf16.mxu1 %v2654_v63  ;;  %3256 = vmatpush3.bf16.msra.mxu0 %v3484_v0  ;;  %v29_v63 = vld [vmem:[%s4641_s0 + $0x70] sm:$0xff]  ;;  %v22_v0 = vld [vmem:[%s4641_s0 + $0x38] sm:$0xff] }
  0xae   :  { %3320 = vmatpush3.bf16.msra.mxu1 %v3486_v1  ;;  %3257 = vmatprep.subr.bf16.mxu0 %v3487_v2  ;;  %v30_v1 = vld [vmem:[%s4641_s0 + $0x78] sm:$0xff]  ;;  %v2731_v2 = vcombine.low %v131_v54, %v139_v55  ;;  %v2624_v4 = vcombine.high %v21_v62, %v29_v63 }
  0xaf   :  { %3321 = vmatprep.subr.bf16.mxu1 %v3489_v3  ;;  %v2733_v3 = vcombine.low %v132_v56, %v140_v57  ;;  %v2626_v5 = vcombine.high %v22_v0, %v30_v1  ;;  %v2674_v56 = vcombine.high %v70_v46, %v78_v47 }
  0xb1   :  { %3258 = vmatpush3.bf16.msra.mxu0 %v3488_v7  ;;  %v45_v7 = vld [vmem:[%s4641_s0 + $0xf0] sm:$0xff] }
  0xb2   :  { %3322 = vmatpush3.bf16.msra.mxu1 %v3490_v9  ;;  %3259 = vmatprep.subr.bf16.mxu0 %v3491_v10  ;;  %v46_v9 = vld [vmem:[%s4641_s0 + $0xf8] sm:$0xff]  ;;  %v2623_v10 = vcombine.low %v21_v62, %v29_v63 }
  0xb3   :  { %2251 = vmatmul.mubr.bf16.gmra.mxu0 %v2651_v11  ;;  %3323 = vmatprep.subr.bf16.mxu1 %v3493_v12  ;;  %v2625_v11 = vcombine.low %v22_v0, %v30_v1  ;;  %v2640_v12 = vcombine.high %v37_v6, %v45_v7  ;;  %v85_v1 = vld [vmem:[%s4641_s0 + $0x230] sm:$0xff] }
  0xb4   :  { %2348 = vmatmul.mubr.bf16.gmra.mxu1 %v2653_v13  ;;  %2258 = vmatprep.mubr.bf16.mxu0 %v2668_v14  ;;  %v2642_v13 = vcombine.high %v38_v8, %v46_v9 }
  0xb5   :  { %2355 = vmatprep.mubr.bf16.mxu1 %v2670_v15  ;;  %3260 = vmatpush3.bf16.msra.mxu0 %v3492_v16  ;;  %v4226_v16 = vld [vmem:[%s4642_s2] ss:$0 sm:$0xff] }
  0xb6   :  { %3324 = vmatpush3.bf16.msra.mxu1 %v3494_v17  ;;  %3261 = vmatprep.subr.bf16.mxu0 %v3495_v18  ;;  %v53_v18 = vld [vmem:[%s4641_s0 + $0x130] sm:$0xff] }
  0xb7   :  { %3325 = vmatprep.subr.bf16.mxu1 %v3497_v19  ;;  %v61_v19 = vld [vmem:[%s4641_s0 + $0x170] sm:$0xff] }
  0xb9   :  { %3262 = vmatpush3.bf16.msra.mxu0 %v3496_v23  ;;  %v62_v23 = vld [vmem:[%s4641_s0 + $0x178] sm:$0xff] }
  0xba   :  { %3326 = vmatpush3.bf16.msra.mxu1 %v3498_v25  ;;  %3263 = vmatprep.subr.bf16.mxu0 %v3499_v26  ;;  %v2639_v26 = vcombine.low %v37_v6, %v45_v7  ;;  %v86_v6 = vld [vmem:[%s4641_s0 + $0x238] sm:$0xff] }
  0xbb   :  { %2259 = vmatmul.mubr.bf16.gmra.mxu0 %v2667_v27  ;;  %3327 = vmatprep.subr.bf16.mxu1 %v3501_v28  ;;  %v94_v7 = vld [vmem:[%s4641_s0 + $0x278] sm:$0xff] }
  0xbc   :  { %2356 = vmatmul.mubr.bf16.gmra.mxu1 %v2669_v29  ;;  %2266 = vmatprep.mubr.bf16.mxu0 %v2684_v30  ;;  %v2641_v29 = vcombine.low %v38_v8, %v46_v9  ;;  %v2656_v30 = vcombine.high %v53_v18, %v61_v19 }
  0xbd   :  { %2363 = vmatprep.mubr.bf16.mxu1 %v2686_v31  ;;  %3264 = vmatpush3.bf16.msra.mxu0 %v3500_v32  ;;  %v2658_v32 = vcombine.high %v54_v22, %v62_v23 }
  0xbe   :  { %3328 = vmatpush3.bf16.msra.mxu1 %v3502_v33  ;;  %3265 = vmatprep.subr.bf16.mxu0 %v3503_v34 }
  0xbf   :  { %3329 = vmatprep.subr.bf16.mxu1 %v3505_v35 }
  0xc1   :  { %3266 = vmatpush3.bf16.msra.mxu0 %v3504_v38 }
  0xc2   :  { %3330 = vmatpush3.bf16.msra.mxu1 %v3506_v41  ;;  %v69_v41 = vld [vmem:[%s4641_s0 + $0x1b0] sm:$0xff] }
  0xc3   :  { %2267 = vmatmul.mubr.bf16.gmra.mxu0 %v2683_v42  ;;  %v77_v42 = vld [vmem:[%s4641_s0 + $0x1f0] sm:$0xff] }
  0xc4   :  { %2364 = vmatmul.mubr.bf16.gmra.mxu1 %v2685_v43  ;;  %2274 = vmatprep.mubr.bf16.mxu0 %v2700_v44  ;;  %v2672_v54 = vcombine.high %v69_v41, %v77_v42 }
  0xc5   :  { %2371 = vmatprep.mubr.bf16.mxu1 %v2702_v45 }
  0xcb   :  { %2275 = vmatmul.mubr.bf16.gmra.mxu0 %v2699_v50  ;;  %v2655_v50 = vcombine.low %v53_v18, %v61_v19 }
  0xcc   :  { %2372 = vmatmul.mubr.bf16.gmra.mxu1 %v2701_v51  ;;  %2282 = vmatprep.mubr.bf16.mxu0 %v2716_v52 }
  0xcd   :  { %2379 = vmatprep.mubr.bf16.mxu1 %v2718_v53  ;;  %v2657_v53 = vcombine.low %v54_v22, %v62_v23 }
  0xd3   :  { %2283 = vmatmul.mubr.bf16.gmra.mxu0 %v2715_v58 }
  0xd4   :  { %2380 = vmatmul.mubr.bf16.gmra.mxu1 %v2717_v59  ;;  %2290 = vmatprep.mubr.bf16.mxu0 %v2732_v60 }
  0xd5   :  { %2387 = vmatprep.mubr.bf16.mxu1 %v2734_v61 }
  0xdb   :  { %2291 = vmatmul.mubr.bf16.gmra.mxu0 %v2731_v2  ;;  %v93_v2 = vld [vmem:[%s4641_s0 + $0x270] sm:$0xff] }
  0xdc   :  { %2388 = vmatmul.mubr.bf16.gmra.mxu1 %v2733_v3  ;;  %2428 = vmatprep.mubr.bf16.mxu0 %v2624_v4 }
  0xdd   :  { %2525 = vmatprep.mubr.bf16.mxu1 %v2626_v5 }
  0xe3   :  { %v2883_v14 = vpop.f32.mrf.mxu0  ;;  %2429 = vmatmul.mubr.bf16.vlgmr.msra.gmra.mxu0 %v2623_v10  ;;  %v2671_v10 = vcombine.low %v69_v41, %v77_v42 }
  0xe4   :  { %v2947_v15 = vpop.f32.mrf.mxu1  ;;  %2526 = vmatmul.mubr.bf16.vlgmr.msra.gmra.mxu1 %v2625_v11  ;;  %2436 = vmatprep.mubr.bf16.mxu0 %v2640_v12 }
  0xe5   :  { %v2884_v17 = vpop.f32.mrf.mxu0  ;;  %2533 = vmatprep.mubr.bf16.mxu1 %v2642_v13  ;;  %v2673_v13 = vcombine.low %v70_v46, %v78_v47 }
  0xe6   :  { %v2885_v20 = vadd.f32 %v2884_v17, %v2883_v14  ;;  %v2948_v21 = vpop.f32.mrf.mxu1  ;;  %v2688_v14 = vcombine.high %v85_v1, %v93_v2  ;;  %v2690_v17 = vcombine.high %v86_v6, %v94_v7 }
  0xe7   :  { %v2949_v24 = vadd.f32 %v2948_v21, %v2947_v15  ;;  %v2886_v25 = vpop.f32.mrf.mxu0 }
  0xe8   :  { %v1849_v27 = vadd.f32 %v2885_v20, %v4226_v16  ;;  %v2950_v28 = vpop.f32.mrf.mxu1 }
  0xe9   :  { %v2887_v31 = vpop.f32.mrf.mxu0 }
  0xea   :  { %v4241_v33 = vadd.f32 %v2949_v24, %v1849_v27  ;;  %v2888_v34 = vadd.f32 %v2887_v31, %v2886_v25  ;;  %v2951_v35 = vpop.f32.mrf.mxu1  ;;  %v109_v27 = vld [vmem:[%s4641_s0 + $0x2f0] sm:$0xff]  ;;  %v102_v31 = vld [vmem:[%s4641_s0 + $0x2b8] sm:$0xff] }
  0xeb   :  { %v2952_v36 = vadd.f32 %v2951_v35, %v2950_v28  ;;  %v2889_v37 = vpop.f32.mrf.mxu0  ;;  %2437 = vmatmul.mubr.bf16.gmra.mxu0 %v2639_v26  ;;  %v101_v26 = vld [vmem:[%s4641_s0 + $0x2b0] sm:$0xff] }
  0xec   :  { %v1852_v38 = vadd.f32 %v2888_v34, %v4226_v16  ;;  %v2953_v39 = vpop.f32.mrf.mxu1  ;;  %2534 = vmatmul.mubr.bf16.gmra.mxu1 %v2641_v29  ;;  %2444 = vmatprep.mubr.bf16.mxu0 %v2656_v30 }
  0xed   :  { %v2890_v40 = vpop.f32.mrf.mxu0  ;;  %2541 = vmatprep.mubr.bf16.mxu1 %v2658_v32  ;;  %v110_v32 = vld [vmem:[%s4641_s0 + $0x2f8] sm:$0xff] }
  0xee   :  { %v4250_v43 = vadd.f32 %v2952_v36, %v1852_v38  ;;  %v2891_v44 = vadd.f32 %v2890_v40, %v2889_v37  ;;  %v2954_v45 = vpop.f32.mrf.mxu1  ;;  %v2687_v36 = vcombine.low %v85_v1, %v93_v2  ;;  %v2704_v40 = vcombine.high %v101_v26, %v109_v27 }
  0xef   :  { %v2955_v48 = vadd.f32 %v2954_v45, %v2953_v39  ;;  %v2892_v49 = vpop.f32.mrf.mxu0  ;;  %v2689_v39 = vcombine.low %v86_v6, %v94_v7  ;;  %v2706_v42 = vcombine.high %v102_v31, %v110_v32  ;;  %v2705_v1 = vcombine.low %v102_v31, %v110_v32 }
  0xf0   :  { %v1857_v51 = vadd.f32 %v2891_v44, %v4226_v16  ;;  %v2956_v52 = vpop.f32.mrf.mxu1 }
  0xf1   :  { %v2893_v55 = vpop.f32.mrf.mxu0 }
  0xf2   :  { %v4259_v57 = vadd.f32 %v2955_v48, %v1857_v51  ;;  %v2894_v58 = vadd.f32 %v2893_v55, %v2892_v49  ;;  %v2957_v59 = vpop.f32.mrf.mxu1 }
  0xf3   :  { %v2958_v60 = vadd.f32 %v2957_v59, %v2956_v52  ;;  %v2895_v61 = vpop.f32.mrf.mxu0  ;;  %2445 = vmatmul.mubr.bf16.gmra.mxu0 %v2655_v50  ;;  %v117_v52 = vld [vmem:[%s4641_s0 + $0x330] sm:$0xff]  ;;  %v126_v59 = vld [vmem:[%s4641_s0 + $0x378] sm:$0xff] }
  0xf4   :  { %v1860_v62 = vadd.f32 %v2894_v58, %v4226_v16  ;;  %v2959_v63 = vpop.f32.mrf.mxu1  ;;  %2542 = vmatmul.mubr.bf16.gmra.mxu1 %v2657_v53  ;;  %2452 = vmatprep.mubr.bf16.mxu0 %v2672_v54  ;;  %v125_v53 = vld [vmem:[%s4641_s0 + $0x370] sm:$0xff]  ;;  %v118_v58 = vld [vmem:[%s4641_s0 + $0x338] sm:$0xff] }
  0xf5   :  { %v2896_v0 = vpop.f32.mrf.mxu0  ;;  %2549 = vmatprep.mubr.bf16.mxu1 %v2674_v56  ;;  %v2720_v2 = vcombine.high %v117_v52, %v125_v53 }
  0xf6   :  { %v4268_v3 = vadd.f32 %v2958_v60, %v1860_v62  ;;  %v2897_v4 = vadd.f32 %v2896_v0, %v2895_v61  ;;  %v2960_v5 = vpop.f32.mrf.mxu1  ;;  %v2703_v62 = vcombine.low %v101_v26, %v109_v27 }
  0xf7   :  { %v2961_v8 = vadd.f32 %v2960_v5, %v2959_v63  ;;  %v2898_v9 = vpop.f32.mrf.mxu0  ;;  %v2722_v5 = vcombine.high %v118_v58, %v126_v59 }
  0xf8   :  { %v1865_v11 = vadd.f32 %v2897_v4, %v4226_v16  ;;  %v2962_v12 = vpop.f32.mrf.mxu1 }
  0xf9   :  { %v2899_v15 = vpop.f32.mrf.mxu0 }
  0xfa   :  { %v4277_v18 = vadd.f32 %v2961_v8, %v1865_v11  ;;  %v2900_v19 = vadd.f32 %v2899_v15, %v2898_v9  ;;  %v2963_v20 = vpop.f32.mrf.mxu1  ;;  %v141_v15 = vld [vmem:[%s4641_s0 + $0x3f0] sm:$0xff] }
  0xfb   :  { %v2964_v21 = vadd.f32 %v2963_v20, %v2962_v12  ;;  %v2901_v22 = vpop.f32.mrf.mxu0  ;;  %2453 = vmatmul.mubr.bf16.gmra.mxu0 %v2671_v10 }
  0xfc   :  { %v1868_v23 = vadd.f32 %v2900_v19, %v4226_v16  ;;  %v2965_v24 = vpop.f32.mrf.mxu1  ;;  %2550 = vmatmul.mubr.bf16.gmra.mxu1 %v2673_v13  ;;  %2460 = vmatprep.mubr.bf16.mxu0 %v2688_v14  ;;  %v133_v14 = vld [vmem:[%s4641_s0 + $0x3b0] sm:$0xff] }
  0xfd   :  { %v2902_v25 = vpop.f32.mrf.mxu0  ;;  %2557 = vmatprep.mubr.bf16.mxu1 %v2690_v17 }
  0xfe   :  { %v4286_v28 = vadd.f32 %v2964_v21, %v1868_v23  ;;  %v2903_v29 = vadd.f32 %v2902_v25, %v2901_v22  ;;  %v2966_v30 = vpop.f32.mrf.mxu1  ;;  %v134_v21 = vld [vmem:[%s4641_s0 + $0x3b8] sm:$0xff]  ;;  %v2719_v25 = vcombine.low %v117_v52, %v125_v53 }
  0xff   :  { %v2967_v34 = vadd.f32 %v2966_v30, %v2965_v24  ;;  %v2904_v35 = vpop.f32.mrf.mxu0  ;;  %v142_v22 = vld [vmem:[%s4641_s0 + $0x3f8] sm:$0xff]  ;;  %v2736_v30 = vcombine.high %v133_v14, %v141_v15 }
 0x100   :  { %v1873_v37 = vadd.f32 %v2903_v29, %v4226_v16  ;;  %v2968_v38 = vpop.f32.mrf.mxu1  ;;  %v2721_v29 = vcombine.low %v118_v58, %v126_v59  ;;  %v2738_v32 = vcombine.high %v134_v21, %v142_v22  ;;  %v2737_v52 = vcombine.low %v134_v21, %v142_v22 }
 0x101   :  { %v2905_v41 = vpop.f32.mrf.mxu0 }
 0x102   :  { %v4295_v44 = vadd.f32 %v2967_v34, %v1873_v37  ;;  %v2906_v45 = vadd.f32 %v2905_v41, %v2904_v35  ;;  %v2969_v46 = vpop.f32.mrf.mxu1 }
 0x103   :  { %v2970_v47 = vadd.f32 %v2969_v46, %v2968_v38  ;;  %v2907_v48 = vpop.f32.mrf.mxu0  ;;  %2461 = vmatmul.mubr.bf16.gmra.mxu0 %v2687_v36 }
 0x104   :  { %v1876_v49 = vadd.f32 %v2906_v45, %v4226_v16  ;;  %v2971_v50 = vpop.f32.mrf.mxu1  ;;  %2558 = vmatmul.mubr.bf16.gmra.mxu1 %v2689_v39  ;;  %2468 = vmatprep.mubr.bf16.mxu0 %v2704_v40 }
 0x105   :  { %v2908_v51 = vpop.f32.mrf.mxu0  ;;  %2565 = vmatprep.mubr.bf16.mxu1 %v2706_v42 }
 0x106   :  { %v4304_v54 = vadd.f32 %v2970_v47, %v1876_v49  ;;  %v2909_v55 = vadd.f32 %v2908_v51, %v2907_v48  ;;  %v2972_v56 = vpop.f32.mrf.mxu1  ;;  %v2735_v49 = vcombine.low %v133_v14, %v141_v15 }
 0x107   :  { %v2973_v60 = vadd.f32 %v2972_v56, %v2971_v50  ;;  %v2910_v61 = vpop.f32.mrf.mxu0 }
 0x108   :  { %v1881_v63 = vadd.f32 %v2909_v55, %v4226_v16  ;;  %v2974_v0 = vpop.f32.mrf.mxu1 }
 0x109   :  { %v2911_v4 = vpop.f32.mrf.mxu0 }
 0x10a   :  { %v4313_v6 = vadd.f32 %v2973_v60, %v1881_v63  ;;  %v2912_v7 = vadd.f32 %v2911_v4, %v2910_v61  ;;  %v2975_v8 = vpop.f32.mrf.mxu1 }
 0x10b   :  { %v2976_v9 = vadd.f32 %v2975_v8, %v2974_v0  ;;  %v2913_v10 = vpop.f32.mrf.mxu0  ;;  %2469 = vmatmul.mubr.bf16.gmra.mxu0 %v2703_v62 }
 0x10c   :  { %v1884_v11 = vadd.f32 %v2912_v7, %v4226_v16  ;;  %v2977_v12 = vpop.f32.mrf.mxu1  ;;  %2566 = vmatmul.mubr.bf16.gmra.mxu1 %v2705_v1  ;;  %2476 = vmatprep.mubr.bf16.mxu0 %v2720_v2 }
 0x10d   :  { %v2914_v13 = vpop.f32.mrf.mxu0  ;;  %2573 = vmatprep.mubr.bf16.mxu1 %v2722_v5 }
 0x10e   :  { %v4322_v17 = vadd.f32 %v2976_v9, %v1884_v11  ;;  %v2915_v19 = vadd.f32 %v2914_v13, %v2913_v10  ;;  %v2978_v20 = vpop.f32.mrf.mxu1 }
 0x10f   :  { %v2979_v23 = vadd.f32 %v2978_v20, %v2977_v12  ;;  %v2916_v24 = vpop.f32.mrf.mxu0 }
 0x110   :  { %v1889_v26 = vadd.f32 %v2915_v19, %v4226_v16  ;;  %v2980_v27 = vpop.f32.mrf.mxu1 }
 0x111   :  { %v2917_v31 = vpop.f32.mrf.mxu0 }
 0x112   :  { %v4331_v34 = vadd.f32 %v2979_v23, %v1889_v26  ;;  %v2918_v35 = vadd.f32 %v2917_v31, %v2916_v24  ;;  %v2981_v36 = vpop.f32.mrf.mxu1 }
 0x113   :  { %v2982_v37 = vadd.f32 %v2981_v36, %v2980_v27  ;;  %v2919_v38 = vpop.f32.mrf.mxu0  ;;  %2477 = vmatmul.mubr.bf16.gmra.mxu0 %v2719_v25 }
 0x114   :  { %v1892_v39 = vadd.f32 %v2918_v35, %v4226_v16  ;;  %v2983_v40 = vpop.f32.mrf.mxu1  ;;  %2574 = vmatmul.mubr.bf16.gmra.mxu1 %v2721_v29  ;;  %2484 = vmatprep.mubr.bf16.mxu0 %v2736_v30 }
 0x115   :  { %v2920_v41 = vpop.f32.mrf.mxu0  ;;  %2581 = vmatprep.mubr.bf16.mxu1 %v2738_v32 }
 0x116   :  { %v4334_v42 = vadd.f32 %v2982_v37, %v1892_v39  ;;  %v2921_v45 = vadd.f32 %v2920_v41, %v2919_v38  ;;  %v2984_v46 = vpop.f32.mrf.mxu1 }
 0x117   :  { %v2985_v47 = vadd.f32 %v2984_v46, %v2983_v40  ;;  %v2922_v48 = vpop.f32.mrf.mxu0 }
 0x118   :  { %v1897_v50 = vadd.f32 %v2921_v45, %v4226_v16  ;;  %v2986_v51 = vpop.f32.mrf.mxu1 }
 0x119   :  { %v2923_v53 = vpop.f32.mrf.mxu0 }
 0x11a   :  { %v4337_v55 = vadd.f32 %v2985_v47, %v1897_v50  ;;  %v2924_v56 = vadd.f32 %v2923_v53, %v2922_v48  ;;  %v2987_v58 = vpop.f32.mrf.mxu1 }
 0x11b   :  { %v2988_v59 = vadd.f32 %v2987_v58, %v2986_v51  ;;  %v2925_v60 = vpop.f32.mrf.mxu0  ;;  %2485 = vmatmul.mubr.bf16.gmra.mxu0 %v2735_v49 }
 0x11c   :  { %v1900_v61 = vadd.f32 %v2924_v56, %v4226_v16  ;;  %v2989_v62 = vpop.f32.mrf.mxu1  ;;  %2582 = vmatmul.mubr.bf16.gmra.mxu1 %v2737_v52 }
 0x11d   :  { %v2926_v63 = vpop.f32.mrf.mxu0 }
 0x11e   :  { %v4340_v0 = vadd.f32 %v2988_v59, %v1900_v61  ;;  %v2927_v1 = vadd.f32 %v2926_v63, %v2925_v60  ;;  %v2990_v2 = vpop.f32.mrf.mxu1 }
 0x11f   :  { %v2991_v4 = vadd.f32 %v2990_v2, %v2989_v62  ;;  %v2928_v5 = vpop.f32.mrf.mxu0 }
 0x120   :  { %v1905_v7 = vadd.f32 %v2927_v1, %v4226_v16  ;;  %v2992_v8 = vpop.f32.mrf.mxu1 }
 0x121   :  { %v2929_v9 = vpop.f32.mrf.mxu0 }
 0x122   :  { %v4343_v10 = vadd.f32 %v2991_v4, %v1905_v7  ;;  %v2930_v11 = vadd.f32 %v2929_v9, %v2928_v5  ;;  %v2993_v12 = vpop.f32.mrf.mxu1 }
 0x123   :  { %v2994_v13 = vadd.f32 %v2993_v12, %v2992_v8  ;;  %v3011_v14 = vpop.f32.mrf.mxu0 }
 0x124   :  { %v1908_v15 = vadd.f32 %v2930_v11, %v4226_v16  ;;  %v3075_v19 = vpop.f32.mrf.mxu1 }
 0x125   :  { %v3012_v20 = vpop.f32.mrf.mxu0 }
 0x126   :  { %v4346_v21 = vadd.f32 %v2994_v13, %v1908_v15  ;;  %v3013_v22 = vadd.f32 %v3012_v20, %v3011_v14  ;;  %v3076_v23 = vpop.f32.mrf.mxu1 }
 0x127   :  { %v3077_v24 = vadd.f32 %v3076_v23, %v3075_v19  ;;  %v3014_v25 = vpop.f32.mrf.mxu0 }
 0x128   :  { %v2043_v26 = vadd.f32 %v3013_v22, %v4241_v33  ;;  %v3078_v27 = vpop.f32.mrf.mxu1 }
 0x129   :  { %v3015_v29 = vpop.f32.mrf.mxu0 }
 0x12a   :  { %v4349_v30 = vadd.f32 %v3077_v24, %v2043_v26  ;;  %v3016_v31 = vadd.f32 %v3015_v29, %v3014_v25  ;;  %v3079_v32 = vpop.f32.mrf.mxu1 }
 0x12b   :  { %v3080_v35 = vadd.f32 %v3079_v32, %v3078_v27  ;;  %v3017_v36 = vpop.f32.mrf.mxu0 }
 0x12c   :  { %v2046_v16 = vadd.f32 %v3016_v31, %v4250_v43  ;;  %v3081_v37 = vpop.f32.mrf.mxu1 }
 0x12d   :  { %v3018_v38 = vpop.f32.mrf.mxu0 }
 0x12e   :  { %v4352_v39 = vadd.f32 %v3080_v35, %v2046_v16  ;;  %v3019_v40 = vadd.f32 %v3018_v38, %v3017_v36  ;;  %v3082_v41 = vpop.f32.mrf.mxu1 }
 0x12f   :  { %v3083_v45 = vadd.f32 %v3082_v41, %v3081_v37  ;;  %v3020_v46 = vpop.f32.mrf.mxu0 }
 0x130   :  { %v2051_v33 = vadd.f32 %v3019_v40, %v4259_v57  ;;  %v3084_v47 = vpop.f32.mrf.mxu1 }
 0x131   :  { %v3021_v48 = vpop.f32.mrf.mxu0 }
 0x132   :  { %v4355_v49 = vadd.f32 %v3083_v45, %v2051_v33  ;;  %v3022_v50 = vadd.f32 %v3021_v48, %v3020_v46  ;;  %v3085_v51 = vpop.f32.mrf.mxu1 }
 0x133   :  { %v3086_v52 = vadd.f32 %v3085_v51, %v3084_v47  ;;  %v3023_v53 = vpop.f32.mrf.mxu0 }
 0x134   :  { %v2054_v43 = vadd.f32 %v3022_v50, %v4268_v3  ;;  %v3087_v56 = vpop.f32.mrf.mxu1 }
 0x135   :  { %v3024_v58 = vpop.f32.mrf.mxu0 }
 0x136   :  { %v4358_v59 = vadd.f32 %v3086_v52, %v2054_v43  ;;  %v3025_v60 = vadd.f32 %v3024_v58, %v3023_v53  ;;  %v3088_v61 = vpop.f32.mrf.mxu1 }
 0x137   :  { %v3089_v62 = vadd.f32 %v3088_v61, %v3087_v56  ;;  %v3026_v63 = vpop.f32.mrf.mxu0 }
 0x138   :  { %v2059_v57 = vadd.f32 %v3025_v60, %v4277_v18  ;;  %v3090_v1 = vpop.f32.mrf.mxu1 }
 0x139   :  { %v3027_v2 = vpop.f32.mrf.mxu0 }
 0x13a   :  { %v4361_v4 = vadd.f32 %v3089_v62, %v2059_v57  ;;  %v3028_v5 = vadd.f32 %v3027_v2, %v3026_v63  ;;  %v3091_v7 = vpop.f32.mrf.mxu1 }
 0x13b   :  { %v3092_v8 = vadd.f32 %v3091_v7, %v3090_v1  ;;  %v3029_v9 = vpop.f32.mrf.mxu0 }
 0x13c   :  { %v2062_v3 = vadd.f32 %v3028_v5, %v4286_v28  ;;  %v3093_v11 = vpop.f32.mrf.mxu1 }
 0x13d   :  { %v3030_v12 = vpop.f32.mrf.mxu0 }
 0x13e   :  { %v4364_v13 = vadd.f32 %v3092_v8, %v2062_v3  ;;  %v3031_v14 = vadd.f32 %v3030_v12, %v3029_v9  ;;  %v3094_v15 = vpop.f32.mrf.mxu1 }
 0x13f   :  { %v3095_v19 = vadd.f32 %v3094_v15, %v3093_v11  ;;  %v3032_v20 = vpop.f32.mrf.mxu0 }
 0x140   :  { %v2067_v18 = vadd.f32 %v3031_v14, %v4295_v44  ;;  %v3096_v22 = vpop.f32.mrf.mxu1 }
 0x141   :  { %v3033_v23 = vpop.f32.mrf.mxu0 }
 0x142   :  { %v4367_v24 = vadd.f32 %v3095_v19, %v2067_v18  ;;  %v3034_v25 = vadd.f32 %v3033_v23, %v3032_v20  ;;  %v3097_v26 = vpop.f32.mrf.mxu1 }
 0x143   :  { %v3098_v27 = vadd.f32 %v3097_v26, %v3096_v22  ;;  %v3035_v29 = vpop.f32.mrf.mxu0 }
 0x144   :  { %v2070_v28 = vadd.f32 %v3034_v25, %v4304_v54  ;;  %v3099_v31 = vpop.f32.mrf.mxu1 }
 0x145   :  { %v3036_v32 = vpop.f32.mrf.mxu0 }
 0x146   :  { %v4370_v35 = vadd.f32 %v3098_v27, %v2070_v28  ;;  %v3037_v36 = vadd.f32 %v3036_v32, %v3035_v29  ;;  %v3100_v16 = vpop.f32.mrf.mxu1 }
 0x147   :  { %v3101_v37 = vadd.f32 %v3100_v16, %v3099_v31  ;;  %v3038_v38 = vpop.f32.mrf.mxu0 }
 0x148   :  { %v2075_v44 = vadd.f32 %v3037_v36, %v4313_v6  ;;  %v3102_v40 = vpop.f32.mrf.mxu1 }
 0x149   :  { %v3039_v41 = vpop.f32.mrf.mxu0 }
 0x14a   :  { %v4373_v45 = vadd.f32 %v3101_v37, %v2075_v44  ;;  %v3040_v46 = vadd.f32 %v3039_v41, %v3038_v38  ;;  %v3103_v33 = vpop.f32.mrf.mxu1 }
 0x14b   :  { %v3104_v47 = vadd.f32 %v3103_v33, %v3102_v40  ;;  %v3041_v48 = vpop.f32.mrf.mxu0 }
 0x14c   :  { %v2078_v54 = vadd.f32 %v3040_v46, %v4322_v17  ;;  %v3105_v50 = vpop.f32.mrf.mxu1 }
 0x14d   :  { %v3042_v51 = vpop.f32.mrf.mxu0 }
 0x14e   :  { %v4376_v52 = vadd.f32 %v3104_v47, %v2078_v54  ;;  %v3043_v53 = vadd.f32 %v3042_v51, %v3041_v48  ;;  %v3106_v43 = vpop.f32.mrf.mxu1 }
 0x14f   :  { %v3107_v56 = vadd.f32 %v3106_v43, %v3105_v50  ;;  %v3044_v58 = vpop.f32.mrf.mxu0 }
 0x150   :  { %v2083_v6 = vadd.f32 %v3043_v53, %v4331_v34  ;;  %v3108_v60 = vpop.f32.mrf.mxu1 }
 0x151   :  { %v3045_v61 = vpop.f32.mrf.mxu0 }
 0x152   :  { %v4379_v62 = vadd.f32 %v3107_v56, %v2083_v6  ;;  %v3046_v63 = vadd.f32 %v3045_v61, %v3044_v58  ;;  %v3109_v57 = vpop.f32.mrf.mxu1 }
 0x153   :  { %v3110_v1 = vadd.f32 %v3109_v57, %v3108_v60  ;;  %v3047_v2 = vpop.f32.mrf.mxu0 }
 0x154   :  { %4644 = vst [vmem:[#allocation2_spill] sm:$0xff] %v4379_v62  ;;  %v2086_v17 = vadd.f32 %v3046_v63, %v4334_v42  ;;  %v3111_v5 = vpop.f32.mrf.mxu1 }
 0x155   :  { %v3048_v7 = vpop.f32.mrf.mxu0 }
 0x156   :  { %v4382_v8 = vadd.f32 %v3110_v1, %v2086_v17  ;;  %v3049_v9 = vadd.f32 %v3048_v7, %v3047_v2  ;;  %v3112_v3 = vpop.f32.mrf.mxu1 }
 0x157   :  { %v3113_v11 = vadd.f32 %v3112_v3, %v3111_v5  ;;  %v3050_v12 = vpop.f32.mrf.mxu0 }
 0x158   :  { %4645 = vst [vmem:[#allocation3_spill] sm:$0xff] %v4382_v8  ;;  %v2091_v34 = vadd.f32 %v3049_v9, %v4337_v55  ;;  %v3114_v14 = vpop.f32.mrf.mxu1 }
 0x159   :  { %v3051_v15 = vpop.f32.mrf.mxu0 }
 0x15a   :  { %v4385_v19 = vadd.f32 %v3113_v11, %v2091_v34  ;;  %v3052_v20 = vadd.f32 %v3051_v15, %v3050_v12  ;;  %v3115_v18 = vpop.f32.mrf.mxu1 }
 0x15b   :  { %v3116_v22 = vadd.f32 %v3115_v18, %v3114_v14  ;;  %v3053_v23 = vpop.f32.mrf.mxu0 }
 0x15c   :  { %4646 = vst [vmem:[#allocation4_spill] sm:$0xff] %v4385_v19  ;;  %v2094_v42 = vadd.f32 %v3052_v20, %v4340_v0  ;;  %v3117_v25 = vpop.f32.mrf.mxu1 }
 0x15d   :  { %v3054_v26 = vpop.f32.mrf.mxu0 }
 0x15e   :  { %v4388_v27 = vadd.f32 %v3116_v22, %v2094_v42  ;;  %v3055_v29 = vadd.f32 %v3054_v26, %v3053_v23  ;;  %v3118_v28 = vpop.f32.mrf.mxu1 }
 0x15f   :  { %v3119_v31 = vadd.f32 %v3118_v28, %v3117_v25  ;;  %v3056_v32 = vpop.f32.mrf.mxu0 }
 0x160   :  { %4647 = vst [vmem:[#allocation5_spill] sm:$0xff] %v4388_v27  ;;  %v2099_v55 = vadd.f32 %v3055_v29, %v4343_v10  ;;  %v3120_v36 = vpop.f32.mrf.mxu1 }
 0x161   :  { %v3057_v16 = vpop.f32.mrf.mxu0 }
 0x162   :  { %v4391_v37 = vadd.f32 %v3119_v31, %v2099_v55  ;;  %v3058_v38 = vadd.f32 %v3057_v16, %v3056_v32  ;;  %v3121_v44 = vpop.f32.mrf.mxu1 }
 0x163   :  { %v3122_v40 = vadd.f32 %v3121_v44, %v3120_v36  ;;  %v3139_v41 = vpop.f32.mrf.mxu0 }
 0x164   :  { %4648 = vst [vmem:[#allocation6_spill] sm:$0xff] %v4391_v37  ;;  %v2102_v0 = vadd.f32 %v3058_v38, %v4346_v21  ;;  %v4394_v46 = vpop.f32.mrf.mxu1 }
 0x165   :  { %v3140_v33 = vpop.f32.mrf.mxu0 }
 0x166   :  { %v4396_v47 = vadd.f32 %v3122_v40, %v2102_v0  ;;  %v4398_v48 = vpop.f32.mrf.mxu1 }
 0x167   :  { %v3142_v54 = vpop.f32.mrf.mxu0 }
 0x168   :  { %4649 = vst [vmem:[#allocation7_spill] sm:$0xff] %v4396_v47  ;;  %v4400_v50 = vpop.f32.mrf.mxu1 }
 0x169   :  { %v3143_v10 = vpop.f32.mrf.mxu0 }
 0x16a   :  { %v4402_v51 = vpop.f32.mrf.mxu1 }
 0x16b   :  { %v4404_v53 = vpop.f32.mrf.mxu0 }
 0x16c   :  { %v4406_v43 = vpop.f32.mrf.mxu1 }
 0x16d   :  { %v4408_v56 = vpop.f32.mrf.mxu0 }
 0x16e   :  { %v4410_v21 = vpop.f32.mrf.mxu1 }
 0x16f   :  { %v4412_v58 = vpop.f32.mrf.mxu0 }
 0x170   :  { %v4414_v6 = vpop.f32.mrf.mxu1 }
 0x171   :  { %v4416_v60 = vpop.f32.mrf.mxu0 }
 0x172   :  { %v4418_v61 = vpop.f32.mrf.mxu1 }
 0x173   :  { %v4420_v63 = vpop.f32.mrf.mxu0 }
 0x174   :  { %v4422_v57 = vpop.f32.mrf.mxu1 }
 0x175   :  { %v4424_v1 = vpop.f32.mrf.mxu0 }
 0x176   :  { %v4426_v2 = vpop.f32.mrf.mxu1 }
 0x177   :  { %v4428_v17 = vpop.f32.mrf.mxu0 }
 0x178   :  { %v4430_v5 = vpop.f32.mrf.mxu1 }
 0x179   :  { %v4432_v7 = vpop.f32.mrf.mxu0 }
 0x17a   :  { %v4434_v9 = vpop.f32.mrf.mxu1 }
 0x17b   :  { %v4436_v3 = vpop.f32.mrf.mxu0 }
 0x17c   :  { %v4438_v11 = vpop.f32.mrf.mxu1 }
 0x17d   :  { %v4440_v12 = vpop.f32.mrf.mxu0 }
 0x17e   :  { %v4442_v34 = vpop.f32.mrf.mxu1 }
 0x17f   :  { %v4444_v14 = vpop.f32.mrf.mxu0 }
 0x180   :  { %v4446_v15 = vpop.f32.mrf.mxu1 }
 0x181   :  { %v4448_v20 = vpop.f32.mrf.mxu0 }
 0x182   :  { %v4450_v18 = vpop.f32.mrf.mxu1 }
 0x183   :  { %v4452_v22 = vpop.f32.mrf.mxu0 }
 0x184   :  { %v4454_v23 = vpop.f32.mrf.mxu1 }
 0x185   :  { %v4456_v42 = vpop.f32.mrf.mxu0 }
 0x186   :  { %v4458_v25 = vpop.f32.mrf.mxu1 }
 0x187   :  { %v4460_v26 = vpop.f32.mrf.mxu0 }
 0x188   :  { %v4462_v29 = vpop.f32.mrf.mxu1 }
 0x189   :  { %v4464_v28 = vpop.f32.mrf.mxu0 }
 0x18a   :  { %v4466_v31 = vpop.f32.mrf.mxu1 }
 0x18b   :  { %4650 = vst [vmem:[#allocation8_spill] sm:$0xff] %v4466_v31  ;;  %v4468_v32 = vpop.f32.mrf.mxu0 }
 0x18c   :  { %v4470_v55 = vpop.f32.mrf.mxu1 }
 0x18d   :  { %4651 = vst [vmem:[#allocation9_spill] sm:$0xff] %v4470_v55  ;;  %v4472_v36 = vpop.f32.mrf.mxu0 }
 0x18e   :  { %v4474_v16 = vpop.f32.mrf.mxu1 }
 0x18f   :  { %4652 = vst [vmem:[#allocation10_spill] sm:$0xff] %v4474_v16  ;;  %v4476_v38 = vpop.f32.mrf.mxu0 }
 0x190   :  { %4653 = vst [vmem:[#allocation11_spill] sm:$0xff] %v4476_v38  ;;  %v4478_v44 = vpop.f32.mrf.mxu1 }
 0x191   :  { %4654 = vst [vmem:[#allocation12_spill] sm:$0xff] %v4478_v44  ;;  %v4480_v40 = vpop.f32.mrf.mxu0 }
 0x192   :  { %4655 = vst [vmem:[#allocation13_spill] sm:$0xff] %v4480_v40  ;;  %v4482_v0 = vpop.f32.mrf.mxu1 }
 0x193   :  { %4656 = vst [vmem:[#allocation14_spill] sm:$0xff] %v4482_v0  ;;  %v4484_v47 = vpop.f32.mrf.mxu0 }
 0x194   :  { %4657 = vst [vmem:[#allocation15_spill] sm:$0xff] %v4484_v47  ;;  %v4486_v37 = vpop.f32.mrf.mxu1  ;;  %v3141_v47 = vadd.f32 %v3140_v33, %v3139_v41 }
 0x195   :  { %4658 = vst [vmem:[#allocation16_spill] sm:$0xff] %v4486_v37  ;;  %v4488_v27 = vpop.f32.mrf.mxu0 }
 0x196   :  { %4659 = vst [vmem:[#allocation17_spill] sm:$0xff] %v4488_v27  ;;  %v4490_v19 = vpop.f32.mrf.mxu1 }
 0x197   :  { %4660 = vst [vmem:[#allocation18_spill] sm:$0xff] %v4490_v19  ;;  %v4492_v8 = vpop.f32.mrf.mxu0 }
 0x198   :  { %4661 = vst [vmem:[#allocation19_spill] sm:$0xff] %v4492_v8  ;;  %v4494_v55 = vpop.f32.mrf.mxu1  ;;  %v3144_v8 = vadd.f32 %v3143_v10, %v3142_v54  ;;  %v3208_v10 = vadd.f32 %v4402_v51, %v4400_v50 }
 0x199   :  { %4662 = vst [vmem:[#allocation20_spill] sm:$0xff] %v4494_v55  ;;  %v4496_v16 = vpop.f32.mrf.mxu0  ;;  %v2237_v55 = vadd.f32 %v3141_v47, %v4349_v30 }
 0x19a   :  { %4663 = vst [vmem:[#allocation21_spill] sm:$0xff] %v4496_v16  ;;  %v4498_v38 = vpop.f32.mrf.mxu1  ;;  %v2240_v41 = vadd.f32 %v3144_v8, %v4352_v39  ;;  %v3150_v39 = vadd.f32 %v4416_v60, %v4412_v58 }
 0x19b   :  { %4664 = vst [vmem:[#allocation22_spill] sm:$0xff] %v4498_v38  ;;  %v4500_v44 = vpop.f32.mrf.mxu0 }
 0x19c   :  { %4665 = vst [vmem:[#allocation23_spill] sm:$0xff] %v4500_v44  ;;  %v4502_v40 = vpop.f32.mrf.mxu1  ;;  %v2248_v58 = vadd.f32 %v3150_v39, %v4358_v59  ;;  %v3156_v59 = vadd.f32 %v4432_v7, %v4428_v17  ;;  %v3159_v17 = vadd.f32 %v4440_v12, %v4436_v3 }
 0x19d   :  { %4666 = vst [vmem:[#allocation24_spill] sm:$0xff] %v4502_v40  ;;  %v4504_v0 = vpop.f32.mrf.mxu0  ;;  %v3205_v40 = vadd.f32 %v4398_v48, %v4394_v46 }
 0x19e   :  { %4667 = vst [vmem:[#allocation25_spill] sm:$0xff] %v4504_v0  ;;  %v4506_v37 = vpop.f32.mrf.mxu1  ;;  %v2337_v0 = vadd.f32 %v3208_v10, %v2240_v41  ;;  %v2261_v3 = vadd.f32 %v3159_v17, %v4367_v24  ;;  %v3165_v24 = vadd.f32 %v4456_v42, %v4452_v22  ;;  %v3168_v22 = vadd.f32 %v4464_v28, %v4460_v26  ;;  %v4675_v17 = vld [vmem:[#allocation11_spill] sm:$0xff] }
 0x19f   :  { %4668 = vst [vmem:[#allocation26_spill] sm:$0xff] %v4506_v37  ;;  %v4508_v27 = vpop.f32.mrf.mxu0  ;;  %v2334_v37 = vadd.f32 %v3205_v40, %v2237_v55 }
 0x1a0   :  { %4669 = vst [vmem:[#allocation27_spill] sm:$0xff] %v4508_v27  ;;  %v4510_v19 = vpop.f32.mrf.mxu1  ;;  %v3147_v27 = vadd.f32 %v4408_v56, %v4404_v53  ;;  %v3211_v56 = vadd.f32 %v4410_v21, %v4406_v43  ;;  %v3214_v43 = vadd.f32 %v4418_v61, %v4414_v6  ;;  %v3217_v6 = vadd.f32 %v4426_v2, %v4422_v57 }
 0x1a1   :  { %4670 = vst [vmem:[#allocation28_spill] sm:$0xff] %v4510_v19  ;;  %v4512_v62 = vpop.f32.mrf.mxu0  ;;  %v3220_v57 = vadd.f32 %v4434_v9, %v4430_v5  ;;  %v3223_v5 = vadd.f32 %v4442_v34, %v4438_v11  ;;  %v3226_v11 = vadd.f32 %v4450_v18, %v4446_v15  ;;  %v3229_v15 = vadd.f32 %v4458_v25, %v4454_v23  ;;  %v4673_v23 = vld [vmem:[#allocation8_spill] sm:$0xff] }
 0x1a2   :  { %4671 = vst [vmem:[#allocation29_spill] sm:$0xff] %v4512_v62  ;;  %v4515_v16 = vpop.f32.mrf.mxu1  ;;  %v2245_v46 = vadd.f32 %v3147_v27, %v4355_v49  ;;  %v3153_v49 = vadd.f32 %v4424_v1, %v4420_v63  ;;  %v2345_v40 = vadd.f32 %v3214_v43, %v2248_v58  ;;  %v2272_v26 = vadd.f32 %v3168_v22, %v4376_v52  ;;  %v4676_v52 = vld [vmem:[#allocation13_spill] sm:$0xff] }
 0x1a3   :  { %4672 = vst [vmem:[#allocation30_spill] sm:$0xff] %v4515_v16  ;;  %v3267_v38 = vpop.f32.mrf.mxu0  ;;  %v2358_v58 = vadd.f32 %v3223_v5, %v2261_v3  ;;  %v3232_v25 = vadd.f32 %v4673_v23, %v4462_v29 }
 0x1a4   :  { %v3331_v44 = vpop.f32.mrf.mxu1  ;;  %v2342_v51 = vadd.f32 %v3211_v56, %v2245_v46  ;;  %v2253_v63 = vadd.f32 %v3153_v49, %v4361_v4  ;;  %v2256_v46 = vadd.f32 %v3156_v59, %v4364_v13  ;;  %v3162_v13 = vadd.f32 %v4448_v20, %v4444_v14 }
 0x1a5   :  { %v3268_v33 = vpop.f32.mrf.mxu0 }
 0x1a6   :  { %v3269_v19 = vadd.f32 %v3268_v33, %v3267_v38  ;;  %v3332_v54 = vpop.f32.mrf.mxu1  ;;  %v2350_v4 = vadd.f32 %v3217_v6, %v2253_v63  ;;  %v2264_v14 = vadd.f32 %v3162_v13, %v4370_v35 }
 0x1a7   :  { %v3270_v30 = vpop.f32.mrf.mxu0  ;;  %v3333_v16 = vadd.f32 %v3332_v54, %v3331_v44 }
 0x1a8   :  { %v2431_v47 = vadd.f32 %v3269_v19, %v2334_v37  ;;  %v3334_v62 = vpop.f32.mrf.mxu1  ;;  %v2361_v35 = vadd.f32 %v3226_v11, %v2264_v14  ;;  %v4684_v11 = vld [vmem:[#allocation19_spill] sm:$0xff] }
 0x1a9   :  { %v3271_v31 = vpop.f32.mrf.mxu0 }
 0x1aa   :  { %v2528_v8 = vadd.f32 %v3333_v16, %v2431_v47  ;;  %v3272_v48 = vadd.f32 %v3271_v31, %v3270_v30  ;;  %v3335_v55 = vpop.f32.mrf.mxu1 }
 0x1ab   :  { %v3273_v53 = vpop.f32.mrf.mxu0  ;;  %v3336_v37 = vadd.f32 %v3335_v55, %v3334_v62 }
 0x1ac   :  { %2590 = vst [vmem:[%s4643_s3] sm:$0xff] %v2528_v8  ;;  %v2434_v19 = vadd.f32 %v3272_v48, %v2337_v0  ;;  %v3337_v50 = vpop.f32.mrf.mxu1 }
 0x1ad   :  { %v3274_v27 = vpop.f32.mrf.mxu0 }
 0x1ae   :  { %v2531_v60 = vadd.f32 %v3336_v37, %v2434_v19  ;;  %v3275_v31 = vadd.f32 %v3274_v27, %v3273_v53  ;;  %v3338_v16 = vpop.f32.mrf.mxu1  ;;  %v2353_v19 = vadd.f32 %v3220_v57, %v2256_v46  ;;  %v2369_v46 = vadd.f32 %v3232_v25, %v2272_v26  ;;  %v4677_v57 = vld [vmem:[#allocation9_spill] sm:$0xff] }
 0x1af   :  { %v3276_v38 = vpop.f32.mrf.mxu0  ;;  %v3339_v21 = vadd.f32 %v3338_v16, %v3337_v50 }
 0x1b0   :  { %2591 = vst [vmem:[%s4643_s3 + $0x8] sm:$0xff] %v2531_v60  ;;  %v2439_v62 = vadd.f32 %v3275_v31, %v2342_v51  ;;  %v3340_v44 = vpop.f32.mrf.mxu1 }
 0x1b1   :  { %v3277_v1 = vpop.f32.mrf.mxu0 }
 0x1b2   :  { %v2536_v0 = vadd.f32 %v3339_v21, %v2439_v62  ;;  %v3278_v41 = vadd.f32 %v3277_v1, %v3276_v38  ;;  %v3341_v33 = vpop.f32.mrf.mxu1 }
 0x1b3   :  { %v3279_v61 = vpop.f32.mrf.mxu0  ;;  %v3342_v10 = vadd.f32 %v3341_v33, %v3340_v44  ;;  %v2269_v44 = vadd.f32 %v3165_v24, %v4373_v45  ;;  %v3171_v45 = vadd.f32 %v4472_v36, %v4468_v32 }
 0x1b4   :  { %2592 = vst [vmem:[%s4643_s3 + $0x10] sm:$0xff] %v2536_v0  ;;  %v2442_v54 = vadd.f32 %v3278_v41, %v2345_v40  ;;  %v3343_v30 = vpop.f32.mrf.mxu1 }
 0x1b5   :  { %v3280_v47 = vpop.f32.mrf.mxu0  ;;  %v2366_v33 = vadd.f32 %v3229_v15, %v2269_v44 }
 0x1b6   :  { %v2539_v7 = vadd.f32 %v3342_v10, %v2442_v54  ;;  %v3281_v39 = vadd.f32 %v3280_v47, %v3279_v61  ;;  %v3344_v8 = vpop.f32.mrf.mxu1  ;;  %v4674_v47 = vld [vmem:[#allocation2_spill] sm:$0xff] }
 0x1b7   :  { %v3282_v48 = vpop.f32.mrf.mxu0  ;;  %v3345_v55 = vadd.f32 %v3344_v8, %v3343_v30  ;;  %v2277_v32 = vadd.f32 %v3171_v45, %v4674_v47  ;;  %v4689_v45 = vld [vmem:[#allocation5_spill] sm:$0xff] }
 0x1b8   :  { %2593 = vst [vmem:[%s4643_s3 + $0x18] sm:$0xff] %v2539_v7  ;;  %v2447_v2 = vadd.f32 %v3281_v39, %v2350_v4  ;;  %v3346_v53 = vpop.f32.mrf.mxu1  ;;  %v3174_v7 = vadd.f32 %v4676_v52, %v4675_v17 }
 0x1b9   :  { %v3283_v56 = vpop.f32.mrf.mxu0 }
 0x1ba   :  { %v2544_v12 = vadd.f32 %v3345_v55, %v2447_v2  ;;  %v3284_v37 = vadd.f32 %v3283_v56, %v3282_v48  ;;  %v3347_v50 = vpop.f32.mrf.mxu1  ;;  %v4678_v2 = vld [vmem:[#allocation10_spill] sm:$0xff] }
 0x1bb   :  { %v3285_v49 = vpop.f32.mrf.mxu0  ;;  %v3348_v27 = vadd.f32 %v3347_v50, %v3346_v53  ;;  %v3235_v29 = vadd.f32 %v4678_v2, %v4677_v57  ;;  %v4680_v50 = vld [vmem:[#allocation15_spill] sm:$0xff] }
 0x1bc   :  { %2594 = vst [vmem:[%s4643_s3 + $0x20] sm:$0xff] %v2544_v12  ;;  %v2450_v9 = vadd.f32 %v3284_v37, %v2353_v19  ;;  %v3349_v51 = vpop.f32.mrf.mxu1  ;;  %v4679_v12 = vld [vmem:[#allocation3_spill] sm:$0xff] }
 0x1bd   :  { %v3286_v20 = vpop.f32.mrf.mxu0  ;;  %v2374_v19 = vadd.f32 %v3235_v29, %v2277_v32  ;;  %v2280_v37 = vadd.f32 %v3174_v7, %v4679_v12  ;;  %v4694_v7 = vld [vmem:[#allocation6_spill] sm:$0xff] }
 0x1be   :  { %v2547_v60 = vadd.f32 %v3348_v27, %v2450_v9  ;;  %v3287_v31 = vadd.f32 %v3286_v20, %v3285_v49  ;;  %v3350_v16 = vpop.f32.mrf.mxu1  ;;  %v4681_v49 = vld [vmem:[#allocation17_spill] sm:$0xff]  ;;  %v4682_v20 = vld [vmem:[#allocation12_spill] sm:$0xff] }
 0x1bf   :  { %v3288_v34 = vpop.f32.mrf.mxu0  ;;  %v3351_v43 = vadd.f32 %v3350_v16, %v3349_v51  ;;  %v3177_v5 = vadd.f32 %v4681_v49, %v4680_v50 }
 0x1c0   :  { %2595 = vst [vmem:[%s4643_s3 + $0x28] sm:$0xff] %v2547_v60  ;;  %v2455_v38 = vadd.f32 %v3287_v31, %v2358_v58  ;;  %v3352_v62 = vpop.f32.mrf.mxu1  ;;  %v4683_v58 = vld [vmem:[#allocation14_spill] sm:$0xff] }
 0x1c1   :  { %v3289_v21 = vpop.f32.mrf.mxu0  ;;  %v3238_v24 = vadd.f32 %v4683_v58, %v4682_v20  ;;  %v4700_v58 = vld [vmem:[#allocation28_spill] sm:$0xff] }
 0x1c2   :  { %v2552_v42 = vadd.f32 %v3351_v43, %v2455_v38  ;;  %v3290_v63 = vadd.f32 %v3289_v21, %v3288_v34  ;;  %v3353_v1 = vpop.f32.mrf.mxu1  ;;  %v4685_v34 = vld [vmem:[#allocation21_spill] sm:$0xff] }
 0x1c3   :  { %v3291_v40 = vpop.f32.mrf.mxu0  ;;  %v3354_v59 = vadd.f32 %v3353_v1, %v3352_v62  ;;  %v3180_v38 = vadd.f32 %v4685_v34, %v4684_v11  ;;  %v2377_v62 = vadd.f32 %v3238_v24, %v2280_v37  ;;  %v4687_v1 = vld [vmem:[#allocation16_spill] sm:$0xff]  ;;  %v4701_v24 = vld [vmem:[#allocation30_spill] sm:$0xff] }
 0x1c4   :  { %2596 = vst [vmem:[%s4643_s3 + $0x30] sm:$0xff] %v2552_v42  ;;  %v2458_v18 = vadd.f32 %v3290_v63, %v2361_v35  ;;  %v3355_v0 = vpop.f32.mrf.mxu1  ;;  %v4686_v35 = vld [vmem:[#allocation4_spill] sm:$0xff] }
 0x1c5   :  { %v3292_v41 = vpop.f32.mrf.mxu0  ;;  %v2285_v21 = vadd.f32 %v3177_v5, %v4686_v35  ;;  %v4699_v5 = vld [vmem:[#allocation7_spill] sm:$0xff] }
 0x1c6   :  { %v2555_v28 = vadd.f32 %v3354_v59, %v2458_v18  ;;  %v3293_v6 = vadd.f32 %v3292_v41, %v3291_v40  ;;  %v3356_v61 = vpop.f32.mrf.mxu1  ;;  %v4688_v40 = vld [vmem:[#allocation18_spill] sm:$0xff]  ;;  %v2288_v41 = vadd.f32 %v3180_v38, %v4689_v45 }
 0x1c7   :  { %v3294_v54 = vpop.f32.mrf.mxu0  ;;  %v3357_v30 = vadd.f32 %v3356_v61, %v3355_v0  ;;  %v3241_v15 = vadd.f32 %v4688_v40, %v4687_v1 }
 0x1c8   :  { %2597 = vst [vmem:[%s4643_s3 + $0x38] sm:$0xff] %v2555_v28  ;;  %v2463_v10 = vadd.f32 %v3293_v6, %v2366_v33  ;;  %v3358_v4 = vpop.f32.mrf.mxu1  ;;  %v4690_v28 = vld [vmem:[#allocation23_spill] sm:$0xff]  ;;  %v4691_v6 = vld [vmem:[#allocation25_spill] sm:$0xff] }
 0x1c9   :  { %v3295_v36 = vpop.f32.mrf.mxu0  ;;  %v2382_v26 = vadd.f32 %v3241_v15, %v2285_v21  ;;  %v3183_v61 = vadd.f32 %v4691_v6, %v4690_v28 }
 0x1ca   :  { %v2560_v39 = vadd.f32 %v3357_v30, %v2463_v10  ;;  %v3296_v8 = vadd.f32 %v3295_v36, %v3294_v54  ;;  %v3359_v48 = vpop.f32.mrf.mxu1  ;;  %v4692_v10 = vld [vmem:[#allocation20_spill] sm:$0xff]  ;;  %v4693_v30 = vld [vmem:[#allocation22_spill] sm:$0xff] }
 0x1cb   :  { %v3297_v55 = vpop.f32.mrf.mxu0  ;;  %v3360_v13 = vadd.f32 %v3359_v48, %v3358_v4  ;;  %v3244_v4 = vadd.f32 %v4693_v30, %v4692_v10  ;;  %v4696_v48 = vld [vmem:[#allocation29_spill] sm:$0xff] }
 0x1cc   :  { %2598 = vst [vmem:[%s4643_s3 + $0x40] sm:$0xff] %v2560_v39  ;;  %v2466_v53 = vadd.f32 %v3296_v8, %v2369_v46  ;;  %v3361_v56 = vpop.f32.mrf.mxu1  ;;  %v2293_v39 = vadd.f32 %v3183_v61, %v4694_v7  ;;  %v4695_v8 = vld [vmem:[#allocation27_spill] sm:$0xff] }
 0x1cd   :  { %v3298_v3 = vpop.f32.mrf.mxu0  ;;  %v2385_v17 = vadd.f32 %v3244_v4, %v2288_v41  ;;  %v3186_v57 = vadd.f32 %v4696_v48, %v4695_v8 }
 0x1ce   :  { %v2563_v9 = vadd.f32 %v3360_v13, %v2466_v53  ;;  %v3299_v27 = vadd.f32 %v3298_v3, %v3297_v55  ;;  %v3362_v51 = vpop.f32.mrf.mxu1  ;;  %v4697_v13 = vld [vmem:[#allocation24_spill] sm:$0xff] }
 0x1cf   :  { %v3300_v14 = vpop.f32.mrf.mxu0  ;;  %v3363_v31 = vadd.f32 %v3362_v51, %v3361_v56  ;;  %v4698_v56 = vld [vmem:[#allocation26_spill] sm:$0xff] }
 0x1d0   :  { %2599 = vst [vmem:[%s4643_s3 + $0x48] sm:$0xff] %v2563_v9  ;;  %v2471_v60 = vadd.f32 %v3299_v27, %v2374_v19  ;;  %v3364_v16 = vpop.f32.mrf.mxu1  ;;  %v3247_v19 = vadd.f32 %v4698_v56, %v4697_v13  ;;  %v2296_v9 = vadd.f32 %v3186_v57, %v4699_v5 }
 0x1d1   :  { %v3301_v43 = vpop.f32.mrf.mxu0 }
 0x1d2   :  { %v2568_v44 = vadd.f32 %v3363_v31, %v2471_v60  ;;  %v3302_v22 = vadd.f32 %v3301_v43, %v3300_v14  ;;  %v3365_v42 = vpop.f32.mrf.mxu1  ;;  %v2390_v49 = vadd.f32 %v3247_v19, %v2293_v39  ;;  %v3250_v60 = vadd.f32 %v4701_v24, %v4700_v58 }
 0x1d3   :  { %v3303_v63 = vpop.f32.mrf.mxu0  ;;  %v3366_v59 = vadd.f32 %v3365_v42, %v3364_v16 }
 0x1d4   :  { %2600 = vst [vmem:[%s4643_s3 + $0x50] sm:$0xff] %v2568_v44  ;;  %v2474_v18 = vadd.f32 %v3302_v22, %v2377_v62  ;;  %v3367_v0 = vpop.f32.mrf.mxu1  ;;  %v2393_v38 = vadd.f32 %v3250_v60, %v2296_v9 }
 0x1d5   :  { %v3304_v33 = vpop.f32.mrf.mxu0 }
 0x1d6   :  { %v2571_v54 = vadd.f32 %v3366_v59, %v2474_v18  ;;  %v3305_v23 = vadd.f32 %v3304_v33, %v3303_v63  ;;  %v3368_v25 = vpop.f32.mrf.mxu1 }
 0x1d7   :  { %v3306_v47 = vpop.f32.mrf.mxu0  ;;  %v3369_v36 = vadd.f32 %v3368_v25, %v3367_v0 }
 0x1d8   :  { %2601 = vst [vmem:[%s4643_s3 + $0x58] sm:$0xff] %v2571_v54  ;;  %v2479_v32 = vadd.f32 %v3305_v23, %v2382_v26  ;;  %v3370_v46 = vpop.f32.mrf.mxu1 }
 0x1d9   :  { %v3307_v52 = vpop.f32.mrf.mxu0 }
 0x1da   :  { %v2576_v2 = vadd.f32 %v3369_v36, %v2479_v32  ;;  %v3308_v29 = vadd.f32 %v3307_v52, %v3306_v47  ;;  %v3371_v55 = vpop.f32.mrf.mxu1 }
 0x1db   :  { %v3309_v53 = vpop.f32.mrf.mxu0  ;;  %v3372_v12 = vadd.f32 %v3371_v55, %v3370_v46 }
 0x1dc   :  { %2602 = vst [vmem:[%s4643_s3 + $0x60] sm:$0xff] %v2576_v2  ;;  %v2482_v3 = vadd.f32 %v3308_v29, %v2385_v17  ;;  %v3373_v37 = vpop.f32.mrf.mxu1 }
 0x1dd   :  { %v3310_v50 = vpop.f32.mrf.mxu0 }
 0x1de   :  { %v2579_v27 = vadd.f32 %v3372_v12, %v2482_v3  ;;  %v3311_v51 = vadd.f32 %v3310_v50, %v3309_v53  ;;  %v3374_v14 = vpop.f32.mrf.mxu1 }
 0x1df   :  { %v3312_v20 = vpop.f32.mrf.mxu0  ;;  %v3375_v16 = vadd.f32 %v3374_v14, %v3373_v37 }
 0x1e0   :  { %2603 = vst [vmem:[%s4643_s3 + $0x68] sm:$0xff] %v2579_v27  ;;  %v2487_v31 = vadd.f32 %v3311_v51, %v2390_v49  ;;  %v3376_v11 = vpop.f32.mrf.mxu1 }
 0x1e1   :  { %v3313_v34 = vpop.f32.mrf.mxu0 }
 0x1e2   :  { %v2584_v43 = vadd.f32 %v3375_v16, %v2487_v31  ;;  %v3314_v62 = vadd.f32 %v3313_v34, %v3312_v20  ;;  %v3377_v35 = vpop.f32.mrf.mxu1 }
 0x1e3   :  { %v3378_v44 = vadd.f32 %v3377_v35, %v3376_v11 }
 0x1e4   :  { %2604 = vst [vmem:[%s4643_s3 + $0x70] sm:$0xff] %v2584_v43  ;;  %v2490_v21 = vadd.f32 %v3314_v62, %v2393_v38 }
 0x1e6   :  { %v2587_v22 = vadd.f32 %v3378_v44, %v2490_v21 }
 0x1e8   :  { %2605 = vst [vmem:[%s4643_s3 + $0x78] sm:$0xff] %v2587_v22 }

</bundles_post_ra>
